<compile_context>
chip_gen: v5e
topology: v5e:2x2
jax: 0.10.0
libtpu: 0.0.40
codegen_flags: <defaults>
</compile_context>

<pallas_src>
import functools

import jax
import jax.numpy as jnp
from jax.experimental import pallas as pl
from jax.experimental.pallas import tpu as pltpu


def _round_up(x, m):
    return (x + m - 1) // m * m


def _pick_tile(n, candidates):
    """Largest candidate tile that evenly divides round_up(n, 8)."""
    n_pad = _round_up(n, 8)
    for t in candidates:
        if n_pad % t == 0:
            return t, n_pad
    return 8, n_pad


def _pick_k_tile(k):
    for t in (512, 256, 128):
        if k >= t and k % t == 0:
            return t, k
    kp = _round_up(k, 8)
    return kp, kp          # small K: a single full-K step


# ---------------------------- Pallas kernels ----------------------------

def _conv_act_kernel(a_ref, b_ref, o_ref, acc_ref, *, act):
    """(tm, tk) @ (tk, tn) accumulated over the K grid axis; the activation is
    fused into the epilogue of the final K step (single HBM write of y)."""
    @pl.when(pl.program_id(2) == 0)
    def _():
        acc_ref[...] = jnp.zeros_like(acc_ref)

    acc_ref[...] += jnp.dot(a_ref[...], b_ref[...],
                            preferred_element_type=jnp.float32)

    @pl.when(pl.program_id(2) == pl.num_programs(2) - 1)
    def _():
        y = acc_ref[...]
        if act == "leaky":
            y = jnp.where(y >= 0.0, y, 0.2 * y)
        elif act == "sigmoid":
            y = 1.0 / (1.0 + jnp.exp(-y))   # exact: keeps output in [0, 1]
        o_ref[...] = y.astype(o_ref.dtype)


def _conv_stats_kernel(a_ref, b_ref, o_ref, sum_ref, ssq_ref, acc_ref):
    """Conv matmul that additionally emits per-(M-block, N-block) column sums
    and sums-of-squares, so BatchNorm stats need no extra pass over y."""
    @pl.when(pl.program_id(2) == 0)
    def _():
        acc_ref[...] = jnp.zeros_like(acc_ref)

    acc_ref[...] += jnp.dot(a_ref[...], b_ref[...],
                            preferred_element_type=jnp.float32)

    @pl.when(pl.program_id(2) == pl.num_programs(2) - 1)
    def _():
        y = acc_ref[...]
        o_ref[...] = y
        sum_ref[...] = jnp.sum(y, axis=0)[None, None, :]
        ssq_ref[...] = jnp.sum(y * y, axis=0)[None, None, :]


def _bn_leaky_kernel(y_ref, scale_ref, shift_ref, o_ref):
    """Per-channel affine (BN scale/shift) + LeakyReLU(0.2); f32 math."""
    z = y_ref[...] * scale_ref[...] + shift_ref[...]
    o_ref[...] = jnp.where(z >= 0.0, z, 0.2 * z).astype(o_ref.dtype)


# --------------------------- pallas_call wrappers ---------------------------

def conv_act_matmul(a, b, act, out_dtype, tm, tn, tk):
    mp, kp = a.shape
    _, cp = b.shape
    return pl.pallas_call(
        functools.partial(_conv_act_kernel, act=act),
        out_shape=jax.ShapeDtypeStruct((mp, cp), out_dtype),
        grid_spec=pltpu.PrefetchScalarGridSpec(
            num_scalar_prefetch=0,
            grid=(mp // tm, cp // tn, kp // tk),
            in_specs=[pl.BlockSpec((tm, tk), lambda i, j, k: (i, k)),
                      pl.BlockSpec((tk, tn), lambda i, j, k: (k, j))],
            out_specs=pl.BlockSpec((tm, tn), lambda i, j, k: (i, j)),
            scratch_shapes=[pltpu.VMEM((tm, tn), jnp.float32)]),
        compiler_params=pltpu.CompilerParams(
            dimension_semantics=("parallel", "parallel", "arbitrary")),
    )(a, b)


def conv_stats_matmul(a, b, tm, tn, tk):
    mp, kp = a.shape
    _, cp = b.shape
    ni, nj, nk = mp // tm, cp // tn, kp // tk
    return pl.pallas_call(
        _conv_stats_kernel,
        out_shape=(jax.ShapeDtypeStruct((mp, cp), jnp.float32),
                   jax.ShapeDtypeStruct((ni, 1, cp), jnp.float32),
                   jax.ShapeDtypeStruct((ni, 1, cp), jnp.float32)),
        grid_spec=pltpu.PrefetchScalarGridSpec(
            num_scalar_prefetch=0,
            grid=(ni, nj, nk),
            in_specs=[pl.BlockSpec((tm, tk), lambda i, j, k: (i, k)),
                      pl.BlockSpec((tk, tn), lambda i, j, k: (k, j))],
            out_specs=(pl.BlockSpec((tm, tn), lambda i, j, k: (i, j)),
                       pl.BlockSpec((1, 1, tn), lambda i, j, k: (i, 0, j)),
                       pl.BlockSpec((1, 1, tn), lambda i, j, k: (i, 0, j))),
            scratch_shapes=[pltpu.VMEM((tm, tn), jnp.float32)]),
        compiler_params=pltpu.CompilerParams(
            dimension_semantics=("parallel", "parallel", "arbitrary")),
    )(a, b)


def bn_leaky(y, scale, shift, out_dtype):
    mp, cp = y.shape
    tm, _ = _pick_tile(mp, (512, 256, 128, 64, 32, 16, 8))
    return pl.pallas_call(
        _bn_leaky_kernel,
        out_shape=jax.ShapeDtypeStruct((mp, cp), out_dtype),
        grid_spec=pltpu.PrefetchScalarGridSpec(
            num_scalar_prefetch=0,
            grid=(mp // tm,),
            in_specs=[pl.BlockSpec((tm, cp), lambda i: (i, 0)),
                      pl.BlockSpec((1, cp), lambda i: (0, 0)),
                      pl.BlockSpec((1, cp), lambda i: (0, 0))],
            out_specs=pl.BlockSpec((tm, cp), lambda i: (i, 0))),
        compiler_params=pltpu.CompilerParams(
            dimension_semantics=("parallel",)),
    )(y, scale, shift)


# ------------------------------- glue (JAX) -------------------------------

def _im2col_nhwc(x, c_real, k, stride, pad):
    """Patch extraction (no compute) from a channels-last activation.
    x: (N, H, W, C_padded); only the first c_real channels are real (padded
    channels are sliced off here so they never widen K).  Returns
    ((N*Ho*Wo, k*k*c_real), Ho, Wo) with K order (ki*k + kj)*c_real + ci."""
    # TODO(synk): express the conv as k*k shifted-window accumulated matmuls
    # (or an in-kernel DMA gather) to avoid materializing the patch blow-up.
    x = x[..., :c_real]
    if pad:
        x = jnp.pad(x, ((0, 0), (pad, pad), (pad, pad), (0, 0)))
    n, hp, wp, c = x.shape
    ho = (hp - k) // stride + 1
    wo = (wp - k) // stride + 1
    cols = []
    for ki in range(k):
        for kj in range(k):
            cols.append(x[:, ki:ki + stride * ho:stride,
                          kj:kj + stride * wo:stride, :])
    col = jnp.concatenate(cols, axis=-1)            # (N, Ho, Wo, k*k*C)
    return col.reshape(n * ho * wo, k * k * c), ho, wo


def conv_block(x_nhwc, c_in, w, stride, pad, gamma=None, beta=None,
               act="leaky"):
    """One Conv2d(bias=False) [+ BatchNorm2d] + activation, channels-last."""
    nb = x_nhwc.shape[0]
    cout, cin, k, _ = w.shape
    assert cin == c_in

    patches, ho, wo = _im2col_nhwc(x_nhwc, c_in, k, stride, pad)   # bf16
    m, kk = patches.shape

    tm, mp = _pick_tile(m, (256, 128, 64, 32, 16, 8))
    tk, kp = _pick_k_tile(kk)
    cp = _round_up(cout, 128)
    tn = 256 if cp % 256 == 0 else 128

    a = jnp.pad(patches, ((0, mp - m), (0, kp - kk)))
    wmat = w.transpose(2, 3, 1, 0).reshape(k * k * cin, cout)   # match im2col K order
    b = jnp.pad(wmat, ((0, kp - kk), (0, cp - cout))).astype(jnp.bfloat16)

    if gamma is None:
        out_dtype = jnp.float32 if act == "sigmoid" else jnp.bfloat16
        out = conv_act_matmul(a, b, act, out_dtype, tm, tn, tk)
    else:
        y, psum, pssq = conv_stats_matmul(a, b, tm, tn, tk)
        # Training-mode BN: biased variance, eps=1e-5.  Padded rows of `a`
        # are zero, so they contribute nothing to the sums; divide by real M.
        csum = jnp.sum(psum[:, 0, :cout], axis=0)
        cssq = jnp.sum(pssq[:, 0, :cout], axis=0)
        mean = csum / m
        var = cssq / m - mean * mean        # biased; fine at DCGAN magnitudes
        inv_std = jax.lax.rsqrt(var + 1e-5)
        scale = gamma * inv_std
        shift = beta - mean * scale
        scale_p = jnp.zeros((1, cp), jnp.float32).at[0, :cout].set(scale)
        shift_p = jnp.zeros((1, cp), jnp.float32).at[0, :cout].set(shift)
        out = bn_leaky(y, scale_p, shift_p, jnp.bfloat16)

    # Keep the channel padding; the next layer's im2col slices it off lazily.
    out = out[:m].reshape(nb, ho, wo, cp)
    return out, cout


def d_forward(params, x):
    w1, w2, g2, b2, w3, g3, b3, w4, g4, b4, w5 = params
    # Single layout/dtype conversion at the boundary: NCHW f32 -> NHWC bf16.
    h = jnp.transpose(x, (0, 2, 3, 1)).astype(jnp.bfloat16)
    h, c = conv_block(h, 3, w1, stride=2, pad=1, act="leaky")
    h, c = conv_block(h, c, w2, stride=2, pad=1, gamma=g2, beta=b2)
    h, c = conv_block(h, c, w3, stride=2, pad=1, gamma=g3, beta=b3)
    h, c = conv_block(h, c, w4, stride=2, pad=1, gamma=g4, beta=b4)
    h, _ = conv_block(h, c, w5, stride=1, pad=0, act="sigmoid")
    # h: (N, 1, 1, 128) f32, real logit lives in channel 0  -> .view(-1)
    return h[:, 0, 0, 0]


def init_params(key):
    ks = jax.random.split(key, 9)
    w1 = 0.02 * jax.random.normal(ks[0], (64, 3, 4, 4), jnp.float32)
    w2 = 0.02 * jax.random.normal(ks[1], (128, 64, 4, 4), jnp.float32)
    w3 = 0.02 * jax.random.normal(ks[2], (256, 128, 4, 4), jnp.float32)
    w4 = 0.02 * jax.random.normal(ks[3], (512, 256, 4, 4), jnp.float32)
    w5 = 0.02 * jax.random.normal(ks[4], (1, 512, 4, 4), jnp.float32)
    g2 = 1.0 + 0.02 * jax.random.normal(ks[5], (128,), jnp.float32)
    g3 = 1.0 + 0.02 * jax.random.normal(ks[6], (256,), jnp.float32)
    g4 = 1.0 + 0.02 * jax.random.normal(ks[7], (512,), jnp.float32)
    b2 = jnp.zeros((128,), jnp.float32)
    b3 = jnp.zeros((256,), jnp.float32)
    b4 = jnp.zeros((512,), jnp.float32)
    return (w1, w2, g2, b2, w3, g3, b3, w4, g4, b4, w5)


if __name__ == "__main__":
    key = jax.random.PRNGKey(0)
    pkey, xkey = jax.random.split(key)
    params = init_params(pkey)
    # Small batch; spatial must be 64 so the final 4x4/s1 conv reduces to 1x1.
    x = jax.random.normal(xkey, (2, 3, 64, 64), jnp.float32)

    out = jax.jit(d_forward)(params, x)
    out = jax.block_until_ready(out)
    assert out.shape == (2,), out.shape
    assert bool(jnp.all((out >= 0.0) & (out <= 1.0)))
    print("KERNEL_OK")
</pallas_src>

<mosaic_0001>
module attributes {stable_mosaic.version = 11 : i64} {
  func.func @_conv_act_kernel(%arg0: i32, %arg1: i32, %arg2: i32, %arg3: memref<256x48xbf16, #tpu.memory_space<vmem>>, %arg4: memref<48x128xbf16, #tpu.memory_space<vmem>>, %arg5: memref<256x128xbf16, #tpu.memory_space<vmem>>, %arg6: memref<256x128xf32, #tpu.memory_space<vmem>>) attributes {dimension_semantics = [#tpu.dimension_semantics<parallel>, #tpu.dimension_semantics<parallel>, #tpu.dimension_semantics<arbitrary>], iteration_bounds = array<i64: 8, 1, 1>, scalar_prefetch = 0 : i64, scratch_operands = 1 : i64, tpu.core_type = #tpu.core_type<tc>, window_params = [{transform_indices = @transform_0, window_bounds = array<i64: 256, 48>}, {transform_indices = @transform_1, window_bounds = array<i64: 48, 128>}, {transform_indices = @transform_2, window_bounds = array<i64: 256, 128>}]} {
    %c0_i32 = arith.constant 0 : i32
    %0 = arith.cmpi eq, %arg2, %c0_i32 : i32
    %1 = arith.extui %0 : i1 to i32
    %c0_i32_0 = arith.constant 0 : i32
    %2 = arith.cmpi ne, %1, %c0_i32_0 : i32
    scf.if %2 {
      %cst_10 = arith.constant 0.000000e+00 : f32
      %12 = vector.broadcast %cst_10 : f32 to vector<256x128xf32>
      %c0_11 = arith.constant 0 : index
      %c0_12 = arith.constant 0 : index
      %13 = vector.load %arg6[%c0_11, %c0_12] : memref<256x128xf32, #tpu.memory_space<vmem>>, vector<256x128xf32>
      tpu.vector_store %arg6[%c0_11, %c0_12], %12 {strides = array<i32>} : memref<256x128xf32, #tpu.memory_space<vmem>>, vector<256x128xf32>,
    } else {
    }
    %c0 = arith.constant 0 : index
    %c0_1 = arith.constant 0 : index
    %3 = vector.load %arg6[%c0, %c0_1] : memref<256x128xf32, #tpu.memory_space<vmem>>, vector<256x128xf32>
    %c0_2 = arith.constant 0 : index
    %c0_3 = arith.constant 0 : index
    %4 = vector.load %arg3[%c0_2, %c0_3] : memref<256x48xbf16, #tpu.memory_space<vmem>>, vector<256x48xbf16>
    %c0_4 = arith.constant 0 : index
    %c0_5 = arith.constant 0 : index
    %5 = vector.load %arg4[%c0_4, %c0_5] : memref<48x128xbf16, #tpu.memory_space<vmem>>, vector<48x128xbf16>
    %cst = arith.constant dense<0.000000e+00> : vector<256x128xf32>
    %6 = tpu.matmul %4, %5, %cst {dimension_numbers = #tpu.dot_dimension_numbers<[1], [0], [0], [1], [0, 0, 1, 1], [], []>} : vector<256x48xbf16>, vector<48x128xbf16>, vector<256x128xf32> -> vector<256x128xf32>
    %7 = arith.addf %3, %6 : vector<256x128xf32>
    %c0_6 = arith.constant 0 : index
    %c0_7 = arith.constant 0 : index
    %8 = vector.load %arg6[%c0_6, %c0_7] : memref<256x128xf32, #tpu.memory_space<vmem>>, vector<256x128xf32>
    tpu.vector_store %arg6[%c0_6, %c0_7], %7 {strides = array<i32>} : memref<256x128xf32, #tpu.memory_space<vmem>>, vector<256x128xf32>,
    %c0_i32_8 = arith.constant 0 : i32
    %9 = arith.cmpi eq, %arg2, %c0_i32_8 : i32
    %10 = arith.extui %9 : i1 to i32
    %c0_i32_9 = arith.constant 0 : i32
    %11 = arith.cmpi ne, %10, %c0_i32_9 : i32
    scf.if %11 {
      %c0_10 = arith.constant 0 : index
      %c0_11 = arith.constant 0 : index
      %12 = vector.load %arg6[%c0_10, %c0_11] : memref<256x128xf32, #tpu.memory_space<vmem>>, vector<256x128xf32>
      %cst_12 = arith.constant 0.000000e+00 : f32
      %13 = vector.broadcast %cst_12 : f32 to vector<256x128xf32>
      %14 = arith.cmpf oge, %12, %13 : vector<256x128xf32>
      %cst_13 = arith.constant 2.000000e-01 : f32
      %15 = vector.broadcast %cst_13 : f32 to vector<256x128xf32>
      %16 = arith.mulf %15, %12 : vector<256x128xf32>
      %17 = arith.select %14, %12, %16 : vector<256x128xi1>, vector<256x128xf32>
      %18 = arith.truncf %17 : vector<256x128xf32> to vector<256x128xbf16>
      %c0_14 = arith.constant 0 : index
      %c0_15 = arith.constant 0 : index
      %19 = vector.load %arg5[%c0_14, %c0_15] : memref<256x128xbf16, #tpu.memory_space<vmem>>, vector<256x128xbf16>
      tpu.vector_store %arg5[%c0_14, %c0_15], %18 {strides = array<i32>} : memref<256x128xbf16, #tpu.memory_space<vmem>>, vector<256x128xbf16>,
    } else {
    }
    return
  }
  func.func @transform_0(%arg0: i32, %arg1: i32, %arg2: i32) -> (i32, i32) {
    %c0_i32 = arith.constant 0 : i32
    return %arg0, %arg2 : i32, i32
  }
  func.func @transform_1(%arg0: i32, %arg1: i32, %arg2: i32) -> (i32, i32) {
    %c0_i32 = arith.constant 0 : i32
    return %arg2, %arg1 : i32, i32
  }
  func.func @transform_2(%arg0: i32, %arg1: i32, %arg2: i32) -> (i32, i32) {
    %c0_i32 = arith.constant 0 : i32
    return %arg0, %arg1 : i32, i32
  }
}

module attributes {stable_mosaic.version = 11 : i64} {
  func.func @_conv_stats_kernel(%arg0: i32, %arg1: i32, %arg2: i32, %arg3: memref<256x512xbf16, #tpu.memory_space<vmem>>, %arg4: memref<512x128xbf16, #tpu.memory_space<vmem>>, %arg5: memref<256x128xf32, #tpu.memory_space<vmem>>, %arg6: memref<1x1x128xf32, #tpu.memory_space<vmem>>, %arg7: memref<1x1x128xf32, #tpu.memory_space<vmem>>, %arg8: memref<256x128xf32, #tpu.memory_space<vmem>>) attributes {dimension_semantics = [#tpu.dimension_semantics<parallel>, #tpu.dimension_semantics<parallel>, #tpu.dimension_semantics<arbitrary>], iteration_bounds = array<i64: 2, 1, 2>, scalar_prefetch = 0 : i64, scratch_operands = 1 : i64, tpu.core_type = #tpu.core_type<tc>, window_params = [{transform_indices = @transform_0, window_bounds = array<i64: 256, 512>}, {transform_indices = @transform_1, window_bounds = array<i64: 512, 128>}, {transform_indices = @transform_2, window_bounds = array<i64: 256, 128>}, {transform_indices = @transform_3, window_bounds = array<i64: 1, 1, 128>}, {transform_indices = @transform_4, window_bounds = array<i64: 1, 1, 128>}]} {
    %c0_i32 = arith.constant 0 : i32
    %0 = arith.cmpi eq, %arg2, %c0_i32 : i32
    %1 = arith.extui %0 : i1 to i32
    %c0_i32_0 = arith.constant 0 : i32
    %2 = arith.cmpi ne, %1, %c0_i32_0 : i32
    scf.if %2 {
      %cst_9 = arith.constant 0.000000e+00 : f32
      %12 = vector.broadcast %cst_9 : f32 to vector<256x128xf32>
      %c0_10 = arith.constant 0 : index
      %c0_11 = arith.constant 0 : index
      %13 = vector.load %arg8[%c0_10, %c0_11] : memref<256x128xf32, #tpu.memory_space<vmem>>, vector<256x128xf32>
      tpu.vector_store %arg8[%c0_10, %c0_11], %12 {strides = array<i32>} : memref<256x128xf32, #tpu.memory_space<vmem>>, vector<256x128xf32>,
    } else {
    }
    %c0 = arith.constant 0 : index
    %c0_1 = arith.constant 0 : index
    %3 = vector.load %arg8[%c0, %c0_1] : memref<256x128xf32, #tpu.memory_space<vmem>>, vector<256x128xf32>
    %c0_2 = arith.constant 0 : index
    %c0_3 = arith.constant 0 : index
    %4 = vector.load %arg3[%c0_2, %c0_3] : memref<256x512xbf16, #tpu.memory_space<vmem>>, vector<256x512xbf16>
    %c0_4 = arith.constant 0 : index
    %c0_5 = arith.constant 0 : index
    %5 = vector.load %arg4[%c0_4, %c0_5] : memref<512x128xbf16, #tpu.memory_space<vmem>>, vector<512x128xbf16>
    %cst = arith.constant dense<0.000000e+00> : vector<256x128xf32>
    %6 = tpu.matmul %4, %5, %cst {dimension_numbers = #tpu.dot_dimension_numbers<[1], [0], [0], [1], [0, 0, 1, 1], [], []>} : vector<256x512xbf16>, vector<512x128xbf16>, vector<256x128xf32> -> vector<256x128xf32>
    %7 = arith.addf %3, %6 : vector<256x128xf32>
    %c0_6 = arith.constant 0 : index
    %c0_7 = arith.constant 0 : index
    %8 = vector.load %arg8[%c0_6, %c0_7] : memref<256x128xf32, #tpu.memory_space<vmem>>, vector<256x128xf32>
    tpu.vector_store %arg8[%c0_6, %c0_7], %7 {strides = array<i32>} : memref<256x128xf32, #tpu.memory_space<vmem>>, vector<256x128xf32>,
    %c1_i32 = arith.constant 1 : i32
    %9 = arith.cmpi eq, %arg2, %c1_i32 : i32
    %10 = arith.extui %9 : i1 to i32
    %c0_i32_8 = arith.constant 0 : i32
    %11 = arith.cmpi ne, %10, %c0_i32_8 : i32
    scf.if %11 {
      %c0_9 = arith.constant 0 : index
      %c0_10 = arith.constant 0 : index
      %12 = vector.load %arg8[%c0_9, %c0_10] : memref<256x128xf32, #tpu.memory_space<vmem>>, vector<256x128xf32>
      %c0_11 = arith.constant 0 : index
      %c0_12 = arith.constant 0 : index
      %13 = vector.load %arg5[%c0_11, %c0_12] : memref<256x128xf32, #tpu.memory_space<vmem>>, vector<256x128xf32>
      tpu.vector_store %arg5[%c0_11, %c0_12], %12 {strides = array<i32>} : memref<256x128xf32, #tpu.memory_space<vmem>>, vector<256x128xf32>,
      %cst_13 = arith.constant dense<0.000000e+00> : vector<128xf32>
      %14 = vector.multi_reduction <add>, %12, %cst_13 [0] : vector<256x128xf32> to vector<128xf32>
      %15 = vector.shape_cast %14 : vector<128xf32> to vector<1x1x128xf32>
      %c0_14 = arith.constant 0 : index
      %c0_15 = arith.constant 0 : index
      %c0_16 = arith.constant 0 : index
      %16 = vector.load %arg6[%c0_14, %c0_15, %c0_16] : memref<1x1x128xf32, #tpu.memory_space<vmem>>, vector<1x1x128xf32>
      tpu.vector_store %arg6[%c0_14, %c0_15, %c0_16], %15 {strides = array<i32>} : memref<1x1x128xf32, #tpu.memory_space<vmem>>, vector<1x1x128xf32>,
      %17 = arith.mulf %12, %12 : vector<256x128xf32>
      %cst_17 = arith.constant dense<0.000000e+00> : vector<128xf32>
      %18 = vector.multi_reduction <add>, %17, %cst_17 [0] : vector<256x128xf32> to vector<128xf32>
      %19 = vector.shape_cast %18 : vector<128xf32> to vector<1x1x128xf32>
      %c0_18 = arith.constant 0 : index
      %c0_19 = arith.constant 0 : index
      %c0_20 = arith.constant 0 : index
      %20 = vector.load %arg7[%c0_18, %c0_19, %c0_20] : memref<1x1x128xf32, #tpu.memory_space<vmem>>, vector<1x1x128xf32>
      tpu.vector_store %arg7[%c0_18, %c0_19, %c0_20], %19 {strides = array<i32>} : memref<1x1x128xf32, #tpu.memory_space<vmem>>, vector<1x1x128xf32>,
    } else {
    }
    return
  }
  func.func @transform_0(%arg0: i32, %arg1: i32, %arg2: i32) -> (i32, i32) {
    %c0_i32 = arith.constant 0 : i32
    return %arg0, %arg2 : i32, i32
  }
  func.func @transform_1(%arg0: i32, %arg1: i32, %arg2: i32) -> (i32, i32) {
    %c0_i32 = arith.constant 0 : i32
    return %arg2, %arg1 : i32, i32
  }
  func.func @transform_2(%arg0: i32, %arg1: i32, %arg2: i32) -> (i32, i32) {
    %c0_i32 = arith.constant 0 : i32
    return %arg0, %arg1 : i32, i32
  }
  func.func @transform_3(%arg0: i32, %arg1: i32, %arg2: i32) -> (i32, i32, i32) {
    %c0_i32 = arith.constant 0 : i32
    %c0_i32_0 = arith.constant 0 : i32
    return %arg0, %c0_i32, %arg1 : i32, i32, i32
  }
  func.func @transform_4(%arg0: i32, %arg1: i32, %arg2: i32) -> (i32, i32, i32) {
    %c0_i32 = arith.constant 0 : i32
    %c0_i32_0 = arith.constant 0 : i32
    return %arg0, %c0_i32, %arg1 : i32, i32, i32
  }
}

module attributes {stable_mosaic.version = 11 : i64} {
  func.func @_bn_leaky_kernel(%arg0: i32, %arg1: memref<512x128xf32, #tpu.memory_space<vmem>>, %arg2: memref<1x128xf32, #tpu.memory_space<vmem>>, %arg3: memref<1x128xf32, #tpu.memory_space<vmem>>, %arg4: memref<512x128xbf16, #tpu.memory_space<vmem>>) attributes {dimension_semantics = [#tpu.dimension_semantics<parallel>], iteration_bounds = array<i64: 1>, scalar_prefetch = 0 : i64, scratch_operands = 0 : i64, tpu.core_type = #tpu.core_type<tc>, window_params = [{transform_indices = @transform_0, window_bounds = array<i64: 512, 128>}, {pipeline_mode = #tpu.pipeline_mode<synchronous>, transform_indices = @transform_1, window_bounds = array<i64: 1, 128>}, {pipeline_mode = #tpu.pipeline_mode<synchronous>, transform_indices = @transform_2, window_bounds = array<i64: 1, 128>}, {transform_indices = @transform_3, window_bounds = array<i64: 512, 128>}]} {
    %c0 = arith.constant 0 : index
    %c0_0 = arith.constant 0 : index
    %0 = vector.load %arg1[%c0, %c0_0] : memref<512x128xf32, #tpu.memory_space<vmem>>, vector<512x128xf32>
    %c0_1 = arith.constant 0 : index
    %c0_2 = arith.constant 0 : index
    %1 = vector.load %arg2[%c0_1, %c0_2] : memref<1x128xf32, #tpu.memory_space<vmem>>, vector<1x128xf32>
    %2 = vector.broadcast %1 : vector<1x128xf32> to vector<512x128xf32>
    %3 = arith.mulf %0, %2 : vector<512x128xf32>
    %c0_3 = arith.constant 0 : index
    %c0_4 = arith.constant 0 : index
    %4 = vector.load %arg3[%c0_3, %c0_4] : memref<1x128xf32, #tpu.memory_space<vmem>>, vector<1x128xf32>
    %5 = vector.broadcast %4 : vector<1x128xf32> to vector<512x128xf32>
    %6 = arith.addf %3, %5 : vector<512x128xf32>
    %cst = arith.constant 0.000000e+00 : f32
    %7 = vector.broadcast %cst : f32 to vector<512x128xf32>
    %8 = arith.cmpf oge, %6, %7 : vector<512x128xf32>
    %cst_5 = arith.constant 2.000000e-01 : f32
    %9 = vector.broadcast %cst_5 : f32 to vector<512x128xf32>
    %10 = arith.mulf %9, %6 : vector<512x128xf32>
    %11 = arith.select %8, %6, %10 : vector<512x128xi1>, vector<512x128xf32>
    %12 = arith.truncf %11 : vector<512x128xf32> to vector<512x128xbf16>
    %c0_6 = arith.constant 0 : index
    %c0_7 = arith.constant 0 : index
    %13 = vector.load %arg4[%c0_6, %c0_7] : memref<512x128xbf16, #tpu.memory_space<vmem>>, vector<512x128xbf16>
    tpu.vector_store %arg4[%c0_6, %c0_7], %12 {strides = array<i32>} : memref<512x128xbf16, #tpu.memory_space<vmem>>, vector<512x128xbf16>,
    return
  }
  func.func @transform_0(%arg0: i32) -> (i32, i32) {
    %c0_i32 = arith.constant 0 : i32
    %c0_i32_0 = arith.constant 0 : i32
    return %arg0, %c0_i32 : i32, i32
  }
  func.func @transform_1(%arg0: i32) -> (i32, i32) {
    %c0_i32 = arith.constant 0 : i32
    %c0_i32_0 = arith.constant 0 : i32
    %c0_i32_1 = arith.constant 0 : i32
    return %c0_i32, %c0_i32_0 : i32, i32
  }
  func.func @transform_2(%arg0: i32) -> (i32, i32) {
    %c0_i32 = arith.constant 0 : i32
    %c0_i32_0 = arith.constant 0 : i32
    %c0_i32_1 = arith.constant 0 : i32
    return %c0_i32, %c0_i32_0 : i32, i32
  }
  func.func @transform_3(%arg0: i32) -> (i32, i32) {
    %c0_i32 = arith.constant 0 : i32
    %c0_i32_0 = arith.constant 0 : i32
    return %arg0, %c0_i32 : i32, i32
  }
}

module attributes {stable_mosaic.version = 11 : i64} {
  func.func @_conv_stats_kernel(%arg0: i32, %arg1: i32, %arg2: i32, %arg3: memref<128x512xbf16, #tpu.memory_space<vmem>>, %arg4: memref<512x256xbf16, #tpu.memory_space<vmem>>, %arg5: memref<128x256xf32, #tpu.memory_space<vmem>>, %arg6: memref<1x1x256xf32, #tpu.memory_space<vmem>>, %arg7: memref<1x1x256xf32, #tpu.memory_space<vmem>>, %arg8: memref<128x256xf32, #tpu.memory_space<vmem>>) attributes {dimension_semantics = [#tpu.dimension_semantics<parallel>, #tpu.dimension_semantics<parallel>, #tpu.dimension_semantics<arbitrary>], iteration_bounds = array<i64: 1, 1, 4>, scalar_prefetch = 0 : i64, scratch_operands = 1 : i64, tpu.core_type = #tpu.core_type<tc>, window_params = [{transform_indices = @transform_0, window_bounds = array<i64: 128, 512>}, {transform_indices = @transform_1, window_bounds = array<i64: 512, 256>}, {transform_indices = @transform_2, window_bounds = array<i64: 128, 256>}, {transform_indices = @transform_3, window_bounds = array<i64: 1, 1, 256>}, {transform_indices = @transform_4, window_bounds = array<i64: 1, 1, 256>}]} {
    %c0_i32 = arith.constant 0 : i32
    %0 = arith.cmpi eq, %arg2, %c0_i32 : i32
    %1 = arith.extui %0 : i1 to i32
    %c0_i32_0 = arith.constant 0 : i32
    %2 = arith.cmpi ne, %1, %c0_i32_0 : i32
    scf.if %2 {
      %cst_9 = arith.constant 0.000000e+00 : f32
      %12 = vector.broadcast %cst_9 : f32 to vector<128x256xf32>
      %c0_10 = arith.constant 0 : index
      %c0_11 = arith.constant 0 : index
      %13 = vector.load %arg8[%c0_10, %c0_11] : memref<128x256xf32, #tpu.memory_space<vmem>>, vector<128x256xf32>
      tpu.vector_store %arg8[%c0_10, %c0_11], %12 {strides = array<i32>} : memref<128x256xf32, #tpu.memory_space<vmem>>, vector<128x256xf32>,
    } else {
    }
    %c0 = arith.constant 0 : index
    %c0_1 = arith.constant 0 : index
    %3 = vector.load %arg8[%c0, %c0_1] : memref<128x256xf32, #tpu.memory_space<vmem>>, vector<128x256xf32>
    %c0_2 = arith.constant 0 : index
    %c0_3 = arith.constant 0 : index
    %4 = vector.load %arg3[%c0_2, %c0_3] : memref<128x512xbf16, #tpu.memory_space<vmem>>, vector<128x512xbf16>
    %c0_4 = arith.constant 0 : index
    %c0_5 = arith.constant 0 : index
    %5 = vector.load %arg4[%c0_4, %c0_5] : memref<512x256xbf16, #tpu.memory_space<vmem>>, vector<512x256xbf16>
    %cst = arith.constant dense<0.000000e+00> : vector<128x256xf32>
    %6 = tpu.matmul %4, %5, %cst {dimension_numbers = #tpu.dot_dimension_numbers<[1], [0], [0], [1], [0, 0, 1, 1], [], []>} : vector<128x512xbf16>, vector<512x256xbf16>, vector<128x256xf32> -> vector<128x256xf32>
    %7 = arith.addf %3, %6 : vector<128x256xf32>
    %c0_6 = arith.constant 0 : index
    %c0_7 = arith.constant 0 : index
    %8 = vector.load %arg8[%c0_6, %c0_7] : memref<128x256xf32, #tpu.memory_space<vmem>>, vector<128x256xf32>
    tpu.vector_store %arg8[%c0_6, %c0_7], %7 {strides = array<i32>} : memref<128x256xf32, #tpu.memory_space<vmem>>, vector<128x256xf32>,
    %c3_i32 = arith.constant 3 : i32
    %9 = arith.cmpi eq, %arg2, %c3_i32 : i32
    %10 = arith.extui %9 : i1 to i32
    %c0_i32_8 = arith.constant 0 : i32
    %11 = arith.cmpi ne, %10, %c0_i32_8 : i32
    scf.if %11 {
      %c0_9 = arith.constant 0 : index
      %c0_10 = arith.constant 0 : index
      %12 = vector.load %arg8[%c0_9, %c0_10] : memref<128x256xf32, #tpu.memory_space<vmem>>, vector<128x256xf32>
      %c0_11 = arith.constant 0 : index
      %c0_12 = arith.constant 0 : index
      %13 = vector.load %arg5[%c0_11, %c0_12] : memref<128x256xf32, #tpu.memory_space<vmem>>, vector<128x256xf32>
      tpu.vector_store %arg5[%c0_11, %c0_12], %12 {strides = array<i32>} : memref<128x256xf32, #tpu.memory_space<vmem>>, vector<128x256xf32>,
      %cst_13 = arith.constant dense<0.000000e+00> : vector<256xf32>
      %14 = vector.multi_reduction <add>, %12, %cst_13 [0] : vector<128x256xf32> to vector<256xf32>
      %15 = vector.shape_cast %14 : vector<256xf32> to vector<1x1x256xf32>
      %c0_14 = arith.constant 0 : index
      %c0_15 = arith.constant 0 : index
      %c0_16 = arith.constant 0 : index
      %16 = vector.load %arg6[%c0_14, %c0_15, %c0_16] : memref<1x1x256xf32, #tpu.memory_space<vmem>>, vector<1x1x256xf32>
      tpu.vector_store %arg6[%c0_14, %c0_15, %c0_16], %15 {strides = array<i32>} : memref<1x1x256xf32, #tpu.memory_space<vmem>>, vector<1x1x256xf32>,
      %17 = arith.mulf %12, %12 : vector<128x256xf32>
      %cst_17 = arith.constant dense<0.000000e+00> : vector<256xf32>
      %18 = vector.multi_reduction <add>, %17, %cst_17 [0] : vector<128x256xf32> to vector<256xf32>
      %19 = vector.shape_cast %18 : vector<256xf32> to vector<1x1x256xf32>
      %c0_18 = arith.constant 0 : index
      %c0_19 = arith.constant 0 : index
      %c0_20 = arith.constant 0 : index
      %20 = vector.load %arg7[%c0_18, %c0_19, %c0_20] : memref<1x1x256xf32, #tpu.memory_space<vmem>>, vector<1x1x256xf32>
      tpu.vector_store %arg7[%c0_18, %c0_19, %c0_20], %19 {strides = array<i32>} : memref<1x1x256xf32, #tpu.memory_space<vmem>>, vector<1x1x256xf32>,
    } else {
    }
    return
  }
  func.func @transform_0(%arg0: i32, %arg1: i32, %arg2: i32) -> (i32, i32) {
    %c0_i32 = arith.constant 0 : i32
    return %arg0, %arg2 : i32, i32
  }
  func.func @transform_1(%arg0: i32, %arg1: i32, %arg2: i32) -> (i32, i32) {
    %c0_i32 = arith.constant 0 : i32
    return %arg2, %arg1 : i32, i32
  }
  func.func @transform_2(%arg0: i32, %arg1: i32, %arg2: i32) -> (i32, i32) {
    %c0_i32 = arith.constant 0 : i32
    return %arg0, %arg1 : i32, i32
  }
  func.func @transform_3(%arg0: i32, %arg1: i32, %arg2: i32) -> (i32, i32, i32) {
    %c0_i32 = arith.constant 0 : i32
    %c0_i32_0 = arith.constant 0 : i32
    return %arg0, %c0_i32, %arg1 : i32, i32, i32
  }
  func.func @transform_4(%arg0: i32, %arg1: i32, %arg2: i32) -> (i32, i32, i32) {
    %c0_i32 = arith.constant 0 : i32
    %c0_i32_0 = arith.constant 0 : i32
    return %arg0, %c0_i32, %arg1 : i32, i32, i32
  }
}

module attributes {stable_mosaic.version = 11 : i64} {
  func.func @_bn_leaky_kernel(%arg0: i32, %arg1: memref<128x256xf32, #tpu.memory_space<vmem>>, %arg2: memref<1x256xf32, #tpu.memory_space<vmem>>, %arg3: memref<1x256xf32, #tpu.memory_space<vmem>>, %arg4: memref<128x256xbf16, #tpu.memory_space<vmem>>) attributes {dimension_semantics = [#tpu.dimension_semantics<parallel>], iteration_bounds = array<i64: 1>, scalar_prefetch = 0 : i64, scratch_operands = 0 : i64, tpu.core_type = #tpu.core_type<tc>, window_params = [{transform_indices = @transform_0, window_bounds = array<i64: 128, 256>}, {pipeline_mode = #tpu.pipeline_mode<synchronous>, transform_indices = @transform_1, window_bounds = array<i64: 1, 256>}, {pipeline_mode = #tpu.pipeline_mode<synchronous>, transform_indices = @transform_2, window_bounds = array<i64: 1, 256>}, {transform_indices = @transform_3, window_bounds = array<i64: 128, 256>}]} {
    %c0 = arith.constant 0 : index
    %c0_0 = arith.constant 0 : index
    %0 = vector.load %arg1[%c0, %c0_0] : memref<128x256xf32, #tpu.memory_space<vmem>>, vector<128x256xf32>
    %c0_1 = arith.constant 0 : index
    %c0_2 = arith.constant 0 : index
    %1 = vector.load %arg2[%c0_1, %c0_2] : memref<1x256xf32, #tpu.memory_space<vmem>>, vector<1x256xf32>
    %2 = vector.broadcast %1 : vector<1x256xf32> to vector<128x256xf32>
    %3 = arith.mulf %0, %2 : vector<128x256xf32>
    %c0_3 = arith.constant 0 : index
    %c0_4 = arith.constant 0 : index
    %4 = vector.load %arg3[%c0_3, %c0_4] : memref<1x256xf32, #tpu.memory_space<vmem>>, vector<1x256xf32>
    %5 = vector.broadcast %4 : vector<1x256xf32> to vector<128x256xf32>
    %6 = arith.addf %3, %5 : vector<128x256xf32>
    %cst = arith.constant 0.000000e+00 : f32
    %7 = vector.broadcast %cst : f32 to vector<128x256xf32>
    %8 = arith.cmpf oge, %6, %7 : vector<128x256xf32>
    %cst_5 = arith.constant 2.000000e-01 : f32
    %9 = vector.broadcast %cst_5 : f32 to vector<128x256xf32>
    %10 = arith.mulf %9, %6 : vector<128x256xf32>
    %11 = arith.select %8, %6, %10 : vector<128x256xi1>, vector<128x256xf32>
    %12 = arith.truncf %11 : vector<128x256xf32> to vector<128x256xbf16>
    %c0_6 = arith.constant 0 : index
    %c0_7 = arith.constant 0 : index
    %13 = vector.load %arg4[%c0_6, %c0_7] : memref<128x256xbf16, #tpu.memory_space<vmem>>, vector<128x256xbf16>
    tpu.vector_store %arg4[%c0_6, %c0_7], %12 {strides = array<i32>} : memref<128x256xbf16, #tpu.memory_space<vmem>>, vector<128x256xbf16>,
    return
  }
  func.func @transform_0(%arg0: i32) -> (i32, i32) {
    %c0_i32 = arith.constant 0 : i32
    %c0_i32_0 = arith.constant 0 : i32
    return %arg0, %c0_i32 : i32, i32
  }
  func.func @transform_1(%arg0: i32) -> (i32, i32) {
    %c0_i32 = arith.constant 0 : i32
    %c0_i32_0 = arith.constant 0 : i32
    %c0_i32_1 = arith.constant 0 : i32
    return %c0_i32, %c0_i32_0 : i32, i32
  }
  func.func @transform_2(%arg0: i32) -> (i32, i32) {
    %c0_i32 = arith.constant 0 : i32
    %c0_i32_0 = arith.constant 0 : i32
    %c0_i32_1 = arith.constant 0 : i32
    return %c0_i32, %c0_i32_0 : i32, i32
  }
  func.func @transform_3(%arg0: i32) -> (i32, i32) {
    %c0_i32 = arith.constant 0 : i32
    %c0_i32_0 = arith.constant 0 : i32
    return %arg0, %c0_i32 : i32, i32
  }
}

module attributes {stable_mosaic.version = 11 : i64} {
  func.func @_conv_stats_kernel(%arg0: i32, %arg1: i32, %arg2: i32, %arg3: memref<32x512xbf16, #tpu.memory_space<vmem>>, %arg4: memref<512x256xbf16, #tpu.memory_space<vmem>>, %arg5: memref<32x256xf32, #tpu.memory_space<vmem>>, %arg6: memref<1x1x256xf32, #tpu.memory_space<vmem>>, %arg7: memref<1x1x256xf32, #tpu.memory_space<vmem>>, %arg8: memref<32x256xf32, #tpu.memory_space<vmem>>) attributes {dimension_semantics = [#tpu.dimension_semantics<parallel>, #tpu.dimension_semantics<parallel>, #tpu.dimension_semantics<arbitrary>], iteration_bounds = array<i64: 1, 2, 8>, scalar_prefetch = 0 : i64, scratch_operands = 1 : i64, tpu.core_type = #tpu.core_type<tc>, window_params = [{transform_indices = @transform_0, window_bounds = array<i64: 32, 512>}, {transform_indices = @transform_1, window_bounds = array<i64: 512, 256>}, {transform_indices = @transform_2, window_bounds = array<i64: 32, 256>}, {transform_indices = @transform_3, window_bounds = array<i64: 1, 1, 256>}, {transform_indices = @transform_4, window_bounds = array<i64: 1, 1, 256>}]} {
    %c0_i32 = arith.constant 0 : i32
    %0 = arith.cmpi eq, %arg2, %c0_i32 : i32
    %1 = arith.extui %0 : i1 to i32
    %c0_i32_0 = arith.constant 0 : i32
    %2 = arith.cmpi ne, %1, %c0_i32_0 : i32
    scf.if %2 {
      %cst_9 = arith.constant 0.000000e+00 : f32
      %12 = vector.broadcast %cst_9 : f32 to vector<32x256xf32>
      %c0_10 = arith.constant 0 : index
      %c0_11 = arith.constant 0 : index
      %13 = vector.load %arg8[%c0_10, %c0_11] : memref<32x256xf32, #tpu.memory_space<vmem>>, vector<32x256xf32>
      tpu.vector_store %arg8[%c0_10, %c0_11], %12 {strides = array<i32>} : memref<32x256xf32, #tpu.memory_space<vmem>>, vector<32x256xf32>,
    } else {
    }
    %c0 = arith.constant 0 : index
    %c0_1 = arith.constant 0 : index
    %3 = vector.load %arg8[%c0, %c0_1] : memref<32x256xf32, #tpu.memory_space<vmem>>, vector<32x256xf32>
    %c0_2 = arith.constant 0 : index
    %c0_3 = arith.constant 0 : index
    %4 = vector.load %arg3[%c0_2, %c0_3] : memref<32x512xbf16, #tpu.memory_space<vmem>>, vector<32x512xbf16>
    %c0_4 = arith.constant 0 : index
    %c0_5 = arith.constant 0 : index
    %5 = vector.load %arg4[%c0_4, %c0_5] : memref<512x256xbf16, #tpu.memory_space<vmem>>, vector<512x256xbf16>
    %cst = arith.constant dense<0.000000e+00> : vector<32x256xf32>
    %6 = tpu.matmul %4, %5, %cst {dimension_numbers = #tpu.dot_dimension_numbers<[1], [0], [0], [1], [0, 0, 1, 1], [], []>} : vector<32x512xbf16>, vector<512x256xbf16>, vector<32x256xf32> -> vector<32x256xf32>
    %7 = arith.addf %3, %6 : vector<32x256xf32>
    %c0_6 = arith.constant 0 : index
    %c0_7 = arith.constant 0 : index
    %8 = vector.load %arg8[%c0_6, %c0_7] : memref<32x256xf32, #tpu.memory_space<vmem>>, vector<32x256xf32>
    tpu.vector_store %arg8[%c0_6, %c0_7], %7 {strides = array<i32>} : memref<32x256xf32, #tpu.memory_space<vmem>>, vector<32x256xf32>,
    %c7_i32 = arith.constant 7 : i32
    %9 = arith.cmpi eq, %arg2, %c7_i32 : i32
    %10 = arith.extui %9 : i1 to i32
    %c0_i32_8 = arith.constant 0 : i32
    %11 = arith.cmpi ne, %10, %c0_i32_8 : i32
    scf.if %11 {
      %c0_9 = arith.constant 0 : index
      %c0_10 = arith.constant 0 : index
      %12 = vector.load %arg8[%c0_9, %c0_10] : memref<32x256xf32, #tpu.memory_space<vmem>>, vector<32x256xf32>
      %c0_11 = arith.constant 0 : index
      %c0_12 = arith.constant 0 : index
      %13 = vector.load %arg5[%c0_11, %c0_12] : memref<32x256xf32, #tpu.memory_space<vmem>>, vector<32x256xf32>
      tpu.vector_store %arg5[%c0_11, %c0_12], %12 {strides = array<i32>} : memref<32x256xf32, #tpu.memory_space<vmem>>, vector<32x256xf32>,
      %cst_13 = arith.constant dense<0.000000e+00> : vector<256xf32>
      %14 = vector.multi_reduction <add>, %12, %cst_13 [0] : vector<32x256xf32> to vector<256xf32>
      %15 = vector.shape_cast %14 : vector<256xf32> to vector<1x1x256xf32>
      %c0_14 = arith.constant 0 : index
      %c0_15 = arith.constant 0 : index
      %c0_16 = arith.constant 0 : index
      %16 = vector.load %arg6[%c0_14, %c0_15, %c0_16] : memref<1x1x256xf32, #tpu.memory_space<vmem>>, vector<1x1x256xf32>
      tpu.vector_store %arg6[%c0_14, %c0_15, %c0_16], %15 {strides = array<i32>} : memref<1x1x256xf32, #tpu.memory_space<vmem>>, vector<1x1x256xf32>,
      %17 = arith.mulf %12, %12 : vector<32x256xf32>
      %cst_17 = arith.constant dense<0.000000e+00> : vector<256xf32>
      %18 = vector.multi_reduction <add>, %17, %cst_17 [0] : vector<32x256xf32> to vector<256xf32>
      %19 = vector.shape_cast %18 : vector<256xf32> to vector<1x1x256xf32>
      %c0_18 = arith.constant 0 : index
      %c0_19 = arith.constant 0 : index
      %c0_20 = arith.constant 0 : index
      %20 = vector.load %arg7[%c0_18, %c0_19, %c0_20] : memref<1x1x256xf32, #tpu.memory_space<vmem>>, vector<1x1x256xf32>
      tpu.vector_store %arg7[%c0_18, %c0_19, %c0_20], %19 {strides = array<i32>} : memref<1x1x256xf32, #tpu.memory_space<vmem>>, vector<1x1x256xf32>,
    } else {
    }
    return
  }
  func.func @transform_0(%arg0: i32, %arg1: i32, %arg2: i32) -> (i32, i32) {
    %c0_i32 = arith.constant 0 : i32
    return %arg0, %arg2 : i32, i32
  }
  func.func @transform_1(%arg0: i32, %arg1: i32, %arg2: i32) -> (i32, i32) {
    %c0_i32 = arith.constant 0 : i32
    return %arg2, %arg1 : i32, i32
  }
  func.func @transform_2(%arg0: i32, %arg1: i32, %arg2: i32) -> (i32, i32) {
    %c0_i32 = arith.constant 0 : i32
    return %arg0, %arg1 : i32, i32
  }
  func.func @transform_3(%arg0: i32, %arg1: i32, %arg2: i32) -> (i32, i32, i32) {
    %c0_i32 = arith.constant 0 : i32
    %c0_i32_0 = arith.constant 0 : i32
    return %arg0, %c0_i32, %arg1 : i32, i32, i32
  }
  func.func @transform_4(%arg0: i32, %arg1: i32, %arg2: i32) -> (i32, i32, i32) {
    %c0_i32 = arith.constant 0 : i32
    %c0_i32_0 = arith.constant 0 : i32
    return %arg0, %c0_i32, %arg1 : i32, i32, i32
  }
}

module attributes {stable_mosaic.version = 11 : i64} {
  func.func @_bn_leaky_kernel(%arg0: i32, %arg1: memref<32x512xf32, #tpu.memory_space<vmem>>, %arg2: memref<1x512xf32, #tpu.memory_space<vmem>>, %arg3: memref<1x512xf32, #tpu.memory_space<vmem>>, %arg4: memref<32x512xbf16, #tpu.memory_space<vmem>>) attributes {dimension_semantics = [#tpu.dimension_semantics<parallel>], iteration_bounds = array<i64: 1>, scalar_prefetch = 0 : i64, scratch_operands = 0 : i64, tpu.core_type = #tpu.core_type<tc>, window_params = [{transform_indices = @transform_0, window_bounds = array<i64: 32, 512>}, {pipeline_mode = #tpu.pipeline_mode<synchronous>, transform_indices = @transform_1, window_bounds = array<i64: 1, 512>}, {pipeline_mode = #tpu.pipeline_mode<synchronous>, transform_indices = @transform_2, window_bounds = array<i64: 1, 512>}, {transform_indices = @transform_3, window_bounds = array<i64: 32, 512>}]} {
    %c0 = arith.constant 0 : index
    %c0_0 = arith.constant 0 : index
    %0 = vector.load %arg1[%c0, %c0_0] : memref<32x512xf32, #tpu.memory_space<vmem>>, vector<32x512xf32>
    %c0_1 = arith.constant 0 : index
    %c0_2 = arith.constant 0 : index
    %1 = vector.load %arg2[%c0_1, %c0_2] : memref<1x512xf32, #tpu.memory_space<vmem>>, vector<1x512xf32>
    %2 = vector.broadcast %1 : vector<1x512xf32> to vector<32x512xf32>
    %3 = arith.mulf %0, %2 : vector<32x512xf32>
    %c0_3 = arith.constant 0 : index
    %c0_4 = arith.constant 0 : index
    %4 = vector.load %arg3[%c0_3, %c0_4] : memref<1x512xf32, #tpu.memory_space<vmem>>, vector<1x512xf32>
    %5 = vector.broadcast %4 : vector<1x512xf32> to vector<32x512xf32>
    %6 = arith.addf %3, %5 : vector<32x512xf32>
    %cst = arith.constant 0.000000e+00 : f32
    %7 = vector.broadcast %cst : f32 to vector<32x512xf32>
    %8 = arith.cmpf oge, %6, %7 : vector<32x512xf32>
    %cst_5 = arith.constant 2.000000e-01 : f32
    %9 = vector.broadcast %cst_5 : f32 to vector<32x512xf32>
    %10 = arith.mulf %9, %6 : vector<32x512xf32>
    %11 = arith.select %8, %6, %10 : vector<32x512xi1>, vector<32x512xf32>
    %12 = arith.truncf %11 : vector<32x512xf32> to vector<32x512xbf16>
    %c0_6 = arith.constant 0 : index
    %c0_7 = arith.constant 0 : index
    %13 = vector.load %arg4[%c0_6, %c0_7] : memref<32x512xbf16, #tpu.memory_space<vmem>>, vector<32x512xbf16>
    tpu.vector_store %arg4[%c0_6, %c0_7], %12 {strides = array<i32>} : memref<32x512xbf16, #tpu.memory_space<vmem>>, vector<32x512xbf16>,
    return
  }
  func.func @transform_0(%arg0: i32) -> (i32, i32) {
    %c0_i32 = arith.constant 0 : i32
    %c0_i32_0 = arith.constant 0 : i32
    return %arg0, %c0_i32 : i32, i32
  }
  func.func @transform_1(%arg0: i32) -> (i32, i32) {
    %c0_i32 = arith.constant 0 : i32
    %c0_i32_0 = arith.constant 0 : i32
    %c0_i32_1 = arith.constant 0 : i32
    return %c0_i32, %c0_i32_0 : i32, i32
  }
  func.func @transform_2(%arg0: i32) -> (i32, i32) {
    %c0_i32 = arith.constant 0 : i32
    %c0_i32_0 = arith.constant 0 : i32
    %c0_i32_1 = arith.constant 0 : i32
    return %c0_i32, %c0_i32_0 : i32, i32
  }
  func.func @transform_3(%arg0: i32) -> (i32, i32) {
    %c0_i32 = arith.constant 0 : i32
    %c0_i32_0 = arith.constant 0 : i32
    return %arg0, %c0_i32 : i32, i32
  }
}

module attributes {stable_mosaic.version = 11 : i64} {
  func.func @_conv_act_kernel(%arg0: i32, %arg1: i32, %arg2: i32, %arg3: memref<8x512xbf16, #tpu.memory_space<vmem>>, %arg4: memref<512x128xbf16, #tpu.memory_space<vmem>>, %arg5: memref<8x128xf32, #tpu.memory_space<vmem>>, %arg6: memref<8x128xf32, #tpu.memory_space<vmem>>) attributes {dimension_semantics = [#tpu.dimension_semantics<parallel>, #tpu.dimension_semantics<parallel>, #tpu.dimension_semantics<arbitrary>], iteration_bounds = array<i64: 1, 1, 16>, scalar_prefetch = 0 : i64, scratch_operands = 1 : i64, tpu.core_type = #tpu.core_type<tc>, window_params = [{transform_indices = @transform_0, window_bounds = array<i64: 8, 512>}, {transform_indices = @transform_1, window_bounds = array<i64: 512, 128>}, {transform_indices = @transform_2, window_bounds = array<i64: 8, 128>}]} {
    %c0_i32 = arith.constant 0 : i32
    %0 = arith.cmpi eq, %arg2, %c0_i32 : i32
    %1 = arith.extui %0 : i1 to i32
    %c0_i32_0 = arith.constant 0 : i32
    %2 = arith.cmpi ne, %1, %c0_i32_0 : i32
    scf.if %2 {
      %cst_9 = arith.constant 0.000000e+00 : f32
      %12 = vector.broadcast %cst_9 : f32 to vector<8x128xf32>
      %c0_10 = arith.constant 0 : index
      %c0_11 = arith.constant 0 : index
      %13 = vector.load %arg6[%c0_10, %c0_11] : memref<8x128xf32, #tpu.memory_space<vmem>>, vector<8x128xf32>
      tpu.vector_store %arg6[%c0_10, %c0_11], %12 {strides = array<i32>} : memref<8x128xf32, #tpu.memory_space<vmem>>, vector<8x128xf32>,
    } else {
    }
    %c0 = arith.constant 0 : index
    %c0_1 = arith.constant 0 : index
    %3 = vector.load %arg6[%c0, %c0_1] : memref<8x128xf32, #tpu.memory_space<vmem>>, vector<8x128xf32>
    %c0_2 = arith.constant 0 : index
    %c0_3 = arith.constant 0 : index
    %4 = vector.load %arg3[%c0_2, %c0_3] : memref<8x512xbf16, #tpu.memory_space<vmem>>, vector<8x512xbf16>
    %c0_4 = arith.constant 0 : index
    %c0_5 = arith.constant 0 : index
    %5 = vector.load %arg4[%c0_4, %c0_5] : memref<512x128xbf16, #tpu.memory_space<vmem>>, vector<512x128xbf16>
    %cst = arith.constant dense<0.000000e+00> : vector<8x128xf32>
    %6 = tpu.matmul %4, %5, %cst {dimension_numbers = #tpu.dot_dimension_numbers<[1], [0], [0], [1], [0, 0, 1, 1], [], []>} : vector<8x512xbf16>, vector<512x128xbf16>, vector<8x128xf32> -> vector<8x128xf32>
    %7 = arith.addf %3, %6 : vector<8x128xf32>
    %c0_6 = arith.constant 0 : index
    %c0_7 = arith.constant 0 : index
    %8 = vector.load %arg6[%c0_6, %c0_7] : memref<8x128xf32, #tpu.memory_space<vmem>>, vector<8x128xf32>
    tpu.vector_store %arg6[%c0_6, %c0_7], %7 {strides = array<i32>} : memref<8x128xf32, #tpu.memory_space<vmem>>, vector<8x128xf32>,
    %c15_i32 = arith.constant 15 : i32
    %9 = arith.cmpi eq, %arg2, %c15_i32 : i32
    %10 = arith.extui %9 : i1 to i32
    %c0_i32_8 = arith.constant 0 : i32
    %11 = arith.cmpi ne, %10, %c0_i32_8 : i32
    scf.if %11 {
      %c0_9 = arith.constant 0 : index
      %c0_10 = arith.constant 0 : index
      %12 = vector.load %arg6[%c0_9, %c0_10] : memref<8x128xf32, #tpu.memory_space<vmem>>, vector<8x128xf32>
      %cst_11 = arith.constant 0.000000e+00 : f32
      %13 = vector.broadcast %cst_11 : f32 to vector<8x128xf32>
      %14 = arith.subf %13, %12 : vector<8x128xf32>
      %15 = math.exp %14 : vector<8x128xf32>
      %cst_12 = arith.constant 1.000000e+00 : f32
      %16 = vector.broadcast %cst_12 : f32 to vector<8x128xf32>
      %17 = arith.addf %16, %15 : vector<8x128xf32>
      %cst_13 = arith.constant 1.000000e+00 : f32
      %18 = vector.broadcast %cst_13 : f32 to vector<8x128xf32>
      %19 = arith.divf %18, %17 : vector<8x128xf32>
      %c0_14 = arith.constant 0 : index
      %c0_15 = arith.constant 0 : index
      %20 = vector.load %arg5[%c0_14, %c0_15] : memref<8x128xf32, #tpu.memory_space<vmem>>, vector<8x128xf32>
      tpu.vector_store %arg5[%c0_14, %c0_15], %19 {strides = array<i32>} : memref<8x128xf32, #tpu.memory_space<vmem>>, vector<8x128xf32>,
    } else {
    }
    return
  }
  func.func @transform_0(%arg0: i32, %arg1: i32, %arg2: i32) -> (i32, i32) {
    %c0_i32 = arith.constant 0 : i32
    return %arg0, %arg2 : i32, i32
  }
  func.func @transform_1(%arg0: i32, %arg1: i32, %arg2: i32) -> (i32, i32) {
    %c0_i32 = arith.constant 0 : i32
    return %arg2, %arg1 : i32, i32
  }
  func.func @transform_2(%arg0: i32, %arg1: i32, %arg2: i32) -> (i32, i32) {
    %c0_i32 = arith.constant 0 : i32
    return %arg0, %arg1 : i32, i32
  }
}

</mosaic_0001>

<bundles_post_ra>
// kernel: d_forward.8
= control target key start
LH: loop header
LB: loop body
LE: loop exit
PB: predicated region body
PF: predicated region fallthrough
CT: control target
= control target key end

     0   :  { %s1209_s9 = smov 0   ;;  %s1211_s10 = smov 0   ;;  %s1310_s0 = inlined_call_operand.vmem [shape: bf16[2048,48], index: 0, kind: input, shape index: {}]   ;;  %s1311_s1 = inlined_call_operand.vmem [shape: bf16[48,128], index: 1, kind: input, shape index: {}]   ;;  %s1312_s2 = inlined_call_operand.vmem [shape: bf16[2048,128], index: 2, kind: output, shape index: {}]  }
   0x1   :  { %s1213_s11 = smov 0  }
   0x2 LB: > { %s31_s12 = sadd.s32 1, %s1188_s10  ;;  %p924_p0 = scmp.ge.s32.totalorder %s1192_s11, 1  ;;  %s1192_s11 = sphi %s1213_s11, %s12_s11   ;;  %s1188_s10 = sphi %s1211_s10, %s1314_s10   ;;  %s1184_s9 = sphi %s1209_s9, %s1313_s9  }
   0x3   : > { %p33_p1 = scmp.ge.s32.totalorder %s31_s12, 8  ;;  %p155_p2 = scmp.lt.s32.totalorder %s1192_s11, 9 }
   0x5   : > { %s1316_s12 = smov (%p33_p1, %s31_s12), 0  ;;  %p156_p3 = pnand %p924_p0, %p155_p2 }
   0x6   : > { %s925_s15 = sshll.u32 (!%p156_p3), %s1184_s9, 5 }
   0x7   : > { %159 = sbr.rel (%p156_p3) target bundleno = 220 (0xdc), region = 28  ;;  %p192_p4 = scmp.lt.s32.totalorder (!%p156_p3), %s925_s15, 255 }
   0xc   : > { %v1041_v0 = vld [vmem:[%s1311_s1 + $0x10] sm:$0xff]  ;;  %v1040_v1 = vld [vmem:[%s1311_s1 + $0x8] sm:$0xff]  ;;  %s1318_s15 = smov (!%p192_p4, %s925_s15), 255  ;;  %v1039_v2 = vld [vmem:[%s1311_s1] sm:$0xff]  ;;  %vm423_vm0 = vcmask 392192  }
   0xd   : > { %477 = vmatpush.bf16.msra.mxu0 %v1041_v0  ;;  %1137 = vmatpush.bf16.msra.mxu1 %v1041_v0  ;;  %s926_s18 = sshll.u32 %s1318_s15, 2 }
   0xe   : > { %1138 = vmatpush.bf16.msra.mxu2 %v1041_v0  ;;  %1139 = vmatpush.bf16.msra.mxu3 %v1041_v0  ;;  %s1244_s23 = scalar_lea.vmem %s1310_s0, %s926_s18  ;;  %s1283_s26 = scalar_lea.vmem %s1312_s2, %s926_s18 }
   0xf   : > { %v1023_v3 = vld [vmem:[%s1244_s23] sm:$0xff]  ;;  %v1024_v7 = vld [vmem:[%s1244_s23 + $0x8] sm:$0xff]  ;;  %v1025_v11 = vld [vmem:[%s1244_s23 + $0x10] sm:$0xff] }
  0x10   : > { %v1027_v4 = vld [vmem:[%s1244_s23 + $0x20] sm:$0xff]  ;;  %v1028_v8 = vld [vmem:[%s1244_s23 + $0x28] sm:$0xff]  ;;  %v1029_v12 = vld [vmem:[%s1244_s23 + $0x30] sm:$0xff] }
  0x11   : > { %478 = vmatpush.bf16.msra.mxu0 %v1040_v1  ;;  %1140 = vmatpush.bf16.msra.mxu1 %v1040_v1  ;;  %v1031_v5 = vld [vmem:[%s1244_s23 + $0x40] sm:$0xff]  ;;  %v1032_v9 = vld [vmem:[%s1244_s23 + $0x48] sm:$0xff]  ;;  %v1033_v13 = vld [vmem:[%s1244_s23 + $0x50] sm:$0xff] }
  0x12   : > { %1141 = vmatpush.bf16.msra.mxu2 %v1040_v1  ;;  %1142 = vmatpush.bf16.msra.mxu3 %v1040_v1  ;;  %v1035_v6 = vld [vmem:[%s1244_s23 + $0x60] sm:$0xff]  ;;  %v1036_v10 = vld [vmem:[%s1244_s23 + $0x68] sm:$0xff]  ;;  %v1037_v14 = vld [vmem:[%s1244_s23 + $0x70] sm:$0xff] }
  0x13   : > { %v1026_v15 = vld [vmem:[%s1244_s23 + $0x18] sm:$0xff] }
  0x14   : > { %v1030_v16 = vld [vmem:[%s1244_s23 + $0x38] sm:$0xff] }
  0x15   : > { %479 = vmatpush.bf16.msra.mxu0 %v1039_v2  ;;  %1143 = vmatpush.bf16.msra.mxu1 %v1039_v2  ;;  %v1034_v17 = vld [vmem:[%s1244_s23 + $0x58] sm:$0xff] }
  0x16   : > { %1144 = vmatpush.bf16.msra.mxu2 %v1039_v2  ;;  %1145 = vmatpush.bf16.msra.mxu3 %v1039_v2  ;;  %v1038_v18 = vld [vmem:[%s1244_s23 + $0x78] sm:$0xff] }
  0x18   : > { %1005 = vmatmul.msk.bf16.vlgmr.msra.gmra.mxu0 %vm423_vm0, %v1023_v3  ;;  %1009 = vmatmul.msk.bf16.vlgmr.msra.gmra.mxu1 %vm423_vm0, %v1027_v4 }
  0x19   : > { %1013 = vmatmul.msk.bf16.vlgmr.msra.gmra.mxu2 %vm423_vm0, %v1031_v5  ;;  %1017 = vmatmul.msk.bf16.vlgmr.msra.gmra.mxu3 %vm423_vm0, %v1035_v6 }
  0x28   : > { %1006 = vmatmul.msk.bf16.gmra.mxu0 %vm423_vm0, %v1024_v7  ;;  %1010 = vmatmul.msk.bf16.gmra.mxu1 %vm423_vm0, %v1028_v8 }
  0x29   : > { %1014 = vmatmul.msk.bf16.gmra.mxu2 %vm423_vm0, %v1032_v9  ;;  %1018 = vmatmul.msk.bf16.gmra.mxu3 %vm423_vm0, %v1036_v10 }
  0x38   : > { %1007 = vmatmul.msk.bf16.gmra.mxu0 %vm423_vm0, %v1025_v11  ;;  %1011 = vmatmul.msk.bf16.gmra.mxu1 %vm423_vm0, %v1029_v12 }
  0x39   : > { %1015 = vmatmul.msk.bf16.gmra.mxu2 %vm423_vm0, %v1033_v13  ;;  %1019 = vmatmul.msk.bf16.gmra.mxu3 %vm423_vm0, %v1037_v14 }
  0x48   : > { %1008 = vmatmul.msk.bf16.gmra.mxu0 %vm423_vm0, %v1026_v15  ;;  %1012 = vmatmul.msk.bf16.gmra.mxu1 %vm423_vm0, %v1030_v16 }
  0x49   : > { %1016 = vmatmul.msk.bf16.gmra.mxu2 %vm423_vm0, %v1034_v17  ;;  %1020 = vmatmul.msk.bf16.gmra.mxu3 %vm423_vm0, %v1038_v18 }
  0x95   : > { %v481_v19 = vpop.f32.mrf.mxu0  ;;  %v501_v20 = vpop.f32.mrf.mxu1 }
  0x96   : > { %v692_v21 = vmul.f32 0.2, %v481_v19  ;;  %v700_v22 = vmul.f32 0.2, %v501_v20  ;;  %vm660_vm1 = vcmp.ge.f32.partialorder %v481_v19, 0.0  ;;  %vm668_vm2 = vcmp.ge.f32.partialorder %v501_v20, 0.0 }
  0x98   : > { %v724_v29 = vsel %vm660_vm1, %v481_v19, %v692_v21  ;;  %v732_v30 = vsel %vm668_vm2, %v501_v20, %v700_v22 }
  0x9c   : > { %v521_v23 = vpop.f32.mrf.mxu2  ;;  %v541_v24 = vpop.f32.mrf.mxu3 }
  0x9d   : > { %v483_v25 = vpop.f32.mrf.mxu0  ;;  %v503_v26 = vpop.f32.mrf.mxu1  ;;  %v708_v35 = vmul.f32 0.2, %v521_v23  ;;  %v716_v36 = vmul.f32 0.2, %v541_v24  ;;  %vm676_vm5 = vcmp.ge.f32.partialorder %v521_v23, 0.0  ;;  %vm684_vm6 = vcmp.ge.f32.partialorder %v541_v24, 0.0 }
  0x9e   : > { %vm661_vm3 = vcmp.ge.f32.partialorder %v483_v25, 0.0  ;;  %v693_v27 = vmul.f32 0.2, %v483_v25  ;;  %vm669_vm4 = vcmp.ge.f32.partialorder %v503_v26, 0.0  ;;  %v701_v28 = vmul.f32 0.2, %v503_v26 }
  0x9f   : > { %v740_v43 = vsel %vm676_vm5, %v521_v23, %v708_v35  ;;  %v748_v44 = vsel %vm684_vm6, %v541_v24, %v716_v36 }
  0xa0   : > { %v725_v31 = vsel %vm661_vm3, %v483_v25, %v693_v27  ;;  %v733_v32 = vsel %vm669_vm4, %v503_v26, %v701_v28 }
  0xa1   : > { %v1045_v33 = vpack.c.bf16 %v725_v31, %v724_v29  ;;  %v1065_v34 = vpack.c.bf16 %v733_v32, %v732_v30 }
  0xa3   : > { %1046 = vst [vmem:[%s1283_s26] sm:$0xff] %v1045_v33  }
  0xa4   : > { %1125 = vst [vmem:[%s1283_s26 + $0x20] sm:$0xff] %v1065_v34   ;;  %v523_v37 = vpop.f32.mrf.mxu2  ;;  %v543_v38 = vpop.f32.mrf.mxu3 }
  0xa5   : > { %vm677_vm7 = vcmp.ge.f32.partialorder %v523_v37, 0.0  ;;  %v709_v39 = vmul.f32 0.2, %v523_v37  ;;  %vm685_vm8 = vcmp.ge.f32.partialorder %v543_v38, 0.0  ;;  %v717_v40 = vmul.f32 0.2, %v543_v38  ;;  %v486_v41 = vpop.f32.mrf.mxu0  ;;  %v506_v42 = vpop.f32.mrf.mxu1 }
  0xa6   : > { %v694_v49 = vmul.f32 0.2, %v486_v41  ;;  %v702_v50 = vmul.f32 0.2, %v506_v42  ;;  %vm662_vm9 = vcmp.ge.f32.partialorder %v486_v41, 0.0  ;;  %vm670_vm10 = vcmp.ge.f32.partialorder %v506_v42, 0.0 }
  0xa7   : > { %v741_v45 = vsel %vm677_vm7, %v523_v37, %v709_v39  ;;  %v749_v46 = vsel %vm685_vm8, %v543_v38, %v717_v40 }
  0xa8   : > { %v1085_v47 = vpack.c.bf16 %v741_v45, %v740_v43  ;;  %v1105_v48 = vpack.c.bf16 %v749_v46, %v748_v44  ;;  %v726_v57 = vsel %vm662_vm9, %v486_v41, %v694_v49  ;;  %v734_v58 = vsel %vm670_vm10, %v506_v42, %v702_v50 }
  0xaa   : > { %1129 = vst [vmem:[%s1283_s26 + $0x40] sm:$0xff] %v1085_v47  }
  0xab   : > { %1133 = vst [vmem:[%s1283_s26 + $0x60] sm:$0xff] %v1105_v48  }
  0xac   : > { %v526_v51 = vpop.f32.mrf.mxu2  ;;  %v546_v52 = vpop.f32.mrf.mxu3 }
  0xad   : > { %v488_v53 = vpop.f32.mrf.mxu0  ;;  %v508_v54 = vpop.f32.mrf.mxu1  ;;  %v710_v63 = vmul.f32 0.2, %v526_v51  ;;  %v718_v0 = vmul.f32 0.2, %v546_v52  ;;  %vm678_vm13 = vcmp.ge.f32.partialorder %v526_v51, 0.0  ;;  %vm686_vm14 = vcmp.ge.f32.partialorder %v546_v52, 0.0 }
  0xae   : > { %vm663_vm11 = vcmp.ge.f32.partialorder %v488_v53, 0.0  ;;  %v695_v55 = vmul.f32 0.2, %v488_v53  ;;  %vm671_vm12 = vcmp.ge.f32.partialorder %v508_v54, 0.0  ;;  %v703_v56 = vmul.f32 0.2, %v508_v54 }
  0xaf   : > { %v742_v7 = vsel %vm678_vm13, %v526_v51, %v710_v63  ;;  %v750_v8 = vsel %vm686_vm14, %v546_v52, %v718_v0 }
  0xb0   : > { %v727_v59 = vsel %vm663_vm11, %v488_v53, %v695_v55  ;;  %v735_v60 = vsel %vm671_vm12, %v508_v54, %v703_v56 }
  0xb1   : > { %v1050_v61 = vpack.c.bf16 %v727_v59, %v726_v57  ;;  %v1070_v62 = vpack.c.bf16 %v735_v60, %v734_v58 }
  0xb3   : > { %1122 = vst [vmem:[%s1283_s26 + $0x8] sm:$0xff] %v1050_v61  }
  0xb4   : > { %1126 = vst [vmem:[%s1283_s26 + $0x28] sm:$0xff] %v1070_v62   ;;  %v528_v1 = vpop.f32.mrf.mxu2  ;;  %v548_v2 = vpop.f32.mrf.mxu3 }
  0xb5   : > { %vm679_vm15 = vcmp.ge.f32.partialorder %v528_v1, 0.0  ;;  %v711_v3 = vmul.f32 0.2, %v528_v1  ;;  %vm687_vm0 = vcmp.ge.f32.partialorder %v548_v2, 0.0  ;;  %v719_v4 = vmul.f32 0.2, %v548_v2  ;;  %v491_v5 = vpop.f32.mrf.mxu0  ;;  %v511_v6 = vpop.f32.mrf.mxu1 }
  0xb6   : > { %v696_v13 = vmul.f32 0.2, %v491_v5  ;;  %v704_v14 = vmul.f32 0.2, %v511_v6  ;;  %vm664_vm1 = vcmp.ge.f32.partialorder %v491_v5, 0.0  ;;  %vm672_vm2 = vcmp.ge.f32.partialorder %v511_v6, 0.0 }
  0xb7   : > { %v743_v9 = vsel %vm679_vm15, %v528_v1, %v711_v3  ;;  %v751_v10 = vsel %vm687_vm0, %v548_v2, %v719_v4 }
  0xb8   : > { %v1090_v11 = vpack.c.bf16 %v743_v9, %v742_v7  ;;  %v1110_v12 = vpack.c.bf16 %v751_v10, %v750_v8  ;;  %v728_v21 = vsel %vm664_vm1, %v491_v5, %v696_v13  ;;  %v736_v22 = vsel %vm672_vm2, %v511_v6, %v704_v14 }
  0xba   : > { %1130 = vst [vmem:[%s1283_s26 + $0x48] sm:$0xff] %v1090_v11  }
  0xbb   : > { %1134 = vst [vmem:[%s1283_s26 + $0x68] sm:$0xff] %v1110_v12  }
  0xbc   : > { %v531_v15 = vpop.f32.mrf.mxu2  ;;  %v551_v16 = vpop.f32.mrf.mxu3 }
  0xbd   : > { %v493_v17 = vpop.f32.mrf.mxu0  ;;  %v513_v18 = vpop.f32.mrf.mxu1  ;;  %v712_v27 = vmul.f32 0.2, %v531_v15  ;;  %v720_v28 = vmul.f32 0.2, %v551_v16  ;;  %vm680_vm5 = vcmp.ge.f32.partialorder %v531_v15, 0.0  ;;  %vm688_vm6 = vcmp.ge.f32.partialorder %v551_v16, 0.0 }
  0xbe   : > { %vm665_vm3 = vcmp.ge.f32.partialorder %v493_v17, 0.0  ;;  %v697_v19 = vmul.f32 0.2, %v493_v17  ;;  %vm673_vm4 = vcmp.ge.f32.partialorder %v513_v18, 0.0  ;;  %v705_v20 = vmul.f32 0.2, %v513_v18 }
  0xbf   : > { %v744_v35 = vsel %vm680_vm5, %v531_v15, %v712_v27  ;;  %v752_v36 = vsel %vm688_vm6, %v551_v16, %v720_v28 }
  0xc0   : > { %v729_v23 = vsel %vm665_vm3, %v493_v17, %v697_v19  ;;  %v737_v24 = vsel %vm673_vm4, %v513_v18, %v705_v20 }
  0xc1   : > { %v1055_v25 = vpack.c.bf16 %v729_v23, %v728_v21  ;;  %v1075_v26 = vpack.c.bf16 %v737_v24, %v736_v22 }
  0xc3   : > { %1123 = vst [vmem:[%s1283_s26 + $0x10] sm:$0xff] %v1055_v25  }
  0xc4   : > { %1127 = vst [vmem:[%s1283_s26 + $0x30] sm:$0xff] %v1075_v26   ;;  %v533_v29 = vpop.f32.mrf.mxu2  ;;  %v553_v30 = vpop.f32.mrf.mxu3 }
  0xc5   : > { %vm681_vm7 = vcmp.ge.f32.partialorder %v533_v29, 0.0  ;;  %v713_v31 = vmul.f32 0.2, %v533_v29  ;;  %vm689_vm8 = vcmp.ge.f32.partialorder %v553_v30, 0.0  ;;  %v721_v32 = vmul.f32 0.2, %v553_v30  ;;  %v496_v33 = vpop.f32.mrf.mxu0  ;;  %v516_v34 = vpop.f32.mrf.mxu1 }
  0xc6   : > { %v698_v41 = vmul.f32 0.2, %v496_v33  ;;  %v706_v42 = vmul.f32 0.2, %v516_v34  ;;  %vm666_vm9 = vcmp.ge.f32.partialorder %v496_v33, 0.0  ;;  %vm674_vm10 = vcmp.ge.f32.partialorder %v516_v34, 0.0 }
  0xc7   : > { %v745_v37 = vsel %vm681_vm7, %v533_v29, %v713_v31  ;;  %v753_v38 = vsel %vm689_vm8, %v553_v30, %v721_v32 }
  0xc8   : > { %v1095_v39 = vpack.c.bf16 %v745_v37, %v744_v35  ;;  %v1115_v40 = vpack.c.bf16 %v753_v38, %v752_v36  ;;  %v730_v49 = vsel %vm666_vm9, %v496_v33, %v698_v41  ;;  %v738_v50 = vsel %vm674_vm10, %v516_v34, %v706_v42 }
  0xca   : > { %1131 = vst [vmem:[%s1283_s26 + $0x50] sm:$0xff] %v1095_v39  }
  0xcb   : > { %1135 = vst [vmem:[%s1283_s26 + $0x70] sm:$0xff] %v1115_v40  }
  0xcc   : > { %v536_v43 = vpop.f32.mrf.mxu2  ;;  %v556_v44 = vpop.f32.mrf.mxu3 }
  0xcd   : > { %v498_v45 = vpop.f32.mrf.mxu0  ;;  %v518_v46 = vpop.f32.mrf.mxu1  ;;  %v714_v55 = vmul.f32 0.2, %v536_v43  ;;  %v722_v56 = vmul.f32 0.2, %v556_v44  ;;  %vm682_vm13 = vcmp.ge.f32.partialorder %v536_v43, 0.0  ;;  %vm690_vm14 = vcmp.ge.f32.partialorder %v556_v44, 0.0 }
  0xce   : > { %vm667_vm11 = vcmp.ge.f32.partialorder %v498_v45, 0.0  ;;  %v699_v47 = vmul.f32 0.2, %v498_v45  ;;  %vm675_vm12 = vcmp.ge.f32.partialorder %v518_v46, 0.0  ;;  %v707_v48 = vmul.f32 0.2, %v518_v46 }
  0xcf   : > { %v746_v61 = vsel %vm682_vm13, %v536_v43, %v714_v55  ;;  %v754_v62 = vsel %vm690_vm14, %v556_v44, %v722_v56 }
  0xd0   : > { %v731_v51 = vsel %vm667_vm11, %v498_v45, %v699_v47  ;;  %v739_v52 = vsel %vm675_vm12, %v518_v46, %v707_v48 }
  0xd1   : > { %v1060_v53 = vpack.c.bf16 %v731_v51, %v730_v49  ;;  %v1080_v54 = vpack.c.bf16 %v739_v52, %v738_v50 }
  0xd3   : > { %1124 = vst [vmem:[%s1283_s26 + $0x18] sm:$0xff] %v1060_v53  }
  0xd4   : > { %1128 = vst [vmem:[%s1283_s26 + $0x38] sm:$0xff] %v1080_v54   ;;  %v538_v57 = vpop.f32.mrf.mxu2  ;;  %v558_v58 = vpop.f32.mrf.mxu3 }
  0xd5   : > { %vm683_vm15 = vcmp.ge.f32.partialorder %v538_v57, 0.0  ;;  %v715_v59 = vmul.f32 0.2, %v538_v57  ;;  %vm691_vm0 = vcmp.ge.f32.partialorder %v558_v58, 0.0  ;;  %v723_v60 = vmul.f32 0.2, %v558_v58 }
  0xd7   : > { %v747_v63 = vsel %vm683_vm15, %v538_v57, %v715_v59  ;;  %v755_v0 = vsel %vm691_vm0, %v558_v58, %v723_v60 }
  0xd8   : > { %v1100_v1 = vpack.c.bf16 %v747_v63, %v746_v61  ;;  %v1120_v2 = vpack.c.bf16 %v755_v0, %v754_v62 }
  0xda   : > { %1132 = vst [vmem:[%s1283_s26 + $0x58] sm:$0xff] %v1100_v1  }
  0xdb   : > { %1136 = vst [vmem:[%s1283_s26 + $0x78] sm:$0xff] %v1120_v2  }
  0xdc PF: > { %s12_s11 = sadd.s32 1, %s1192_s11   ;;  %s1313_s9 = smov %s1188_s10 }
  0xdd   : > { %p9_p5 = scmp.ge.s32.totalorder %s12_s11, 10   ;;  %s1314_s10 = smov %s1316_s12 }
  0xdf   :  { %11 = sbr.rel (!%p9_p5) target bundleno = 2 (0x2), region = 69 }

// kernel: d_forward.10
= control target key start
LH: loop header
LB: loop body
LE: loop exit
PB: predicated region body
PF: predicated region fallthrough
CT: control target
= control target key end

     0   :  { %s1178_s0 = inlined_call_operand.vmem [shape: f32[512,128], index: 0, kind: input, shape index: {}]   ;;  %s1179_s1 = inlined_call_operand.vmem [shape: f32[1,128], index: 1, kind: input, shape index: {}]   ;;  %s1180_s2 = inlined_call_operand.vmem [shape: f32[1,128], index: 2, kind: input, shape index: {}]   ;;  %s1181_s3 = inlined_call_operand.vmem [shape: bf16[512,128], index: 3, kind: output, shape index: {}]  }
   0x1   :  { %v14_v0 = vld [vmem:[%s1178_s0] sm:$0xff]  ;;  %v15_v1 = vld [vmem:[%s1178_s0 + $0x8] sm:$0xff]  ;;  %v16_v4 = vld [vmem:[%s1178_s0 + $0x10] sm:$0xff] }
   0x2   :  { %v760_v2 = vld [vmem:[%s1179_s1] ss:$0 sm:$0xff]  ;;  %v17_v5 = vld [vmem:[%s1178_s0 + $0x18] sm:$0xff]  ;;  %v19_v11 = vld [vmem:[%s1178_s0 + $0x28] sm:$0xff] }
   0x3   :  { %v765_v3 = vld [vmem:[%s1180_s2] ss:$0 sm:$0xff]  ;;  %v82_v7 = vmul.f32 %v760_v2, %v14_v0  ;;  %v83_v8 = vmul.f32 %v760_v2, %v15_v1  ;;  %v84_v9 = vmul.f32 %v760_v2, %v16_v4  ;;  %v85_v10 = vmul.f32 %v760_v2, %v17_v5  ;;  %v20_v12 = vld [vmem:[%s1178_s0 + $0x30] sm:$0xff]  ;;  %v21_v13 = vld [vmem:[%s1178_s0 + $0x38] sm:$0xff] }
   0x4   :  { %v18_v6 = vld [vmem:[%s1178_s0 + $0x20] sm:$0xff]  ;;  %v87_v15 = vmul.f32 %v760_v2, %v19_v11  ;;  %v88_v16 = vmul.f32 %v760_v2, %v20_v12  ;;  %v89_v17 = vmul.f32 %v760_v2, %v21_v13  ;;  %v23_v37 = vld [vmem:[%s1178_s0 + $0x48] sm:$0xff]  ;;  %v24_v38 = vld [vmem:[%s1178_s0 + $0x50] sm:$0xff] }
   0x5   :  { %v86_v14 = vmul.f32 %v760_v2, %v18_v6  ;;  %v150_v18 = vadd.f32 %v765_v3, %v82_v7  ;;  %v151_v19 = vadd.f32 %v765_v3, %v83_v8  ;;  %v152_v20 = vadd.f32 %v765_v3, %v84_v9  ;;  %v22_v32 = vld [vmem:[%s1178_s0 + $0x40] sm:$0xff]  ;;  %v25_v39 = vld [vmem:[%s1178_s0 + $0x58] sm:$0xff]  ;;  %v27_v51 = vld [vmem:[%s1178_s0 + $0x68] sm:$0xff] }
   0x6   :  { %v153_v21 = vadd.f32 %v765_v3, %v85_v10  ;;  %v155_v23 = vadd.f32 %v765_v3, %v87_v15  ;;  %v156_v24 = vadd.f32 %v765_v3, %v88_v16  ;;  %v157_v25 = vadd.f32 %v765_v3, %v89_v17  ;;  %v26_v50 = vld [vmem:[%s1178_s0 + $0x60] sm:$0xff]  ;;  %v28_v63 = vld [vmem:[%s1178_s0 + $0x70] sm:$0xff]  ;;  %v29_v0 = vld [vmem:[%s1178_s0 + $0x78] sm:$0xff] }
   0x7   :  { %v154_v22 = vadd.f32 %v765_v3, %v86_v14  ;;  %vm214_vm0 = vcmp.ge.f32.partialorder %v150_v18, 0.0  ;;  %vm215_vm1 = vcmp.ge.f32.partialorder %v151_v19, 0.0  ;;  %v278_v26 = vmul.f32 0.2, %v150_v18  ;;  %v30_v12 = vld [vmem:[%s1178_s0 + $0x80] sm:$0xff]  ;;  %v31_v13 = vld [vmem:[%s1178_s0 + $0x88] sm:$0xff] }
   0x8   :  { %v279_v27 = vmul.f32 0.2, %v151_v19  ;;  %vm216_vm2 = vcmp.ge.f32.partialorder %v152_v20, 0.0  ;;  %vm217_vm3 = vcmp.ge.f32.partialorder %v153_v21, 0.0  ;;  %v280_v28 = vmul.f32 0.2, %v152_v20 }
   0x9   :  { %v281_v29 = vmul.f32 0.2, %v153_v21  ;;  %v342_v30 = vsel %vm214_vm0, %v150_v18, %v278_v26  ;;  %vm218_vm4 = vcmp.ge.f32.partialorder %v154_v22, 0.0  ;;  %vm219_vm5 = vcmp.ge.f32.partialorder %v155_v23, 0.0  ;;  %v32_v17 = vld [vmem:[%s1178_s0 + $0x90] sm:$0xff]  ;;  %v33_v18 = vld [vmem:[%s1178_s0 + $0x98] sm:$0xff] }
   0xa   :  { %v343_v31 = vsel %vm215_vm1, %v151_v19, %v279_v27  ;;  %v344_v34 = vsel %vm216_vm2, %v152_v20, %v280_v28  ;;  %v282_v36 = vmul.f32 0.2, %v154_v22  ;;  %v283_v41 = vmul.f32 0.2, %v155_v23 }
   0xb   :  { %v541_v33 = vpack.c.bf16 %v343_v31, %v342_v30  ;;  %v345_v35 = vsel %vm217_vm3, %v153_v21, %v281_v29  ;;  %vm220_vm6 = vcmp.ge.f32.partialorder %v156_v24, 0.0  ;;  %vm221_vm7 = vcmp.ge.f32.partialorder %v157_v25, 0.0  ;;  %v34_v30 = vld [vmem:[%s1178_s0 + $0xa0] sm:$0xff]  ;;  %v35_v31 = vld [vmem:[%s1178_s0 + $0xa8] sm:$0xff] }
   0xc   :  { %v546_v40 = vpack.c.bf16 %v345_v35, %v344_v34  ;;  %v346_v42 = vsel %vm218_vm4, %v154_v22, %v282_v36  ;;  %v284_v43 = vmul.f32 0.2, %v156_v24  ;;  %v285_v44 = vmul.f32 0.2, %v157_v25 }
   0xd   :  { %542 = vst [vmem:[%s1181_s3] sm:$0xff] %v541_v33   ;;  %v90_v45 = vmul.f32 %v760_v2, %v22_v32  ;;  %v347_v46 = vsel %vm219_vm5, %v155_v23, %v283_v41  ;;  %v91_v47 = vmul.f32 %v760_v2, %v23_v37  ;;  %v92_v48 = vmul.f32 %v760_v2, %v24_v38 }
   0xe   :  { %698 = vst [vmem:[%s1181_s3 + $0x8] sm:$0xff] %v546_v40   ;;  %v93_v49 = vmul.f32 %v760_v2, %v25_v39  ;;  %v551_v52 = vpack.c.bf16 %v347_v46, %v346_v42  ;;  %v348_v53 = vsel %vm220_vm6, %v156_v24, %v284_v43  ;;  %v349_v54 = vsel %vm221_vm7, %v157_v25, %v285_v44  ;;  %v36_v44 = vld [vmem:[%s1178_s0 + $0xb0] sm:$0xff] }
   0xf   :  { %v158_v55 = vadd.f32 %v765_v3, %v90_v45  ;;  %v556_v56 = vpack.c.bf16 %v349_v54, %v348_v53  ;;  %v159_v57 = vadd.f32 %v765_v3, %v91_v47  ;;  %v160_v58 = vadd.f32 %v765_v3, %v92_v48  ;;  %v37_v45 = vld [vmem:[%s1178_s0 + $0xb8] sm:$0xff] }
  0x10   :  { %v161_v59 = vadd.f32 %v765_v3, %v93_v49  ;;  %699 = vst [vmem:[%s1181_s3 + $0x10] sm:$0xff] %v551_v52   ;;  %v94_v61 = vmul.f32 %v760_v2, %v26_v50  ;;  %v95_v62 = vmul.f32 %v760_v2, %v27_v51  ;;  %v96_v10 = vmul.f32 %v760_v2, %v28_v63 }
  0x11   :  { %vm222_vm8 = vcmp.ge.f32.partialorder %v158_v55, 0.0  ;;  %v286_v60 = vmul.f32 0.2, %v158_v55  ;;  %700 = vst [vmem:[%s1181_s3 + $0x18] sm:$0xff] %v556_v56   ;;  %vm223_vm9 = vcmp.ge.f32.partialorder %v159_v57, 0.0  ;;  %vm224_vm10 = vcmp.ge.f32.partialorder %v160_v58, 0.0 }
  0x12   :  { %v287_v1 = vmul.f32 0.2, %v159_v57  ;;  %vm225_vm11 = vcmp.ge.f32.partialorder %v161_v59, 0.0  ;;  %v288_v5 = vmul.f32 0.2, %v160_v58  ;;  %v162_v7 = vadd.f32 %v765_v3, %v94_v61  ;;  %v38_v56 = vld [vmem:[%s1178_s0 + $0xc0] sm:$0xff] }
  0x13   :  { %v350_v4 = vsel %vm222_vm8, %v158_v55, %v286_v60  ;;  %v289_v6 = vmul.f32 0.2, %v161_v59  ;;  %v163_v9 = vadd.f32 %v765_v3, %v95_v62  ;;  %v97_v11 = vmul.f32 %v760_v2, %v29_v0  ;;  %v40_v61 = vld [vmem:[%s1178_s0 + $0xd0] sm:$0xff]  ;;  %v41_v62 = vld [vmem:[%s1178_s0 + $0xd8] sm:$0xff] }
  0x14   :  { %v351_v8 = vsel %vm223_vm9, %v159_v57, %v287_v1  ;;  %v352_v15 = vsel %vm224_vm10, %v160_v58, %v288_v5  ;;  %vm226_vm12 = vcmp.ge.f32.partialorder %v162_v7, 0.0  ;;  %v290_v20 = vmul.f32 0.2, %v162_v7  ;;  %v39_v57 = vld [vmem:[%s1178_s0 + $0xc8] sm:$0xff] }
  0x15   :  { %v561_v14 = vpack.c.bf16 %v351_v8, %v350_v4  ;;  %v353_v16 = vsel %vm225_vm11, %v161_v59, %v289_v6  ;;  %vm227_vm13 = vcmp.ge.f32.partialorder %v163_v9, 0.0  ;;  %v291_v21 = vmul.f32 0.2, %v163_v9 }
  0x16   :  { %v566_v19 = vpack.c.bf16 %v353_v16, %v352_v15  ;;  %v164_v22 = vadd.f32 %v765_v3, %v96_v10  ;;  %v165_v23 = vadd.f32 %v765_v3, %v97_v11  ;;  %v98_v24 = vmul.f32 %v760_v2, %v30_v12  ;;  %v42_v12 = vld [vmem:[%s1178_s0 + $0xe0] sm:$0xff] }
  0x17   :  { %701 = vst [vmem:[%s1181_s3 + $0x20] sm:$0xff] %v561_v14   ;;  %v99_v25 = vmul.f32 %v760_v2, %v31_v13  ;;  %v354_v26 = vsel %vm226_vm12, %v162_v7, %v290_v20  ;;  %v355_v27 = vsel %vm227_vm13, %v163_v9, %v291_v21  ;;  %v100_v28 = vmul.f32 %v760_v2, %v32_v17  ;;  %v43_v13 = vld [vmem:[%s1178_s0 + $0xe8] sm:$0xff] }
  0x18   :  { %702 = vst [vmem:[%s1181_s3 + $0x28] sm:$0xff] %v566_v19   ;;  %v101_v29 = vmul.f32 %v760_v2, %v33_v18  ;;  %v571_v32 = vpack.c.bf16 %v355_v27, %v354_v26  ;;  %vm228_vm14 = vcmp.ge.f32.partialorder %v164_v22, 0.0  ;;  %vm229_vm15 = vcmp.ge.f32.partialorder %v165_v23, 0.0  ;;  %v44_v26 = vld [vmem:[%s1178_s0 + $0xf0] sm:$0xff]  ;;  %v45_v27 = vld [vmem:[%s1178_s0 + $0xf8] sm:$0xff] }
  0x19   :  { %v292_v33 = vmul.f32 0.2, %v164_v22  ;;  %v293_v34 = vmul.f32 0.2, %v165_v23  ;;  %v166_v35 = vadd.f32 %v765_v3, %v98_v24  ;;  %v167_v36 = vadd.f32 %v765_v3, %v99_v25 }
  0x1a   :  { %v168_v37 = vadd.f32 %v765_v3, %v100_v28  ;;  %703 = vst [vmem:[%s1181_s3 + $0x30] sm:$0xff] %v571_v32   ;;  %v169_v39 = vadd.f32 %v765_v3, %v101_v29  ;;  %v102_v40 = vmul.f32 %v760_v2, %v34_v30  ;;  %v103_v41 = vmul.f32 %v760_v2, %v35_v31 }
  0x1b   :  { %v356_v38 = vsel %vm228_vm14, %v164_v22, %v292_v33  ;;  %v357_v42 = vsel %vm229_vm15, %v165_v23, %v293_v34  ;;  %vm230_vm0 = vcmp.ge.f32.partialorder %v166_v35, 0.0  ;;  %vm231_vm1 = vcmp.ge.f32.partialorder %v167_v36, 0.0 }
  0x1c   :  { %v294_v43 = vmul.f32 0.2, %v166_v35  ;;  %v576_v46 = vpack.c.bf16 %v357_v42, %v356_v38  ;;  %v295_v47 = vmul.f32 0.2, %v167_v36  ;;  %vm232_vm2 = vcmp.ge.f32.partialorder %v168_v37, 0.0  ;;  %v46_v38 = vld [vmem:[%s1178_s0 + $0x100] sm:$0xff] }
  0x1d   :  { %vm233_vm3 = vcmp.ge.f32.partialorder %v169_v39, 0.0  ;;  %v296_v49 = vmul.f32 0.2, %v168_v37  ;;  %v297_v50 = vmul.f32 0.2, %v169_v39  ;;  %v170_v51 = vadd.f32 %v765_v3, %v102_v40 }
  0x1e   :  { %v358_v48 = vsel %vm230_vm0, %v166_v35, %v294_v43  ;;  %704 = vst [vmem:[%s1181_s3 + $0x38] sm:$0xff] %v576_v46   ;;  %v359_v52 = vsel %vm231_vm1, %v167_v36, %v295_v47  ;;  %v171_v53 = vadd.f32 %v765_v3, %v103_v41  ;;  %v104_v54 = vmul.f32 %v760_v2, %v36_v44  ;;  %v48_v43 = vld [vmem:[%s1178_s0 + $0x110] sm:$0xff]  ;;  %v49_v44 = vld [vmem:[%s1178_s0 + $0x118] sm:$0xff] }
  0x1f   :  { %v105_v55 = vmul.f32 %v760_v2, %v37_v45  ;;  %v581_v58 = vpack.c.bf16 %v359_v52, %v358_v48  ;;  %v360_v59 = vsel %vm232_vm2, %v168_v37, %v296_v49  ;;  %v361_v60 = vsel %vm233_vm3, %v169_v39, %v297_v50  ;;  %v47_v39 = vld [vmem:[%s1178_s0 + $0x108] sm:$0xff] }
  0x20   :  { %vm234_vm4 = vcmp.ge.f32.partialorder %v170_v51, 0.0  ;;  %v586_v63 = vpack.c.bf16 %v361_v60, %v360_v59  ;;  %vm235_vm5 = vcmp.ge.f32.partialorder %v171_v53, 0.0  ;;  %v298_v0 = vmul.f32 0.2, %v170_v51 }
  0x21   :  { %v299_v1 = vmul.f32 0.2, %v171_v53  ;;  %705 = vst [vmem:[%s1181_s3 + $0x40] sm:$0xff] %v581_v58   ;;  %v172_v4 = vadd.f32 %v765_v3, %v104_v54  ;;  %v173_v5 = vadd.f32 %v765_v3, %v105_v55  ;;  %v106_v6 = vmul.f32 %v760_v2, %v38_v56  ;;  %v50_v56 = vld [vmem:[%s1178_s0 + $0x120] sm:$0xff] }
  0x22   :  { %v107_v7 = vmul.f32 %v760_v2, %v39_v57  ;;  %706 = vst [vmem:[%s1181_s3 + $0x48] sm:$0xff] %v586_v63   ;;  %v362_v8 = vsel %vm234_vm4, %v170_v51, %v298_v0  ;;  %v108_v10 = vmul.f32 %v760_v2, %v40_v61  ;;  %v109_v11 = vmul.f32 %v760_v2, %v41_v62  ;;  %v51_v57 = vld [vmem:[%s1178_s0 + $0x128] sm:$0xff] }
  0x23   :  { %v363_v9 = vsel %vm235_vm5, %v171_v53, %v299_v1  ;;  %vm236_vm6 = vcmp.ge.f32.partialorder %v172_v4, 0.0  ;;  %vm237_vm7 = vcmp.ge.f32.partialorder %v173_v5, 0.0  ;;  %v300_v15 = vmul.f32 0.2, %v172_v4 }
  0x24   :  { %v591_v14 = vpack.c.bf16 %v363_v9, %v362_v8  ;;  %v301_v16 = vmul.f32 0.2, %v173_v5  ;;  %v174_v17 = vadd.f32 %v765_v3, %v106_v6  ;;  %v175_v18 = vadd.f32 %v765_v3, %v107_v7  ;;  %v52_v8 = vld [vmem:[%s1178_s0 + $0x130] sm:$0xff]  ;;  %v53_v9 = vld [vmem:[%s1178_s0 + $0x138] sm:$0xff] }
  0x25   :  { %v176_v19 = vadd.f32 %v765_v3, %v108_v10  ;;  %v364_v20 = vsel %vm236_vm6, %v172_v4, %v300_v15  ;;  %v177_v21 = vadd.f32 %v765_v3, %v109_v11  ;;  %v110_v22 = vmul.f32 %v760_v2, %v42_v12 }
  0x26   :  { %707 = vst [vmem:[%s1181_s3 + $0x50] sm:$0xff] %v591_v14   ;;  %v111_v23 = vmul.f32 %v760_v2, %v43_v13  ;;  %v365_v24 = vsel %vm237_vm7, %v173_v5, %v301_v16  ;;  %vm238_vm8 = vcmp.ge.f32.partialorder %v174_v17, 0.0  ;;  %vm239_vm9 = vcmp.ge.f32.partialorder %v175_v18, 0.0 }
  0x27   :  { %v302_v25 = vmul.f32 0.2, %v174_v17  ;;  %v596_v28 = vpack.c.bf16 %v365_v24, %v364_v20  ;;  %v303_v29 = vmul.f32 0.2, %v175_v18  ;;  %vm240_vm10 = vcmp.ge.f32.partialorder %v176_v19, 0.0  ;;  %v54_v20 = vld [vmem:[%s1178_s0 + $0x140] sm:$0xff] }
  0x28   :  { %vm241_vm11 = vcmp.ge.f32.partialorder %v177_v21, 0.0  ;;  %v304_v31 = vmul.f32 0.2, %v176_v19  ;;  %v305_v32 = vmul.f32 0.2, %v177_v21  ;;  %v178_v33 = vadd.f32 %v765_v3, %v110_v22 }
  0x29   :  { %v366_v30 = vsel %vm238_vm8, %v174_v17, %v302_v25  ;;  %708 = vst [vmem:[%s1181_s3 + $0x58] sm:$0xff] %v596_v28   ;;  %v367_v34 = vsel %vm239_vm9, %v175_v18, %v303_v29  ;;  %v179_v35 = vadd.f32 %v765_v3, %v111_v23  ;;  %v112_v36 = vmul.f32 %v760_v2, %v44_v26  ;;  %v56_v25 = vld [vmem:[%s1178_s0 + $0x150] sm:$0xff]  ;;  %v57_v26 = vld [vmem:[%s1178_s0 + $0x158] sm:$0xff] }
  0x2a   :  { %v113_v37 = vmul.f32 %v760_v2, %v45_v27  ;;  %v601_v40 = vpack.c.bf16 %v367_v34, %v366_v30  ;;  %v368_v41 = vsel %vm240_vm10, %v176_v19, %v304_v31  ;;  %v369_v42 = vsel %vm241_vm11, %v177_v21, %v305_v32  ;;  %v55_v21 = vld [vmem:[%s1178_s0 + $0x148] sm:$0xff] }
  0x2b   :  { %vm242_vm12 = vcmp.ge.f32.partialorder %v178_v33, 0.0  ;;  %v606_v45 = vpack.c.bf16 %v369_v42, %v368_v41  ;;  %vm243_vm13 = vcmp.ge.f32.partialorder %v179_v35, 0.0  ;;  %v306_v46 = vmul.f32 0.2, %v178_v33 }
  0x2c   :  { %v307_v47 = vmul.f32 0.2, %v179_v35  ;;  %709 = vst [vmem:[%s1181_s3 + $0x60] sm:$0xff] %v601_v40   ;;  %v180_v48 = vadd.f32 %v765_v3, %v112_v36  ;;  %v181_v49 = vadd.f32 %v765_v3, %v113_v37  ;;  %v114_v50 = vmul.f32 %v760_v2, %v46_v38  ;;  %v58_v38 = vld [vmem:[%s1178_s0 + $0x160] sm:$0xff] }
  0x2d   :  { %v115_v51 = vmul.f32 %v760_v2, %v47_v39  ;;  %710 = vst [vmem:[%s1181_s3 + $0x68] sm:$0xff] %v606_v45   ;;  %v370_v52 = vsel %vm242_vm12, %v178_v33, %v306_v46  ;;  %v116_v54 = vmul.f32 %v760_v2, %v48_v43  ;;  %v117_v55 = vmul.f32 %v760_v2, %v49_v44  ;;  %v59_v39 = vld [vmem:[%s1178_s0 + $0x168] sm:$0xff] }
  0x2e   :  { %v371_v53 = vsel %vm243_vm13, %v179_v35, %v307_v47  ;;  %vm244_vm14 = vcmp.ge.f32.partialorder %v180_v48, 0.0  ;;  %vm245_vm15 = vcmp.ge.f32.partialorder %v181_v49, 0.0  ;;  %v308_v59 = vmul.f32 0.2, %v180_v48 }
  0x2f   :  { %v611_v58 = vpack.c.bf16 %v371_v53, %v370_v52  ;;  %v309_v60 = vmul.f32 0.2, %v181_v49  ;;  %v182_v61 = vadd.f32 %v765_v3, %v114_v50  ;;  %v183_v62 = vadd.f32 %v765_v3, %v115_v51  ;;  %v60_v52 = vld [vmem:[%s1178_s0 + $0x170] sm:$0xff]  ;;  %v61_v53 = vld [vmem:[%s1178_s0 + $0x178] sm:$0xff] }
  0x30   :  { %v184_v63 = vadd.f32 %v765_v3, %v116_v54  ;;  %v372_v0 = vsel %vm244_vm14, %v180_v48, %v308_v59  ;;  %v185_v1 = vadd.f32 %v765_v3, %v117_v55  ;;  %v118_v4 = vmul.f32 %v760_v2, %v50_v56 }
  0x31   :  { %711 = vst [vmem:[%s1181_s3 + $0x70] sm:$0xff] %v611_v58   ;;  %v119_v5 = vmul.f32 %v760_v2, %v51_v57  ;;  %v373_v6 = vsel %vm245_vm15, %v181_v49, %v309_v60  ;;  %vm246_vm0 = vcmp.ge.f32.partialorder %v182_v61, 0.0  ;;  %vm247_vm1 = vcmp.ge.f32.partialorder %v183_v62, 0.0 }
  0x32   :  { %v310_v7 = vmul.f32 0.2, %v182_v61  ;;  %v616_v10 = vpack.c.bf16 %v373_v6, %v372_v0  ;;  %v311_v11 = vmul.f32 0.2, %v183_v62  ;;  %vm248_vm2 = vcmp.ge.f32.partialorder %v184_v63, 0.0  ;;  %v62_v0 = vld [vmem:[%s1178_s0 + $0x180] sm:$0xff] }
  0x33   :  { %vm249_vm3 = vcmp.ge.f32.partialorder %v185_v1, 0.0  ;;  %v312_v13 = vmul.f32 0.2, %v184_v63  ;;  %v313_v14 = vmul.f32 0.2, %v185_v1  ;;  %v186_v15 = vadd.f32 %v765_v3, %v118_v4 }
  0x34   :  { %v374_v12 = vsel %vm246_vm0, %v182_v61, %v310_v7  ;;  %712 = vst [vmem:[%s1181_s3 + $0x78] sm:$0xff] %v616_v10   ;;  %v375_v16 = vsel %vm247_vm1, %v183_v62, %v311_v11  ;;  %v187_v17 = vadd.f32 %v765_v3, %v119_v5  ;;  %v120_v18 = vmul.f32 %v760_v2, %v52_v8  ;;  %v64_v7 = vld [vmem:[%s1178_s0 + $0x190] sm:$0xff]  ;;  %v65_v8 = vld [vmem:[%s1178_s0 + $0x198] sm:$0xff] }
  0x35   :  { %v121_v19 = vmul.f32 %v760_v2, %v53_v9  ;;  %v621_v22 = vpack.c.bf16 %v375_v16, %v374_v12  ;;  %v376_v23 = vsel %vm248_vm2, %v184_v63, %v312_v13  ;;  %v377_v24 = vsel %vm249_vm3, %v185_v1, %v313_v14  ;;  %v63_v1 = vld [vmem:[%s1178_s0 + $0x188] sm:$0xff] }
  0x36   :  { %vm250_vm4 = vcmp.ge.f32.partialorder %v186_v15, 0.0  ;;  %v626_v27 = vpack.c.bf16 %v377_v24, %v376_v23  ;;  %vm251_vm5 = vcmp.ge.f32.partialorder %v187_v17, 0.0  ;;  %v314_v28 = vmul.f32 0.2, %v186_v15 }
  0x37   :  { %v315_v29 = vmul.f32 0.2, %v187_v17  ;;  %713 = vst [vmem:[%s1181_s3 + $0x80] sm:$0xff] %v621_v22   ;;  %v188_v30 = vadd.f32 %v765_v3, %v120_v18  ;;  %v189_v31 = vadd.f32 %v765_v3, %v121_v19  ;;  %v122_v32 = vmul.f32 %v760_v2, %v54_v20  ;;  %v66_v20 = vld [vmem:[%s1178_s0 + $0x1a0] sm:$0xff] }
  0x38   :  { %v123_v33 = vmul.f32 %v760_v2, %v55_v21  ;;  %714 = vst [vmem:[%s1181_s3 + $0x88] sm:$0xff] %v626_v27   ;;  %v378_v34 = vsel %vm250_vm4, %v186_v15, %v314_v28  ;;  %v124_v36 = vmul.f32 %v760_v2, %v56_v25  ;;  %v125_v37 = vmul.f32 %v760_v2, %v57_v26  ;;  %v67_v21 = vld [vmem:[%s1178_s0 + $0x1a8] sm:$0xff] }
  0x39   :  { %v379_v35 = vsel %vm251_vm5, %v187_v17, %v315_v29  ;;  %vm252_vm6 = vcmp.ge.f32.partialorder %v188_v30, 0.0  ;;  %vm253_vm7 = vcmp.ge.f32.partialorder %v189_v31, 0.0  ;;  %v316_v41 = vmul.f32 0.2, %v188_v30 }
  0x3a   :  { %v631_v40 = vpack.c.bf16 %v379_v35, %v378_v34  ;;  %v317_v42 = vmul.f32 0.2, %v189_v31  ;;  %v190_v43 = vadd.f32 %v765_v3, %v122_v32  ;;  %v191_v44 = vadd.f32 %v765_v3, %v123_v33  ;;  %v68_v34 = vld [vmem:[%s1178_s0 + $0x1b0] sm:$0xff]  ;;  %v69_v35 = vld [vmem:[%s1178_s0 + $0x1b8] sm:$0xff] }
  0x3b   :  { %v192_v45 = vadd.f32 %v765_v3, %v124_v36  ;;  %v380_v46 = vsel %vm252_vm6, %v188_v30, %v316_v41  ;;  %v193_v47 = vadd.f32 %v765_v3, %v125_v37  ;;  %v126_v48 = vmul.f32 %v760_v2, %v58_v38 }
  0x3c   :  { %715 = vst [vmem:[%s1181_s3 + $0x90] sm:$0xff] %v631_v40   ;;  %v127_v49 = vmul.f32 %v760_v2, %v59_v39  ;;  %v381_v50 = vsel %vm253_vm7, %v189_v31, %v317_v42  ;;  %vm254_vm8 = vcmp.ge.f32.partialorder %v190_v43, 0.0  ;;  %vm255_vm9 = vcmp.ge.f32.partialorder %v191_v44, 0.0 }
  0x3d   :  { %v318_v51 = vmul.f32 0.2, %v190_v43  ;;  %v636_v54 = vpack.c.bf16 %v381_v50, %v380_v46  ;;  %v319_v55 = vmul.f32 0.2, %v191_v44  ;;  %vm256_vm10 = vcmp.ge.f32.partialorder %v192_v45, 0.0  ;;  %v70_v46 = vld [vmem:[%s1178_s0 + $0x1c0] sm:$0xff] }
  0x3e   :  { %vm257_vm11 = vcmp.ge.f32.partialorder %v193_v47, 0.0  ;;  %v320_v57 = vmul.f32 0.2, %v192_v45  ;;  %v321_v58 = vmul.f32 0.2, %v193_v47  ;;  %v194_v59 = vadd.f32 %v765_v3, %v126_v48 }
  0x3f   :  { %v382_v56 = vsel %vm254_vm8, %v190_v43, %v318_v51  ;;  %716 = vst [vmem:[%s1181_s3 + $0x98] sm:$0xff] %v636_v54   ;;  %v383_v60 = vsel %vm255_vm9, %v191_v44, %v319_v55  ;;  %v195_v61 = vadd.f32 %v765_v3, %v127_v49  ;;  %v128_v62 = vmul.f32 %v760_v2, %v60_v52  ;;  %v72_v51 = vld [vmem:[%s1178_s0 + $0x1d0] sm:$0xff]  ;;  %v73_v52 = vld [vmem:[%s1178_s0 + $0x1d8] sm:$0xff] }
  0x40   :  { %v129_v63 = vmul.f32 %v760_v2, %v61_v53  ;;  %v641_v4 = vpack.c.bf16 %v383_v60, %v382_v56  ;;  %v384_v5 = vsel %vm256_vm10, %v192_v45, %v320_v57  ;;  %v385_v6 = vsel %vm257_vm11, %v193_v47, %v321_v58  ;;  %v71_v47 = vld [vmem:[%s1178_s0 + $0x1c8] sm:$0xff] }
  0x41   :  { %vm258_vm12 = vcmp.ge.f32.partialorder %v194_v59, 0.0  ;;  %v646_v9 = vpack.c.bf16 %v385_v6, %v384_v5  ;;  %vm259_vm13 = vcmp.ge.f32.partialorder %v195_v61, 0.0  ;;  %v322_v10 = vmul.f32 0.2, %v194_v59 }
  0x42   :  { %v323_v11 = vmul.f32 0.2, %v195_v61  ;;  %717 = vst [vmem:[%s1181_s3 + $0xa0] sm:$0xff] %v641_v4   ;;  %v196_v12 = vadd.f32 %v765_v3, %v128_v62  ;;  %v197_v13 = vadd.f32 %v765_v3, %v129_v63  ;;  %v130_v14 = vmul.f32 %v760_v2, %v62_v0  ;;  %v74_v0 = vld [vmem:[%s1178_s0 + $0x1e0] sm:$0xff] }
  0x43   :  { %v131_v15 = vmul.f32 %v760_v2, %v63_v1  ;;  %718 = vst [vmem:[%s1181_s3 + $0xa8] sm:$0xff] %v646_v9   ;;  %v386_v16 = vsel %vm258_vm12, %v194_v59, %v322_v10  ;;  %v132_v18 = vmul.f32 %v760_v2, %v64_v7  ;;  %v133_v19 = vmul.f32 %v760_v2, %v65_v8  ;;  %v75_v1 = vld [vmem:[%s1178_s0 + $0x1e8] sm:$0xff] }
  0x44   :  { %v387_v17 = vsel %vm259_vm13, %v195_v61, %v323_v11  ;;  %vm260_vm14 = vcmp.ge.f32.partialorder %v196_v12, 0.0  ;;  %vm261_vm15 = vcmp.ge.f32.partialorder %v197_v13, 0.0  ;;  %v324_v23 = vmul.f32 0.2, %v196_v12 }
  0x45   :  { %v651_v22 = vpack.c.bf16 %v387_v17, %v386_v16  ;;  %v325_v24 = vmul.f32 0.2, %v197_v13  ;;  %v198_v25 = vadd.f32 %v765_v3, %v130_v14  ;;  %v199_v26 = vadd.f32 %v765_v3, %v131_v15  ;;  %v76_v16 = vld [vmem:[%s1178_s0 + $0x1f0] sm:$0xff]  ;;  %v77_v17 = vld [vmem:[%s1178_s0 + $0x1f8] sm:$0xff] }
  0x46   :  { %v200_v27 = vadd.f32 %v765_v3, %v132_v18  ;;  %v388_v28 = vsel %vm260_vm14, %v196_v12, %v324_v23  ;;  %v201_v29 = vadd.f32 %v765_v3, %v133_v19  ;;  %v134_v30 = vmul.f32 %v760_v2, %v66_v20 }
  0x47   :  { %719 = vst [vmem:[%s1181_s3 + $0xb0] sm:$0xff] %v651_v22   ;;  %v135_v31 = vmul.f32 %v760_v2, %v67_v21  ;;  %v389_v32 = vsel %vm261_vm15, %v197_v13, %v325_v24  ;;  %vm262_vm0 = vcmp.ge.f32.partialorder %v198_v25, 0.0  ;;  %vm263_vm1 = vcmp.ge.f32.partialorder %v199_v26, 0.0 }
  0x48   :  { %v326_v33 = vmul.f32 0.2, %v198_v25  ;;  %v656_v36 = vpack.c.bf16 %v389_v32, %v388_v28  ;;  %v327_v37 = vmul.f32 0.2, %v199_v26  ;;  %vm264_vm2 = vcmp.ge.f32.partialorder %v200_v27, 0.0 }
  0x49   :  { %vm265_vm3 = vcmp.ge.f32.partialorder %v201_v29, 0.0  ;;  %v328_v39 = vmul.f32 0.2, %v200_v27  ;;  %v329_v40 = vmul.f32 0.2, %v201_v29  ;;  %v202_v41 = vadd.f32 %v765_v3, %v134_v30 }
  0x4a   :  { %v390_v38 = vsel %vm262_vm0, %v198_v25, %v326_v33  ;;  %720 = vst [vmem:[%s1181_s3 + $0xb8] sm:$0xff] %v656_v36   ;;  %v391_v42 = vsel %vm263_vm1, %v199_v26, %v327_v37  ;;  %v203_v43 = vadd.f32 %v765_v3, %v135_v31  ;;  %v136_v44 = vmul.f32 %v760_v2, %v68_v34 }
  0x4b   :  { %v137_v45 = vmul.f32 %v760_v2, %v69_v35  ;;  %v661_v48 = vpack.c.bf16 %v391_v42, %v390_v38  ;;  %v392_v49 = vsel %vm264_vm2, %v200_v27, %v328_v39  ;;  %v393_v50 = vsel %vm265_vm3, %v201_v29, %v329_v40 }
  0x4c   :  { %vm266_vm4 = vcmp.ge.f32.partialorder %v202_v41, 0.0  ;;  %v666_v53 = vpack.c.bf16 %v393_v50, %v392_v49  ;;  %vm267_vm5 = vcmp.ge.f32.partialorder %v203_v43, 0.0  ;;  %v330_v54 = vmul.f32 0.2, %v202_v41 }
  0x4d   :  { %v331_v55 = vmul.f32 0.2, %v203_v43  ;;  %721 = vst [vmem:[%s1181_s3 + $0xc0] sm:$0xff] %v661_v48   ;;  %v204_v56 = vadd.f32 %v765_v3, %v136_v44  ;;  %v205_v57 = vadd.f32 %v765_v3, %v137_v45  ;;  %v138_v58 = vmul.f32 %v760_v2, %v70_v46 }
  0x4e   :  { %v139_v59 = vmul.f32 %v760_v2, %v71_v47  ;;  %722 = vst [vmem:[%s1181_s3 + $0xc8] sm:$0xff] %v666_v53   ;;  %v394_v60 = vsel %vm266_vm4, %v202_v41, %v330_v54  ;;  %v140_v62 = vmul.f32 %v760_v2, %v72_v51  ;;  %v141_v63 = vmul.f32 %v760_v2, %v73_v52 }
  0x4f   :  { %v395_v61 = vsel %vm267_vm5, %v203_v43, %v331_v55  ;;  %vm268_vm6 = vcmp.ge.f32.partialorder %v204_v56, 0.0  ;;  %vm269_vm7 = vcmp.ge.f32.partialorder %v205_v57, 0.0  ;;  %v332_v5 = vmul.f32 0.2, %v204_v56 }
  0x50   :  { %v671_v4 = vpack.c.bf16 %v395_v61, %v394_v60  ;;  %v333_v6 = vmul.f32 0.2, %v205_v57  ;;  %v206_v7 = vadd.f32 %v765_v3, %v138_v58  ;;  %v207_v8 = vadd.f32 %v765_v3, %v139_v59 }
  0x51   :  { %v208_v9 = vadd.f32 %v765_v3, %v140_v62  ;;  %v396_v10 = vsel %vm268_vm6, %v204_v56, %v332_v5  ;;  %v209_v11 = vadd.f32 %v765_v3, %v141_v63  ;;  %v142_v12 = vmul.f32 %v760_v2, %v74_v0 }
  0x52   :  { %723 = vst [vmem:[%s1181_s3 + $0xd0] sm:$0xff] %v671_v4   ;;  %v143_v13 = vmul.f32 %v760_v2, %v75_v1  ;;  %v397_v14 = vsel %vm269_vm7, %v205_v57, %v333_v6  ;;  %vm270_vm8 = vcmp.ge.f32.partialorder %v206_v7, 0.0  ;;  %vm271_vm9 = vcmp.ge.f32.partialorder %v207_v8, 0.0 }
  0x53   :  { %v334_v15 = vmul.f32 0.2, %v206_v7  ;;  %v676_v18 = vpack.c.bf16 %v397_v14, %v396_v10  ;;  %v335_v19 = vmul.f32 0.2, %v207_v8  ;;  %vm272_vm10 = vcmp.ge.f32.partialorder %v208_v9, 0.0 }
  0x54   :  { %vm273_vm11 = vcmp.ge.f32.partialorder %v209_v11, 0.0  ;;  %v336_v21 = vmul.f32 0.2, %v208_v9  ;;  %v337_v22 = vmul.f32 0.2, %v209_v11  ;;  %v210_v23 = vadd.f32 %v765_v3, %v142_v12 }
  0x55   :  { %v398_v20 = vsel %vm270_vm8, %v206_v7, %v334_v15  ;;  %724 = vst [vmem:[%s1181_s3 + $0xd8] sm:$0xff] %v676_v18   ;;  %v399_v24 = vsel %vm271_vm9, %v207_v8, %v335_v19  ;;  %v211_v25 = vadd.f32 %v765_v3, %v143_v13  ;;  %v144_v26 = vmul.f32 %v760_v2, %v76_v16 }
  0x56   :  { %v145_v27 = vmul.f32 %v760_v2, %v77_v17  ;;  %v681_v28 = vpack.c.bf16 %v399_v24, %v398_v20  ;;  %v400_v29 = vsel %vm272_vm10, %v208_v9, %v336_v21  ;;  %v401_v30 = vsel %vm273_vm11, %v209_v11, %v337_v22 }
  0x57   :  { %vm274_vm12 = vcmp.ge.f32.partialorder %v210_v23, 0.0  ;;  %v686_v31 = vpack.c.bf16 %v401_v30, %v400_v29  ;;  %vm275_vm13 = vcmp.ge.f32.partialorder %v211_v25, 0.0  ;;  %v338_v32 = vmul.f32 0.2, %v210_v23 }
  0x58   :  { %v339_v33 = vmul.f32 0.2, %v211_v25  ;;  %725 = vst [vmem:[%s1181_s3 + $0xe0] sm:$0xff] %v681_v28   ;;  %v212_v34 = vadd.f32 %v765_v3, %v144_v26  ;;  %v213_v35 = vadd.f32 %v765_v3, %v145_v27 }
  0x59   :  { %726 = vst [vmem:[%s1181_s3 + $0xe8] sm:$0xff] %v686_v31   ;;  %v402_v2 = vsel %vm274_vm12, %v210_v23, %v338_v32 }
  0x5a   :  { %v403_v36 = vsel %vm275_vm13, %v211_v25, %v339_v33  ;;  %vm276_vm14 = vcmp.ge.f32.partialorder %v212_v34, 0.0  ;;  %vm277_vm15 = vcmp.ge.f32.partialorder %v213_v35, 0.0  ;;  %v340_v38 = vmul.f32 0.2, %v212_v34 }
  0x5b   :  { %v691_v37 = vpack.c.bf16 %v403_v36, %v402_v2  ;;  %v341_v39 = vmul.f32 0.2, %v213_v35 }
  0x5c   :  { %v404_v40 = vsel %vm276_vm14, %v212_v34, %v340_v38 }
  0x5d   :  { %727 = vst [vmem:[%s1181_s3 + $0xf0] sm:$0xff] %v691_v37   ;;  %v405_v41 = vsel %vm277_vm15, %v213_v35, %v341_v39 }
  0x5e   :  { %v696_v42 = vpack.c.bf16 %v405_v41, %v404_v40 }
  0x60   :  { %728 = vst [vmem:[%s1181_s3 + $0xf8] sm:$0xff] %v696_v42  }

// kernel: d_forward.9
= control target key start
LH: loop header
LB: loop body
LE: loop exit
PB: predicated region body
PF: predicated region fallthrough
CT: control target
= control target key end

     0   :  { %s2563_s15 = smov 0   ;;  %s2565_s16 = smov 0   ;;  %s3009_s0 = inlined_call_operand.vmem [shape: bf16[512,1024], index: 0, kind: input, shape index: {}]   ;;  %s3010_s1 = inlined_call_operand.vmem [shape: bf16[1024,128], index: 1, kind: input, shape index: {}]   ;;  %s3011_s2 = inlined_call_operand.vmem [shape: f32[512,128], index: 2, kind: output, shape index: {0}]   ;;  %s3012_s3 = inlined_call_operand.vmem [shape: f32[2,1,128], index: 3, kind: output, shape index: {1}]   ;;  %s3013_s4 = inlined_call_operand.vmem [shape: f32[2,1,128], index: 4, kind: output, shape index: {2}]  }
   0x1   :  { %s2567_s17 = smov 0   ;;  %s2569_s18 = smov 0  }
   0x2   :  { %s2571_s19 = smov 0   ;;  %s2573_s20 = smov 0  }
   0x3   :  { %s2575_s21 = smov 0  }
   0x4 LB: > { %s27_s22 = sadd.s32 1, %s2527_s19  ;;  %s34_s23 = sadd.s32 1, %s2531_s20  ;;  %s2535_s21 = sphi %s2575_s21, %s15_s21   ;;  %s2531_s20 = sphi %s2573_s20, %s3019_s20   ;;  %s2527_s19 = sphi %s2571_s19, %s3018_s19   ;;  %s2523_s18 = sphi %s2569_s18, %s3017_s18   ;;  %s2519_s17 = sphi %s2567_s17, %s3016_s17   ;;  %s2515_s16 = sphi %s2565_s16, %s3015_s16   ;;  %s2511_s15 = sphi %s2563_s15, %s3014_s15  }
   0x5   : > { %p28_p0 = scmp.ge.s32.totalorder %s27_s22, 2  ;;  %p50_p1 = scmp.ne.s32.totalorder %s2515_s16, %s2511_s15 }
   0x6   : > { %p51_p2 = scmp.eq.s32.totalorder %s2535_s21, 0  ;;  %s43_s27 = sadd.s32 1, %s2515_s16 }
   0x7   : > { %s3021_s22 = smov (%p28_p0, %s27_s22), 0  ;;  %s3023_s23 = smov (!%p28_p0, %s34_s23), %s2531_s20 }
   0x8   : > { %p52_p3 = por %p51_p2, %p50_p1  ;;  %p36_p4 = scmp.ge.s32.totalorder %s3023_s23, 2 }
   0x9   : > { %s39_s24 = ssub.s32 %s2527_s19, %s3021_s22  ;;  %p1927_p6 = scmp.ge.s32.totalorder %s2535_s21, 4 }
   0xa   : > { %s3025_s23 = smov (%p36_p4, %s3023_s23), 0 }
   0xb   : > { %s38_s25 = ssub.s32 %s2531_s20, %s3025_s23  ;;  %188 = sbr.rel (%p1927_p6) target bundleno = 87 (0x57), region = 16 }
   0xc   : > { %s40_s26 = sor.u32 %s39_s24, %s38_s25 }
   0xd   : > { %p41_p5 = scmp.eq.s32.totalorder %s40_s26, 0 }
   0xf   : > { %s2614_s28 = scalar_select %p41_p5, %s2515_s16, %s43_s27  }
  0x10   : > { %191 = sbr.rel (!%p52_p3) target bundleno = 87 (0x57), region = 20  ;;  %s193_s29 = sand.u32 (%p52_p3), 1, %s2515_s16  }
  0x11   : > { %s1930_s30 = sshll.u32 (%p52_p3), %s2527_s19, 2  ;;  %s1928_s5 = sshll.u32 (%p52_p3), %s193_s29, 9 }
  0x12   : > { %s2327_s6 = sshll.u32 (%p52_p3), %s2531_s20, 8  ;;  %s2628_s12 = scalar_lea.vmem (%p52_p3), [#allocation3], %s1928_s5 }
  0x13   : > { %s199_s7 = sadd.s32 (%p52_p3), %s2327_s6, %s1930_s30 }
  0x14   : > { %s1932_s8 = sshll.u32 (%p52_p3), %s199_s7, 2 }
  0x15   : > { %s2623_s11 = scalar_lea.vmem %s3009_s0, %s1932_s8 }
  0x16   : > { %v214_v0 = vld [vmem:[%s2623_s11] sm:$0xff]  ;;  %v216_v1 = vld [vmem:[%s2623_s11 + $0x8] sm:$0xff] }
  0x17   : > { %v218_v2 = vld [vmem:[%s2623_s11 + $0x20] sm:$0xff]  ;;  %215 = vst [vmem:[%s2628_s12] sm:$0xff] %v214_v0  ;;  %v220_v3 = vld [vmem:[%s2623_s11 + $0x28] sm:$0xff] }
  0x18   : > { %217 = vst [vmem:[%s2628_s12 + $0x8] sm:$0xff] %v216_v1  ;;  %v222_v4 = vld [vmem:[%s2623_s11 + $0x40] sm:$0xff]  ;;  %v224_v5 = vld [vmem:[%s2623_s11 + $0x48] sm:$0xff] }
  0x19   : > { %219 = vst [vmem:[%s2628_s12 + $0x10] sm:$0xff] %v218_v2  ;;  %v226_v6 = vld [vmem:[%s2623_s11 + $0x60] sm:$0xff]  ;;  %v228_v7 = vld [vmem:[%s2623_s11 + $0x68] sm:$0xff] }
  0x1a   : > { %221 = vst [vmem:[%s2628_s12 + $0x18] sm:$0xff] %v220_v3  ;;  %v230_v8 = vld [vmem:[%s2623_s11 + $0x80] sm:$0xff]  ;;  %v232_v9 = vld [vmem:[%s2623_s11 + $0x88] sm:$0xff] }
  0x1b   : > { %223 = vst [vmem:[%s2628_s12 + $0x20] sm:$0xff] %v222_v4  ;;  %v234_v10 = vld [vmem:[%s2623_s11 + $0xa0] sm:$0xff]  ;;  %v236_v11 = vld [vmem:[%s2623_s11 + $0xa8] sm:$0xff] }
  0x1c   : > { %225 = vst [vmem:[%s2628_s12 + $0x28] sm:$0xff] %v224_v5  ;;  %v238_v12 = vld [vmem:[%s2623_s11 + $0xc0] sm:$0xff]  ;;  %v240_v13 = vld [vmem:[%s2623_s11 + $0xc8] sm:$0xff] }
  0x1d   : > { %227 = vst [vmem:[%s2628_s12 + $0x30] sm:$0xff] %v226_v6  ;;  %v242_v14 = vld [vmem:[%s2623_s11 + $0xe0] sm:$0xff]  ;;  %v244_v15 = vld [vmem:[%s2623_s11 + $0xe8] sm:$0xff] }
  0x1e   : > { %229 = vst [vmem:[%s2628_s12 + $0x38] sm:$0xff] %v228_v7  ;;  %v246_v16 = vld [vmem:[%s2623_s11 + $0x100] sm:$0xff]  ;;  %v248_v17 = vld [vmem:[%s2623_s11 + $0x108] sm:$0xff] }
  0x1f   : > { %231 = vst [vmem:[%s2628_s12 + $0x40] sm:$0xff] %v230_v8  ;;  %v250_v18 = vld [vmem:[%s2623_s11 + $0x120] sm:$0xff]  ;;  %v252_v19 = vld [vmem:[%s2623_s11 + $0x128] sm:$0xff] }
  0x20   : > { %233 = vst [vmem:[%s2628_s12 + $0x48] sm:$0xff] %v232_v9  ;;  %v254_v20 = vld [vmem:[%s2623_s11 + $0x140] sm:$0xff]  ;;  %v256_v21 = vld [vmem:[%s2623_s11 + $0x148] sm:$0xff] }
  0x21   : > { %235 = vst [vmem:[%s2628_s12 + $0x50] sm:$0xff] %v234_v10  ;;  %v258_v22 = vld [vmem:[%s2623_s11 + $0x160] sm:$0xff]  ;;  %v260_v23 = vld [vmem:[%s2623_s11 + $0x168] sm:$0xff] }
  0x22   : > { %237 = vst [vmem:[%s2628_s12 + $0x58] sm:$0xff] %v236_v11  ;;  %v262_v24 = vld [vmem:[%s2623_s11 + $0x180] sm:$0xff]  ;;  %v264_v25 = vld [vmem:[%s2623_s11 + $0x188] sm:$0xff] }
  0x23   : > { %239 = vst [vmem:[%s2628_s12 + $0x60] sm:$0xff] %v238_v12  ;;  %v266_v26 = vld [vmem:[%s2623_s11 + $0x1a0] sm:$0xff]  ;;  %v268_v27 = vld [vmem:[%s2623_s11 + $0x1a8] sm:$0xff] }
  0x24   : > { %241 = vst [vmem:[%s2628_s12 + $0x68] sm:$0xff] %v240_v13  ;;  %v270_v28 = vld [vmem:[%s2623_s11 + $0x1c0] sm:$0xff]  ;;  %v272_v29 = vld [vmem:[%s2623_s11 + $0x1c8] sm:$0xff] }
  0x25   : > { %243 = vst [vmem:[%s2628_s12 + $0x70] sm:$0xff] %v242_v14  ;;  %v274_v30 = vld [vmem:[%s2623_s11 + $0x1e0] sm:$0xff]  ;;  %v276_v31 = vld [vmem:[%s2623_s11 + $0x1e8] sm:$0xff] }
  0x26   : > { %245 = vst [vmem:[%s2628_s12 + $0x78] sm:$0xff] %v244_v15  ;;  %v278_v32 = vld [vmem:[%s2623_s11 + $0x200] sm:$0xff]  ;;  %v280_v33 = vld [vmem:[%s2623_s11 + $0x208] sm:$0xff] }
  0x27   : > { %247 = vst [vmem:[%s2628_s12 + $0x80] sm:$0xff] %v246_v16  ;;  %v282_v34 = vld [vmem:[%s2623_s11 + $0x220] sm:$0xff]  ;;  %v284_v35 = vld [vmem:[%s2623_s11 + $0x228] sm:$0xff] }
  0x28   : > { %249 = vst [vmem:[%s2628_s12 + $0x88] sm:$0xff] %v248_v17  ;;  %v286_v36 = vld [vmem:[%s2623_s11 + $0x240] sm:$0xff]  ;;  %v288_v37 = vld [vmem:[%s2623_s11 + $0x248] sm:$0xff] }
  0x29   : > { %251 = vst [vmem:[%s2628_s12 + $0x90] sm:$0xff] %v250_v18  ;;  %v290_v38 = vld [vmem:[%s2623_s11 + $0x260] sm:$0xff]  ;;  %v292_v39 = vld [vmem:[%s2623_s11 + $0x268] sm:$0xff] }
  0x2a   : > { %253 = vst [vmem:[%s2628_s12 + $0x98] sm:$0xff] %v252_v19  ;;  %v294_v40 = vld [vmem:[%s2623_s11 + $0x280] sm:$0xff]  ;;  %v296_v41 = vld [vmem:[%s2623_s11 + $0x288] sm:$0xff] }
  0x2b   : > { %255 = vst [vmem:[%s2628_s12 + $0xa0] sm:$0xff] %v254_v20  ;;  %v298_v42 = vld [vmem:[%s2623_s11 + $0x2a0] sm:$0xff]  ;;  %v300_v43 = vld [vmem:[%s2623_s11 + $0x2a8] sm:$0xff] }
  0x2c   : > { %257 = vst [vmem:[%s2628_s12 + $0xa8] sm:$0xff] %v256_v21  ;;  %v302_v44 = vld [vmem:[%s2623_s11 + $0x2c0] sm:$0xff]  ;;  %v304_v45 = vld [vmem:[%s2623_s11 + $0x2c8] sm:$0xff] }
  0x2d   : > { %259 = vst [vmem:[%s2628_s12 + $0xb0] sm:$0xff] %v258_v22  ;;  %v306_v46 = vld [vmem:[%s2623_s11 + $0x2e0] sm:$0xff]  ;;  %v308_v47 = vld [vmem:[%s2623_s11 + $0x2e8] sm:$0xff] }
  0x2e   : > { %261 = vst [vmem:[%s2628_s12 + $0xb8] sm:$0xff] %v260_v23  ;;  %v310_v48 = vld [vmem:[%s2623_s11 + $0x300] sm:$0xff]  ;;  %v312_v49 = vld [vmem:[%s2623_s11 + $0x308] sm:$0xff] }
  0x2f   : > { %263 = vst [vmem:[%s2628_s12 + $0xc0] sm:$0xff] %v262_v24  ;;  %v314_v50 = vld [vmem:[%s2623_s11 + $0x320] sm:$0xff]  ;;  %v316_v51 = vld [vmem:[%s2623_s11 + $0x328] sm:$0xff] }
  0x30   : > { %265 = vst [vmem:[%s2628_s12 + $0xc8] sm:$0xff] %v264_v25  ;;  %v318_v52 = vld [vmem:[%s2623_s11 + $0x340] sm:$0xff]  ;;  %v320_v53 = vld [vmem:[%s2623_s11 + $0x348] sm:$0xff] }
  0x31   : > { %267 = vst [vmem:[%s2628_s12 + $0xd0] sm:$0xff] %v266_v26  ;;  %v322_v54 = vld [vmem:[%s2623_s11 + $0x360] sm:$0xff]  ;;  %v324_v55 = vld [vmem:[%s2623_s11 + $0x368] sm:$0xff] }
  0x32   : > { %269 = vst [vmem:[%s2628_s12 + $0xd8] sm:$0xff] %v268_v27  ;;  %v326_v56 = vld [vmem:[%s2623_s11 + $0x380] sm:$0xff]  ;;  %v328_v57 = vld [vmem:[%s2623_s11 + $0x388] sm:$0xff] }
  0x33   : > { %271 = vst [vmem:[%s2628_s12 + $0xe0] sm:$0xff] %v270_v28  ;;  %v330_v58 = vld [vmem:[%s2623_s11 + $0x3a0] sm:$0xff]  ;;  %v332_v59 = vld [vmem:[%s2623_s11 + $0x3a8] sm:$0xff] }
  0x34   : > { %273 = vst [vmem:[%s2628_s12 + $0xe8] sm:$0xff] %v272_v29  ;;  %v334_v60 = vld [vmem:[%s2623_s11 + $0x3c0] sm:$0xff]  ;;  %v336_v61 = vld [vmem:[%s2623_s11 + $0x3c8] sm:$0xff] }
  0x35   : > { %275 = vst [vmem:[%s2628_s12 + $0xf0] sm:$0xff] %v274_v30  ;;  %v338_v62 = vld [vmem:[%s2623_s11 + $0x3e0] sm:$0xff]  ;;  %v340_v63 = vld [vmem:[%s2623_s11 + $0x3e8] sm:$0xff] }
  0x36   : > { %277 = vst [vmem:[%s2628_s12 + $0xf8] sm:$0xff] %v276_v31 }
  0x37   : > { %279 = vst [vmem:[%s2628_s12 + $0x100] sm:$0xff] %v278_v32 }
  0x38   : > { %281 = vst [vmem:[%s2628_s12 + $0x108] sm:$0xff] %v280_v33 }
  0x39   : > { %283 = vst [vmem:[%s2628_s12 + $0x110] sm:$0xff] %v282_v34 }
  0x3a   : > { %285 = vst [vmem:[%s2628_s12 + $0x118] sm:$0xff] %v284_v35 }
  0x3b   : > { %287 = vst [vmem:[%s2628_s12 + $0x120] sm:$0xff] %v286_v36 }
  0x3c   : > { %289 = vst [vmem:[%s2628_s12 + $0x128] sm:$0xff] %v288_v37 }
  0x3d   : > { %291 = vst [vmem:[%s2628_s12 + $0x130] sm:$0xff] %v290_v38 }
  0x3e   : > { %293 = vst [vmem:[%s2628_s12 + $0x138] sm:$0xff] %v292_v39 }
  0x3f   : > { %295 = vst [vmem:[%s2628_s12 + $0x140] sm:$0xff] %v294_v40 }
  0x40   : > { %297 = vst [vmem:[%s2628_s12 + $0x148] sm:$0xff] %v296_v41 }
  0x41   : > { %299 = vst [vmem:[%s2628_s12 + $0x150] sm:$0xff] %v298_v42 }
  0x42   : > { %301 = vst [vmem:[%s2628_s12 + $0x158] sm:$0xff] %v300_v43 }
  0x43   : > { %303 = vst [vmem:[%s2628_s12 + $0x160] sm:$0xff] %v302_v44 }
  0x44   : > { %305 = vst [vmem:[%s2628_s12 + $0x168] sm:$0xff] %v304_v45 }
  0x45   : > { %307 = vst [vmem:[%s2628_s12 + $0x170] sm:$0xff] %v306_v46 }
  0x46   : > { %309 = vst [vmem:[%s2628_s12 + $0x178] sm:$0xff] %v308_v47 }
  0x47   : > { %311 = vst [vmem:[%s2628_s12 + $0x180] sm:$0xff] %v310_v48 }
  0x48   : > { %313 = vst [vmem:[%s2628_s12 + $0x188] sm:$0xff] %v312_v49 }
  0x49   : > { %315 = vst [vmem:[%s2628_s12 + $0x190] sm:$0xff] %v314_v50 }
  0x4a   : > { %317 = vst [vmem:[%s2628_s12 + $0x198] sm:$0xff] %v316_v51 }
  0x4b   : > { %319 = vst [vmem:[%s2628_s12 + $0x1a0] sm:$0xff] %v318_v52 }
  0x4c   : > { %321 = vst [vmem:[%s2628_s12 + $0x1a8] sm:$0xff] %v320_v53 }
  0x4d   : > { %323 = vst [vmem:[%s2628_s12 + $0x1b0] sm:$0xff] %v322_v54 }
  0x4e   : > { %325 = vst [vmem:[%s2628_s12 + $0x1b8] sm:$0xff] %v324_v55 }
  0x4f   : > { %327 = vst [vmem:[%s2628_s12 + $0x1c0] sm:$0xff] %v326_v56 }
  0x50   : > { %329 = vst [vmem:[%s2628_s12 + $0x1c8] sm:$0xff] %v328_v57 }
  0x51   : > { %331 = vst [vmem:[%s2628_s12 + $0x1d0] sm:$0xff] %v330_v58 }
  0x52   : > { %333 = vst [vmem:[%s2628_s12 + $0x1d8] sm:$0xff] %v332_v59 }
  0x53   : > { %335 = vst [vmem:[%s2628_s12 + $0x1e0] sm:$0xff] %v334_v60 }
  0x54   : > { %337 = vst [vmem:[%s2628_s12 + $0x1e8] sm:$0xff] %v336_v61 }
  0x55   : > { %339 = vst [vmem:[%s2628_s12 + $0x1f0] sm:$0xff] %v338_v62 }
  0x56   : > { %341 = vst [vmem:[%s2628_s12 + $0x1f8] sm:$0xff] %v340_v63 }
  0x57 PF: > { %p1933_p7 = scmp.ge.s32.totalorder %s2535_s21, 1  ;;  %p358_p8 = scmp.lt.s32.totalorder %s2535_s21, 5 }
  0x59   : > { %p359_p9 = pnand %p1933_p7, %p358_p8 }
  0x5a   : > { %s365_s13 = sand.u32 (!%p359_p9), 1, %s2511_s15   ;;  %s1935_s14 = sshll.u32 (!%p359_p9), %s2519_s17, 6 }
  0x5b   : > { %362 = sbr.rel (%p359_p9) target bundleno = 638 (0x27e), region = 47  ;;  %s1934_s24 = sshll.u32 (!%p359_p9), %s365_s13, 9 }
  0x5c   : > { %p416_p10 = scmp.lt.s32.totalorder (!%p359_p9), %s1935_s14, 127  ;;  %s1937_s25 = sshll.u32 (!%p359_p9), %s2523_s18, 5 }
  0x5d   : > { %p425_p11 = scmp.lt.s32.totalorder (!%p359_p9), %s1937_s25, 63  ;;  %p433_p12 = scmp.lt.s32.totalorder (!%p359_p9), %s2523_s18, 1 }
  0x5e   : > { %p1939_p13 = scmp.ne.s32.totalorder (!%p359_p9), %s2519_s17, 0 }
  0x60   : > { %s3027_s14 = smov (!%p416_p10, %s1935_s14), 127  ;;  %s3029_s25 = smov (!%p425_p11, %s1937_s25), 63 }
  0x61   : > { %s1936_s26 = sshll.u32 %s3027_s14, 2  ;;  %s3031_s18 = smov (!%p433_p12, %s2523_s18), 1 }
  0x62   : > { %s2764_s30 = scalar_lea.vmem %s3010_s1, %s1936_s26  ;;  %s1938_s5 = sshll.u32 %s3029_s25, 3 }
  0x63   : > { %s2772_s7 = scalar_lea.vmem %s3011_s2, %s1938_s5  ;;  %s438_s10 = scalar_lea.vmem %s3012_s3, %s3031_s18 }
  0x64   : > { %s444_s13 = scalar_lea.vmem %s3013_s4, %s3031_s18  ;;  %s2782_s14 = scalar_lea.vmem [#allocation3], %s1934_s24 }
  0x65   : > { %448 = sbr.rel (%p1939_p13) target bundleno = 139 (0x8b), region = 55 }
  0x6a   : > { %v2537_v0 = vmov 0.0  }
  0x6b   : > { %449 = vst [vmem:[#allocation2 + $0xb0] sm:$0xff] %v2537_v0 }
  0x6c   : > { %450 = vst [vmem:[#allocation2] sm:$0xff] %v2537_v0 }
  0x6d   : > { %451 = vst [vmem:[#allocation2 + $0xd8] sm:$0xff] %v2537_v0 }
  0x6e   : > { %452 = vst [vmem:[#allocation2 + $0x18] sm:$0xff] %v2537_v0 }
  0x6f   : > { %453 = vst [vmem:[#allocation2 + $0x50] sm:$0xff] %v2537_v0 }
  0x70   : > { %454 = vst [vmem:[#allocation2 + $0x68] sm:$0xff] %v2537_v0 }
  0x71   : > { %455 = vst [vmem:[#allocation2 + $0x30] sm:$0xff] %v2537_v0 }
  0x72   : > { %456 = vst [vmem:[#allocation2 + $0x48] sm:$0xff] %v2537_v0 }
  0x73   : > { %457 = vst [vmem:[#allocation2 + $0x80] sm:$0xff] %v2537_v0 }
  0x74   : > { %458 = vst [vmem:[#allocation2 + $0x88] sm:$0xff] %v2537_v0 }
  0x75   : > { %459 = vst [vmem:[#allocation2 + $0xe8] sm:$0xff] %v2537_v0 }
  0x76   : > { %460 = vst [vmem:[#allocation2 + $0xb8] sm:$0xff] %v2537_v0 }
  0x77   : > { %461 = vst [vmem:[#allocation2 + $0x60] sm:$0xff] %v2537_v0 }
  0x78   : > { %462 = vst [vmem:[#allocation2 + $0xf0] sm:$0xff] %v2537_v0 }
  0x79   : > { %463 = vst [vmem:[#allocation2 + $0x8] sm:$0xff] %v2537_v0 }
  0x7a   : > { %464 = vst [vmem:[#allocation2 + $0x78] sm:$0xff] %v2537_v0 }
  0x7b   : > { %465 = vst [vmem:[#allocation2 + $0x38] sm:$0xff] %v2537_v0 }
  0x7c   : > { %466 = vst [vmem:[#allocation2 + $0x58] sm:$0xff] %v2537_v0 }
  0x7d   : > { %467 = vst [vmem:[#allocation2 + $0x40] sm:$0xff] %v2537_v0 }
  0x7e   : > { %468 = vst [vmem:[#allocation2 + $0xc8] sm:$0xff] %v2537_v0 }
  0x7f   : > { %469 = vst [vmem:[#allocation2 + $0xe0] sm:$0xff] %v2537_v0 }
  0x80   : > { %470 = vst [vmem:[#allocation2 + $0x90] sm:$0xff] %v2537_v0 }
  0x81   : > { %471 = vst [vmem:[#allocation2 + $0x70] sm:$0xff] %v2537_v0 }
  0x82   : > { %472 = vst [vmem:[#allocation2 + $0xc0] sm:$0xff] %v2537_v0 }
  0x83   : > { %473 = vst [vmem:[#allocation2 + $0xa8] sm:$0xff] %v2537_v0 }
  0x84   : > { %474 = vst [vmem:[#allocation2 + $0xd0] sm:$0xff] %v2537_v0 }
  0x85   : > { %475 = vst [vmem:[#allocation2 + $0x10] sm:$0xff] %v2537_v0 }
  0x86   : > { %476 = vst [vmem:[#allocation2 + $0x28] sm:$0xff] %v2537_v0 }
  0x87   : > { %477 = vst [vmem:[#allocation2 + $0xa0] sm:$0xff] %v2537_v0 }
  0x88   : > { %478 = vst [vmem:[#allocation2 + $0xf8] sm:$0xff] %v2537_v0 }
  0x89   : > { %479 = vst [vmem:[#allocation2 + $0x20] sm:$0xff] %v2537_v0 }
  0x8a   : > { %480 = vst [vmem:[#allocation2 + $0x98] sm:$0xff] %v2537_v0 }
  0x8b PF: > { %v2399_v1 = vld [vmem:[%s2764_s30 + $0x38] sm:$0xff]  ;;  %v2398_v5 = vld [vmem:[%s2764_s30 + $0x30] sm:$0xff]  ;;  %v2397_v9 = vld [vmem:[%s2764_s30 + $0x28] sm:$0xff]  ;;  %p2324_p0 = scmp.ne.s32.totalorder %s2519_s17, 1 }
  0x8c   : > { %v2407_v2 = vld [vmem:[%s2764_s30 + $0x78] sm:$0xff]  ;;  %1153 = vmatpush.bf16.msra.mxu0 %v2399_v1  ;;  %v2406_v6 = vld [vmem:[%s2764_s30 + $0x70] sm:$0xff]  ;;  %v2405_v10 = vld [vmem:[%s2764_s30 + $0x68] sm:$0xff] }
  0x8d   : > { %v2415_v3 = vld [vmem:[%s2764_s30 + $0xb8] sm:$0xff]  ;;  %1242 = vmatpush.bf16.msra.mxu1 %v2407_v2  ;;  %v2414_v7 = vld [vmem:[%s2764_s30 + $0xb0] sm:$0xff]  ;;  %v2413_v11 = vld [vmem:[%s2764_s30 + $0xa8] sm:$0xff] }
  0x8e   : > { %v2423_v4 = vld [vmem:[%s2764_s30 + $0xf8] sm:$0xff]  ;;  %1331 = vmatpush.bf16.msra.mxu2 %v2415_v3  ;;  %v2422_v8 = vld [vmem:[%s2764_s30 + $0xf0] sm:$0xff]  ;;  %v2421_v12 = vld [vmem:[%s2764_s30 + $0xe8] sm:$0xff] }
  0x8f   : > { %1420 = vmatpush.bf16.msra.mxu3 %v2423_v4  ;;  %v2396_v13 = vld [vmem:[%s2764_s30 + $0x20] sm:$0xff]  ;;  %v2395_v17 = vld [vmem:[%s2764_s30 + $0x18] sm:$0xff]  ;;  %v2394_v21 = vld [vmem:[%s2764_s30 + $0x10] sm:$0xff] }
  0x90   : > { %1154 = vmatpush.bf16.msra.mxu0 %v2398_v5  ;;  %v2404_v14 = vld [vmem:[%s2764_s30 + $0x60] sm:$0xff]  ;;  %v2403_v18 = vld [vmem:[%s2764_s30 + $0x58] sm:$0xff]  ;;  %v2402_v22 = vld [vmem:[%s2764_s30 + $0x50] sm:$0xff] }
  0x91   : > { %1243 = vmatpush.bf16.msra.mxu1 %v2406_v6  ;;  %v2412_v15 = vld [vmem:[%s2764_s30 + $0xa0] sm:$0xff]  ;;  %v2411_v19 = vld [vmem:[%s2764_s30 + $0x98] sm:$0xff]  ;;  %v2410_v23 = vld [vmem:[%s2764_s30 + $0x90] sm:$0xff] }
  0x92   : > { %1332 = vmatpush.bf16.msra.mxu2 %v2414_v7  ;;  %v2420_v16 = vld [vmem:[%s2764_s30 + $0xe0] sm:$0xff]  ;;  %v2419_v20 = vld [vmem:[%s2764_s30 + $0xd8] sm:$0xff]  ;;  %v2418_v24 = vld [vmem:[%s2764_s30 + $0xd0] sm:$0xff] }
  0x93   : > { %1421 = vmatpush.bf16.msra.mxu3 %v2422_v8  ;;  %v2393_v25 = vld [vmem:[%s2764_s30 + $0x8] sm:$0xff]  ;;  %v2392_v29 = vld [vmem:[%s2764_s30] sm:$0xff]  ;;  %v2330_v34 = vld [vmem:[%s2782_s14 + $0xc] sm:$0xf0] }
  0x94   : > { %1155 = vmatpush.bf16.msra.mxu0 %v2397_v9  ;;  %v2401_v26 = vld [vmem:[%s2764_s30 + $0x48] sm:$0xff]  ;;  %v2400_v30 = vld [vmem:[%s2764_s30 + $0x40] sm:$0xff]  ;;  %v1944_v36 = vld [vmem:[%s2782_s14 + $0x10] sm:$0xf0] }
  0x95   : > { %1244 = vmatpush.bf16.msra.mxu1 %v2405_v10  ;;  %v2409_v27 = vld [vmem:[%s2764_s30 + $0x88] sm:$0xff]  ;;  %v2408_v31 = vld [vmem:[%s2764_s30 + $0x80] sm:$0xff]  ;;  %v2331_v38 = vld [vmem:[%s2782_s14 + $0x14] sm:$0xf0] }
  0x96   : > { %1333 = vmatpush.bf16.msra.mxu2 %v2413_v11  ;;  %v2417_v28 = vld [vmem:[%s2764_s30 + $0xc8] sm:$0xff]  ;;  %v2416_v32 = vld [vmem:[%s2764_s30 + $0xc0] sm:$0xff]  ;;  %v1952_v40 = vld [vmem:[%s2782_s14 + $0x18] sm:$0xf0] }
  0x97   : > { %1422 = vmatpush.bf16.msra.mxu3 %v2421_v12  ;;  %v1942_v33 = vld [vmem:[%s2782_s14] sm:$0xf]  ;;  %v2328_v35 = vld [vmem:[%s2782_s14 + $0x4] sm:$0xf]  ;;  %v1950_v37 = vld [vmem:[%s2782_s14 + $0x8] sm:$0xf] }
  0x98   : > { %1156 = vmatpush.bf16.msra.mxu0 %v2396_v13  ;;  %v2329_v39 = vld [vmem:[%s2782_s14 + $0xc] sm:$0xf]  ;;  %v1943_v41 = vor.u32 %v2330_v34, %v1942_v33  ;;  %v1947_v42 = vor.u32 %v2328_v35, %v1944_v36  ;;  %v1951_v43 = vor.u32 %v2331_v38, %v1950_v37  ;;  %v1958_v45 = vld [vmem:[%s2782_s14 + $0x20] sm:$0xf]  ;;  %v2334_v46 = vld [vmem:[%s2782_s14 + $0x2c] sm:$0xf0] }
  0x99   : > { %1245 = vmatpush.bf16.msra.mxu1 %v2404_v14  ;;  %v1955_v44 = vor.u32 %v2329_v39, %v1952_v40  ;;  %v2332_v47 = vld [vmem:[%s2782_s14 + $0x24] sm:$0xf]  ;;  %v1960_v48 = vld [vmem:[%s2782_s14 + $0x30] sm:$0xf0]  ;;  %v1966_v49 = vld [vmem:[%s2782_s14 + $0x28] sm:$0xf]  ;;  %v1959_v53 = vor.u32 %v2334_v46, %v1958_v45 }
  0x9a   : > { %1334 = vmatpush.bf16.msra.mxu2 %v2412_v15  ;;  %v2335_v50 = vld [vmem:[%s2782_s14 + $0x34] sm:$0xf0]  ;;  %v2333_v51 = vld [vmem:[%s2782_s14 + $0x2c] sm:$0xf]  ;;  %v1968_v52 = vld [vmem:[%s2782_s14 + $0x38] sm:$0xf0]  ;;  %v1963_v54 = vor.u32 %v2332_v47, %v1960_v48 }
  0x9b   : > { %1423 = vmatpush.bf16.msra.mxu3 %v2420_v16  ;;  %v1967_v55 = vor.u32 %v2335_v50, %v1966_v49  ;;  %v1971_v56 = vor.u32 %v2333_v51, %v1968_v52  ;;  %v1974_v57 = vld [vmem:[%s2782_s14 + $0x40] sm:$0xf]  ;;  %v2338_v58 = vld [vmem:[%s2782_s14 + $0x4c] sm:$0xf0]  ;;  %v2336_v59 = vld [vmem:[%s2782_s14 + $0x44] sm:$0xf] }
  0x9c   : > { %1157 = vmatpush.bf16.msra.mxu0 %v2395_v17  ;;  %v1976_v60 = vld [vmem:[%s2782_s14 + $0x50] sm:$0xf0]  ;;  %v1982_v61 = vld [vmem:[%s2782_s14 + $0x48] sm:$0xf]  ;;  %v2339_v62 = vld [vmem:[%s2782_s14 + $0x54] sm:$0xf0]  ;;  %v1975_v1 = vor.u32 %v2338_v58, %v1974_v57 }
  0x9d   : > { %1246 = vmatpush.bf16.msra.mxu1 %v2403_v18  ;;  %v2337_v63 = vld [vmem:[%s2782_s14 + $0x4c] sm:$0xf]  ;;  %v1984_v0 = vld [vmem:[%s2782_s14 + $0x58] sm:$0xf0]  ;;  %v1979_v2 = vor.u32 %v2336_v59, %v1976_v60  ;;  %v1983_v3 = vor.u32 %v2339_v62, %v1982_v61  ;;  %v1990_v5 = vld [vmem:[%s2782_s14 + $0x60] sm:$0xf] }
  0x9e   : > { %1335 = vmatpush.bf16.msra.mxu2 %v2411_v19  ;;  %v1987_v4 = vor.u32 %v2337_v63, %v1984_v0  ;;  %v2342_v6 = vld [vmem:[%s2782_s14 + $0x6c] sm:$0xf0]  ;;  %v2340_v7 = vld [vmem:[%s2782_s14 + $0x64] sm:$0xf]  ;;  %v1992_v8 = vld [vmem:[%s2782_s14 + $0x70] sm:$0xf0] }
  0x9f   : > { %1424 = vmatpush.bf16.msra.mxu3 %v2419_v20  ;;  %v1998_v9 = vld [vmem:[%s2782_s14 + $0x68] sm:$0xf]  ;;  %v2343_v10 = vld [vmem:[%s2782_s14 + $0x74] sm:$0xf0]  ;;  %v2341_v11 = vld [vmem:[%s2782_s14 + $0x6c] sm:$0xf]  ;;  %v1991_v13 = vor.u32 %v2342_v6, %v1990_v5  ;;  %v1995_v14 = vor.u32 %v2340_v7, %v1992_v8 }
  0xa0   : > { %1158 = vmatpush.bf16.msra.mxu0 %v2394_v21  ;;  %v2000_v12 = vld [vmem:[%s2782_s14 + $0x78] sm:$0xf0]  ;;  %v1999_v15 = vor.u32 %v2343_v10, %v1998_v9  ;;  %v2006_v17 = vld [vmem:[%s2782_s14 + $0x80] sm:$0xf]  ;;  %v2346_v18 = vld [vmem:[%s2782_s14 + $0x8c] sm:$0xf0] }
  0xa1   : > { %1247 = vmatpush.bf16.msra.mxu1 %v2402_v22  ;;  %v2003_v16 = vor.u32 %v2341_v11, %v2000_v12  ;;  %v2344_v19 = vld [vmem:[%s2782_s14 + $0x84] sm:$0xf]  ;;  %v2008_v20 = vld [vmem:[%s2782_s14 + $0x90] sm:$0xf0]  ;;  %v2014_v21 = vld [vmem:[%s2782_s14 + $0x88] sm:$0xf] }
  0xa2   : > { %1336 = vmatpush.bf16.msra.mxu2 %v2410_v23  ;;  %v2347_v22 = vld [vmem:[%s2782_s14 + $0x94] sm:$0xf0]  ;;  %v2345_v23 = vld [vmem:[%s2782_s14 + $0x8c] sm:$0xf]  ;;  %v2030_v33 = vld [vmem:[%s2782_s14 + $0xa8] sm:$0xf] }
  0xa3   : > { %1425 = vmatpush.bf16.msra.mxu3 %v2418_v24  ;;  %v2016_v24 = vld [vmem:[%s2782_s14 + $0x98] sm:$0xf0]  ;;  %v2351_v34 = vld [vmem:[%s2782_s14 + $0xb4] sm:$0xf0]  ;;  %v2349_v35 = vld [vmem:[%s2782_s14 + $0xac] sm:$0xf] }
  0xa4   : > { %1159 = vmatpush.bf16.msra.mxu0 %v2393_v25  ;;  %v2007_v25 = vor.u32 %v2346_v18, %v2006_v17  ;;  %v2032_v36 = vld [vmem:[%s2782_s14 + $0xb8] sm:$0xf0]  ;;  %v2031_v39 = vor.u32 %v2351_v34, %v2030_v33  ;;  %v2046_v45 = vld [vmem:[%s2782_s14 + $0xc8] sm:$0xf]  ;;  %v2355_v46 = vld [vmem:[%s2782_s14 + $0xd4] sm:$0xf0] }
  0xa5   : > { %1248 = vmatpush.bf16.msra.mxu1 %v2401_v26  ;;  %v2011_v26 = vor.u32 %v2344_v19, %v2008_v20  ;;  %v2035_v40 = vor.u32 %v2349_v35, %v2032_v36  ;;  %v2353_v47 = vld [vmem:[%s2782_s14 + $0xcc] sm:$0xf]  ;;  %v2048_v48 = vld [vmem:[%s2782_s14 + $0xd8] sm:$0xf0]  ;;  %v2047_v51 = vor.u32 %v2355_v46, %v2046_v45  ;;  %v2062_v57 = vld [vmem:[%s2782_s14 + $0xe8] sm:$0xf] }
  0xa6   : > { %1337 = vmatpush.bf16.msra.mxu2 %v2409_v27  ;;  %v2015_v27 = vor.u32 %v2347_v22, %v2014_v21  ;;  %v2051_v52 = vor.u32 %v2353_v47, %v2048_v48  ;;  %v2359_v58 = vld [vmem:[%s2782_s14 + $0xf4] sm:$0xf0]  ;;  %v2357_v59 = vld [vmem:[%s2782_s14 + $0xec] sm:$0xf]  ;;  %v2064_v60 = vld [vmem:[%s2782_s14 + $0xf8] sm:$0xf0] }
  0xa7   : > { %1426 = vmatpush.bf16.msra.mxu3 %v2417_v28  ;;  %v2019_v28 = vor.u32 %v2345_v23, %v2016_v24  ;;  %v2063_v63 = vor.u32 %v2359_v58, %v2062_v57  ;;  %v2067_v0 = vor.u32 %v2357_v59, %v2064_v60  ;;  %v2078_v5 = vld [vmem:[%s2782_s14 + $0x108] sm:$0xf]  ;;  %v2363_v6 = vld [vmem:[%s2782_s14 + $0x114] sm:$0xf0]  ;;  %v2361_v7 = vld [vmem:[%s2782_s14 + $0x10c] sm:$0xf] }
  0xa8   : > { %1160 = vmatpush.bf16.msra.mxu0 %v2392_v29  ;;  %v2022_v29 = vld [vmem:[%s2782_s14 + $0xa0] sm:$0xf]  ;;  %v2080_v8 = vld [vmem:[%s2782_s14 + $0x118] sm:$0xf0]  ;;  %v481_v21 = vld [vmem:[#allocation2 + $0xb0] sm:$0xff] }
  0xa9   : > { %1249 = vmatpush.bf16.msra.mxu1 %v2400_v30  ;;  %v2350_v30 = vld [vmem:[%s2782_s14 + $0xac] sm:$0xf0]  ;;  %v2086_v23 = vld [vmem:[%s2782_s14 + $0x120] sm:$0xf]  ;;  %v2104_v57 = vld [vmem:[%s2782_s14 + $0x150] sm:$0xf0] }
  0xaa   : > { %1338 = vmatpush.bf16.msra.mxu2 %v2408_v31  ;;  %v2348_v31 = vld [vmem:[%s2782_s14 + $0xa4] sm:$0xf]  ;;  %v2023_v37 = vor.u32 %v2350_v30, %v2022_v29  ;;  %v2366_v24 = vld [vmem:[%s2782_s14 + $0x12c] sm:$0xf0]  ;;  %v2367_v29 = vld [vmem:[%s2782_s14 + $0x134] sm:$0xf0] }
  0xab   : > { %1427 = vmatpush.bf16.msra.mxu3 %v2416_v32  ;;  %1161 = vmatmul.bf16.vlgmr.msra.gmra.mxu0 %v1943_v41  ;;  %v2024_v32 = vld [vmem:[%s2782_s14 + $0xb0] sm:$0xf0]  ;;  %v2038_v41 = vld [vmem:[%s2782_s14 + $0xc0] sm:$0xf]  ;;  %v2365_v30 = vld [vmem:[%s2782_s14 + $0x12c] sm:$0xf]  ;;  %v2087_v35 = vor.u32 %v2366_v24, %v2086_v23 }
  0xac   : > { %1250 = vmatmul.bf16.vlgmr.msra.gmra.mxu1 %v1947_v42  ;;  %v2027_v38 = vor.u32 %v2348_v31, %v2024_v32  ;;  %v2354_v42 = vld [vmem:[%s2782_s14 + $0xcc] sm:$0xf0]  ;;  %v2096_v31 = vld [vmem:[%s2782_s14 + $0x138] sm:$0xf0]  ;;  %v2110_v58 = vld [vmem:[%s2782_s14 + $0x148] sm:$0xf] }
  0xad   : > { %1339 = vmatmul.bf16.vlgmr.msra.gmra.mxu2 %v1951_v43  ;;  %v2352_v43 = vld [vmem:[%s2782_s14 + $0xc4] sm:$0xf]  ;;  %v2039_v49 = vor.u32 %v2354_v42, %v2038_v41  ;;  %v2099_v41 = vor.u32 %v2365_v30, %v2096_v31  ;;  %v2371_v59 = vld [vmem:[%s2782_s14 + $0x154] sm:$0xf0]  ;;  %v2369_v60 = vld [vmem:[%s2782_s14 + $0x14c] sm:$0xf] }
  0xae   : > { %1428 = vmatmul.bf16.vlgmr.msra.gmra.mxu3 %v1955_v44  ;;  %v2040_v44 = vld [vmem:[%s2782_s14 + $0xd0] sm:$0xf0]  ;;  %v482_v42 = vld [vmem:[#allocation2] sm:$0xff]  ;;  %v2126_v24 = vld [vmem:[%s2782_s14 + $0x168] sm:$0xf] }
  0xaf   : > { %v2043_v50 = vor.u32 %v2352_v43, %v2040_v44  ;;  %v2120_v23 = vld [vmem:[%s2782_s14 + $0x170] sm:$0xf0] }
  0xbb   : > { %1166 = vmatmul.bf16.gmra.mxu0 %v1959_v53  ;;  %v2054_v53 = vld [vmem:[%s2782_s14 + $0xe0] sm:$0xf] }
  0xbc   : > { %1255 = vmatmul.bf16.gmra.mxu1 %v1963_v54  ;;  %v2358_v54 = vld [vmem:[%s2782_s14 + $0xec] sm:$0xf0] }
  0xbd   : > { %1344 = vmatmul.bf16.gmra.mxu2 %v1967_v55  ;;  %v2356_v55 = vld [vmem:[%s2782_s14 + $0xe4] sm:$0xf]  ;;  %v2055_v61 = vor.u32 %v2358_v54, %v2054_v53  ;;  %v2102_v53 = vld [vmem:[%s2782_s14 + $0x140] sm:$0xf]  ;;  %v2370_v54 = vld [vmem:[%s2782_s14 + $0x14c] sm:$0xf0] }
  0xbe   : > { %1433 = vmatmul.bf16.gmra.mxu3 %v1971_v56  ;;  %v2056_v56 = vld [vmem:[%s2782_s14 + $0xf0] sm:$0xf0] }
  0xbf   : > { %v2059_v62 = vor.u32 %v2356_v55, %v2056_v56  ;;  %v2368_v56 = vld [vmem:[%s2782_s14 + $0x144] sm:$0xf] }
  0xcb   : > { %1171 = vmatmul.bf16.gmra.mxu0 %v1975_v1  ;;  %v2070_v1 = vld [vmem:[%s2782_s14 + $0x100] sm:$0xf] }
  0xcc   : > { %1260 = vmatmul.bf16.gmra.mxu1 %v1979_v2  ;;  %v2362_v2 = vld [vmem:[%s2782_s14 + $0x10c] sm:$0xf0] }
  0xcd   : > { %1349 = vmatmul.bf16.gmra.mxu2 %v1983_v3  ;;  %v2360_v3 = vld [vmem:[%s2782_s14 + $0x104] sm:$0xf]  ;;  %v2071_v9 = vor.u32 %v2362_v2, %v2070_v1  ;;  %v2103_v1 = vor.u32 %v2370_v54, %v2102_v53  ;;  %v2107_v2 = vor.u32 %v2368_v56, %v2104_v57  ;;  %v2136_v53 = vld [vmem:[%s2782_s14 + $0x190] sm:$0xf0]  ;;  %v2142_v54 = vld [vmem:[%s2782_s14 + $0x188] sm:$0xf] }
  0xce   : > { %1438 = vmatmul.bf16.gmra.mxu3 %v1987_v4  ;;  %v2072_v4 = vld [vmem:[%s2782_s14 + $0x110] sm:$0xf0]  ;;  %v2377_v56 = vld [vmem:[%s2782_s14 + $0x18c] sm:$0xf]  ;;  %v2144_v57 = vld [vmem:[%s2782_s14 + $0x198] sm:$0xf0] }
  0xcf   : > { %v2075_v10 = vor.u32 %v2360_v3, %v2072_v4 }
  0xdb   : > { %1176 = vmatmul.bf16.gmra.mxu0 %v1991_v13  ;;  %v2079_v13 = vor.u32 %v2363_v6, %v2078_v5  ;;  %v2111_v6 = vor.u32 %v2371_v59, %v2110_v58 }
  0xdc   : > { %1265 = vmatmul.bf16.gmra.mxu1 %v1995_v14  ;;  %v2083_v14 = vor.u32 %v2361_v7, %v2080_v8  ;;  %v484_v8 = vld [vmem:[#allocation2 + $0x18] sm:$0xff] }
  0xdd   : > { %1354 = vmatmul.bf16.gmra.mxu2 %v1999_v15 }
  0xde   : > { %1443 = vmatmul.bf16.gmra.mxu3 %v2003_v16 }
  0xeb   : > { %1181 = vmatmul.bf16.gmra.mxu0 %v2007_v25 }
  0xec   : > { %1270 = vmatmul.bf16.gmra.mxu1 %v2011_v26  ;;  %v2364_v26 = vld [vmem:[%s2782_s14 + $0x124] sm:$0xf] }
  0xed   : > { %1359 = vmatmul.bf16.gmra.mxu2 %v2015_v27  ;;  %v2088_v27 = vld [vmem:[%s2782_s14 + $0x130] sm:$0xf0] }
  0xee   : > { %1448 = vmatmul.bf16.gmra.mxu3 %v2019_v28  ;;  %v2094_v28 = vld [vmem:[%s2782_s14 + $0x128] sm:$0xf]  ;;  %v2091_v36 = vor.u32 %v2364_v26, %v2088_v27  ;;  %v2373_v26 = vld [vmem:[%s2782_s14 + $0x16c] sm:$0xf]  ;;  %v2128_v27 = vld [vmem:[%s2782_s14 + $0x178] sm:$0xf0] }
  0xfb   : > { %1186 = vmatmul.bf16.gmra.mxu0 %v2023_v37 }
  0xfc   : > { %1275 = vmatmul.bf16.gmra.mxu1 %v2027_v38 }
  0xfd   : > { %1364 = vmatmul.bf16.gmra.mxu2 %v2031_v39 }
  0xfe   : > { %1453 = vmatmul.bf16.gmra.mxu3 %v2035_v40  ;;  %v2095_v40 = vor.u32 %v2367_v29, %v2094_v28 }
 0x10b   : > { %1191 = vmatmul.bf16.gmra.mxu0 %v2039_v49 }
 0x10c   : > { %1280 = vmatmul.bf16.gmra.mxu1 %v2043_v50 }
 0x10d   : > { %1369 = vmatmul.bf16.gmra.mxu2 %v2047_v51  ;;  %v483_v51 = vld [vmem:[#allocation2 + $0xd8] sm:$0xff] }
 0x10e   : > { %1458 = vmatmul.bf16.gmra.mxu3 %v2051_v52 }
 0x11b   : > { %1196 = vmatmul.bf16.gmra.mxu0 %v2055_v61  ;;  %v2112_v61 = vld [vmem:[%s2782_s14 + $0x158] sm:$0xf0] }
 0x11c   : > { %1285 = vmatmul.bf16.gmra.mxu1 %v2059_v62  ;;  %v2115_v7 = vor.u32 %v2369_v60, %v2112_v61 }
 0x11d   : > { %1374 = vmatmul.bf16.gmra.mxu2 %v2063_v63 }
 0x11e   : > { %1463 = vmatmul.bf16.gmra.mxu3 %v2067_v0 }
 0x128   : > { %v1162_v11 = vpop.f32.mrf.mxu0 }
 0x129   : > { %v1251_v12 = vpop.f32.mrf.mxu1 }
 0x12a   : > { %v1252_v15 = vadd.f32 %v1251_v12, %v1162_v11 }
 0x12b   : > { %1201 = vmatmul.bf16.gmra.mxu0 %v2071_v9 }
 0x12c   : > { %1290 = vmatmul.bf16.gmra.mxu1 %v2075_v10 }
 0x12d   : > { %1379 = vmatmul.bf16.gmra.mxu2 %v2079_v13 }
 0x12e   : > { %1468 = vmatmul.bf16.gmra.mxu3 %v2083_v14 }
 0x130   : > { %v1340_v16 = vpop.f32.mrf.mxu2  ;;  %v1164_v19 = vpop.f32.mrf.mxu0 }
 0x131   : > { %v1429_v17 = vpop.f32.mrf.mxu3  ;;  %v1341_v18 = vadd.f32 %v1340_v16, %v1252_v15  ;;  %v1253_v20 = vpop.f32.mrf.mxu1 }
 0x132   : > { %v1254_v32 = vadd.f32 %v1253_v20, %v1164_v19  ;;  %v2118_v19 = vld [vmem:[%s2782_s14 + $0x160] sm:$0xf]  ;;  %v2374_v20 = vld [vmem:[%s2782_s14 + $0x16c] sm:$0xf0] }
 0x133   : > { %v1430_v22 = vadd.f32 %v1429_v17, %v1341_v18  ;;  %v485_v17 = vld [vmem:[#allocation2 + $0x50] sm:$0xff]  ;;  %v2119_v31 = vor.u32 %v2374_v20, %v2118_v19  ;;  %v2158_v20 = vld [vmem:[%s2782_s14 + $0x1a8] sm:$0xf] }
 0x134   : > { %v2152_v19 = vld [vmem:[%s2782_s14 + $0x1b0] sm:$0xf0] }
 0x135   : > { %v1509_v25 = vadd.f32 %v1430_v22, %v481_v21  ;;  %v2372_v22 = vld [vmem:[%s2782_s14 + $0x164] sm:$0xf] }
 0x137   : > { %1541 = vst [vmem:[#allocation2 + $0xb0] sm:$0xff] %v1509_v25  ;;  %v2375_v25 = vld [vmem:[%s2782_s14 + $0x174] sm:$0xf0] }
 0x138   : > { %v1342_v33 = vpop.f32.mrf.mxu2  ;;  %v1167_v38 = vpop.f32.mrf.mxu0 }
 0x139   : > { %v1431_v34 = vpop.f32.mrf.mxu3  ;;  %v1343_v37 = vadd.f32 %v1342_v33, %v1254_v32  ;;  %v1256_v39 = vpop.f32.mrf.mxu1  ;;  %v2123_v32 = vor.u32 %v2372_v22, %v2120_v23  ;;  %v2381_v22 = vld [vmem:[%s2782_s14 + $0x1ac] sm:$0xf]  ;;  %v2160_v23 = vld [vmem:[%s2782_s14 + $0x1b8] sm:$0xf0] }
 0x13a   : > { %v1257_v45 = vadd.f32 %v1256_v39, %v1167_v38  ;;  %v486_v38 = vld [vmem:[#allocation2 + $0x68] sm:$0xff] }
 0x13b   : > { %v1432_v43 = vadd.f32 %v1431_v34, %v1343_v37  ;;  %1206 = vmatmul.bf16.gmra.mxu0 %v2087_v35  ;;  %v2131_v37 = vor.u32 %v2373_v26, %v2128_v27 }
 0x13c   : > { %1295 = vmatmul.bf16.gmra.mxu1 %v2091_v36  ;;  %v2127_v36 = vor.u32 %v2375_v25, %v2126_v24 }
 0x13d   : > { %v1510_v44 = vadd.f32 %v1432_v43, %v482_v42  ;;  %1384 = vmatmul.bf16.gmra.mxu2 %v2095_v40 }
 0x13e   : > { %1473 = vmatmul.bf16.gmra.mxu3 %v2099_v41 }
 0x13f   : > { %1542 = vst [vmem:[#allocation2] sm:$0xff] %v1510_v44 }
 0x140   : > { %v1345_v46 = vpop.f32.mrf.mxu2  ;;  %v1169_v49 = vpop.f32.mrf.mxu0 }
 0x141   : > { %v1434_v47 = vpop.f32.mrf.mxu3  ;;  %v1346_v48 = vadd.f32 %v1345_v46, %v1257_v45  ;;  %v1258_v50 = vpop.f32.mrf.mxu1 }
 0x142   : > { %v1259_v62 = vadd.f32 %v1258_v50, %v1169_v49  ;;  %v2134_v49 = vld [vmem:[%s2782_s14 + $0x180] sm:$0xf]  ;;  %v2378_v50 = vld [vmem:[%s2782_s14 + $0x18c] sm:$0xf0] }
 0x143   : > { %v1435_v52 = vadd.f32 %v1434_v47, %v1346_v48  ;;  %v487_v47 = vld [vmem:[#allocation2 + $0x30] sm:$0xff]  ;;  %v2135_v61 = vor.u32 %v2378_v50, %v2134_v49  ;;  %v2174_v50 = vld [vmem:[%s2782_s14 + $0x1c8] sm:$0xf] }
 0x144   : > { %v2168_v49 = vld [vmem:[%s2782_s14 + $0x1d0] sm:$0xf0] }
 0x145   : > { %v1511_v55 = vadd.f32 %v1435_v52, %v483_v51  ;;  %v2376_v52 = vld [vmem:[%s2782_s14 + $0x184] sm:$0xf] }
 0x147   : > { %1543 = vst [vmem:[#allocation2 + $0xd8] sm:$0xff] %v1511_v55  ;;  %v2379_v55 = vld [vmem:[%s2782_s14 + $0x194] sm:$0xf0] }
 0x148   : > { %v1347_v63 = vpop.f32.mrf.mxu2  ;;  %v1172_v4 = vpop.f32.mrf.mxu0 }
 0x149   : > { %v1436_v0 = vpop.f32.mrf.mxu3  ;;  %v1348_v3 = vadd.f32 %v1347_v63, %v1259_v62  ;;  %v1261_v5 = vpop.f32.mrf.mxu1  ;;  %v2139_v62 = vor.u32 %v2376_v52, %v2136_v53  ;;  %v2385_v52 = vld [vmem:[%s2782_s14 + $0x1cc] sm:$0xf]  ;;  %v2176_v53 = vld [vmem:[%s2782_s14 + $0x1d8] sm:$0xf0] }
 0x14a   : > { %v1262_v11 = vadd.f32 %v1261_v5, %v1172_v4  ;;  %v488_v4 = vld [vmem:[#allocation2 + $0x48] sm:$0xff] }
 0x14b   : > { %v1437_v9 = vadd.f32 %v1436_v0, %v1348_v3  ;;  %1211 = vmatmul.bf16.gmra.mxu0 %v2103_v1  ;;  %v2147_v3 = vor.u32 %v2377_v56, %v2144_v57 }
 0x14c   : > { %1300 = vmatmul.bf16.gmra.mxu1 %v2107_v2  ;;  %v2143_v2 = vor.u32 %v2379_v55, %v2142_v54 }
 0x14d   : > { %v1512_v10 = vadd.f32 %v1437_v9, %v484_v8  ;;  %1389 = vmatmul.bf16.gmra.mxu2 %v2111_v6 }
 0x14e   : > { %1478 = vmatmul.bf16.gmra.mxu3 %v2115_v7 }
 0x14f   : > { %1544 = vst [vmem:[#allocation2 + $0x18] sm:$0xff] %v1512_v10 }
 0x150   : > { %v1350_v12 = vpop.f32.mrf.mxu2  ;;  %v1174_v15 = vpop.f32.mrf.mxu0 }
 0x151   : > { %v1439_v13 = vpop.f32.mrf.mxu3  ;;  %v1351_v14 = vadd.f32 %v1350_v12, %v1262_v11  ;;  %v1263_v16 = vpop.f32.mrf.mxu1 }
 0x152   : > { %v1264_v28 = vadd.f32 %v1263_v16, %v1174_v15  ;;  %v2150_v15 = vld [vmem:[%s2782_s14 + $0x1a0] sm:$0xf]  ;;  %v2382_v16 = vld [vmem:[%s2782_s14 + $0x1ac] sm:$0xf0] }
 0x153   : > { %v1440_v18 = vadd.f32 %v1439_v13, %v1351_v14  ;;  %v489_v13 = vld [vmem:[#allocation2 + $0x80] sm:$0xff]  ;;  %v2151_v27 = vor.u32 %v2382_v16, %v2150_v15  ;;  %v2184_v15 = vld [vmem:[%s2782_s14 + $0x1f0] sm:$0xf0]  ;;  %v2190_v16 = vld [vmem:[%s2782_s14 + $0x1e8] sm:$0xf] }
 0x155   : > { %v1513_v21 = vadd.f32 %v1440_v18, %v485_v17  ;;  %v2380_v18 = vld [vmem:[%s2782_s14 + $0x1a4] sm:$0xf] }
 0x157   : > { %1545 = vst [vmem:[#allocation2 + $0x50] sm:$0xff] %v1513_v21  ;;  %v2383_v21 = vld [vmem:[%s2782_s14 + $0x1b4] sm:$0xf0] }
 0x158   : > { %v1352_v29 = vpop.f32.mrf.mxu2  ;;  %v1177_v34 = vpop.f32.mrf.mxu0 }
 0x159   : > { %v1441_v30 = vpop.f32.mrf.mxu3  ;;  %v1353_v33 = vadd.f32 %v1352_v29, %v1264_v28  ;;  %v1266_v35 = vpop.f32.mrf.mxu1  ;;  %v2155_v28 = vor.u32 %v2380_v18, %v2152_v19  ;;  %v2389_v18 = vld [vmem:[%s2782_s14 + $0x1ec] sm:$0xf]  ;;  %v2192_v19 = vld [vmem:[%s2782_s14 + $0x1f8] sm:$0xf0] }
 0x15a   : > { %v1267_v41 = vadd.f32 %v1266_v35, %v1177_v34  ;;  %v490_v34 = vld [vmem:[#allocation2 + $0x88] sm:$0xff] }
 0x15b   : > { %v1442_v39 = vadd.f32 %v1441_v30, %v1353_v33  ;;  %1216 = vmatmul.bf16.gmra.mxu0 %v2119_v31  ;;  %v2163_v33 = vor.u32 %v2381_v22, %v2160_v23 }
 0x15c   : > { %1305 = vmatmul.bf16.gmra.mxu1 %v2123_v32  ;;  %v2159_v32 = vor.u32 %v2383_v21, %v2158_v20 }
 0x15d   : > { %v1514_v40 = vadd.f32 %v1442_v39, %v486_v38  ;;  %1394 = vmatmul.bf16.gmra.mxu2 %v2127_v36 }
 0x15e   : > { %1483 = vmatmul.bf16.gmra.mxu3 %v2131_v37 }
 0x15f   : > { %1546 = vst [vmem:[#allocation2 + $0x68] sm:$0xff] %v1514_v40 }
 0x160   : > { %v1355_v42 = vpop.f32.mrf.mxu2  ;;  %v1179_v45 = vpop.f32.mrf.mxu0 }
 0x161   : > { %v1444_v43 = vpop.f32.mrf.mxu3  ;;  %v1356_v44 = vadd.f32 %v1355_v42, %v1267_v41  ;;  %v1268_v46 = vpop.f32.mrf.mxu1 }
 0x162   : > { %v1269_v58 = vadd.f32 %v1268_v46, %v1179_v45  ;;  %v2166_v45 = vld [vmem:[%s2782_s14 + $0x1c0] sm:$0xf]  ;;  %v2386_v46 = vld [vmem:[%s2782_s14 + $0x1cc] sm:$0xf0] }
 0x163   : > { %v1445_v48 = vadd.f32 %v1444_v43, %v1356_v44  ;;  %v491_v43 = vld [vmem:[#allocation2 + $0xe8] sm:$0xff]  ;;  %v2167_v57 = vor.u32 %v2386_v46, %v2166_v45 }
 0x165   : > { %v1515_v51 = vadd.f32 %v1445_v48, %v487_v47  ;;  %v2384_v48 = vld [vmem:[%s2782_s14 + $0x1c4] sm:$0xf] }
 0x167   : > { %1547 = vst [vmem:[#allocation2 + $0x30] sm:$0xff] %v1515_v51  ;;  %v2387_v51 = vld [vmem:[%s2782_s14 + $0x1d4] sm:$0xf0] }
 0x168   : > { %v1357_v59 = vpop.f32.mrf.mxu2  ;;  %v1182_v0 = vpop.f32.mrf.mxu0 }
 0x169   : > { %v1446_v60 = vpop.f32.mrf.mxu3  ;;  %v1358_v63 = vadd.f32 %v1357_v59, %v1269_v58  ;;  %v1271_v1 = vpop.f32.mrf.mxu1  ;;  %v2171_v58 = vor.u32 %v2384_v48, %v2168_v49  ;;  %v496_v48 = vld [vmem:[#allocation2 + $0x78] sm:$0xff] }
 0x16a   : > { %v1272_v7 = vadd.f32 %v1271_v1, %v1182_v0  ;;  %v492_v0 = vld [vmem:[#allocation2 + $0xb8] sm:$0xff] }
 0x16b   : > { %v1447_v5 = vadd.f32 %v1446_v60, %v1358_v63  ;;  %1221 = vmatmul.bf16.gmra.mxu0 %v2135_v61  ;;  %v2179_v63 = vor.u32 %v2385_v52, %v2176_v53 }
 0x16c   : > { %1310 = vmatmul.bf16.gmra.mxu1 %v2139_v62  ;;  %v2175_v62 = vor.u32 %v2387_v51, %v2174_v50 }
 0x16d   : > { %v1516_v6 = vadd.f32 %v1447_v5, %v488_v4  ;;  %1399 = vmatmul.bf16.gmra.mxu2 %v2143_v2 }
 0x16e   : > { %1488 = vmatmul.bf16.gmra.mxu3 %v2147_v3 }
 0x16f   : > { %1548 = vst [vmem:[#allocation2 + $0x48] sm:$0xff] %v1516_v6 }
 0x170   : > { %v1360_v8 = vpop.f32.mrf.mxu2  ;;  %v1184_v11 = vpop.f32.mrf.mxu0 }
 0x171   : > { %v1449_v9 = vpop.f32.mrf.mxu3  ;;  %v1361_v10 = vadd.f32 %v1360_v8, %v1272_v7  ;;  %v1273_v12 = vpop.f32.mrf.mxu1 }
 0x172   : > { %v1274_v24 = vadd.f32 %v1273_v12, %v1184_v11  ;;  %v2182_v11 = vld [vmem:[%s2782_s14 + $0x1e0] sm:$0xf]  ;;  %v2390_v12 = vld [vmem:[%s2782_s14 + $0x1ec] sm:$0xf0] }
 0x173   : > { %v1450_v14 = vadd.f32 %v1449_v9, %v1361_v10  ;;  %v493_v9 = vld [vmem:[#allocation2 + $0x60] sm:$0xff]  ;;  %v2183_v23 = vor.u32 %v2390_v12, %v2182_v11 }
 0x174   : > { %v499_v11 = vld [vmem:[#allocation2 + $0x40] sm:$0xff] }
 0x175   : > { %v1517_v17 = vadd.f32 %v1450_v14, %v489_v13  ;;  %v2388_v14 = vld [vmem:[%s2782_s14 + $0x1e4] sm:$0xf] }
 0x177   : > { %1549 = vst [vmem:[#allocation2 + $0x80] sm:$0xff] %v1517_v17  ;;  %v2391_v17 = vld [vmem:[%s2782_s14 + $0x1f4] sm:$0xf0] }
 0x178   : > { %v1362_v25 = vpop.f32.mrf.mxu2  ;;  %v1187_v30 = vpop.f32.mrf.mxu0 }
 0x179   : > { %v1451_v26 = vpop.f32.mrf.mxu3  ;;  %v1363_v29 = vadd.f32 %v1362_v25, %v1274_v24  ;;  %v1276_v31 = vpop.f32.mrf.mxu1  ;;  %v2187_v24 = vor.u32 %v2388_v14, %v2184_v15 }
 0x17a   : > { %v1277_v37 = vadd.f32 %v1276_v31, %v1187_v30  ;;  %v494_v30 = vld [vmem:[#allocation2 + $0xf0] sm:$0xff] }
 0x17b   : > { %v1452_v35 = vadd.f32 %v1451_v26, %v1363_v29  ;;  %1226 = vmatmul.bf16.gmra.mxu0 %v2151_v27  ;;  %v2195_v29 = vor.u32 %v2389_v18, %v2192_v19 }
 0x17c   : > { %1315 = vmatmul.bf16.gmra.mxu1 %v2155_v28  ;;  %v2191_v28 = vor.u32 %v2391_v17, %v2190_v16 }
 0x17d   : > { %v1518_v36 = vadd.f32 %v1452_v35, %v490_v34  ;;  %1404 = vmatmul.bf16.gmra.mxu2 %v2159_v32 }
 0x17e   : > { %1493 = vmatmul.bf16.gmra.mxu3 %v2163_v33 }
 0x17f   : > { %1550 = vst [vmem:[#allocation2 + $0x88] sm:$0xff] %v1518_v36 }
 0x180   : > { %v1365_v38 = vpop.f32.mrf.mxu2  ;;  %v1189_v41 = vpop.f32.mrf.mxu0 }
 0x181   : > { %v1454_v39 = vpop.f32.mrf.mxu3  ;;  %v1366_v40 = vadd.f32 %v1365_v38, %v1277_v37  ;;  %v1278_v42 = vpop.f32.mrf.mxu1 }
 0x182   : > { %v1279_v54 = vadd.f32 %v1278_v42, %v1189_v41 }
 0x183   : > { %v1455_v44 = vadd.f32 %v1454_v39, %v1366_v40  ;;  %v495_v39 = vld [vmem:[#allocation2 + $0x8] sm:$0xff] }
 0x185   : > { %v1519_v47 = vadd.f32 %v1455_v44, %v491_v43 }
 0x187   : > { %1551 = vst [vmem:[#allocation2 + $0xe8] sm:$0xff] %v1519_v47 }
 0x188   : > { %v1367_v55 = vpop.f32.mrf.mxu2  ;;  %v1192_v60 = vpop.f32.mrf.mxu0 }
 0x189   : > { %v1456_v56 = vpop.f32.mrf.mxu3  ;;  %v1368_v59 = vadd.f32 %v1367_v55, %v1279_v54  ;;  %v1281_v61 = vpop.f32.mrf.mxu1 }
 0x18a   : > { %v1282_v3 = vadd.f32 %v1281_v61, %v1192_v60 }
 0x18b   : > { %v1457_v1 = vadd.f32 %v1456_v56, %v1368_v59  ;;  %1231 = vmatmul.bf16.gmra.mxu0 %v2167_v57  ;;  %v497_v57 = vld [vmem:[#allocation2 + $0x38] sm:$0xff] }
 0x18c   : > { %1320 = vmatmul.bf16.gmra.mxu1 %v2171_v58 }
 0x18d   : > { %v1520_v2 = vadd.f32 %v1457_v1, %v492_v0  ;;  %1409 = vmatmul.bf16.gmra.mxu2 %v2175_v62 }
 0x18e   : > { %1498 = vmatmul.bf16.gmra.mxu3 %v2179_v63 }
 0x18f   : > { %1552 = vst [vmem:[#allocation2 + $0xb8] sm:$0xff] %v1520_v2  ;;  %v498_v2 = vld [vmem:[#allocation2 + $0x58] sm:$0xff] }
 0x190   : > { %v1370_v4 = vpop.f32.mrf.mxu2  ;;  %v1194_v7 = vpop.f32.mrf.mxu0 }
 0x191   : > { %v1459_v5 = vpop.f32.mrf.mxu3  ;;  %v1371_v6 = vadd.f32 %v1370_v4, %v1282_v3  ;;  %v1283_v8 = vpop.f32.mrf.mxu1 }
 0x192   : > { %v1284_v20 = vadd.f32 %v1283_v8, %v1194_v7 }
 0x193   : > { %v1460_v10 = vadd.f32 %v1459_v5, %v1371_v6 }
 0x195   : > { %v1521_v13 = vadd.f32 %v1460_v10, %v493_v9 }
 0x197   : > { %1553 = vst [vmem:[#allocation2 + $0x60] sm:$0xff] %v1521_v13 }
 0x198   : > { %v1372_v21 = vpop.f32.mrf.mxu2  ;;  %v1197_v26 = vpop.f32.mrf.mxu0 }
 0x199   : > { %v1461_v22 = vpop.f32.mrf.mxu3  ;;  %v1373_v25 = vadd.f32 %v1372_v21, %v1284_v20  ;;  %v1286_v27 = vpop.f32.mrf.mxu1  ;;  %v500_v20 = vld [vmem:[#allocation2 + $0xc8] sm:$0xff] }
 0x19a   : > { %v1287_v33 = vadd.f32 %v1286_v27, %v1197_v26 }
 0x19b   : > { %v1462_v31 = vadd.f32 %v1461_v22, %v1373_v25  ;;  %1236 = vmatmul.bf16.gmra.mxu0 %v2183_v23 }
 0x19c   : > { %1325 = vmatmul.bf16.gmra.mxu1 %v2187_v24 }
 0x19d   : > { %v1522_v32 = vadd.f32 %v1462_v31, %v494_v30  ;;  %1414 = vmatmul.bf16.gmra.mxu2 %v2191_v28 }
 0x19e   : > { %1503 = vmatmul.bf16.gmra.mxu3 %v2195_v29  ;;  %v501_v29 = vld [vmem:[#allocation2 + $0xe0] sm:$0xff] }
 0x19f   : > { %1554 = vst [vmem:[#allocation2 + $0xf0] sm:$0xff] %v1522_v32 }
 0x1a0   : > { %v1375_v34 = vpop.f32.mrf.mxu2  ;;  %v1199_v37 = vpop.f32.mrf.mxu0 }
 0x1a1   : > { %v1464_v35 = vpop.f32.mrf.mxu3  ;;  %v1376_v36 = vadd.f32 %v1375_v34, %v1287_v33  ;;  %v1288_v38 = vpop.f32.mrf.mxu1 }
 0x1a2   : > { %v1289_v42 = vadd.f32 %v1288_v38, %v1199_v37  ;;  %v502_v38 = vld [vmem:[#allocation2 + $0x90] sm:$0xff] }
 0x1a3   : > { %v1465_v40 = vadd.f32 %v1464_v35, %v1376_v36 }
 0x1a5   : > { %v1523_v41 = vadd.f32 %v1465_v40, %v495_v39 }
 0x1a7   : > { %1555 = vst [vmem:[#allocation2 + $0x8] sm:$0xff] %v1523_v41 }
 0x1a8   : > { %v1377_v43 = vpop.f32.mrf.mxu2  ;;  %v1202_v46 = vpop.f32.mrf.mxu0 }
 0x1a9   : > { %v1466_v44 = vpop.f32.mrf.mxu3  ;;  %v1378_v45 = vadd.f32 %v1377_v43, %v1289_v42  ;;  %v1291_v47 = vpop.f32.mrf.mxu1 }
 0x1aa   : > { %v1292_v51 = vadd.f32 %v1291_v47, %v1202_v46  ;;  %v503_v47 = vld [vmem:[#allocation2 + $0x70] sm:$0xff] }
 0x1ab   : > { %v1467_v49 = vadd.f32 %v1466_v44, %v1378_v45 }
 0x1ad   : > { %v1524_v50 = vadd.f32 %v1467_v49, %v496_v48 }
 0x1af   : > { %1556 = vst [vmem:[#allocation2 + $0x78] sm:$0xff] %v1524_v50 }
 0x1b0   : > { %v1380_v52 = vpop.f32.mrf.mxu2  ;;  %v1204_v55 = vpop.f32.mrf.mxu0 }
 0x1b1   : > { %v1469_v53 = vpop.f32.mrf.mxu3  ;;  %v1381_v54 = vadd.f32 %v1380_v52, %v1292_v51  ;;  %v1293_v56 = vpop.f32.mrf.mxu1 }
 0x1b2   : > { %v1294_v60 = vadd.f32 %v1293_v56, %v1204_v55  ;;  %v504_v56 = vld [vmem:[#allocation2 + $0xc0] sm:$0xff] }
 0x1b3   : > { %v1470_v58 = vadd.f32 %v1469_v53, %v1381_v54 }
 0x1b5   : > { %v1525_v59 = vadd.f32 %v1470_v58, %v497_v57 }
 0x1b7   : > { %1557 = vst [vmem:[#allocation2 + $0x38] sm:$0xff] %v1525_v59 }
 0x1b8   : > { %v1382_v61 = vpop.f32.mrf.mxu2  ;;  %v1207_v0 = vpop.f32.mrf.mxu0 }
 0x1b9   : > { %v1471_v62 = vpop.f32.mrf.mxu3  ;;  %v1383_v63 = vadd.f32 %v1382_v61, %v1294_v60  ;;  %v1296_v1 = vpop.f32.mrf.mxu1 }
 0x1ba   : > { %v1297_v5 = vadd.f32 %v1296_v1, %v1207_v0  ;;  %v505_v1 = vld [vmem:[#allocation2 + $0xa8] sm:$0xff] }
 0x1bb   : > { %v1472_v3 = vadd.f32 %v1471_v62, %v1383_v63 }
 0x1bd   : > { %v1526_v4 = vadd.f32 %v1472_v3, %v498_v2 }
 0x1bf   : > { %1558 = vst [vmem:[#allocation2 + $0x58] sm:$0xff] %v1526_v4 }
 0x1c0   : > { %v1385_v6 = vpop.f32.mrf.mxu2  ;;  %v1209_v9 = vpop.f32.mrf.mxu0 }
 0x1c1   : > { %v1474_v7 = vpop.f32.mrf.mxu3  ;;  %v1386_v8 = vadd.f32 %v1385_v6, %v1297_v5  ;;  %v1298_v10 = vpop.f32.mrf.mxu1 }
 0x1c2   : > { %v1299_v14 = vadd.f32 %v1298_v10, %v1209_v9  ;;  %v506_v10 = vld [vmem:[#allocation2 + $0xd0] sm:$0xff] }
 0x1c3   : > { %v1475_v12 = vadd.f32 %v1474_v7, %v1386_v8 }
 0x1c5   : > { %v1527_v13 = vadd.f32 %v1475_v12, %v499_v11 }
 0x1c7   : > { %1559 = vst [vmem:[#allocation2 + $0x40] sm:$0xff] %v1527_v13 }
 0x1c8   : > { %v1387_v15 = vpop.f32.mrf.mxu2  ;;  %v1212_v18 = vpop.f32.mrf.mxu0 }
 0x1c9   : > { %v1476_v16 = vpop.f32.mrf.mxu3  ;;  %v1388_v17 = vadd.f32 %v1387_v15, %v1299_v14  ;;  %v1301_v19 = vpop.f32.mrf.mxu1 }
 0x1ca   : > { %v1302_v23 = vadd.f32 %v1301_v19, %v1212_v18  ;;  %v507_v19 = vld [vmem:[#allocation2 + $0x10] sm:$0xff] }
 0x1cb   : > { %v1477_v21 = vadd.f32 %v1476_v16, %v1388_v17 }
 0x1cd   : > { %v1528_v22 = vadd.f32 %v1477_v21, %v500_v20 }
 0x1cf   : > { %1560 = vst [vmem:[#allocation2 + $0xc8] sm:$0xff] %v1528_v22 }
 0x1d0   : > { %v1390_v24 = vpop.f32.mrf.mxu2  ;;  %v1214_v27 = vpop.f32.mrf.mxu0 }
 0x1d1   : > { %v1479_v25 = vpop.f32.mrf.mxu3  ;;  %v1391_v26 = vadd.f32 %v1390_v24, %v1302_v23  ;;  %v1303_v28 = vpop.f32.mrf.mxu1 }
 0x1d2   : > { %v1304_v32 = vadd.f32 %v1303_v28, %v1214_v27  ;;  %v508_v28 = vld [vmem:[#allocation2 + $0x28] sm:$0xff] }
 0x1d3   : > { %v1480_v30 = vadd.f32 %v1479_v25, %v1391_v26 }
 0x1d5   : > { %v1529_v31 = vadd.f32 %v1480_v30, %v501_v29 }
 0x1d7   : > { %1561 = vst [vmem:[#allocation2 + $0xe0] sm:$0xff] %v1529_v31 }
 0x1d8   : > { %v1392_v33 = vpop.f32.mrf.mxu2  ;;  %v1217_v36 = vpop.f32.mrf.mxu0 }
 0x1d9   : > { %v1481_v34 = vpop.f32.mrf.mxu3  ;;  %v1393_v35 = vadd.f32 %v1392_v33, %v1304_v32  ;;  %v1306_v37 = vpop.f32.mrf.mxu1 }
 0x1da   : > { %v1307_v41 = vadd.f32 %v1306_v37, %v1217_v36  ;;  %v509_v37 = vld [vmem:[#allocation2 + $0xa0] sm:$0xff] }
 0x1db   : > { %v1482_v39 = vadd.f32 %v1481_v34, %v1393_v35 }
 0x1dd   : > { %v1530_v40 = vadd.f32 %v1482_v39, %v502_v38 }
 0x1df   : > { %1562 = vst [vmem:[#allocation2 + $0x90] sm:$0xff] %v1530_v40 }
 0x1e0   : > { %v1395_v42 = vpop.f32.mrf.mxu2  ;;  %v1219_v45 = vpop.f32.mrf.mxu0 }
 0x1e1   : > { %v1484_v43 = vpop.f32.mrf.mxu3  ;;  %v1396_v44 = vadd.f32 %v1395_v42, %v1307_v41  ;;  %v1308_v46 = vpop.f32.mrf.mxu1 }
 0x1e2   : > { %v1309_v50 = vadd.f32 %v1308_v46, %v1219_v45 }
 0x1e3   : > { %v1485_v48 = vadd.f32 %v1484_v43, %v1396_v44  ;;  %v510_v44 = vld [vmem:[#allocation2 + $0xf8] sm:$0xff] }
 0x1e5   : > { %v1531_v49 = vadd.f32 %v1485_v48, %v503_v47 }
 0x1e7   : > { %1563 = vst [vmem:[#allocation2 + $0x70] sm:$0xff] %v1531_v49 }
 0x1e8   : > { %v1397_v51 = vpop.f32.mrf.mxu2  ;;  %v1222_v54 = vpop.f32.mrf.mxu0 }
 0x1e9   : > { %v1486_v52 = vpop.f32.mrf.mxu3  ;;  %v1398_v53 = vadd.f32 %v1397_v51, %v1309_v50  ;;  %v1311_v55 = vpop.f32.mrf.mxu1 }
 0x1ea   : > { %v1312_v59 = vadd.f32 %v1311_v55, %v1222_v54 }
 0x1eb   : > { %v1487_v57 = vadd.f32 %v1486_v52, %v1398_v53  ;;  %v511_v53 = vld [vmem:[#allocation2 + $0x20] sm:$0xff] }
 0x1ed   : > { %v1532_v58 = vadd.f32 %v1487_v57, %v504_v56 }
 0x1ef   : > { %1564 = vst [vmem:[#allocation2 + $0xc0] sm:$0xff] %v1532_v58 }
 0x1f0   : > { %v1400_v60 = vpop.f32.mrf.mxu2  ;;  %v1224_v63 = vpop.f32.mrf.mxu0 }
 0x1f1   : > { %v1489_v61 = vpop.f32.mrf.mxu3  ;;  %v1401_v62 = vadd.f32 %v1400_v60, %v1312_v59  ;;  %v1313_v0 = vpop.f32.mrf.mxu1 }
 0x1f2   : > { %v1314_v4 = vadd.f32 %v1313_v0, %v1224_v63 }
 0x1f3   : > { %v1490_v2 = vadd.f32 %v1489_v61, %v1401_v62  ;;  %v512_v61 = vld [vmem:[#allocation2 + $0x98] sm:$0xff] }
 0x1f5   : > { %v1533_v3 = vadd.f32 %v1490_v2, %v505_v1 }
 0x1f7   : > { %1565 = vst [vmem:[#allocation2 + $0xa8] sm:$0xff] %v1533_v3 }
 0x1f8   : > { %v1402_v5 = vpop.f32.mrf.mxu2  ;;  %v1227_v8 = vpop.f32.mrf.mxu0 }
 0x1f9   : > { %v1491_v6 = vpop.f32.mrf.mxu3  ;;  %v1403_v7 = vadd.f32 %v1402_v5, %v1314_v4  ;;  %v1316_v9 = vpop.f32.mrf.mxu1 }
 0x1fa   : > { %v1317_v13 = vadd.f32 %v1316_v9, %v1227_v8 }
 0x1fb   : > { %v1492_v11 = vadd.f32 %v1491_v6, %v1403_v7 }
 0x1fd   : > { %v1534_v12 = vadd.f32 %v1492_v11, %v506_v10 }
 0x1ff   : > { %1566 = vst [vmem:[#allocation2 + $0xd0] sm:$0xff] %v1534_v12 }
 0x200   : > { %v1405_v14 = vpop.f32.mrf.mxu2  ;;  %v1229_v17 = vpop.f32.mrf.mxu0 }
 0x201   : > { %v1494_v15 = vpop.f32.mrf.mxu3  ;;  %v1406_v16 = vadd.f32 %v1405_v14, %v1317_v13  ;;  %v1318_v18 = vpop.f32.mrf.mxu1 }
 0x202   : > { %v1319_v22 = vadd.f32 %v1318_v18, %v1229_v17 }
 0x203   : > { %v1495_v20 = vadd.f32 %v1494_v15, %v1406_v16 }
 0x205   : > { %v1535_v21 = vadd.f32 %v1495_v20, %v507_v19 }
 0x207   : > { %1567 = vst [vmem:[#allocation2 + $0x10] sm:$0xff] %v1535_v21 }
 0x208   : > { %v1407_v23 = vpop.f32.mrf.mxu2  ;;  %v1232_v26 = vpop.f32.mrf.mxu0 }
 0x209   : > { %v1496_v24 = vpop.f32.mrf.mxu3  ;;  %v1408_v25 = vadd.f32 %v1407_v23, %v1319_v22  ;;  %v1321_v27 = vpop.f32.mrf.mxu1 }
 0x20a   : > { %v1322_v31 = vadd.f32 %v1321_v27, %v1232_v26 }
 0x20b   : > { %v1497_v29 = vadd.f32 %v1496_v24, %v1408_v25 }
 0x20d   : > { %v1536_v30 = vadd.f32 %v1497_v29, %v508_v28 }
 0x20f   : > { %1568 = vst [vmem:[#allocation2 + $0x28] sm:$0xff] %v1536_v30 }
 0x210   : > { %v1410_v32 = vpop.f32.mrf.mxu2  ;;  %v1234_v35 = vpop.f32.mrf.mxu0 }
 0x211   : > { %v1499_v33 = vpop.f32.mrf.mxu3  ;;  %v1411_v34 = vadd.f32 %v1410_v32, %v1322_v31  ;;  %v1323_v36 = vpop.f32.mrf.mxu1 }
 0x212   : > { %v1324_v40 = vadd.f32 %v1323_v36, %v1234_v35 }
 0x213   : > { %v1500_v38 = vadd.f32 %v1499_v33, %v1411_v34 }
 0x215   : > { %v1537_v39 = vadd.f32 %v1500_v38, %v509_v37 }
 0x217   : > { %1569 = vst [vmem:[#allocation2 + $0xa0] sm:$0xff] %v1537_v39 }
 0x218   : > { %v1412_v41 = vpop.f32.mrf.mxu2  ;;  %v1237_v45 = vpop.f32.mrf.mxu0 }
 0x219   : > { %v1501_v42 = vpop.f32.mrf.mxu3  ;;  %v1413_v43 = vadd.f32 %v1412_v41, %v1324_v40  ;;  %v1326_v46 = vpop.f32.mrf.mxu1 }
 0x21a   : > { %v1327_v49 = vadd.f32 %v1326_v46, %v1237_v45 }
 0x21b   : > { %v1502_v47 = vadd.f32 %v1501_v42, %v1413_v43 }
 0x21d   : > { %v1538_v48 = vadd.f32 %v1502_v47, %v510_v44 }
 0x21f   : > { %1570 = vst [vmem:[#allocation2 + $0xf8] sm:$0xff] %v1538_v48 }
 0x220   : > { %v1415_v50 = vpop.f32.mrf.mxu2  ;;  %v1239_v55 = vpop.f32.mrf.mxu0 }
 0x221   : > { %v1504_v51 = vpop.f32.mrf.mxu3  ;;  %v1416_v52 = vadd.f32 %v1415_v50, %v1327_v49  ;;  %v1328_v56 = vpop.f32.mrf.mxu1 }
 0x222   : > { %v1329_v58 = vadd.f32 %v1328_v56, %v1239_v55 }
 0x223   : > { %v1505_v54 = vadd.f32 %v1504_v51, %v1416_v52 }
 0x225   : > { %v1539_v57 = vadd.f32 %v1505_v54, %v511_v53 }
 0x227   : > { %1571 = vst [vmem:[#allocation2 + $0x20] sm:$0xff] %v1539_v57 }
 0x228   : > { %v1417_v59 = vpop.f32.mrf.mxu2 }
 0x229   : > { %v1418_v60 = vadd.f32 %v1417_v59, %v1329_v58  ;;  %v1506_v62 = vpop.f32.mrf.mxu3 }
 0x22b   : > { %v1507_v63 = vadd.f32 %v1506_v62, %v1418_v60  ;;  %1576 = sbr.rel (%p2324_p0) target bundleno = 638 (0x27e), region = 59 }
 0x22d   : > { %v1540_v0 = vadd.f32 %v1507_v63, %v512_v61 }
 0x22f   : > { %1572 = vst [vmem:[#allocation2 + $0x98] sm:$0xff] %v1540_v0 }
 0x230   : > { %v1577_v1 = vld [vmem:[#allocation2 + $0xb0] sm:$0xff]  ;;  %v1578_v2 = vld [vmem:[#allocation2] sm:$0xff]  ;;  %v1579_v3 = vld [vmem:[#allocation2 + $0xd8] sm:$0xff] }
 0x231   : > { %1609 = vst [vmem:[%s2772_s7] sm:$0xff] %v1577_v1  ;;  %v1679_v4 = vmul.f32 %v1577_v1, %v1577_v1  ;;  %v1641_v5 = vadd.f32 %v1578_v2, %v1577_v1  ;;  %v1680_v6 = vmul.f32 %v1578_v2, %v1578_v2  ;;  %v1681_v7 = vmul.f32 %v1579_v3, %v1579_v3  ;;  %v1580_v8 = vld [vmem:[#allocation2 + $0x18] sm:$0xff]  ;;  %v1581_v9 = vld [vmem:[#allocation2 + $0x50] sm:$0xff]  ;;  %v1582_v13 = vld [vmem:[#allocation2 + $0x68] sm:$0xff] }
 0x232   : > { %1610 = vst [vmem:[%s2772_s7 + $0x8] sm:$0xff] %v1578_v2  ;;  %v1682_v12 = vmul.f32 %v1580_v8, %v1580_v8  ;;  %v1683_v16 = vmul.f32 %v1581_v9, %v1581_v9  ;;  %v1583_v17 = vld [vmem:[#allocation2 + $0x30] sm:$0xff]  ;;  %v1684_v20 = vmul.f32 %v1582_v13, %v1582_v13  ;;  %v1584_v21 = vld [vmem:[#allocation2 + $0x48] sm:$0xff]  ;;  %v1585_v22 = vld [vmem:[#allocation2 + $0x80] sm:$0xff] }
 0x233   : > { %v1711_v10 = vadd.f32 %v1680_v6, %v1679_v4  ;;  %1611 = vst [vmem:[%s2772_s7 + $0x10] sm:$0xff] %v1579_v3  ;;  %v1642_v11 = vadd.f32 %v1641_v5, %v1579_v3  ;;  %v1685_v25 = vmul.f32 %v1583_v17, %v1583_v17  ;;  %v1586_v26 = vld [vmem:[#allocation2 + $0x88] sm:$0xff]  ;;  %v1686_v30 = vmul.f32 %v1584_v21, %v1584_v21  ;;  %v1588_v31 = vld [vmem:[#allocation2 + $0xb8] sm:$0xff]  ;;  %v1589_v32 = vld [vmem:[#allocation2 + $0x60] sm:$0xff] }
 0x234   : > { %1612 = vst [vmem:[%s2772_s7 + $0x18] sm:$0xff] %v1580_v8  ;;  %v1587_v27 = vld [vmem:[#allocation2 + $0xe8] sm:$0xff]  ;;  %v1687_v35 = vmul.f32 %v1585_v22, %v1585_v22  ;;  %v1590_v36 = vld [vmem:[#allocation2 + $0xf0] sm:$0xff]  ;;  %v1688_v40 = vmul.f32 %v1586_v26, %v1586_v26  ;;  %v1592_v41 = vld [vmem:[#allocation2 + $0x78] sm:$0xff]  ;;  %v1690_v50 = vmul.f32 %v1588_v31, %v1588_v31  ;;  %v1691_v55 = vmul.f32 %v1589_v32, %v1589_v32 }
 0x235   : > { %v1712_v14 = vadd.f32 %v1711_v10, %v1681_v7  ;;  %v1643_v15 = vadd.f32 %v1642_v11, %v1580_v8  ;;  %1613 = vst [vmem:[%s2772_s7 + $0x20] sm:$0xff] %v1581_v9  ;;  %v1591_v37 = vld [vmem:[#allocation2 + $0x8] sm:$0xff]  ;;  %v1593_v42 = vld [vmem:[#allocation2 + $0x38] sm:$0xff]  ;;  %v1689_v45 = vmul.f32 %v1587_v27, %v1587_v27  ;;  %v1595_v47 = vld [vmem:[#allocation2 + $0x40] sm:$0xff]  ;;  %v1692_v60 = vmul.f32 %v1590_v36, %v1590_v36 }
 0x236   : > { %1614 = vst [vmem:[%s2772_s7 + $0x28] sm:$0xff] %v1582_v13  ;;  %v1594_v46 = vld [vmem:[#allocation2 + $0x58] sm:$0xff]  ;;  %v1596_v51 = vld [vmem:[#allocation2 + $0xc8] sm:$0xff]  ;;  %v1597_v52 = vld [vmem:[#allocation2 + $0xe0] sm:$0xff]  ;;  %v1693_v1 = vmul.f32 %v1591_v37, %v1591_v37  ;;  %v1694_v6 = vmul.f32 %v1592_v41, %v1592_v41  ;;  %v1695_v11 = vmul.f32 %v1593_v42, %v1593_v42 }
 0x237   : > { %v1713_v18 = vadd.f32 %v1712_v14, %v1682_v12  ;;  %v1644_v19 = vadd.f32 %v1643_v15, %v1581_v9  ;;  %1615 = vst [vmem:[%s2772_s7 + $0x30] sm:$0xff] %v1583_v17  ;;  %v1598_v56 = vld [vmem:[#allocation2 + $0x90] sm:$0xff]  ;;  %v1600_v61 = vld [vmem:[#allocation2 + $0xc0] sm:$0xff]  ;;  %v1601_v62 = vld [vmem:[#allocation2 + $0xa8] sm:$0xff] }
 0x238   : > { %1616 = vst [vmem:[%s2772_s7 + $0x38] sm:$0xff] %v1584_v21  ;;  %v1599_v57 = vld [vmem:[#allocation2 + $0x70] sm:$0xff]  ;;  %v1604_v7 = vld [vmem:[#allocation2 + $0x28] sm:$0xff]  ;;  %v1605_v8 = vld [vmem:[#allocation2 + $0xa0] sm:$0xff] }
 0x239   : > { %v1714_v23 = vadd.f32 %v1713_v18, %v1683_v16  ;;  %v1645_v24 = vadd.f32 %v1644_v19, %v1582_v13  ;;  %1617 = vst [vmem:[%s2772_s7 + $0x40] sm:$0xff] %v1585_v22  ;;  %v1602_v2 = vld [vmem:[#allocation2 + $0xd0] sm:$0xff]  ;;  %v1606_v12 = vld [vmem:[#allocation2 + $0xf8] sm:$0xff]  ;;  %v1607_v13 = vld [vmem:[#allocation2 + $0x20] sm:$0xff]  ;;  %v1696_v16 = vmul.f32 %v1594_v46, %v1594_v46 }
 0x23a   : > { %1618 = vst [vmem:[%s2772_s7 + $0x48] sm:$0xff] %v1586_v26  ;;  %v1603_v3 = vld [vmem:[#allocation2 + $0x10] sm:$0xff] }
 0x23b   : > { %v1715_v28 = vadd.f32 %v1714_v23, %v1684_v20  ;;  %v1646_v29 = vadd.f32 %v1645_v24, %v1583_v17  ;;  %1619 = vst [vmem:[%s2772_s7 + $0x50] sm:$0xff] %v1587_v27  ;;  %v1608_v17 = vld [vmem:[#allocation2 + $0x98] sm:$0xff]  ;;  %v1697_v20 = vmul.f32 %v1595_v47, %v1595_v47  ;;  %v1698_v23 = vmul.f32 %v1596_v51, %v1596_v51 }
 0x23c   : > { %1620 = vst [vmem:[%s2772_s7 + $0x58] sm:$0xff] %v1588_v31 }
 0x23d   : > { %v1716_v33 = vadd.f32 %v1715_v28, %v1685_v25  ;;  %v1647_v34 = vadd.f32 %v1646_v29, %v1584_v21  ;;  %1621 = vst [vmem:[%s2772_s7 + $0x60] sm:$0xff] %v1589_v32  ;;  %v1700_v29 = vmul.f32 %v1598_v56, %v1598_v56 }
 0x23e   : > { %1622 = vst [vmem:[%s2772_s7 + $0x68] sm:$0xff] %v1590_v36 }
 0x23f   : > { %v1717_v38 = vadd.f32 %v1716_v33, %v1686_v30  ;;  %v1648_v39 = vadd.f32 %v1647_v34, %v1585_v22  ;;  %1623 = vst [vmem:[%s2772_s7 + $0x70] sm:$0xff] %v1591_v37 }
 0x240   : > { %1624 = vst [vmem:[%s2772_s7 + $0x78] sm:$0xff] %v1592_v41 }
 0x241   : > { %v1718_v43 = vadd.f32 %v1717_v38, %v1687_v35  ;;  %v1649_v44 = vadd.f32 %v1648_v39, %v1586_v26  ;;  %1625 = vst [vmem:[%s2772_s7 + $0x80] sm:$0xff] %v1593_v42  ;;  %v1699_v26 = vmul.f32 %v1597_v52, %v1597_v52  ;;  %v1702_v35 = vmul.f32 %v1600_v61, %v1600_v61 }
 0x242   : > { %1626 = vst [vmem:[%s2772_s7 + $0x88] sm:$0xff] %v1594_v46  ;;  %v1703_v38 = vmul.f32 %v1601_v62, %v1601_v62 }
 0x243   : > { %v1719_v48 = vadd.f32 %v1718_v43, %v1688_v40  ;;  %v1650_v49 = vadd.f32 %v1649_v44, %v1587_v27  ;;  %1627 = vst [vmem:[%s2772_s7 + $0x90] sm:$0xff] %v1595_v47  ;;  %v1705_v44 = vmul.f32 %v1603_v3, %v1603_v3 }
 0x244   : > { %1628 = vst [vmem:[%s2772_s7 + $0x98] sm:$0xff] %v1596_v51 }
 0x245   : > { %v1720_v53 = vadd.f32 %v1719_v48, %v1689_v45  ;;  %v1651_v54 = vadd.f32 %v1650_v49, %v1588_v31  ;;  %1629 = vst [vmem:[%s2772_s7 + $0xa0] sm:$0xff] %v1597_v52 }
 0x246   : > { %1630 = vst [vmem:[%s2772_s7 + $0xa8] sm:$0xff] %v1598_v56 }
 0x247   : > { %v1721_v58 = vadd.f32 %v1720_v53, %v1690_v50  ;;  %v1652_v59 = vadd.f32 %v1651_v54, %v1589_v32  ;;  %1631 = vst [vmem:[%s2772_s7 + $0xb0] sm:$0xff] %v1599_v57  ;;  %v1701_v32 = vmul.f32 %v1599_v57, %v1599_v57  ;;  %v1707_v50 = vmul.f32 %v1605_v8, %v1605_v8 }
 0x248   : > { %1632 = vst [vmem:[%s2772_s7 + $0xb8] sm:$0xff] %v1600_v61  ;;  %v1708_v53 = vmul.f32 %v1606_v12, %v1606_v12 }
 0x249   : > { %v1722_v63 = vadd.f32 %v1721_v58, %v1691_v55  ;;  %v1653_v0 = vadd.f32 %v1652_v59, %v1590_v36  ;;  %1633 = vst [vmem:[%s2772_s7 + $0xc0] sm:$0xff] %v1601_v62  ;;  %v1710_v59 = vmul.f32 %v1608_v17, %v1608_v17 }
 0x24a   : > { %1634 = vst [vmem:[%s2772_s7 + $0xc8] sm:$0xff] %v1602_v2 }
 0x24b   : > { %v1723_v4 = vadd.f32 %v1722_v63, %v1692_v60  ;;  %v1654_v5 = vadd.f32 %v1653_v0, %v1591_v37  ;;  %1635 = vst [vmem:[%s2772_s7 + $0xd0] sm:$0xff] %v1603_v3 }
 0x24c   : > { %1636 = vst [vmem:[%s2772_s7 + $0xd8] sm:$0xff] %v1604_v7 }
 0x24d   : > { %v1724_v9 = vadd.f32 %v1723_v4, %v1693_v1  ;;  %v1655_v10 = vadd.f32 %v1654_v5, %v1592_v41  ;;  %1637 = vst [vmem:[%s2772_s7 + $0xe0] sm:$0xff] %v1605_v8  ;;  %v1704_v41 = vmul.f32 %v1602_v2, %v1602_v2 }
 0x24e   : > { %1638 = vst [vmem:[%s2772_s7 + $0xe8] sm:$0xff] %v1606_v12 }
 0x24f   : > { %v1725_v14 = vadd.f32 %v1724_v9, %v1694_v6  ;;  %v1656_v15 = vadd.f32 %v1655_v10, %v1593_v42  ;;  %1639 = vst [vmem:[%s2772_s7 + $0xf0] sm:$0xff] %v1607_v13 }
 0x250   : > { %1640 = vst [vmem:[%s2772_s7 + $0xf8] sm:$0xff] %v1608_v17 }
 0x251   : > { %v1726_v18 = vadd.f32 %v1725_v14, %v1695_v11  ;;  %v1657_v19 = vadd.f32 %v1656_v15, %v1594_v46 }
 0x253   : > { %v1727_v21 = vadd.f32 %v1726_v18, %v1696_v16  ;;  %v1658_v22 = vadd.f32 %v1657_v19, %v1595_v47  ;;  %v1706_v47 = vmul.f32 %v1604_v7, %v1604_v7 }
 0x255   : > { %v1728_v24 = vadd.f32 %v1727_v21, %v1697_v20  ;;  %v1659_v25 = vadd.f32 %v1658_v22, %v1596_v51 }
 0x257   : > { %v1729_v27 = vadd.f32 %v1728_v24, %v1698_v23  ;;  %v1660_v28 = vadd.f32 %v1659_v25, %v1597_v52 }
 0x259   : > { %v1730_v30 = vadd.f32 %v1729_v27, %v1699_v26  ;;  %v1661_v31 = vadd.f32 %v1660_v28, %v1598_v56  ;;  %v1709_v56 = vmul.f32 %v1607_v13, %v1607_v13 }
 0x25b   : > { %v1731_v33 = vadd.f32 %v1730_v30, %v1700_v29  ;;  %v1662_v34 = vadd.f32 %v1661_v31, %v1599_v57 }
 0x25d   : > { %v1732_v36 = vadd.f32 %v1731_v33, %v1701_v32  ;;  %v1663_v37 = vadd.f32 %v1662_v34, %v1600_v61 }
 0x25f   : > { %v1733_v39 = vadd.f32 %v1732_v36, %v1702_v35  ;;  %v1664_v40 = vadd.f32 %v1663_v37, %v1601_v62 }
 0x261   : > { %v1734_v42 = vadd.f32 %v1733_v39, %v1703_v38  ;;  %v1665_v43 = vadd.f32 %v1664_v40, %v1602_v2 }
 0x263   : > { %v1735_v45 = vadd.f32 %v1734_v42, %v1704_v41  ;;  %v1666_v46 = vadd.f32 %v1665_v43, %v1603_v3 }
 0x265   : > { %v1736_v48 = vadd.f32 %v1735_v45, %v1705_v44  ;;  %v1667_v49 = vadd.f32 %v1666_v46, %v1604_v7 }
 0x267   : > { %v1737_v51 = vadd.f32 %v1736_v48, %v1706_v47  ;;  %v1668_v52 = vadd.f32 %v1667_v49, %v1605_v8 }
 0x269   : > { %v1738_v54 = vadd.f32 %v1737_v51, %v1707_v50  ;;  %v1669_v55 = vadd.f32 %v1668_v52, %v1606_v12 }
 0x26b   : > { %v1739_v57 = vadd.f32 %v1738_v54, %v1708_v53  ;;  %v1670_v58 = vadd.f32 %v1669_v55, %v1607_v13 }
 0x26d   : > { %v1740_v60 = vadd.f32 %v1739_v57, %v1709_v56  ;;  %v1671_v61 = vadd.f32 %v1670_v58, %v1608_v17 }
 0x26f   : > { %v1672_v62 = vrot.slane %v1671_v61, 4  ;;  %v1741_v63 = vadd.f32 %v1740_v60, %v1710_v59 }
 0x271   : > { %v1673_v0 = vadd.f32 %v1672_v62, %v1671_v61  ;;  %v1742_v1 = vrot.slane %v1741_v63, 4 }
 0x273   : > { %v1674_v2 = vrot.slane %v1673_v0, 2  ;;  %v1743_v3 = vadd.f32 %v1742_v1, %v1741_v63 }
 0x275   : > { %v1675_v4 = vadd.f32 %v1674_v2, %v1673_v0  ;;  %v1744_v5 = vrot.slane %v1743_v3, 2 }
 0x277   : > { %v1676_v6 = vrot.slane %v1675_v4, 1  ;;  %v1745_v7 = vadd.f32 %v1744_v5, %v1743_v3 }
 0x279   : > { %v1677_v8 = vadd.f32 %v1676_v6, %v1675_v4  ;;  %v1746_v9 = vrot.slane %v1745_v7, 1 }
 0x27b   : > { %1678 = vst [vmem:[%s438_s10] sm:$0x1] %v1677_v8  ;;  %v1747_v10 = vadd.f32 %v1746_v9, %v1745_v7 }
 0x27d   : > { %1748 = vst [vmem:[%s444_s13] sm:$0x1] %v1747_v10 }
 0x27e PF: > { %s15_s21 = sadd.s32 1, %s2535_s21   ;;  %s3014_s15 = smov %s2515_s16 }
 0x27f   : > { %p12_p1 = scmp.ge.s32.totalorder %s15_s21, 6   ;;  %s3015_s16 = smov %s2614_s28 }
 0x280   : > { %s3016_s17 = smov %s2527_s19  ;;  %s3017_s18 = smov %s2531_s20 }
 0x281   : > { %s3018_s19 = smov %s3021_s22  ;;  %s3019_s20 = smov %s3025_s23 }
 0x282   :  { %14 = sbr.rel (!%p12_p1) target bundleno = 4 (0x4), region = 121 }

// kernel: d_forward.11
= control target key start
LH: loop header
LB: loop body
LE: loop exit
PB: predicated region body
PF: predicated region fallthrough
CT: control target
= control target key end

     0   :  { %s2508_s15 = smov 0   ;;  %s2510_s16 = smov 0   ;;  %s3069_s0 = inlined_call_operand.vmem [shape: bf16[128,2048], index: 0, kind: input, shape index: {}]   ;;  %s3070_s1 = inlined_call_operand.vmem [shape: bf16[2048,256], index: 1, kind: input, shape index: {}]   ;;  %s3071_s2 = inlined_call_operand.vmem [shape: f32[128,256], index: 2, kind: output, shape index: {0}]   ;;  %s3072_s3 = inlined_call_operand.vmem [shape: f32[1,1,256], index: 3, kind: output, shape index: {1}]   ;;  %s3073_s4 = inlined_call_operand.vmem [shape: f32[1,1,256], index: 4, kind: output, shape index: {2}]  }
   0x1   :  { %s2512_s17 = smov 0   ;;  %s2514_s18 = smov 0  }
   0x2   :  { %s2516_s19 = smov 0  }
   0x3 LB: > { %s27_s20 = sadd.s32 1, %s2476_s18  ;;  %p50_p1 = scmp.ne.s32.totalorder %s2468_s16, %s2464_s15  ;;  %s2480_s19 = sphi %s2516_s19, %s15_s19   ;;  %s2476_s18 = sphi %s2514_s18, %s3077_s18   ;;  %s2472_s17 = sphi %s2512_s17, %s3076_s17   ;;  %s2468_s16 = sphi %s2510_s16, %s3075_s16   ;;  %s2464_s15 = sphi %s2508_s15, %s3074_s15  }
   0x4   : > { %p28_p0 = scmp.ge.s32.totalorder %s27_s20, 4  ;;  %p51_p2 = scmp.eq.s32.totalorder %s2480_s19, 0 }
   0x5   : > { %s43_s22 = sadd.s32 1, %s2468_s16  ;;  %p1900_p5 = scmp.ge.s32.totalorder %s2480_s19, 4 }
   0x6   : > { %s3079_s20 = smov (%p28_p0, %s27_s20), 0  ;;  %p52_p3 = por %p51_p2, %p50_p1 }
   0x7   : > { %s39_s21 = ssub.s32 %s2476_s18, %s3079_s20  ;;  %188 = sbr.rel (%p1900_p5) target bundleno = 48 (0x30), region = 16 }
   0x8   : > { %p41_p4 = scmp.eq.s32.totalorder %s39_s21, 0 }
   0xa   : > { %s2543_s23 = scalar_select %p41_p4, %s2468_s16, %s43_s22  }
   0xc   : > { %191 = sbr.rel (!%p52_p3) target bundleno = 48 (0x30), region = 20  ;;  %s193_s24 = sand.u32 (%p52_p3), 1, %s2468_s16  }
   0xd   : > { %s2303_s25 = sshll.u32 (%p52_p3), %s2476_s18, 4  ;;  %s1901_s26 = sshll.u32 (%p52_p3), %s193_s24, 8 }
   0xe   : > { %s2551_s29 = scalar_lea.vmem (%p52_p3), %s3069_s0, %s2303_s25  ;;  %s2556_s30 = scalar_lea.vmem (%p52_p3), [#allocation3], %s1901_s26 }
   0xf   : > { %v214_v0 = vld [vmem:[%s2551_s29] sm:$0xff] (%p52_p3)  ;;  %v216_v1 = vld [vmem:[%s2551_s29 + $0x8] sm:$0xff] (%p52_p3) }
  0x10   : > { %v218_v2 = vld [vmem:[%s2551_s29 + $0x40] sm:$0xff] (%p52_p3)  ;;  %215 = vst [vmem:[%s2556_s30] sm:$0xff] (%p52_p3), %v214_v0  ;;  %v220_v3 = vld [vmem:[%s2551_s29 + $0x48] sm:$0xff] (%p52_p3) }
  0x11   : > { %217 = vst [vmem:[%s2556_s30 + $0x8] sm:$0xff] %v216_v1  ;;  %v222_v4 = vld [vmem:[%s2551_s29 + $0x80] sm:$0xff]  ;;  %v224_v5 = vld [vmem:[%s2551_s29 + $0x88] sm:$0xff] }
  0x12   : > { %219 = vst [vmem:[%s2556_s30 + $0x10] sm:$0xff] %v218_v2  ;;  %v226_v6 = vld [vmem:[%s2551_s29 + $0xc0] sm:$0xff]  ;;  %v228_v7 = vld [vmem:[%s2551_s29 + $0xc8] sm:$0xff] }
  0x13   : > { %221 = vst [vmem:[%s2556_s30 + $0x18] sm:$0xff] %v220_v3  ;;  %v230_v8 = vld [vmem:[%s2551_s29 + $0x100] sm:$0xff]  ;;  %v232_v9 = vld [vmem:[%s2551_s29 + $0x108] sm:$0xff] }
  0x14   : > { %223 = vst [vmem:[%s2556_s30 + $0x20] sm:$0xff] %v222_v4  ;;  %v234_v10 = vld [vmem:[%s2551_s29 + $0x140] sm:$0xff]  ;;  %v236_v11 = vld [vmem:[%s2551_s29 + $0x148] sm:$0xff] }
  0x15   : > { %225 = vst [vmem:[%s2556_s30 + $0x28] sm:$0xff] %v224_v5  ;;  %v238_v12 = vld [vmem:[%s2551_s29 + $0x180] sm:$0xff]  ;;  %v240_v13 = vld [vmem:[%s2551_s29 + $0x188] sm:$0xff] }
  0x16   : > { %227 = vst [vmem:[%s2556_s30 + $0x30] sm:$0xff] %v226_v6  ;;  %v242_v14 = vld [vmem:[%s2551_s29 + $0x1c0] sm:$0xff]  ;;  %v244_v15 = vld [vmem:[%s2551_s29 + $0x1c8] sm:$0xff] }
  0x17   : > { %229 = vst [vmem:[%s2556_s30 + $0x38] sm:$0xff] %v228_v7  ;;  %v246_v16 = vld [vmem:[%s2551_s29 + $0x200] sm:$0xff]  ;;  %v248_v17 = vld [vmem:[%s2551_s29 + $0x208] sm:$0xff] }
  0x18   : > { %231 = vst [vmem:[%s2556_s30 + $0x40] sm:$0xff] %v230_v8  ;;  %v250_v18 = vld [vmem:[%s2551_s29 + $0x240] sm:$0xff]  ;;  %v252_v19 = vld [vmem:[%s2551_s29 + $0x248] sm:$0xff] }
  0x19   : > { %233 = vst [vmem:[%s2556_s30 + $0x48] sm:$0xff] %v232_v9  ;;  %v254_v20 = vld [vmem:[%s2551_s29 + $0x280] sm:$0xff]  ;;  %v256_v21 = vld [vmem:[%s2551_s29 + $0x288] sm:$0xff] }
  0x1a   : > { %235 = vst [vmem:[%s2556_s30 + $0x50] sm:$0xff] %v234_v10  ;;  %v258_v22 = vld [vmem:[%s2551_s29 + $0x2c0] sm:$0xff]  ;;  %v260_v23 = vld [vmem:[%s2551_s29 + $0x2c8] sm:$0xff] }
  0x1b   : > { %237 = vst [vmem:[%s2556_s30 + $0x58] sm:$0xff] %v236_v11  ;;  %v262_v24 = vld [vmem:[%s2551_s29 + $0x300] sm:$0xff]  ;;  %v264_v25 = vld [vmem:[%s2551_s29 + $0x308] sm:$0xff] }
  0x1c   : > { %239 = vst [vmem:[%s2556_s30 + $0x60] sm:$0xff] %v238_v12  ;;  %v266_v26 = vld [vmem:[%s2551_s29 + $0x340] sm:$0xff]  ;;  %v268_v27 = vld [vmem:[%s2551_s29 + $0x348] sm:$0xff] }
  0x1d   : > { %241 = vst [vmem:[%s2556_s30 + $0x68] sm:$0xff] %v240_v13  ;;  %v270_v28 = vld [vmem:[%s2551_s29 + $0x380] sm:$0xff]  ;;  %v272_v29 = vld [vmem:[%s2551_s29 + $0x388] sm:$0xff] }
  0x1e   : > { %243 = vst [vmem:[%s2556_s30 + $0x70] sm:$0xff] %v242_v14  ;;  %v274_v30 = vld [vmem:[%s2551_s29 + $0x3c0] sm:$0xff]  ;;  %v276_v31 = vld [vmem:[%s2551_s29 + $0x3c8] sm:$0xff] }
  0x1f   : > { %245 = vst [vmem:[%s2556_s30 + $0x78] sm:$0xff] %v244_v15 }
  0x20   : > { %247 = vst [vmem:[%s2556_s30 + $0x80] sm:$0xff] %v246_v16 }
  0x21   : > { %249 = vst [vmem:[%s2556_s30 + $0x88] sm:$0xff] %v248_v17 }
  0x22   : > { %251 = vst [vmem:[%s2556_s30 + $0x90] sm:$0xff] %v250_v18 }
  0x23   : > { %253 = vst [vmem:[%s2556_s30 + $0x98] sm:$0xff] %v252_v19 }
  0x24   : > { %255 = vst [vmem:[%s2556_s30 + $0xa0] sm:$0xff] %v254_v20 }
  0x25   : > { %257 = vst [vmem:[%s2556_s30 + $0xa8] sm:$0xff] %v256_v21 }
  0x26   : > { %259 = vst [vmem:[%s2556_s30 + $0xb0] sm:$0xff] %v258_v22 }
  0x27   : > { %261 = vst [vmem:[%s2556_s30 + $0xb8] sm:$0xff] %v260_v23 }
  0x28   : > { %263 = vst [vmem:[%s2556_s30 + $0xc0] sm:$0xff] %v262_v24 }
  0x29   : > { %265 = vst [vmem:[%s2556_s30 + $0xc8] sm:$0xff] %v264_v25 }
  0x2a   : > { %267 = vst [vmem:[%s2556_s30 + $0xd0] sm:$0xff] %v266_v26 }
  0x2b   : > { %269 = vst [vmem:[%s2556_s30 + $0xd8] sm:$0xff] %v268_v27 }
  0x2c   : > { %271 = vst [vmem:[%s2556_s30 + $0xe0] sm:$0xff] %v270_v28 }
  0x2d   : > { %273 = vst [vmem:[%s2556_s30 + $0xe8] sm:$0xff] %v272_v29 }
  0x2e   : > { %275 = vst [vmem:[%s2556_s30 + $0xf0] sm:$0xff] %v274_v30 }
  0x2f   : > { %277 = vst [vmem:[%s2556_s30 + $0xf8] sm:$0xff] %v276_v31 }
  0x30 PF: > { %p1904_p6 = scmp.ge.s32.totalorder %s2480_s19, 1  ;;  %p297_p7 = scmp.lt.s32.totalorder %s2480_s19, 5 }
  0x32   : > { %p298_p8 = pnand %p1904_p6, %p297_p7 }
  0x33   : > { %s304_s5 = sand.u32 (!%p298_p8), 1, %s2464_s15   ;;  %s1906_s6 = sshll.u32 (!%p298_p8), %s2472_s17, 6 }
  0x34   : > { %301 = sbr.rel (%p298_p8) target bundleno = 568 (0x238), region = 47  ;;  %s1905_s7 = sshll.u32 (!%p298_p8), %s304_s5, 8 }
  0x35   : > { %p364_p9 = scmp.lt.s32.totalorder (!%p298_p8), %s1906_s6, 255  ;;  %s2628_s12 = scalar_lea.vmem (!%p298_p8), [#allocation3], %s1905_s7 }
  0x36   : > { %p1909_p10 = scmp.ne.s32.totalorder (!%p298_p8), %s2472_s17, 0 }
  0x39   : > { %s3081_s6 = smov (!%p364_p9, %s1906_s6), 255  ;;  %407 = sbr.rel (%p1909_p10) target bundleno = 95 (0x5f), region = 55 }
  0x3a   : > { %s2304_s8 = sshll.u32 %s3081_s6, 3 }
  0x3b   : > { %s2626_s11 = scalar_lea.vmem %s3070_s1, %s2304_s8 }
  0x3e   : > { %v2482_v32 = vmov 0.0  }
  0x3f   : > { %408 = vst [vmem:[#allocation2 + $0xb0] sm:$0xff] %v2482_v32 }
  0x40   : > { %409 = vst [vmem:[#allocation2] sm:$0xff] %v2482_v32 }
  0x41   : > { %410 = vst [vmem:[#allocation2 + $0xd8] sm:$0xff] %v2482_v32 }
  0x42   : > { %411 = vst [vmem:[#allocation2 + $0x18] sm:$0xff] %v2482_v32 }
  0x43   : > { %412 = vst [vmem:[#allocation2 + $0x50] sm:$0xff] %v2482_v32 }
  0x44   : > { %413 = vst [vmem:[#allocation2 + $0x68] sm:$0xff] %v2482_v32 }
  0x45   : > { %414 = vst [vmem:[#allocation2 + $0x30] sm:$0xff] %v2482_v32 }
  0x46   : > { %415 = vst [vmem:[#allocation2 + $0x48] sm:$0xff] %v2482_v32 }
  0x47   : > { %416 = vst [vmem:[#allocation2 + $0x80] sm:$0xff] %v2482_v32 }
  0x48   : > { %417 = vst [vmem:[#allocation2 + $0x88] sm:$0xff] %v2482_v32 }
  0x49   : > { %418 = vst [vmem:[#allocation2 + $0xe8] sm:$0xff] %v2482_v32 }
  0x4a   : > { %419 = vst [vmem:[#allocation2 + $0xb8] sm:$0xff] %v2482_v32 }
  0x4b   : > { %420 = vst [vmem:[#allocation2 + $0x60] sm:$0xff] %v2482_v32 }
  0x4c   : > { %421 = vst [vmem:[#allocation2 + $0xf0] sm:$0xff] %v2482_v32 }
  0x4d   : > { %422 = vst [vmem:[#allocation2 + $0x8] sm:$0xff] %v2482_v32 }
  0x4e   : > { %423 = vst [vmem:[#allocation2 + $0x78] sm:$0xff] %v2482_v32 }
  0x4f   : > { %424 = vst [vmem:[#allocation2 + $0x38] sm:$0xff] %v2482_v32 }
  0x50   : > { %425 = vst [vmem:[#allocation2 + $0x58] sm:$0xff] %v2482_v32 }
  0x51   : > { %426 = vst [vmem:[#allocation2 + $0x40] sm:$0xff] %v2482_v32 }
  0x52   : > { %427 = vst [vmem:[#allocation2 + $0xc8] sm:$0xff] %v2482_v32 }
  0x53   : > { %428 = vst [vmem:[#allocation2 + $0xe0] sm:$0xff] %v2482_v32 }
  0x54   : > { %429 = vst [vmem:[#allocation2 + $0x90] sm:$0xff] %v2482_v32 }
  0x55   : > { %430 = vst [vmem:[#allocation2 + $0x70] sm:$0xff] %v2482_v32 }
  0x56   : > { %431 = vst [vmem:[#allocation2 + $0xc0] sm:$0xff] %v2482_v32 }
  0x57   : > { %432 = vst [vmem:[#allocation2 + $0xa8] sm:$0xff] %v2482_v32 }
  0x58   : > { %433 = vst [vmem:[#allocation2 + $0xd0] sm:$0xff] %v2482_v32 }
  0x59   : > { %434 = vst [vmem:[#allocation2 + $0x10] sm:$0xff] %v2482_v32 }
  0x5a   : > { %435 = vst [vmem:[#allocation2 + $0x28] sm:$0xff] %v2482_v32 }
  0x5b   : > { %436 = vst [vmem:[#allocation2 + $0xa0] sm:$0xff] %v2482_v32 }
  0x5c   : > { %437 = vst [vmem:[#allocation2 + $0xf8] sm:$0xff] %v2482_v32 }
  0x5d   : > { %438 = vst [vmem:[#allocation2 + $0x20] sm:$0xff] %v2482_v32 }
  0x5e   : > { %439 = vst [vmem:[#allocation2 + $0x98] sm:$0xff] %v2482_v32 }
  0x5f PF: > { %v2096_v33 = vld [vmem:[%s2626_s11 + $0x70] sm:$0xf]  ;;  %v2352_v34 = vld [vmem:[%s2626_s11 + $0x74] sm:$0xf0]  ;;  %v2088_v44 = vld [vmem:[%s2626_s11 + $0x60] sm:$0xf] }
  0x60   : > { %v2160_v35 = vld [vmem:[%s2626_s11 + $0xf0] sm:$0xf]  ;;  %v2097_v36 = vor.u32 %v2352_v34, %v2096_v33  ;;  %v2368_v37 = vld [vmem:[%s2626_s11 + $0xf4] sm:$0xf0]  ;;  %v2350_v46 = vld [vmem:[%s2626_s11 + $0x64] sm:$0xf0] }
  0x61   : > { %v2224_v38 = vld [vmem:[%s2626_s11 + $0x170] sm:$0xf]  ;;  %v2384_v39 = vld [vmem:[%s2626_s11 + $0x174] sm:$0xf0]  ;;  %v2161_v40 = vor.u32 %v2368_v37, %v2160_v35  ;;  %v2152_v47 = vld [vmem:[%s2626_s11 + $0xe0] sm:$0xf]  ;;  %v2089_v49 = vor.u32 %v2350_v46, %v2088_v44 }
  0x62   : > { %v2225_v41 = vor.u32 %v2384_v39, %v2224_v38  ;;  %v2288_v42 = vld [vmem:[%s2626_s11 + $0x1f0] sm:$0xf]  ;;  %v2400_v43 = vld [vmem:[%s2626_s11 + $0x1f4] sm:$0xf0]  ;;  %1048 = vmatpush.bf16.msra.mxu0 %v2097_v36  ;;  %v2366_v48 = vld [vmem:[%s2626_s11 + $0xe4] sm:$0xf0] }
  0x63   : > { %v2289_v45 = vor.u32 %v2400_v43, %v2288_v42  ;;  %1097 = vmatpush.bf16.msra.mxu1 %v2161_v40  ;;  %v2153_v50 = vor.u32 %v2366_v48, %v2152_v47  ;;  %v2216_v51 = vld [vmem:[%s2626_s11 + $0x160] sm:$0xf]  ;;  %v2382_v52 = vld [vmem:[%s2626_s11 + $0x164] sm:$0xf0]  ;;  %v2080_v56 = vld [vmem:[%s2626_s11 + $0x50] sm:$0xf] }
  0x64   : > { %1146 = vmatpush.bf16.msra.mxu2 %v2225_v41  ;;  %v2280_v53 = vld [vmem:[%s2626_s11 + $0x1e0] sm:$0xf]  ;;  %v2217_v54 = vor.u32 %v2382_v52, %v2216_v51  ;;  %v2398_v55 = vld [vmem:[%s2626_s11 + $0x1e4] sm:$0xf0]  ;;  %v2348_v57 = vld [vmem:[%s2626_s11 + $0x54] sm:$0xf0] }
  0x65   : > { %1195 = vmatpush.bf16.msra.mxu3 %v2289_v45  ;;  %v2281_v58 = vor.u32 %v2398_v55, %v2280_v53  ;;  %v2144_v59 = vld [vmem:[%s2626_s11 + $0xd0] sm:$0xf]  ;;  %v2364_v60 = vld [vmem:[%s2626_s11 + $0xd4] sm:$0xf0]  ;;  %v2081_v62 = vor.u32 %v2348_v57, %v2080_v56  ;;  %v2072_v4 = vld [vmem:[%s2626_s11 + $0x40] sm:$0xf] }
  0x66   : > { %v2208_v61 = vld [vmem:[%s2626_s11 + $0x150] sm:$0xf]  ;;  %1049 = vmatpush.bf16.msra.mxu0 %v2089_v49  ;;  %v2380_v63 = vld [vmem:[%s2626_s11 + $0x154] sm:$0xf0]  ;;  %v2145_v2 = vor.u32 %v2364_v60, %v2144_v59  ;;  %v2346_v5 = vld [vmem:[%s2626_s11 + $0x44] sm:$0xf0] }
  0x67   : > { %v2272_v0 = vld [vmem:[%s2626_s11 + $0x1d0] sm:$0xf]  ;;  %v2396_v1 = vld [vmem:[%s2626_s11 + $0x1d4] sm:$0xf0]  ;;  %1098 = vmatpush.bf16.msra.mxu1 %v2153_v50  ;;  %v2209_v3 = vor.u32 %v2380_v63, %v2208_v61  ;;  %v2136_v6 = vld [vmem:[%s2626_s11 + $0xc0] sm:$0xf]  ;;  %v2073_v13 = vor.u32 %v2346_v5, %v2072_v4 }
  0x68   : > { %1147 = vmatpush.bf16.msra.mxu2 %v2217_v54  ;;  %v2273_v7 = vor.u32 %v2396_v1, %v2272_v0  ;;  %v2362_v8 = vld [vmem:[%s2626_s11 + $0xc4] sm:$0xf0]  ;;  %v2200_v9 = vld [vmem:[%s2626_s11 + $0x140] sm:$0xf]  ;;  %v2064_v16 = vld [vmem:[%s2626_s11 + $0x30] sm:$0xf] }
  0x69   : > { %1196 = vmatpush.bf16.msra.mxu3 %v2281_v58  ;;  %v2378_v10 = vld [vmem:[%s2626_s11 + $0x144] sm:$0xf0]  ;;  %v2264_v11 = vld [vmem:[%s2626_s11 + $0x1c0] sm:$0xf]  ;;  %v2137_v14 = vor.u32 %v2362_v8, %v2136_v6  ;;  %v2344_v17 = vld [vmem:[%s2626_s11 + $0x34] sm:$0xf0] }
  0x6a   : > { %v2394_v12 = vld [vmem:[%s2626_s11 + $0x1c4] sm:$0xf0]  ;;  %1050 = vmatpush.bf16.msra.mxu0 %v2081_v62  ;;  %v2201_v15 = vor.u32 %v2378_v10, %v2200_v9  ;;  %v2128_v18 = vld [vmem:[%s2626_s11 + $0xb0] sm:$0xf]  ;;  %v2360_v20 = vld [vmem:[%s2626_s11 + $0xb4] sm:$0xf0]  ;;  %v2065_v25 = vor.u32 %v2344_v17, %v2064_v16 }
  0x6b   : > { %1099 = vmatpush.bf16.msra.mxu1 %v2145_v2  ;;  %v2265_v19 = vor.u32 %v2394_v12, %v2264_v11  ;;  %v2192_v21 = vld [vmem:[%s2626_s11 + $0x130] sm:$0xf]  ;;  %v2376_v22 = vld [vmem:[%s2626_s11 + $0x134] sm:$0xf0]  ;;  %v2129_v26 = vor.u32 %v2360_v20, %v2128_v18  ;;  %v2056_v28 = vld [vmem:[%s2626_s11 + $0x20] sm:$0xf] }
  0x6c   : > { %1148 = vmatpush.bf16.msra.mxu2 %v2209_v3  ;;  %v2256_v23 = vld [vmem:[%s2626_s11 + $0x1b0] sm:$0xf]  ;;  %v2392_v24 = vld [vmem:[%s2626_s11 + $0x1b4] sm:$0xf0]  ;;  %v2193_v27 = vor.u32 %v2376_v22, %v2192_v21  ;;  %v2342_v29 = vld [vmem:[%s2626_s11 + $0x24] sm:$0xf0] }
  0x6d   : > { %1197 = vmatpush.bf16.msra.mxu3 %v2273_v7  ;;  %v2120_v30 = vld [vmem:[%s2626_s11 + $0xa0] sm:$0xf]  ;;  %v2257_v31 = vor.u32 %v2392_v24, %v2256_v23  ;;  %v2358_v32 = vld [vmem:[%s2626_s11 + $0xa4] sm:$0xf0]  ;;  %v2057_v37 = vor.u32 %v2342_v29, %v2056_v28  ;;  %v2048_v40 = vld [vmem:[%s2626_s11 + $0x10] sm:$0xf] }
  0x6e   : > { %1051 = vmatpush.bf16.msra.mxu0 %v2073_v13  ;;  %v2184_v33 = vld [vmem:[%s2626_s11 + $0x120] sm:$0xf]  ;;  %v2374_v34 = vld [vmem:[%s2626_s11 + $0x124] sm:$0xf0]  ;;  %v2121_v38 = vor.u32 %v2358_v32, %v2120_v30  ;;  %v2340_v41 = vld [vmem:[%s2626_s11 + $0x14] sm:$0xf0] }
  0x6f   : > { %1100 = vmatpush.bf16.msra.mxu1 %v2137_v14  ;;  %v2248_v35 = vld [vmem:[%s2626_s11 + $0x1a0] sm:$0xf]  ;;  %v2390_v36 = vld [vmem:[%s2626_s11 + $0x1a4] sm:$0xf0]  ;;  %v2185_v39 = vor.u32 %v2374_v34, %v2184_v33  ;;  %v2112_v42 = vld [vmem:[%s2626_s11 + $0x90] sm:$0xf]  ;;  %v2049_v50 = vor.u32 %v2340_v41, %v2048_v40 }
  0x70   : > { %1149 = vmatpush.bf16.msra.mxu2 %v2201_v15  ;;  %v2249_v43 = vor.u32 %v2390_v36, %v2248_v35  ;;  %v2356_v44 = vld [vmem:[%s2626_s11 + $0x94] sm:$0xf0]  ;;  %v2176_v45 = vld [vmem:[%s2626_s11 + $0x110] sm:$0xf]  ;;  %v2040_v49 = vld [vmem:[%s2626_s11] sm:$0xf] }
  0x71   : > { %1198 = vmatpush.bf16.msra.mxu3 %v2265_v19  ;;  %v2372_v46 = vld [vmem:[%s2626_s11 + $0x114] sm:$0xf0]  ;;  %v2240_v47 = vld [vmem:[%s2626_s11 + $0x190] sm:$0xf]  ;;  %v2338_v51 = vld [vmem:[%s2626_s11 + $0x4] sm:$0xf0]  ;;  %v2113_v54 = vor.u32 %v2356_v44, %v2112_v42 }
  0x72   : > { %1052 = vmatpush.bf16.msra.mxu0 %v2065_v25  ;;  %v2388_v48 = vld [vmem:[%s2626_s11 + $0x194] sm:$0xf0]  ;;  %v2104_v52 = vld [vmem:[%s2626_s11 + $0x80] sm:$0xf]  ;;  %v2354_v53 = vld [vmem:[%s2626_s11 + $0x84] sm:$0xf0]  ;;  %v2177_v55 = vor.u32 %v2372_v46, %v2176_v45  ;;  %v2041_v3 = vor.u32 %v2338_v51, %v2040_v49 }
  0x73   : > { %1101 = vmatpush.bf16.msra.mxu1 %v2129_v26  ;;  %v2168_v56 = vld [vmem:[%s2626_s11 + $0x100] sm:$0xf]  ;;  %v2370_v57 = vld [vmem:[%s2626_s11 + $0x104] sm:$0xf0]  ;;  %v2241_v59 = vor.u32 %v2388_v48, %v2240_v47  ;;  %v2307_v62 = vld [vmem:[%s2628_s12 + $0xc] sm:$0xf0]  ;;  %v2105_v7 = vor.u32 %v2354_v53, %v2104_v52 }
  0x74   : > { %1150 = vmatpush.bf16.msra.mxu2 %v2193_v27  ;;  %v2232_v58 = vld [vmem:[%s2626_s11 + $0x180] sm:$0xf]  ;;  %v2386_v60 = vld [vmem:[%s2626_s11 + $0x184] sm:$0xf0]  ;;  %v2305_v63 = vld [vmem:[%s2628_s12 + $0x4] sm:$0xf]  ;;  %v2169_v8 = vor.u32 %v2370_v57, %v2168_v56 }
  0x75   : > { %1199 = vmatpush.bf16.msra.mxu3 %v2257_v31  ;;  %v1912_v61 = vld [vmem:[%s2628_s12] sm:$0xf]  ;;  %v1914_v0 = vld [vmem:[%s2628_s12 + $0x10] sm:$0xf0]  ;;  %v2226_v2 = vld [vmem:[%s2626_s11 + $0x178] sm:$0xf0]  ;;  %v2233_v12 = vor.u32 %v2386_v60, %v2232_v58 }
  0x76   : > { %1053 = vmatpush.bf16.msra.mxu0 %v2057_v37  ;;  %v2383_v1 = vld [vmem:[%s2626_s11 + $0x174] sm:$0xf]  ;;  %v1920_v4 = vld [vmem:[%s2628_s12 + $0x8] sm:$0xf]  ;;  %v2290_v6 = vld [vmem:[%s2626_s11 + $0x1f8] sm:$0xf0]  ;;  %v2710_v17 = vor.u32 %v2307_v62, %v1912_v61  ;;  %v2715_v22 = vor.u32 %v2305_v63, %v1914_v0 }
  0x77   : > { %1102 = vmatpush.bf16.msra.mxu1 %v2121_v38  ;;  %v2399_v5 = vld [vmem:[%s2626_s11 + $0x1f4] sm:$0xf]  ;;  %v2308_v9 = vld [vmem:[%s2628_s12 + $0x14] sm:$0xf0]  ;;  %v2306_v10 = vld [vmem:[%s2628_s12 + $0xc] sm:$0xf]  ;;  %v2229_v13 = vor.u32 %v2383_v1, %v2226_v2 }
  0x78   : > { %1151 = vmatpush.bf16.msra.mxu2 %v2185_v39  ;;  %v1922_v11 = vld [vmem:[%s2628_s12 + $0x18] sm:$0xf0]  ;;  %v2351_v14 = vld [vmem:[%s2626_s11 + $0x74] sm:$0xf]  ;;  %v2293_v18 = vor.u32 %v2399_v5, %v2290_v6  ;;  %v2381_v20 = vld [vmem:[%s2626_s11 + $0x164] sm:$0xf]  ;;  %v2717_v23 = vor.u32 %v2308_v9, %v1920_v4 }
  0x79   : > { %1200 = vmatpush.bf16.msra.mxu3 %v2249_v43  ;;  %v2098_v15 = vld [vmem:[%s2626_s11 + $0x78] sm:$0xf0]  ;;  %v2367_v16 = vld [vmem:[%s2626_s11 + $0xf4] sm:$0xf]  ;;  %v2218_v21 = vld [vmem:[%s2626_s11 + $0x168] sm:$0xf0]  ;;  %v2721_v26 = vor.u32 %v2306_v10, %v1922_v11 }
  0x7a   : > { %1054 = vmatpush.bf16.msra.mxu0 %v2049_v50  ;;  %v2162_v19 = vld [vmem:[%s2626_s11 + $0xf8] sm:$0xf0]  ;;  %v2397_v24 = vld [vmem:[%s2626_s11 + $0x1e4] sm:$0xf]  ;;  %v2282_v25 = vld [vmem:[%s2626_s11 + $0x1e8] sm:$0xf0]  ;;  %v2101_v27 = vor.u32 %v2351_v14, %v2098_v15  ;;  %v2221_v29 = vor.u32 %v2381_v20, %v2218_v21 }
  0x7b   : > { %1103 = vmatpush.bf16.msra.mxu1 %v2113_v54  ;;  %v2165_v28 = vor.u32 %v2367_v16, %v2162_v19  ;;  %v2349_v30 = vld [vmem:[%s2626_s11 + $0x64] sm:$0xf]  ;;  %v2090_v31 = vld [vmem:[%s2626_s11 + $0x68] sm:$0xf0]  ;;  %v2285_v32 = vor.u32 %v2397_v24, %v2282_v25  ;;  %v2379_v36 = vld [vmem:[%s2626_s11 + $0x154] sm:$0xf] }
  0x7c   : > { %1152 = vmatpush.bf16.msra.mxu2 %v2177_v55  ;;  %v2365_v33 = vld [vmem:[%s2626_s11 + $0xe4] sm:$0xf]  ;;  %v2154_v34 = vld [vmem:[%s2626_s11 + $0xe8] sm:$0xf0]  ;;  %v2093_v35 = vor.u32 %v2349_v30, %v2090_v31  ;;  %v2210_v37 = vld [vmem:[%s2626_s11 + $0x158] sm:$0xf0] }
  0x7d   : > { %1201 = vmatpush.bf16.msra.mxu3 %v2241_v59  ;;  %v2395_v38 = vld [vmem:[%s2626_s11 + $0x1d4] sm:$0xf]  ;;  %v2157_v39 = vor.u32 %v2365_v33, %v2154_v34  ;;  %v2213_v40 = vor.u32 %v2379_v36, %v2210_v37  ;;  %v2274_v41 = vld [vmem:[%s2626_s11 + $0x1d8] sm:$0xf0]  ;;  %v1928_v49 = vld [vmem:[%s2628_s12 + $0x20] sm:$0xf] }
  0x7e   : > { %1055 = vmatpush.bf16.msra.mxu0 %v2041_v3  ;;  %v2347_v42 = vld [vmem:[%s2626_s11 + $0x54] sm:$0xf]  ;;  %v2082_v43 = vld [vmem:[%s2626_s11 + $0x58] sm:$0xf0]  ;;  %v2277_v44 = vor.u32 %v2395_v38, %v2274_v41  ;;  %v2311_v50 = vld [vmem:[%s2628_s12 + $0x2c] sm:$0xf0] }
  0x7f   : > { %1104 = vmatpush.bf16.msra.mxu1 %v2105_v7  ;;  %v2363_v45 = vld [vmem:[%s2626_s11 + $0xd4] sm:$0xf]  ;;  %v2146_v46 = vld [vmem:[%s2626_s11 + $0xd8] sm:$0xf0]  ;;  %v2085_v47 = vor.u32 %v2347_v42, %v2082_v43  ;;  %v2309_v51 = vld [vmem:[%s2628_s12 + $0x24] sm:$0xf]  ;;  %v2747_v57 = vor.u32 %v2311_v50, %v1928_v49 }
  0x80   : > { %1153 = vmatpush.bf16.msra.mxu2 %v2169_v8  ;;  %v2149_v48 = vor.u32 %v2363_v45, %v2146_v46  ;;  %v1930_v52 = vld [vmem:[%s2628_s12 + $0x30] sm:$0xf0]  ;;  %v1936_v53 = vld [vmem:[%s2628_s12 + $0x28] sm:$0xf]  ;;  %v2312_v54 = vld [vmem:[%s2628_s12 + $0x34] sm:$0xf0] }
  0x81   : > { %1202 = vmatpush.bf16.msra.mxu3 %v2233_v12  ;;  %1056 = vmatmul.bf16.vlgmr.msra.gmra.mxu0 %v2710_v17  ;;  %v2310_v55 = vld [vmem:[%s2628_s12 + $0x2c] sm:$0xf]  ;;  %v1938_v56 = vld [vmem:[%s2628_s12 + $0x38] sm:$0xf0]  ;;  %v2749_v58 = vor.u32 %v2309_v51, %v1930_v52  ;;  %v2751_v59 = vor.u32 %v2312_v54, %v1936_v53  ;;  %v2377_v61 = vld [vmem:[%s2626_s11 + $0x144] sm:$0xf] }
  0x82   : > { %1105 = vmatmul.bf16.vlgmr.msra.gmra.mxu1 %v2715_v22  ;;  %1244 = vmatpush.bf16.msrb.mxu0 %v2101_v27  ;;  %v2753_v60 = vor.u32 %v2310_v55, %v1938_v56  ;;  %v2202_v62 = vld [vmem:[%s2626_s11 + $0x148] sm:$0xf0]  ;;  %v2393_v63 = vld [vmem:[%s2626_s11 + $0x1c4] sm:$0xf]  ;;  %v1944_v9 = vld [vmem:[%s2628_s12 + $0x40] sm:$0xf] }
  0x83   : > { %1154 = vmatmul.bf16.vlgmr.msra.gmra.mxu2 %v2717_v23  ;;  %1293 = vmatpush.bf16.msrb.mxu1 %v2165_v28  ;;  %v2205_v0 = vor.u32 %v2377_v61, %v2202_v62  ;;  %v2266_v1 = vld [vmem:[%s2626_s11 + $0x1c8] sm:$0xf0]  ;;  %v2345_v2 = vld [vmem:[%s2626_s11 + $0x44] sm:$0xf]  ;;  %v2315_v10 = vld [vmem:[%s2628_s12 + $0x4c] sm:$0xf0] }
  0x84   : > { %1342 = vmatpush.bf16.msrb.mxu2 %v2229_v13  ;;  %1203 = vmatmul.bf16.vlgmr.msra.gmra.mxu3 %v2721_v26  ;;  %v2074_v3 = vld [vmem:[%s2626_s11 + $0x48] sm:$0xf0]  ;;  %v2269_v4 = vor.u32 %v2393_v63, %v2266_v1  ;;  %v2361_v6 = vld [vmem:[%s2626_s11 + $0xc4] sm:$0xf]  ;;  %v1946_v12 = vld [vmem:[%s2628_s12 + $0x50] sm:$0xf0] }
  0x85   : > { %1391 = vmatpush.bf16.msrb.mxu3 %v2293_v18  ;;  %v2077_v5 = vor.u32 %v2345_v2, %v2074_v3  ;;  %v2138_v7 = vld [vmem:[%s2626_s11 + $0xc8] sm:$0xf0]  ;;  %v2313_v11 = vld [vmem:[%s2628_s12 + $0x44] sm:$0xf]  ;;  %v1952_v13 = vld [vmem:[%s2628_s12 + $0x48] sm:$0xf]  ;;  %v2775_v18 = vor.u32 %v2315_v10, %v1944_v9 }
  0x86   : > { %1245 = vmatpush.bf16.msrb.mxu0 %v2093_v35  ;;  %v2141_v8 = vor.u32 %v2361_v6, %v2138_v7  ;;  %v2316_v14 = vld [vmem:[%s2628_s12 + $0x54] sm:$0xf0]  ;;  %v2314_v15 = vld [vmem:[%s2628_s12 + $0x4c] sm:$0xf]  ;;  %v1954_v16 = vld [vmem:[%s2628_s12 + $0x58] sm:$0xf0]  ;;  %v2777_v19 = vor.u32 %v2313_v11, %v1946_v12 }
  0x87   : > { %1294 = vmatpush.bf16.msrb.mxu1 %v2157_v39  ;;  %v2779_v20 = vor.u32 %v2316_v14, %v1952_v13  ;;  %v2781_v21 = vor.u32 %v2314_v15, %v1954_v16  ;;  %v2375_v24 = vld [vmem:[%s2626_s11 + $0x134] sm:$0xf]  ;;  %v2194_v25 = vld [vmem:[%s2626_s11 + $0x138] sm:$0xf0]  ;;  %v1960_v37 = vld [vmem:[%s2628_s12 + $0x60] sm:$0xf] }
  0x88   : > { %1343 = vmatpush.bf16.msrb.mxu2 %v2221_v29  ;;  %v2391_v27 = vld [vmem:[%s2626_s11 + $0x1b4] sm:$0xf]  ;;  %v2197_v28 = vor.u32 %v2375_v24, %v2194_v25  ;;  %v2258_v29 = vld [vmem:[%s2626_s11 + $0x1b8] sm:$0xf0]  ;;  %v2319_v38 = vld [vmem:[%s2628_s12 + $0x6c] sm:$0xf0] }
  0x89   : > { %1392 = vmatpush.bf16.msrb.mxu3 %v2285_v32  ;;  %v2343_v30 = vld [vmem:[%s2626_s11 + $0x34] sm:$0xf]  ;;  %v2066_v31 = vld [vmem:[%s2626_s11 + $0x38] sm:$0xf0]  ;;  %v2261_v32 = vor.u32 %v2391_v27, %v2258_v29  ;;  %v2317_v39 = vld [vmem:[%s2628_s12 + $0x64] sm:$0xf]  ;;  %v2803_v45 = vor.u32 %v2319_v38, %v1960_v37 }
  0x8a   : > { %1246 = vmatpush.bf16.msrb.mxu0 %v2085_v47  ;;  %v2069_v33 = vor.u32 %v2343_v30, %v2066_v31  ;;  %v2359_v34 = vld [vmem:[%s2626_s11 + $0xb4] sm:$0xf]  ;;  %v2130_v35 = vld [vmem:[%s2626_s11 + $0xb8] sm:$0xf0]  ;;  %v1968_v41 = vld [vmem:[%s2628_s12 + $0x68] sm:$0xf] }
  0x8b   : > { %1295 = vmatpush.bf16.msrb.mxu1 %v2149_v48  ;;  %v2133_v36 = vor.u32 %v2359_v34, %v2130_v35  ;;  %v2320_v42 = vld [vmem:[%s2628_s12 + $0x74] sm:$0xf0]  ;;  %v2318_v43 = vld [vmem:[%s2628_s12 + $0x6c] sm:$0xf]  ;;  %v2373_v49 = vld [vmem:[%s2626_s11 + $0x124] sm:$0xf] }
  0x8c   : > { %1344 = vmatpush.bf16.msrb.mxu2 %v2213_v40  ;;  %v1962_v40 = vld [vmem:[%s2628_s12 + $0x70] sm:$0xf0]  ;;  %v2807_v47 = vor.u32 %v2320_v42, %v1968_v41  ;;  %v2186_v50 = vld [vmem:[%s2626_s11 + $0x128] sm:$0xf0]  ;;  %v2389_v51 = vld [vmem:[%s2626_s11 + $0x1a4] sm:$0xf] }
  0x8d   : > { %1393 = vmatpush.bf16.msrb.mxu3 %v2277_v44  ;;  %v1970_v44 = vld [vmem:[%s2628_s12 + $0x78] sm:$0xf0]  ;;  %v2805_v46 = vor.u32 %v2317_v39, %v1962_v40  ;;  %v2189_v52 = vor.u32 %v2373_v49, %v2186_v50  ;;  %v2250_v53 = vld [vmem:[%s2626_s11 + $0x1a8] sm:$0xf0]  ;;  %v2341_v54 = vld [vmem:[%s2626_s11 + $0x24] sm:$0xf] }
  0x8e   : > { %1247 = vmatpush.bf16.msrb.mxu0 %v2077_v5  ;;  %v2809_v48 = vor.u32 %v2318_v43, %v1970_v44  ;;  %v2058_v55 = vld [vmem:[%s2626_s11 + $0x28] sm:$0xf0]  ;;  %v2253_v56 = vor.u32 %v2389_v51, %v2250_v53  ;;  %v2357_v62 = vld [vmem:[%s2626_s11 + $0xa4] sm:$0xf]  ;;  %v1976_v1 = vld [vmem:[%s2628_s12 + $0x80] sm:$0xf] }
  0x8f   : > { %1296 = vmatpush.bf16.msrb.mxu1 %v2141_v8  ;;  %v2061_v61 = vor.u32 %v2341_v54, %v2058_v55  ;;  %v2122_v63 = vld [vmem:[%s2626_s11 + $0xa8] sm:$0xf0]  ;;  %v2323_v2 = vld [vmem:[%s2628_s12 + $0x8c] sm:$0xf0]  ;;  %v2321_v3 = vld [vmem:[%s2628_s12 + $0x84] sm:$0xf] }
  0x90   : > { %1345 = vmatpush.bf16.msrb.mxu2 %v2205_v0  ;;  %v2125_v0 = vor.u32 %v2357_v62, %v2122_v63  ;;  %v1984_v5 = vld [vmem:[%s2628_s12 + $0x88] sm:$0xf]  ;;  %v2324_v6 = vld [vmem:[%s2628_s12 + $0x94] sm:$0xf0]  ;;  %v2322_v7 = vld [vmem:[%s2628_s12 + $0x8c] sm:$0xf]  ;;  %v2831_v9 = vor.u32 %v2323_v2, %v1976_v1 }
  0x91   : > { %1061 = vmatmul.bf16.gmra.mxu0 %v2747_v57  ;;  %1394 = vmatpush.bf16.msrb.mxu3 %v2269_v4  ;;  %v1978_v4 = vld [vmem:[%s2628_s12 + $0x90] sm:$0xf0]  ;;  %v1986_v8 = vld [vmem:[%s2628_s12 + $0x98] sm:$0xf0]  ;;  %v2835_v11 = vor.u32 %v2324_v6, %v1984_v5  ;;  %v2327_v34 = vld [vmem:[%s2628_s12 + $0xac] sm:$0xf0] }
  0x92   : > { %1110 = vmatmul.bf16.gmra.mxu1 %v2749_v58  ;;  %1248 = vmatpush.bf16.msrb.mxu0 %v2069_v33  ;;  %v2833_v10 = vor.u32 %v2321_v3, %v1978_v4  ;;  %v2837_v12 = vor.u32 %v2322_v7, %v1986_v8  ;;  %v2371_v13 = vld [vmem:[%s2626_s11 + $0x114] sm:$0xf]  ;;  %v2178_v14 = vld [vmem:[%s2626_s11 + $0x118] sm:$0xf0]  ;;  %v1992_v33 = vld [vmem:[%s2628_s12 + $0xa0] sm:$0xf] }
  0x93   : > { %1159 = vmatmul.bf16.gmra.mxu2 %v2751_v59  ;;  %1297 = vmatpush.bf16.msrb.mxu1 %v2133_v36  ;;  %v2387_v15 = vld [vmem:[%s2626_s11 + $0x194] sm:$0xf]  ;;  %v2181_v16 = vor.u32 %v2371_v13, %v2178_v14  ;;  %v2242_v24 = vld [vmem:[%s2626_s11 + $0x198] sm:$0xf0]  ;;  %v2325_v35 = vld [vmem:[%s2628_s12 + $0xa4] sm:$0xf]  ;;  %v2859_v41 = vor.u32 %v2327_v34, %v1992_v33 }
  0x94   : > { %1208 = vmatmul.bf16.gmra.mxu3 %v2753_v60  ;;  %1346 = vmatpush.bf16.msrb.mxu2 %v2197_v28  ;;  %v2339_v25 = vld [vmem:[%s2626_s11 + $0x14] sm:$0xf]  ;;  %v2050_v27 = vld [vmem:[%s2626_s11 + $0x18] sm:$0xf0]  ;;  %v2245_v28 = vor.u32 %v2387_v15, %v2242_v24  ;;  %v2000_v37 = vld [vmem:[%s2628_s12 + $0xa8] sm:$0xf] }
  0x95   : > { %1395 = vmatpush.bf16.msrb.mxu3 %v2261_v32  ;;  %v2053_v29 = vor.u32 %v2339_v25, %v2050_v27  ;;  %v2355_v30 = vld [vmem:[%s2626_s11 + $0x94] sm:$0xf]  ;;  %v2114_v31 = vld [vmem:[%s2626_s11 + $0x98] sm:$0xf0]  ;;  %v2328_v38 = vld [vmem:[%s2628_s12 + $0xb4] sm:$0xf0] }
  0x96   : > { %1249 = vmatpush.bf16.msrb.mxu0 %v2061_v61  ;;  %v2117_v32 = vor.u32 %v2355_v30, %v2114_v31  ;;  %v1994_v36 = vld [vmem:[%s2628_s12 + $0xb0] sm:$0xf0]  ;;  %v2326_v39 = vld [vmem:[%s2628_s12 + $0xac] sm:$0xf]  ;;  %v2002_v40 = vld [vmem:[%s2628_s12 + $0xb8] sm:$0xf0]  ;;  %v2863_v43 = vor.u32 %v2328_v38, %v2000_v37 }
  0x97   : > { %1298 = vmatpush.bf16.msrb.mxu1 %v2125_v0  ;;  %v2861_v42 = vor.u32 %v2325_v35, %v1994_v36  ;;  %v2865_v44 = vor.u32 %v2326_v39, %v2002_v40  ;;  %v2369_v49 = vld [vmem:[%s2626_s11 + $0x104] sm:$0xf]  ;;  %v2170_v50 = vld [vmem:[%s2626_s11 + $0x108] sm:$0xf0]  ;;  %v2008_v1 = vld [vmem:[%s2628_s12 + $0xc0] sm:$0xf] }
  0x98   : > { %1347 = vmatpush.bf16.msrb.mxu2 %v2189_v52  ;;  %v2385_v51 = vld [vmem:[%s2626_s11 + $0x184] sm:$0xf]  ;;  %v2173_v52 = vor.u32 %v2369_v49, %v2170_v50  ;;  %v2234_v53 = vld [vmem:[%s2626_s11 + $0x188] sm:$0xf0]  ;;  %v2331_v2 = vld [vmem:[%s2628_s12 + $0xcc] sm:$0xf0] }
  0x99   : > { %1396 = vmatpush.bf16.msrb.mxu3 %v2253_v56  ;;  %v2337_v54 = vld [vmem:[%s2626_s11 + $0x4] sm:$0xf]  ;;  %v2042_v55 = vld [vmem:[%s2626_s11 + $0x8] sm:$0xf0]  ;;  %v2237_v56 = vor.u32 %v2385_v51, %v2234_v53  ;;  %v2010_v4 = vld [vmem:[%s2628_s12 + $0xd0] sm:$0xf0]  ;;  %v2887_v13 = vor.u32 %v2331_v2, %v2008_v1 }
  0x9a   : > { %1250 = vmatpush.bf16.msrb.mxu0 %v2053_v29  ;;  %v2045_v61 = vor.u32 %v2337_v54, %v2042_v55  ;;  %v2353_v62 = vld [vmem:[%s2626_s11 + $0x84] sm:$0xf]  ;;  %v2106_v63 = vld [vmem:[%s2626_s11 + $0x88] sm:$0xf0]  ;;  %v2016_v5 = vld [vmem:[%s2628_s12 + $0xc8] sm:$0xf] }
  0x9b   : > { %1299 = vmatpush.bf16.msrb.mxu1 %v2117_v32  ;;  %v2109_v0 = vor.u32 %v2353_v62, %v2106_v63  ;;  %v2329_v3 = vld [vmem:[%s2628_s12 + $0xc4] sm:$0xf]  ;;  %v2332_v6 = vld [vmem:[%s2628_s12 + $0xd4] sm:$0xf0]  ;;  %v2330_v7 = vld [vmem:[%s2628_s12 + $0xcc] sm:$0xf] }
  0x9c   : > { %1348 = vmatpush.bf16.msrb.mxu2 %v2181_v16  ;;  %v2018_v8 = vld [vmem:[%s2628_s12 + $0xd8] sm:$0xf0]  ;;  %v2889_v14 = vor.u32 %v2329_v3, %v2010_v4  ;;  %v2891_v15 = vor.u32 %v2332_v6, %v2016_v5  ;;  %v2024_v24 = vld [vmem:[%s2628_s12 + $0xe0] sm:$0xf]  ;;  %v2335_v25 = vld [vmem:[%s2628_s12 + $0xec] sm:$0xf0] }
  0x9d   : > { %1397 = vmatpush.bf16.msrb.mxu3 %v2245_v28  ;;  %v2893_v16 = vor.u32 %v2330_v7, %v2018_v8  ;;  %v2333_v27 = vld [vmem:[%s2628_s12 + $0xe4] sm:$0xf]  ;;  %v2026_v28 = vld [vmem:[%s2628_s12 + $0xf0] sm:$0xf0]  ;;  %v2032_v29 = vld [vmem:[%s2628_s12 + $0xe8] sm:$0xf]  ;;  %v2907_v33 = vor.u32 %v2335_v25, %v2024_v24 }
  0x9e   : > { %1251 = vmatpush.bf16.msrb.mxu0 %v2045_v61  ;;  %v2336_v30 = vld [vmem:[%s2628_s12 + $0xf4] sm:$0xf0]  ;;  %v2334_v31 = vld [vmem:[%s2628_s12 + $0xec] sm:$0xf]  ;;  %v2034_v32 = vld [vmem:[%s2628_s12 + $0xf8] sm:$0xf0]  ;;  %v2909_v34 = vor.u32 %v2333_v27, %v2026_v28 }
  0x9f   : > { %1300 = vmatpush.bf16.msrb.mxu1 %v2109_v0  ;;  %v2911_v35 = vor.u32 %v2336_v30, %v2032_v29  ;;  %v2913_v36 = vor.u32 %v2334_v31, %v2034_v32  ;;  %v442_v0 = vld [vmem:[#allocation2 + $0xd8] sm:$0xff]  ;;  %v444_v6 = vld [vmem:[#allocation2 + $0x50] sm:$0xff]  ;;  %p2294_p11 = scmp.ne.s32.totalorder %s2472_s17, 3 }
  0xa0   : > { %1349 = vmatpush.bf16.msrb.mxu2 %v2173_v52  ;;  %v440_v52 = vld [vmem:[#allocation2 + $0xb0] sm:$0xff] }
  0xa1   : > { %1066 = vmatmul.bf16.gmra.mxu0 %v2775_v18  ;;  %1398 = vmatpush.bf16.msrb.mxu3 %v2237_v56 }
  0xa2   : > { %1115 = vmatmul.bf16.gmra.mxu1 %v2777_v19 }
  0xa3   : > { %1164 = vmatmul.bf16.gmra.mxu2 %v2779_v20 }
  0xa4   : > { %1213 = vmatmul.bf16.gmra.mxu3 %v2781_v21 }
  0xb1   : > { %1071 = vmatmul.bf16.gmra.mxu0 %v2803_v45 }
  0xb2   : > { %1120 = vmatmul.bf16.gmra.mxu1 %v2805_v46 }
  0xb3   : > { %1169 = vmatmul.bf16.gmra.mxu2 %v2807_v47 }
  0xb4   : > { %1218 = vmatmul.bf16.gmra.mxu3 %v2809_v48 }
  0xc1   : > { %1076 = vmatmul.bf16.gmra.mxu0 %v2831_v9 }
  0xc2   : > { %1125 = vmatmul.bf16.gmra.mxu1 %v2833_v10 }
  0xc3   : > { %1174 = vmatmul.bf16.gmra.mxu2 %v2835_v11 }
  0xc4   : > { %1223 = vmatmul.bf16.gmra.mxu3 %v2837_v12 }
  0xd1   : > { %1081 = vmatmul.bf16.gmra.mxu0 %v2859_v41 }
  0xd2   : > { %1130 = vmatmul.bf16.gmra.mxu1 %v2861_v42 }
  0xd3   : > { %1179 = vmatmul.bf16.gmra.mxu2 %v2863_v43 }
  0xd4   : > { %1228 = vmatmul.bf16.gmra.mxu3 %v2865_v44 }
  0xe1   : > { %1086 = vmatmul.bf16.gmra.mxu0 %v2887_v13 }
  0xe2   : > { %1135 = vmatmul.bf16.gmra.mxu1 %v2889_v14 }
  0xe3   : > { %1184 = vmatmul.bf16.gmra.mxu2 %v2891_v15 }
  0xe4   : > { %1233 = vmatmul.bf16.gmra.mxu3 %v2893_v16 }
  0xf1   : > { %1091 = vmatmul.bf16.gmra.mxu0 %v2907_v33 }
  0xf2   : > { %1140 = vmatmul.bf16.gmra.mxu1 %v2909_v34 }
  0xf3   : > { %1189 = vmatmul.bf16.gmra.mxu2 %v2911_v35 }
  0xf4   : > { %1238 = vmatmul.bf16.gmra.mxu3 %v2913_v36 }
  0xfe   : > { %v1057_v37 = vpop.f32.mrf.mxu0 }
  0xff   : > { %v1106_v38 = vpop.f32.mrf.mxu1 }
 0x100   : > { %v1107_v39 = vadd.f32 %v1106_v38, %v1057_v37 }
 0x101   : > { %1252 = vmatmul.bf16.vlgmr.msrb.gmra.mxu0 %v2710_v17 }
 0x102   : > { %1301 = vmatmul.bf16.vlgmr.msrb.gmra.mxu1 %v2715_v22 }
 0x103   : > { %1350 = vmatmul.bf16.vlgmr.msrb.gmra.mxu2 %v2717_v23 }
 0x104   : > { %1399 = vmatmul.bf16.vlgmr.msrb.gmra.mxu3 %v2721_v26 }
 0x106   : > { %v1155_v40 = vpop.f32.mrf.mxu2  ;;  %v1059_v51 = vpop.f32.mrf.mxu0 }
 0x107   : > { %v1156_v49 = vadd.f32 %v1155_v40, %v1107_v39  ;;  %v1204_v50 = vpop.f32.mrf.mxu3  ;;  %v1108_v53 = vpop.f32.mrf.mxu1  ;;  %v448_v40 = vld [vmem:[#allocation2 + $0x80] sm:$0xff] }
 0x108   : > { %v1109_v56 = vadd.f32 %v1108_v53, %v1059_v51 }
 0x109   : > { %v1205_v54 = vadd.f32 %v1204_v50, %v1156_v49 }
 0x10b   : > { %v1440_v55 = vadd.f32 %v1205_v54, %v440_v52 }
 0x10d   : > { %1472 = vst [vmem:[#allocation2 + $0xb0] sm:$0xff] %v1440_v55 }
 0x10e   : > { %v1157_v61 = vpop.f32.mrf.mxu2  ;;  %v1062_v63 = vpop.f32.mrf.mxu0 }
 0x10f   : > { %v1158_v62 = vadd.f32 %v1157_v61, %v1109_v56  ;;  %v1206_v17 = vpop.f32.mrf.mxu3  ;;  %v1111_v22 = vpop.f32.mrf.mxu1 }
 0x110   : > { %v1112_v26 = vadd.f32 %v1111_v22, %v1062_v63  ;;  %v452_v22 = vld [vmem:[#allocation2 + $0x60] sm:$0xff] }
 0x111   : > { %v1207_v1 = vadd.f32 %v1206_v17, %v1158_v62  ;;  %1257 = vmatmul.bf16.gmra.mxu0 %v2747_v57 }
 0x112   : > { %1306 = vmatmul.bf16.gmra.mxu1 %v2749_v58  ;;  %v446_v58 = vld [vmem:[#allocation2 + $0x30] sm:$0xff] }
 0x113   : > { %v1442_v23 = vadd.f32 %v1207_v1, %v442_v0  ;;  %1355 = vmatmul.bf16.gmra.mxu2 %v2751_v59 }
 0x114   : > { %1404 = vmatmul.bf16.gmra.mxu3 %v2753_v60 }
 0x115   : > { %1474 = vst [vmem:[#allocation2 + $0xd8] sm:$0xff] %v1442_v23 }
 0x116   : > { %v1160_v2 = vpop.f32.mrf.mxu2  ;;  %v1064_v5 = vpop.f32.mrf.mxu0 }
 0x117   : > { %v1161_v3 = vadd.f32 %v1160_v2, %v1112_v26  ;;  %v1209_v4 = vpop.f32.mrf.mxu3  ;;  %v1113_v7 = vpop.f32.mrf.mxu1 }
 0x118   : > { %v1114_v25 = vadd.f32 %v1113_v7, %v1064_v5 }
 0x119   : > { %v1210_v8 = vadd.f32 %v1209_v4, %v1161_v3 }
 0x11b   : > { %v1444_v24 = vadd.f32 %v1210_v8, %v444_v6 }
 0x11d   : > { %1476 = vst [vmem:[#allocation2 + $0x50] sm:$0xff] %v1444_v24 }
 0x11e   : > { %v1162_v57 = vpop.f32.mrf.mxu2  ;;  %v1067_v29 = vpop.f32.mrf.mxu0 }
 0x11f   : > { %v1163_v27 = vadd.f32 %v1162_v57, %v1114_v25  ;;  %v1211_v28 = vpop.f32.mrf.mxu3  ;;  %v1116_v30 = vpop.f32.mrf.mxu1 }
 0x120   : > { %v1117_v31 = vadd.f32 %v1116_v30, %v1067_v29 }
 0x121   : > { %v1212_v59 = vadd.f32 %v1211_v28, %v1163_v27  ;;  %1262 = vmatmul.bf16.gmra.mxu0 %v2775_v18  ;;  %v456_v27 = vld [vmem:[#allocation2 + $0x38] sm:$0xff] }
 0x122   : > { %1311 = vmatmul.bf16.gmra.mxu1 %v2777_v19  ;;  %v450_v19 = vld [vmem:[#allocation2 + $0xe8] sm:$0xff] }
 0x123   : > { %v1446_v60 = vadd.f32 %v1212_v59, %v446_v58  ;;  %1360 = vmatmul.bf16.gmra.mxu2 %v2779_v20 }
 0x124   : > { %1409 = vmatmul.bf16.gmra.mxu3 %v2781_v21 }
 0x125   : > { %1478 = vst [vmem:[#allocation2 + $0x30] sm:$0xff] %v1446_v60 }
 0x126   : > { %v1165_v32 = vpop.f32.mrf.mxu2  ;;  %v1069_v39 = vpop.f32.mrf.mxu0 }
 0x127   : > { %v1166_v37 = vadd.f32 %v1165_v32, %v1117_v31  ;;  %v1214_v38 = vpop.f32.mrf.mxu3  ;;  %v1118_v49 = vpop.f32.mrf.mxu1 }
 0x128   : > { %v1119_v52 = vadd.f32 %v1118_v49, %v1069_v39 }
 0x129   : > { %v1215_v50 = vadd.f32 %v1214_v38, %v1166_v37 }
 0x12b   : > { %v1448_v51 = vadd.f32 %v1215_v50, %v448_v40  ;;  %v460_v50 = vld [vmem:[#allocation2 + $0xe0] sm:$0xff] }
 0x12d   : > { %1480 = vst [vmem:[#allocation2 + $0x80] sm:$0xff] %v1448_v51 }
 0x12e   : > { %v1167_v18 = vpop.f32.mrf.mxu2  ;;  %v1072_v55 = vpop.f32.mrf.mxu0 }
 0x12f   : > { %v1168_v53 = vadd.f32 %v1167_v18, %v1119_v52  ;;  %v1216_v54 = vpop.f32.mrf.mxu3  ;;  %v1121_v56 = vpop.f32.mrf.mxu1 }
 0x130   : > { %v1122_v61 = vadd.f32 %v1121_v56, %v1072_v55 }
 0x131   : > { %v1217_v20 = vadd.f32 %v1216_v54, %v1168_v53  ;;  %1267 = vmatmul.bf16.gmra.mxu0 %v2803_v45 }
 0x132   : > { %1316 = vmatmul.bf16.gmra.mxu1 %v2805_v46  ;;  %v454_v46 = vld [vmem:[#allocation2 + $0x8] sm:$0xff] }
 0x133   : > { %v1450_v21 = vadd.f32 %v1217_v20, %v450_v19  ;;  %1365 = vmatmul.bf16.gmra.mxu2 %v2807_v47 }
 0x134   : > { %1414 = vmatmul.bf16.gmra.mxu3 %v2809_v48 }
 0x135   : > { %1482 = vst [vmem:[#allocation2 + $0xe8] sm:$0xff] %v1450_v21 }
 0x136   : > { %v1170_v62 = vpop.f32.mrf.mxu2  ;;  %v1074_v0 = vpop.f32.mrf.mxu0 }
 0x137   : > { %v1171_v17 = vadd.f32 %v1170_v62, %v1122_v61  ;;  %v1219_v63 = vpop.f32.mrf.mxu3  ;;  %v1123_v1 = vpop.f32.mrf.mxu1 }
 0x138   : > { %v1124_v2 = vadd.f32 %v1123_v1, %v1074_v0 }
 0x139   : > { %v1220_v23 = vadd.f32 %v1219_v63, %v1171_v17  ;;  %v464_v63 = vld [vmem:[#allocation2 + $0xa8] sm:$0xff] }
 0x13b   : > { %v1452_v26 = vadd.f32 %v1220_v23, %v452_v22 }
 0x13d   : > { %1484 = vst [vmem:[#allocation2 + $0x60] sm:$0xff] %v1452_v26 }
 0x13e   : > { %v1172_v45 = vpop.f32.mrf.mxu2  ;;  %v1077_v5 = vpop.f32.mrf.mxu0 }
 0x13f   : > { %v1173_v3 = vadd.f32 %v1172_v45, %v1124_v2  ;;  %v1221_v4 = vpop.f32.mrf.mxu3  ;;  %v1126_v6 = vpop.f32.mrf.mxu1 }
 0x140   : > { %v1127_v7 = vadd.f32 %v1126_v6, %v1077_v5 }
 0x141   : > { %v1222_v47 = vadd.f32 %v1221_v4, %v1173_v3  ;;  %1272 = vmatmul.bf16.gmra.mxu0 %v2831_v9 }
 0x142   : > { %1321 = vmatmul.bf16.gmra.mxu1 %v2833_v10  ;;  %v458_v10 = vld [vmem:[#allocation2 + $0x40] sm:$0xff] }
 0x143   : > { %v1454_v48 = vadd.f32 %v1222_v47, %v454_v46  ;;  %1370 = vmatmul.bf16.gmra.mxu2 %v2835_v11 }
 0x144   : > { %1419 = vmatmul.bf16.gmra.mxu3 %v2837_v12 }
 0x145   : > { %1486 = vst [vmem:[#allocation2 + $0x8] sm:$0xff] %v1454_v48  ;;  %v468_v48 = vld [vmem:[#allocation2 + $0xa0] sm:$0xff] }
 0x146   : > { %v1175_v8 = vpop.f32.mrf.mxu2  ;;  %v1079_v57 = vpop.f32.mrf.mxu0 }
 0x147   : > { %v1176_v24 = vadd.f32 %v1175_v8, %v1127_v7  ;;  %v1224_v25 = vpop.f32.mrf.mxu3  ;;  %v1128_v28 = vpop.f32.mrf.mxu1 }
 0x148   : > { %v1129_v30 = vadd.f32 %v1128_v28, %v1079_v57 }
 0x149   : > { %v1225_v29 = vadd.f32 %v1224_v25, %v1176_v24 }
 0x14b   : > { %v1456_v58 = vadd.f32 %v1225_v29, %v456_v27 }
 0x14d   : > { %1488 = vst [vmem:[#allocation2 + $0x38] sm:$0xff] %v1456_v58 }
 0x14e   : > { %v1177_v9 = vpop.f32.mrf.mxu2  ;;  %v1082_v31 = vpop.f32.mrf.mxu0 }
 0x14f   : > { %v1178_v59 = vadd.f32 %v1177_v9, %v1129_v30  ;;  %v1226_v60 = vpop.f32.mrf.mxu3  ;;  %v1131_v32 = vpop.f32.mrf.mxu1 }
 0x150   : > { %v1132_v37 = vadd.f32 %v1131_v32, %v1082_v31  ;;  %v441_v31 = vld [vmem:[#allocation2] sm:$0xff] }
 0x151   : > { %v1227_v11 = vadd.f32 %v1226_v60, %v1178_v59  ;;  %1277 = vmatmul.bf16.gmra.mxu0 %v2859_v41 }
 0x152   : > { %1326 = vmatmul.bf16.gmra.mxu1 %v2861_v42  ;;  %v462_v42 = vld [vmem:[#allocation2 + $0x70] sm:$0xff] }
 0x153   : > { %v1458_v12 = vadd.f32 %v1227_v11, %v458_v10  ;;  %1375 = vmatmul.bf16.gmra.mxu2 %v2863_v43 }
 0x154   : > { %1424 = vmatmul.bf16.gmra.mxu3 %v2865_v44 }
 0x155   : > { %1490 = vst [vmem:[#allocation2 + $0x40] sm:$0xff] %v1458_v12 }
 0x156   : > { %v1180_v38 = vpop.f32.mrf.mxu2  ;;  %v1084_v49 = vpop.f32.mrf.mxu0 }
 0x157   : > { %v1181_v39 = vadd.f32 %v1180_v38, %v1132_v37  ;;  %v1229_v40 = vpop.f32.mrf.mxu3  ;;  %v1133_v51 = vpop.f32.mrf.mxu1 }
 0x158   : > { %v1134_v53 = vadd.f32 %v1133_v51, %v1084_v49  ;;  %v443_v49 = vld [vmem:[#allocation2 + $0x18] sm:$0xff] }
 0x159   : > { %v1230_v52 = vadd.f32 %v1229_v40, %v1181_v39 }
 0x15b   : > { %v1460_v18 = vadd.f32 %v1230_v52, %v460_v50 }
 0x15d   : > { %1492 = vst [vmem:[#allocation2 + $0xe0] sm:$0xff] %v1460_v18 }
 0x15e   : > { %v1182_v41 = vpop.f32.mrf.mxu2  ;;  %v1087_v19 = vpop.f32.mrf.mxu0 }
 0x15f   : > { %v1183_v54 = vadd.f32 %v1182_v41, %v1134_v53  ;;  %v1231_v55 = vpop.f32.mrf.mxu3  ;;  %v1136_v56 = vpop.f32.mrf.mxu1 }
 0x160   : > { %v1137_v20 = vadd.f32 %v1136_v56, %v1087_v19  ;;  %v445_v19 = vld [vmem:[#allocation2 + $0x68] sm:$0xff] }
 0x161   : > { %v1232_v43 = vadd.f32 %v1231_v55, %v1183_v54  ;;  %1282 = vmatmul.bf16.gmra.mxu0 %v2887_v13 }
 0x162   : > { %1331 = vmatmul.bf16.gmra.mxu1 %v2889_v14  ;;  %v466_v14 = vld [vmem:[#allocation2 + $0x10] sm:$0xff] }
 0x163   : > { %v1462_v44 = vadd.f32 %v1232_v43, %v462_v42  ;;  %1380 = vmatmul.bf16.gmra.mxu2 %v2891_v15 }
 0x164   : > { %1429 = vmatmul.bf16.gmra.mxu3 %v2893_v16 }
 0x165   : > { %1494 = vst [vmem:[#allocation2 + $0x70] sm:$0xff] %v1462_v44 }
 0x166   : > { %v1185_v21 = vpop.f32.mrf.mxu2  ;;  %v1089_v17 = vpop.f32.mrf.mxu0 }
 0x167   : > { %v1186_v61 = vadd.f32 %v1185_v21, %v1137_v20  ;;  %v1234_v62 = vpop.f32.mrf.mxu3  ;;  %v1138_v0 = vpop.f32.mrf.mxu1 }
 0x168   : > { %v1139_v23 = vadd.f32 %v1138_v0, %v1089_v17  ;;  %v447_v17 = vld [vmem:[#allocation2 + $0x48] sm:$0xff] }
 0x169   : > { %v1235_v22 = vadd.f32 %v1234_v62, %v1186_v61 }
 0x16b   : > { %v1464_v1 = vadd.f32 %v1235_v22, %v464_v63 }
 0x16d   : > { %1496 = vst [vmem:[#allocation2 + $0xa8] sm:$0xff] %v1464_v1 }
 0x16e   : > { %v1187_v13 = vpop.f32.mrf.mxu2  ;;  %v1092_v45 = vpop.f32.mrf.mxu0 }
 0x16f   : > { %v1188_v26 = vadd.f32 %v1187_v13, %v1139_v23  ;;  %v1236_v2 = vpop.f32.mrf.mxu3  ;;  %v1141_v3 = vpop.f32.mrf.mxu1 }
 0x170   : > { %v1142_v4 = vadd.f32 %v1141_v3, %v1092_v45  ;;  %v449_v45 = vld [vmem:[#allocation2 + $0x88] sm:$0xff] }
 0x171   : > { %v1237_v15 = vadd.f32 %v1236_v2, %v1188_v26  ;;  %1287 = vmatmul.bf16.gmra.mxu0 %v2907_v33 }
 0x172   : > { %1336 = vmatmul.bf16.gmra.mxu1 %v2909_v34  ;;  %v470_v34 = vld [vmem:[#allocation2 + $0x20] sm:$0xff] }
 0x173   : > { %v1466_v16 = vadd.f32 %v1237_v15, %v466_v14  ;;  %1385 = vmatmul.bf16.gmra.mxu2 %v2911_v35 }
 0x174   : > { %1434 = vmatmul.bf16.gmra.mxu3 %v2913_v36 }
 0x175   : > { %1498 = vst [vmem:[#allocation2 + $0x10] sm:$0xff] %v1466_v16 }
 0x176   : > { %v1190_v5 = vpop.f32.mrf.mxu2  ;;  %v1094_v47 = vpop.f32.mrf.mxu0 }
 0x177   : > { %v1191_v46 = vadd.f32 %v1190_v5, %v1142_v4  ;;  %v1239_v6 = vpop.f32.mrf.mxu3  ;;  %v1143_v7 = vpop.f32.mrf.mxu1 }
 0x178   : > { %v1144_v25 = vadd.f32 %v1143_v7, %v1094_v47  ;;  %v451_v47 = vld [vmem:[#allocation2 + $0xb8] sm:$0xff] }
 0x179   : > { %v1240_v8 = vadd.f32 %v1239_v6, %v1191_v46 }
 0x17b   : > { %v1468_v24 = vadd.f32 %v1240_v8, %v468_v48 }
 0x17d   : > { %1500 = vst [vmem:[#allocation2 + $0xa0] sm:$0xff] %v1468_v24 }
 0x17e   : > { %v1192_v33 = vpop.f32.mrf.mxu2  ;;  %v1253_v28 = vpop.f32.mrf.mxu0 }
 0x17f   : > { %v1193_v57 = vadd.f32 %v1192_v33, %v1144_v25  ;;  %v1241_v27 = vpop.f32.mrf.mxu3  ;;  %v1302_v29 = vpop.f32.mrf.mxu1 }
 0x180   : > { %v1303_v36 = vadd.f32 %v1302_v29, %v1253_v28  ;;  %v453_v28 = vld [vmem:[#allocation2 + $0xf0] sm:$0xff] }
 0x181   : > { %v1242_v35 = vadd.f32 %v1241_v27, %v1193_v57 }
 0x183   : > { %v1470_v58 = vadd.f32 %v1242_v35, %v470_v34 }
 0x185   : > { %1502 = vst [vmem:[#allocation2 + $0x20] sm:$0xff] %v1470_v58 }
 0x186   : > { %v1351_v30 = vpop.f32.mrf.mxu2  ;;  %v1255_v60 = vpop.f32.mrf.mxu0 }
 0x187   : > { %v1352_v9 = vadd.f32 %v1351_v30, %v1303_v36  ;;  %v1400_v59 = vpop.f32.mrf.mxu3  ;;  %v1304_v10 = vpop.f32.mrf.mxu1 }
 0x188   : > { %v1305_v12 = vadd.f32 %v1304_v10, %v1255_v60  ;;  %v455_v60 = vld [vmem:[#allocation2 + $0x78] sm:$0xff] }
 0x189   : > { %v1401_v32 = vadd.f32 %v1400_v59, %v1352_v9 }
 0x18b   : > { %v1441_v11 = vadd.f32 %v1401_v32, %v441_v31 }
 0x18d   : > { %1473 = vst [vmem:[#allocation2] sm:$0xff] %v1441_v11 }
 0x18e   : > { %v1353_v37 = vpop.f32.mrf.mxu2  ;;  %v1258_v40 = vpop.f32.mrf.mxu0 }
 0x18f   : > { %v1354_v38 = vadd.f32 %v1353_v37, %v1305_v12  ;;  %v1402_v39 = vpop.f32.mrf.mxu3  ;;  %v1307_v50 = vpop.f32.mrf.mxu1 }
 0x190   : > { %v1308_v18 = vadd.f32 %v1307_v50, %v1258_v40  ;;  %v457_v40 = vld [vmem:[#allocation2 + $0x58] sm:$0xff] }
 0x191   : > { %v1403_v51 = vadd.f32 %v1402_v39, %v1354_v38 }
 0x193   : > { %v1443_v52 = vadd.f32 %v1403_v51, %v443_v49 }
 0x195   : > { %1475 = vst [vmem:[#allocation2 + $0x18] sm:$0xff] %v1443_v52 }
 0x196   : > { %v1356_v53 = vpop.f32.mrf.mxu2  ;;  %v1260_v55 = vpop.f32.mrf.mxu0 }
 0x197   : > { %v1357_v41 = vadd.f32 %v1356_v53, %v1308_v18  ;;  %v1405_v54 = vpop.f32.mrf.mxu3  ;;  %v1309_v42 = vpop.f32.mrf.mxu1 }
 0x198   : > { %v1310_v44 = vadd.f32 %v1309_v42, %v1260_v55  ;;  %v459_v55 = vld [vmem:[#allocation2 + $0xc8] sm:$0xff] }
 0x199   : > { %v1406_v56 = vadd.f32 %v1405_v54, %v1357_v41 }
 0x19b   : > { %v1445_v43 = vadd.f32 %v1406_v56, %v445_v19 }
 0x19d   : > { %1477 = vst [vmem:[#allocation2 + $0x68] sm:$0xff] %v1445_v43 }
 0x19e   : > { %v1358_v20 = vpop.f32.mrf.mxu2  ;;  %v1263_v62 = vpop.f32.mrf.mxu0 }
 0x19f   : > { %v1359_v21 = vadd.f32 %v1358_v20, %v1310_v44  ;;  %v1407_v61 = vpop.f32.mrf.mxu3  ;;  %v1312_v63 = vpop.f32.mrf.mxu1 }
 0x1a0   : > { %v1313_v1 = vadd.f32 %v1312_v63, %v1263_v62  ;;  %v461_v62 = vld [vmem:[#allocation2 + $0x90] sm:$0xff] }
 0x1a1   : > { %v1408_v0 = vadd.f32 %v1407_v61, %v1359_v21 }
 0x1a3   : > { %v1447_v22 = vadd.f32 %v1408_v0, %v447_v17 }
 0x1a5   : > { %1479 = vst [vmem:[#allocation2 + $0x48] sm:$0xff] %v1447_v22 }
 0x1a6   : > { %v1361_v23 = vpop.f32.mrf.mxu2  ;;  %v1265_v2 = vpop.f32.mrf.mxu0 }
 0x1a7   : > { %v1362_v13 = vadd.f32 %v1361_v23, %v1313_v1  ;;  %v1410_v26 = vpop.f32.mrf.mxu3  ;;  %v1314_v14 = vpop.f32.mrf.mxu1 }
 0x1a8   : > { %v1315_v16 = vadd.f32 %v1314_v14, %v1265_v2  ;;  %v463_v2 = vld [vmem:[#allocation2 + $0xc0] sm:$0xff] }
 0x1a9   : > { %v1411_v3 = vadd.f32 %v1410_v26, %v1362_v13 }
 0x1ab   : > { %v1449_v15 = vadd.f32 %v1411_v3, %v449_v45 }
 0x1ad   : > { %1481 = vst [vmem:[#allocation2 + $0x88] sm:$0xff] %v1449_v15 }
 0x1ae   : > { %v1363_v4 = vpop.f32.mrf.mxu2  ;;  %v1268_v6 = vpop.f32.mrf.mxu0 }
 0x1af   : > { %v1364_v5 = vadd.f32 %v1363_v4, %v1315_v16  ;;  %v1412_v46 = vpop.f32.mrf.mxu3  ;;  %v1317_v48 = vpop.f32.mrf.mxu1 }
 0x1b0   : > { %v1318_v24 = vadd.f32 %v1317_v48, %v1268_v6  ;;  %v465_v6 = vld [vmem:[#allocation2 + $0xd0] sm:$0xff] }
 0x1b1   : > { %v1413_v7 = vadd.f32 %v1412_v46, %v1364_v5 }
 0x1b3   : > { %v1451_v8 = vadd.f32 %v1413_v7, %v451_v47 }
 0x1b5   : > { %1483 = vst [vmem:[#allocation2 + $0xb8] sm:$0xff] %v1451_v8 }
 0x1b6   : > { %v1366_v25 = vpop.f32.mrf.mxu2  ;;  %v1270_v27 = vpop.f32.mrf.mxu0 }
 0x1b7   : > { %v1367_v33 = vadd.f32 %v1366_v25, %v1318_v24  ;;  %v1415_v57 = vpop.f32.mrf.mxu3  ;;  %v1319_v34 = vpop.f32.mrf.mxu1 }
 0x1b8   : > { %v1320_v58 = vadd.f32 %v1319_v34, %v1270_v27 }
 0x1b9   : > { %v1416_v29 = vadd.f32 %v1415_v57, %v1367_v33  ;;  %v467_v57 = vld [vmem:[#allocation2 + $0x28] sm:$0xff] }
 0x1bb   : > { %v1453_v35 = vadd.f32 %v1416_v29, %v453_v28 }
 0x1bd   : > { %1485 = vst [vmem:[#allocation2 + $0xf0] sm:$0xff] %v1453_v35 }
 0x1be   : > { %v1368_v36 = vpop.f32.mrf.mxu2  ;;  %v1273_v59 = vpop.f32.mrf.mxu0 }
 0x1bf   : > { %v1369_v30 = vadd.f32 %v1368_v36, %v1320_v58  ;;  %v1417_v9 = vpop.f32.mrf.mxu3  ;;  %v1322_v31 = vpop.f32.mrf.mxu1 }
 0x1c0   : > { %v1323_v11 = vadd.f32 %v1322_v31, %v1273_v59 }
 0x1c1   : > { %v1418_v10 = vadd.f32 %v1417_v9, %v1369_v30  ;;  %v469_v9 = vld [vmem:[#allocation2 + $0xf8] sm:$0xff] }
 0x1c3   : > { %v1455_v32 = vadd.f32 %v1418_v10, %v455_v60 }
 0x1c5   : > { %1487 = vst [vmem:[#allocation2 + $0x78] sm:$0xff] %v1455_v32 }
 0x1c6   : > { %v1371_v12 = vpop.f32.mrf.mxu2  ;;  %v1275_v39 = vpop.f32.mrf.mxu0 }
 0x1c7   : > { %v1372_v37 = vadd.f32 %v1371_v12, %v1323_v11  ;;  %v1420_v38 = vpop.f32.mrf.mxu3  ;;  %v1324_v49 = vpop.f32.mrf.mxu1 }
 0x1c8   : > { %v1325_v52 = vadd.f32 %v1324_v49, %v1275_v39 }
 0x1c9   : > { %v1421_v50 = vadd.f32 %v1420_v38, %v1372_v37  ;;  %v471_v37 = vld [vmem:[#allocation2 + $0x98] sm:$0xff] }
 0x1cb   : > { %v1457_v51 = vadd.f32 %v1421_v50, %v457_v40 }
 0x1cd   : > { %1489 = vst [vmem:[#allocation2 + $0x58] sm:$0xff] %v1457_v51 }
 0x1ce   : > { %v1373_v18 = vpop.f32.mrf.mxu2  ;;  %v1278_v54 = vpop.f32.mrf.mxu0 }
 0x1cf   : > { %v1374_v53 = vadd.f32 %v1373_v18, %v1325_v52  ;;  %v1422_v41 = vpop.f32.mrf.mxu3  ;;  %v1327_v19 = vpop.f32.mrf.mxu1 }
 0x1d0   : > { %v1328_v43 = vadd.f32 %v1327_v19, %v1278_v54 }
 0x1d1   : > { %v1423_v42 = vadd.f32 %v1422_v41, %v1374_v53 }
 0x1d3   : > { %v1459_v56 = vadd.f32 %v1423_v42, %v459_v55 }
 0x1d5   : > { %1491 = vst [vmem:[#allocation2 + $0xc8] sm:$0xff] %v1459_v56 }
 0x1d6   : > { %v1376_v44 = vpop.f32.mrf.mxu2  ;;  %v1280_v61 = vpop.f32.mrf.mxu0 }
 0x1d7   : > { %v1377_v20 = vadd.f32 %v1376_v44, %v1328_v43  ;;  %v1425_v21 = vpop.f32.mrf.mxu3  ;;  %v1329_v17 = vpop.f32.mrf.mxu1 }
 0x1d8   : > { %v1330_v22 = vadd.f32 %v1329_v17, %v1280_v61 }
 0x1d9   : > { %v1426_v63 = vadd.f32 %v1425_v21, %v1377_v20 }
 0x1db   : > { %v1461_v0 = vadd.f32 %v1426_v63, %v461_v62 }
 0x1dd   : > { %1493 = vst [vmem:[#allocation2 + $0x90] sm:$0xff] %v1461_v0 }
 0x1de   : > { %v1378_v1 = vpop.f32.mrf.mxu2  ;;  %v1283_v26 = vpop.f32.mrf.mxu0 }
 0x1df   : > { %v1379_v23 = vadd.f32 %v1378_v1, %v1330_v22  ;;  %v1427_v13 = vpop.f32.mrf.mxu3  ;;  %v1332_v45 = vpop.f32.mrf.mxu1 }
 0x1e0   : > { %v1333_v15 = vadd.f32 %v1332_v45, %v1283_v26 }
 0x1e1   : > { %v1428_v14 = vadd.f32 %v1427_v13, %v1379_v23 }
 0x1e3   : > { %v1463_v3 = vadd.f32 %v1428_v14, %v463_v2 }
 0x1e5   : > { %1495 = vst [vmem:[#allocation2 + $0xc0] sm:$0xff] %v1463_v3 }
 0x1e6   : > { %v1381_v16 = vpop.f32.mrf.mxu2  ;;  %v1285_v46 = vpop.f32.mrf.mxu0 }
 0x1e7   : > { %v1382_v4 = vadd.f32 %v1381_v16, %v1333_v15  ;;  %v1430_v5 = vpop.f32.mrf.mxu3  ;;  %v1334_v47 = vpop.f32.mrf.mxu1 }
 0x1e8   : > { %v1335_v8 = vadd.f32 %v1334_v47, %v1285_v46 }
 0x1e9   : > { %v1431_v48 = vadd.f32 %v1430_v5, %v1382_v4 }
 0x1eb   : > { %v1465_v7 = vadd.f32 %v1431_v48, %v465_v6 }
 0x1ed   : > { %1497 = vst [vmem:[#allocation2 + $0xd0] sm:$0xff] %v1465_v7 }
 0x1ee   : > { %v1383_v24 = vpop.f32.mrf.mxu2  ;;  %v1288_v27 = vpop.f32.mrf.mxu0 }
 0x1ef   : > { %v1384_v25 = vadd.f32 %v1383_v24, %v1335_v8  ;;  %v1432_v33 = vpop.f32.mrf.mxu3  ;;  %v1337_v28 = vpop.f32.mrf.mxu1 }
 0x1f0   : > { %v1338_v35 = vadd.f32 %v1337_v28, %v1288_v27 }
 0x1f1   : > { %v1433_v34 = vadd.f32 %v1432_v33, %v1384_v25 }
 0x1f3   : > { %v1467_v29 = vadd.f32 %v1433_v34, %v467_v57 }
 0x1f5   : > { %1499 = vst [vmem:[#allocation2 + $0x28] sm:$0xff] %v1467_v29 }
 0x1f6   : > { %v1386_v58 = vpop.f32.mrf.mxu2  ;;  %v1290_v60 = vpop.f32.mrf.mxu0 }
 0x1f7   : > { %v1387_v36 = vadd.f32 %v1386_v58, %v1338_v35  ;;  %v1435_v30 = vpop.f32.mrf.mxu3  ;;  %v1339_v31 = vpop.f32.mrf.mxu1 }
 0x1f8   : > { %v1340_v32 = vadd.f32 %v1339_v31, %v1290_v60 }
 0x1f9   : > { %v1436_v59 = vadd.f32 %v1435_v30, %v1387_v36 }
 0x1fb   : > { %v1469_v10 = vadd.f32 %v1436_v59, %v469_v9 }
 0x1fd   : > { %1501 = vst [vmem:[#allocation2 + $0xf8] sm:$0xff] %v1469_v10 }
 0x1fe   : > { %v1388_v11 = vpop.f32.mrf.mxu2 }
 0x1ff   : > { %v1389_v12 = vadd.f32 %v1388_v11, %v1340_v32  ;;  %v1437_v38 = vpop.f32.mrf.mxu3 }
 0x201   : > { %v1438_v39 = vadd.f32 %v1437_v38, %v1389_v12  ;;  %1507 = sbr.rel (%p2294_p11) target bundleno = 568 (0x238), region = 59 }
 0x203   : > { %v1471_v40 = vadd.f32 %v1438_v39, %v471_v37 }
 0x205   : > { %1503 = vst [vmem:[#allocation2 + $0x98] sm:$0xff] %v1471_v40 }
 0x206   : > { %v1508_v49 = vld [vmem:[#allocation2 + $0xb0] sm:$0xff]  ;;  %v1509_v50 = vld [vmem:[#allocation2] sm:$0xff]  ;;  %v1510_v51 = vld [vmem:[#allocation2 + $0xd8] sm:$0xff]  ;;  %vm1617_vm0 = vcmask 1040384  }
 0x207   : > { %1540 = vst [vmem:[%s3071_s2] sm:$0xff] %v1508_v49  ;;  %v1625_v52 = vmul.f32 %v1508_v49, %v1508_v49  ;;  %v1626_v18 = vmul.f32 %v1509_v50, %v1509_v50  ;;  %v1572_v53 = vadd.f32 %v1510_v51, %v1508_v49  ;;  %v1627_v41 = vmul.f32 %v1510_v51, %v1510_v51  ;;  %v1511_v54 = vld [vmem:[#allocation2 + $0x18] sm:$0xff]  ;;  %v1512_v55 = vld [vmem:[#allocation2 + $0x50] sm:$0xff]  ;;  %v1513_v19 = vld [vmem:[#allocation2 + $0x68] sm:$0xff] }
 0x208   : > { %1541 = vst [vmem:[%s3071_s2 + $0x8] sm:$0xff] %v1509_v50  ;;  %v1593_v42 = vadd.f32 %v1511_v54, %v1509_v50  ;;  %v1628_v56 = vmul.f32 %v1511_v54, %v1511_v54  ;;  %v1629_v43 = vmul.f32 %v1512_v55, %v1512_v55  ;;  %v1630_v44 = vmul.f32 %v1513_v19, %v1513_v19  ;;  %v1514_v20 = vld [vmem:[#allocation2 + $0x30] sm:$0xff]  ;;  %v1515_v21 = vld [vmem:[#allocation2 + $0x48] sm:$0xff]  ;;  %v1516_v61 = vld [vmem:[#allocation2 + $0x80] sm:$0xff] }
 0x209   : > { %1542 = vst [vmem:[%s3071_s2 + $0x10] sm:$0xff] %v1510_v51  ;;  %v1657_v62 = vadd.f32 %v1627_v41, %v1625_v52  ;;  %v1573_v17 = vadd.f32 %v1572_v53, %v1512_v55  ;;  %v1631_v63 = vmul.f32 %v1514_v20, %v1514_v20  ;;  %v1517_v0 = vld [vmem:[#allocation2 + $0x88] sm:$0xff]  ;;  %v1632_v23 = vmul.f32 %v1515_v21, %v1515_v21  ;;  %v1519_v14 = vld [vmem:[#allocation2 + $0xb8] sm:$0xff]  ;;  %v1520_v4 = vld [vmem:[#allocation2 + $0x60] sm:$0xff] }
 0x20a   : > { %1543 = vst [vmem:[%s3071_s2 + $0x18] sm:$0xff] %v1511_v54  ;;  %v1678_v22 = vadd.f32 %v1628_v56, %v1626_v18  ;;  %v1594_v1 = vadd.f32 %v1593_v42, %v1513_v19  ;;  %v1518_v13 = vld [vmem:[#allocation2 + $0xe8] sm:$0xff]  ;;  %v1633_v45 = vmul.f32 %v1516_v61, %v1516_v61  ;;  %v1634_v16 = vmul.f32 %v1517_v0, %v1517_v0  ;;  %v1521_v47 = vld [vmem:[#allocation2 + $0xf0] sm:$0xff]  ;;  %v1523_v27 = vld [vmem:[#allocation2 + $0x78] sm:$0xff] }
 0x20b   : > { %1544 = vst [vmem:[%s3071_s2 + $0x20] sm:$0xff] %v1512_v55  ;;  %v1658_v26 = vadd.f32 %v1657_v62, %v1629_v43  ;;  %v1574_v2 = vadd.f32 %v1573_v17, %v1514_v20  ;;  %v1635_v6 = vmul.f32 %v1518_v13, %v1518_v13  ;;  %v1636_v8 = vmul.f32 %v1519_v14, %v1519_v14  ;;  %v1522_v24 = vld [vmem:[#allocation2 + $0x8] sm:$0xff]  ;;  %v1524_v35 = vld [vmem:[#allocation2 + $0x38] sm:$0xff]  ;;  %v1526_v10 = vld [vmem:[#allocation2 + $0x40] sm:$0xff] }
 0x20c   : > { %1545 = vst [vmem:[%s3071_s2 + $0x28] sm:$0xff] %v1513_v19  ;;  %v1679_v3 = vadd.f32 %v1678_v22, %v1630_v44  ;;  %v1595_v15 = vadd.f32 %v1594_v1, %v1515_v21  ;;  %v1637_v57 = vmul.f32 %v1520_v4, %v1520_v4  ;;  %v1638_v29 = vmul.f32 %v1521_v47, %v1521_v47  ;;  %v1525_v9 = vld [vmem:[#allocation2 + $0x58] sm:$0xff]  ;;  %v1527_v37 = vld [vmem:[#allocation2 + $0xc8] sm:$0xff]  ;;  %v1528_v49 = vld [vmem:[#allocation2 + $0xe0] sm:$0xff] }
 0x20d   : > { %1546 = vst [vmem:[%s3071_s2 + $0x30] sm:$0xff] %v1514_v20  ;;  %v1659_v5 = vadd.f32 %v1658_v26, %v1631_v63  ;;  %v1575_v46 = vadd.f32 %v1574_v2, %v1516_v61  ;;  %v1639_v30 = vmul.f32 %v1522_v24, %v1522_v24  ;;  %v1640_v31 = vmul.f32 %v1523_v27, %v1523_v27  ;;  %v1529_v18 = vld [vmem:[#allocation2 + $0x90] sm:$0xff]  ;;  %v1531_v43 = vld [vmem:[#allocation2 + $0xc0] sm:$0xff] }
 0x20e   : > { %1547 = vst [vmem:[%s3071_s2 + $0x38] sm:$0xff] %v1515_v21  ;;  %v1680_v48 = vadd.f32 %v1679_v3, %v1632_v23  ;;  %v1596_v7 = vadd.f32 %v1595_v15, %v1517_v0  ;;  %v1641_v12 = vmul.f32 %v1524_v35, %v1524_v35  ;;  %v1642_v40 = vmul.f32 %v1525_v9, %v1525_v9  ;;  %v1530_v55 = vld [vmem:[#allocation2 + $0x70] sm:$0xff] }
 0x20f   : > { %1548 = vst [vmem:[%s3071_s2 + $0x40] sm:$0xff] %v1516_v61  ;;  %v1660_v25 = vadd.f32 %v1659_v5, %v1633_v45  ;;  %v1576_v33 = vadd.f32 %v1575_v46, %v1518_v13  ;;  %v1643_v52 = vmul.f32 %v1526_v10, %v1526_v10  ;;  %v1644_v54 = vmul.f32 %v1527_v37, %v1527_v37  ;;  %v1532_v61 = vld [vmem:[#allocation2 + $0xa8] sm:$0xff] }
 0x210   : > { %1549 = vst [vmem:[%s3071_s2 + $0x48] sm:$0xff] %v1517_v0  ;;  %v1681_v28 = vadd.f32 %v1680_v48, %v1634_v16  ;;  %v1597_v34 = vadd.f32 %v1596_v7, %v1519_v14  ;;  %v1645_v56 = vmul.f32 %v1528_v49, %v1528_v49  ;;  %v1646_v21 = vmul.f32 %v1529_v18, %v1529_v18  ;;  %v1533_v0 = vld [vmem:[#allocation2 + $0xd0] sm:$0xff] }
 0x211   : > { %1550 = vst [vmem:[%s3071_s2 + $0x50] sm:$0xff] %v1518_v13  ;;  %v1661_v58 = vadd.f32 %v1660_v25, %v1635_v6  ;;  %v1577_v36 = vadd.f32 %v1576_v33, %v1520_v4  ;;  %v1647_v63 = vmul.f32 %v1530_v55, %v1530_v55  ;;  %v1648_v23 = vmul.f32 %v1531_v43, %v1531_v43  ;;  %v1534_v13 = vld [vmem:[#allocation2 + $0x10] sm:$0xff] }
 0x212   : > { %1551 = vst [vmem:[%s3071_s2 + $0x58] sm:$0xff] %v1519_v14  ;;  %v1682_v59 = vadd.f32 %v1681_v28, %v1636_v8  ;;  %v1598_v60 = vadd.f32 %v1597_v34, %v1521_v47  ;;  %v1649_v45 = vmul.f32 %v1532_v61, %v1532_v61  ;;  %v1535_v14 = vld [vmem:[#allocation2 + $0x28] sm:$0xff]  ;;  %v1650_v16 = vmul.f32 %v1533_v0, %v1533_v0 }
 0x213   : > { %1552 = vst [vmem:[%s3071_s2 + $0x60] sm:$0xff] %v1520_v4  ;;  %v1662_v32 = vadd.f32 %v1661_v58, %v1637_v57  ;;  %v1578_v11 = vadd.f32 %v1577_v36, %v1522_v24  ;;  %v1536_v4 = vld [vmem:[#allocation2 + $0xa0] sm:$0xff]  ;;  %v1651_v6 = vmul.f32 %v1534_v13, %v1534_v13  ;;  %v1652_v8 = vmul.f32 %v1535_v14, %v1535_v14 }
 0x214   : > { %1553 = vst [vmem:[%s3071_s2 + $0x68] sm:$0xff] %v1521_v47  ;;  %v1683_v38 = vadd.f32 %v1682_v59, %v1638_v29  ;;  %v1599_v39 = vadd.f32 %v1598_v60, %v1523_v27  ;;  %v1537_v47 = vld [vmem:[#allocation2 + $0xf8] sm:$0xff]  ;;  %v1653_v57 = vmul.f32 %v1536_v4, %v1536_v4 }
 0x215   : > { %1554 = vst [vmem:[%s3071_s2 + $0x70] sm:$0xff] %v1522_v24  ;;  %v1663_v50 = vadd.f32 %v1662_v32, %v1639_v30  ;;  %v1579_v51 = vadd.f32 %v1578_v11, %v1524_v35  ;;  %v1538_v24 = vld [vmem:[#allocation2 + $0x20] sm:$0xff]  ;;  %v1654_v29 = vmul.f32 %v1537_v47, %v1537_v47 }
 0x216   : > { %1555 = vst [vmem:[%s3071_s2 + $0x78] sm:$0xff] %v1523_v27  ;;  %v1684_v53 = vadd.f32 %v1683_v38, %v1640_v31  ;;  %v1600_v41 = vadd.f32 %v1599_v39, %v1525_v9  ;;  %v1539_v27 = vld [vmem:[#allocation2 + $0x98] sm:$0xff]  ;;  %v1655_v36 = vmul.f32 %v1538_v24, %v1538_v24 }
 0x217   : > { %1556 = vst [vmem:[%s3071_s2 + $0x80] sm:$0xff] %v1524_v35  ;;  %v1664_v19 = vadd.f32 %v1663_v50, %v1641_v12  ;;  %v1580_v42 = vadd.f32 %v1579_v51, %v1526_v10  ;;  %v1656_v59 = vmul.f32 %v1539_v27, %v1539_v27 }
 0x218   : > { %1557 = vst [vmem:[%s3071_s2 + $0x88] sm:$0xff] %v1525_v9  ;;  %v1685_v44 = vadd.f32 %v1684_v53, %v1642_v40  ;;  %v1601_v20 = vadd.f32 %v1600_v41, %v1527_v37 }
 0x219   : > { %1558 = vst [vmem:[%s3071_s2 + $0x90] sm:$0xff] %v1526_v10  ;;  %v1665_v62 = vadd.f32 %v1664_v19, %v1643_v52  ;;  %v1581_v17 = vadd.f32 %v1580_v42, %v1528_v49 }
 0x21a   : > { %1559 = vst [vmem:[%s3071_s2 + $0x98] sm:$0xff] %v1527_v37  ;;  %v1686_v22 = vadd.f32 %v1685_v44, %v1644_v54  ;;  %v1602_v1 = vadd.f32 %v1601_v20, %v1529_v18  ;;  %v1620_v44 = vlaneseq }
 0x21b   : > { %1560 = vst [vmem:[%s3071_s2 + $0xa0] sm:$0xff] %v1528_v49  ;;  %v1666_v26 = vadd.f32 %v1665_v62, %v1645_v56  ;;  %v1582_v2 = vadd.f32 %v1581_v17, %v1530_v55 }
 0x21c   : > { %1561 = vst [vmem:[%s3071_s2 + $0xa8] sm:$0xff] %v1529_v18  ;;  %v1687_v3 = vadd.f32 %v1686_v22, %v1646_v21  ;;  %v1603_v15 = vadd.f32 %v1602_v1, %v1531_v43  ;;  %vm1622_vm1 = vcmp.lt.s32.totalorder %v1620_v44, 256 }
 0x21d   : > { %1562 = vst [vmem:[%s3071_s2 + $0xb0] sm:$0xff] %v1530_v55  ;;  %v1667_v5 = vadd.f32 %v1666_v26, %v1647_v63  ;;  %v1583_v46 = vadd.f32 %v1582_v2, %v1532_v61 }
 0x21e   : > { %1563 = vst [vmem:[%s3071_s2 + $0xb8] sm:$0xff] %v1531_v43  ;;  %v1688_v48 = vadd.f32 %v1687_v3, %v1648_v23  ;;  %v1604_v7 = vadd.f32 %v1603_v15, %v1533_v0 }
 0x21f   : > { %1564 = vst [vmem:[%s3071_s2 + $0xc0] sm:$0xff] %v1532_v61  ;;  %v1668_v25 = vadd.f32 %v1667_v5, %v1649_v45  ;;  %v1584_v33 = vadd.f32 %v1583_v46, %v1534_v13 }
 0x220   : > { %1565 = vst [vmem:[%s3071_s2 + $0xc8] sm:$0xff] %v1533_v0  ;;  %v1689_v28 = vadd.f32 %v1688_v48, %v1650_v16  ;;  %v1605_v34 = vadd.f32 %v1604_v7, %v1535_v14 }
 0x221   : > { %1566 = vst [vmem:[%s3071_s2 + $0xd0] sm:$0xff] %v1534_v13  ;;  %v1669_v35 = vadd.f32 %v1668_v25, %v1651_v6  ;;  %v1585_v58 = vadd.f32 %v1584_v33, %v1536_v4 }
 0x222   : > { %1567 = vst [vmem:[%s3071_s2 + $0xd8] sm:$0xff] %v1535_v14  ;;  %v1690_v30 = vadd.f32 %v1689_v28, %v1652_v8  ;;  %v1606_v9 = vadd.f32 %v1605_v34, %v1537_v47 }
 0x223   : > { %1568 = vst [vmem:[%s3071_s2 + $0xe0] sm:$0xff] %v1536_v4  ;;  %v1670_v60 = vadd.f32 %v1669_v35, %v1653_v57  ;;  %v1586_v31 = vadd.f32 %v1585_v58, %v1538_v24 }
 0x224   : > { %1569 = vst [vmem:[%s3071_s2 + $0xe8] sm:$0xff] %v1537_v47  ;;  %v1691_v10 = vadd.f32 %v1690_v30, %v1654_v29  ;;  %v1607_v32 = vadd.f32 %v1606_v9, %v1539_v27 }
 0x225   : > { %1570 = vst [vmem:[%s3071_s2 + $0xf0] sm:$0xff] %v1538_v24  ;;  %v1587_v11 = vrot.slane %v1586_v31, 4  ;;  %v1671_v12 = vadd.f32 %v1670_v60, %v1655_v36 }
 0x226   : > { %1571 = vst [vmem:[%s3071_s2 + $0xf8] sm:$0xff] %v1539_v27  ;;  %v1608_v37 = vrot.slane %v1607_v32, 4  ;;  %v1692_v38 = vadd.f32 %v1691_v10, %v1656_v59 }
 0x227   : > { %v1588_v39 = vadd.f32 %v1587_v11, %v1586_v31  ;;  %v1672_v40 = vrot.slane %v1671_v12, 4 }
 0x228   : > { %v1609_v49 = vadd.f32 %v1608_v37, %v1607_v32  ;;  %v1693_v50 = vrot.slane %v1692_v38, 4 }
 0x229   : > { %v1589_v51 = vrot.slane %v1588_v39, 2  ;;  %v1673_v52 = vadd.f32 %v1672_v40, %v1671_v12 }
 0x22a   : > { %v1610_v18 = vrot.slane %v1609_v49, 2  ;;  %v1694_v53 = vadd.f32 %v1693_v50, %v1692_v38 }
 0x22b   : > { %v1590_v41 = vadd.f32 %v1589_v51, %v1588_v39  ;;  %v1674_v54 = vrot.slane %v1673_v52, 2 }
 0x22c   : > { %v1611_v55 = vadd.f32 %v1610_v18, %v1609_v49  ;;  %v1695_v19 = vrot.slane %v1694_v53, 2 }
 0x22d   : > { %v1591_v42 = vrot.slane %v1590_v41, 1  ;;  %v1675_v56 = vadd.f32 %v1674_v54, %v1673_v52 }
 0x22e   : > { %v1612_v43 = vrot.slane %v1611_v55, 1  ;;  %v1696_v20 = vadd.f32 %v1695_v19, %v1694_v53 }
 0x22f   : > { %v1676_v21 = vrot.slane %v1675_v56, 1  ;;  %v1592_v61 = vadd.f32 %v1591_v42, %v1590_v41 }
 0x230   : > { %v1613_v62 = vadd.f32 %v1612_v43, %v1611_v55  ;;  %v1697_v17 = vrot.slane %v1696_v20, 1 }
 0x231   : > { %v1677_v0 = vadd.f32 %v1676_v21, %v1675_v56 }
 0x232   : > { %v1616_v63 = vrot.slane %v1613_v62, 7  ;;  %v1698_v22 = vadd.f32 %v1697_v17, %v1696_v20 }
 0x234   : > { %v1618_v1 = vsel %vm1617_vm0, %v1592_v61, %v1616_v63  ;;  %v1701_v23 = vrot.slane %v1698_v22, 7 }
 0x235   : > { %1624 = vst.msk [vmem:[%s3072_s3] sm:$0x3] %vm1622_vm1, %v1618_v1 }
 0x236   : > { %v1702_v13 = vsel %vm1617_vm0, %v1677_v0, %v1701_v23 }
 0x237   : > { %1704 = vst.msk [vmem:[%s3073_s4] sm:$0x3] %vm1622_vm1, %v1702_v13 }
 0x238 PF: > { %s15_s19 = sadd.s32 1, %s2480_s19   ;;  %s3074_s15 = smov %s2468_s16 }
 0x239   : > { %p12_p12 = scmp.ge.s32.totalorder %s15_s19, 6   ;;  %s3075_s16 = smov %s2543_s23 }
 0x23a   : > { %s3076_s17 = smov %s2476_s18  ;;  %s3077_s18 = smov %s3079_s20 }
 0x23b   :  { %14 = sbr.rel (!%p12_p12) target bundleno = 3 (0x3), region = 121 }

// kernel: d_forward.12
= control target key start
LH: loop header
LB: loop body
LE: loop exit
PB: predicated region body
PF: predicated region fallthrough
CT: control target
= control target key end

     0   :  { %s497_s0 = inlined_call_operand.vmem [shape: f32[128,256], index: 0, kind: input, shape index: {}]   ;;  %s498_s1 = inlined_call_operand.vmem [shape: f32[1,256], index: 1, kind: input, shape index: {}]   ;;  %s499_s2 = inlined_call_operand.vmem [shape: f32[1,256], index: 2, kind: input, shape index: {}]   ;;  %s500_s3 = inlined_call_operand.vmem [shape: bf16[128,256], index: 3, kind: output, shape index: {}]  }
   0x1   :  { %v14_v0 = vld [vmem:[%s497_s0] sm:$0xff]  ;;  %v15_v1 = vld [vmem:[%s497_s0 + $0x8] sm:$0xff]  ;;  %v16_v6 = vld [vmem:[%s497_s0 + $0x10] sm:$0xff] }
   0x2   :  { %v46_v2 = vld [vmem:[%s498_s1] sm:$0x3]  ;;  %v17_v7 = vld [vmem:[%s497_s0 + $0x18] sm:$0xff]  ;;  %v19_v11 = vld [vmem:[%s497_s0 + $0x28] sm:$0xff] }
   0x3   :  { %v283_v3 = vperm.slane %v46_v2, 0  ;;  %v285_v4 = vperm.slane %v46_v2, 1  ;;  %v84_v5 = vld [vmem:[%s499_s2] sm:$0x3]  ;;  %v20_v12 = vld [vmem:[%s497_s0 + $0x30] sm:$0xff]  ;;  %v21_v17 = vld [vmem:[%s497_s0 + $0x38] sm:$0xff] }
   0x4   :  { %v296_v8 = vperm.slane %v84_v5, 0  ;;  %v298_v9 = vperm.slane %v84_v5, 1  ;;  %v18_v10 = vld [vmem:[%s497_s0 + $0x20] sm:$0xff]  ;;  %v23_v41 = vld [vmem:[%s497_s0 + $0x48] sm:$0xff]  ;;  %v24_v42 = vld [vmem:[%s497_s0 + $0x50] sm:$0xff] }
   0x5   :  { %v52_v13 = vmul.f32 %v283_v3, %v14_v0  ;;  %v53_v14 = vmul.f32 %v285_v4, %v15_v1  ;;  %v54_v15 = vmul.f32 %v283_v3, %v16_v6  ;;  %v55_v16 = vmul.f32 %v285_v4, %v17_v7  ;;  %v22_v36 = vld [vmem:[%s497_s0 + $0x40] sm:$0xff]  ;;  %v25_v43 = vld [vmem:[%s497_s0 + $0x58] sm:$0xff]  ;;  %v27_v55 = vld [vmem:[%s497_s0 + $0x68] sm:$0xff] }
   0x6   :  { %v56_v18 = vmul.f32 %v283_v3, %v18_v10  ;;  %v57_v19 = vmul.f32 %v285_v4, %v19_v11  ;;  %v58_v20 = vmul.f32 %v283_v3, %v20_v12  ;;  %v59_v21 = vmul.f32 %v285_v4, %v21_v17  ;;  %v26_v54 = vld [vmem:[%s497_s0 + $0x60] sm:$0xff]  ;;  %v28_v5 = vld [vmem:[%s497_s0 + $0x70] sm:$0xff]  ;;  %v29_v6 = vld [vmem:[%s497_s0 + $0x78] sm:$0xff] }
   0x7   :  { %v90_v22 = vadd.f32 %v296_v8, %v52_v13  ;;  %v91_v23 = vadd.f32 %v298_v9, %v53_v14  ;;  %v92_v24 = vadd.f32 %v296_v8, %v54_v15  ;;  %v93_v25 = vadd.f32 %v298_v9, %v55_v16 }
   0x8   :  { %v94_v26 = vadd.f32 %v296_v8, %v56_v18  ;;  %v95_v27 = vadd.f32 %v298_v9, %v57_v19  ;;  %v96_v28 = vadd.f32 %v296_v8, %v58_v20  ;;  %v97_v29 = vadd.f32 %v298_v9, %v59_v21  ;;  %v30_v18 = vld [vmem:[%s497_s0 + $0x80] sm:$0xff]  ;;  %v31_v19 = vld [vmem:[%s497_s0 + $0x88] sm:$0xff] }
   0x9   :  { %vm122_vm0 = vcmp.ge.f32.partialorder %v90_v22, 0.0  ;;  %vm123_vm1 = vcmp.ge.f32.partialorder %v91_v23, 0.0  ;;  %v154_v30 = vmul.f32 0.2, %v90_v22  ;;  %v155_v31 = vmul.f32 0.2, %v91_v23 }
   0xa   :  { %vm124_vm2 = vcmp.ge.f32.partialorder %v92_v24, 0.0  ;;  %vm125_vm3 = vcmp.ge.f32.partialorder %v93_v25, 0.0  ;;  %v156_v32 = vmul.f32 0.2, %v92_v24  ;;  %v157_v33 = vmul.f32 0.2, %v93_v25 }
   0xb   :  { %v186_v34 = vsel %vm122_vm0, %v90_v22, %v154_v30  ;;  %v187_v35 = vsel %vm123_vm1, %v91_v23, %v155_v31  ;;  %vm126_vm4 = vcmp.ge.f32.partialorder %v94_v26, 0.0  ;;  %vm127_vm5 = vcmp.ge.f32.partialorder %v95_v27, 0.0  ;;  %v32_v23 = vld [vmem:[%s497_s0 + $0x90] sm:$0xff] }
   0xc   :  { %v218_v37 = vpack.c.bf16 %v187_v35, %v186_v34  ;;  %v188_v38 = vsel %vm124_vm2, %v92_v24, %v156_v32  ;;  %v189_v39 = vsel %vm125_vm3, %v93_v25, %v157_v33  ;;  %v158_v40 = vmul.f32 0.2, %v94_v26  ;;  %v33_v24 = vld [vmem:[%s497_s0 + $0x98] sm:$0xff] }
   0xd   :  { %v219_v44 = vpack.c.bf16 %v189_v39, %v188_v38  ;;  %v159_v45 = vmul.f32 0.2, %v95_v27  ;;  %vm128_vm6 = vcmp.ge.f32.partialorder %v96_v28, 0.0  ;;  %vm129_vm7 = vcmp.ge.f32.partialorder %v97_v29, 0.0 }
   0xe   :  { %234 = vst [vmem:[%s500_s3] sm:$0xff] %v218_v37  ;;  %v190_v46 = vsel %vm126_vm4, %v94_v26, %v158_v40  ;;  %v160_v47 = vmul.f32 0.2, %v96_v28  ;;  %v161_v48 = vmul.f32 0.2, %v97_v29  ;;  %v60_v49 = vmul.f32 %v283_v3, %v22_v36  ;;  %v34_v36 = vld [vmem:[%s497_s0 + $0xa0] sm:$0xff]  ;;  %v35_v37 = vld [vmem:[%s497_s0 + $0xa8] sm:$0xff] }
   0xf   :  { %235 = vst [vmem:[%s500_s3 + $0x8] sm:$0xff] %v219_v44  ;;  %v191_v50 = vsel %vm127_vm5, %v95_v27, %v159_v45  ;;  %v61_v51 = vmul.f32 %v285_v4, %v23_v41  ;;  %v62_v52 = vmul.f32 %v283_v3, %v24_v42  ;;  %v63_v53 = vmul.f32 %v285_v4, %v25_v43 }
  0x10   :  { %v220_v56 = vpack.c.bf16 %v191_v50, %v190_v46  ;;  %v192_v57 = vsel %vm128_vm6, %v96_v28, %v160_v47  ;;  %v193_v58 = vsel %vm129_vm7, %v97_v29, %v161_v48  ;;  %v98_v59 = vadd.f32 %v296_v8, %v60_v49  ;;  %v36_v50 = vld [vmem:[%s497_s0 + $0xb0] sm:$0xff] }
  0x11   :  { %v221_v60 = vpack.c.bf16 %v193_v58, %v192_v57  ;;  %v99_v61 = vadd.f32 %v298_v9, %v61_v51  ;;  %v100_v62 = vadd.f32 %v296_v8, %v62_v52  ;;  %v101_v63 = vadd.f32 %v298_v9, %v63_v53  ;;  %v37_v51 = vld [vmem:[%s497_s0 + $0xb8] sm:$0xff] }
  0x12   :  { %236 = vst [vmem:[%s500_s3 + $0x10] sm:$0xff] %v220_v56  ;;  %vm130_vm8 = vcmp.ge.f32.partialorder %v98_v59, 0.0  ;;  %v162_v0 = vmul.f32 0.2, %v98_v59  ;;  %v64_v1 = vmul.f32 %v283_v3, %v26_v54  ;;  %v65_v2 = vmul.f32 %v285_v4, %v27_v55 }
  0x13   :  { %237 = vst [vmem:[%s500_s3 + $0x18] sm:$0xff] %v221_v60  ;;  %vm131_vm9 = vcmp.ge.f32.partialorder %v99_v61, 0.0  ;;  %v163_v7 = vmul.f32 0.2, %v99_v61  ;;  %vm132_vm10 = vcmp.ge.f32.partialorder %v100_v62, 0.0  ;;  %vm133_vm11 = vcmp.ge.f32.partialorder %v101_v63, 0.0 }
  0x14   :  { %v194_v10 = vsel %vm130_vm8, %v98_v59, %v162_v0  ;;  %v164_v11 = vmul.f32 0.2, %v100_v62  ;;  %v165_v12 = vmul.f32 0.2, %v101_v63  ;;  %v102_v13 = vadd.f32 %v296_v8, %v64_v1 }
  0x15   :  { %v195_v14 = vsel %vm131_vm9, %v99_v61, %v163_v7  ;;  %v103_v15 = vadd.f32 %v298_v9, %v65_v2  ;;  %v66_v16 = vmul.f32 %v283_v3, %v28_v5  ;;  %v67_v17 = vmul.f32 %v285_v4, %v29_v6  ;;  %v40_v5 = vld [vmem:[%s497_s0 + $0xd0] sm:$0xff]  ;;  %v41_v6 = vld [vmem:[%s497_s0 + $0xd8] sm:$0xff] }
  0x16   :  { %v222_v20 = vpack.c.bf16 %v195_v14, %v194_v10  ;;  %v196_v21 = vsel %vm132_vm10, %v100_v62, %v164_v11  ;;  %v197_v22 = vsel %vm133_vm11, %v101_v63, %v165_v12  ;;  %vm134_vm12 = vcmp.ge.f32.partialorder %v102_v13, 0.0  ;;  %v38_v62 = vld [vmem:[%s497_s0 + $0xc0] sm:$0xff]  ;;  %v39_v63 = vld [vmem:[%s497_s0 + $0xc8] sm:$0xff] }
  0x17   :  { %v223_v25 = vpack.c.bf16 %v197_v22, %v196_v21  ;;  %vm135_vm13 = vcmp.ge.f32.partialorder %v103_v15, 0.0  ;;  %v166_v26 = vmul.f32 0.2, %v102_v13  ;;  %v167_v27 = vmul.f32 0.2, %v103_v15  ;;  %v43_v21 = vld [vmem:[%s497_s0 + $0xe8] sm:$0xff] }
  0x18   :  { %238 = vst [vmem:[%s500_s3 + $0x20] sm:$0xff] %v222_v20  ;;  %v104_v28 = vadd.f32 %v296_v8, %v66_v16  ;;  %v105_v29 = vadd.f32 %v298_v9, %v67_v17  ;;  %v68_v30 = vmul.f32 %v283_v3, %v30_v18  ;;  %v69_v31 = vmul.f32 %v285_v4, %v31_v19  ;;  %v42_v20 = vld [vmem:[%s497_s0 + $0xe0] sm:$0xff] }
  0x19   :  { %239 = vst [vmem:[%s500_s3 + $0x28] sm:$0xff] %v223_v25  ;;  %v198_v32 = vsel %vm134_vm12, %v102_v13, %v166_v26  ;;  %v199_v33 = vsel %vm135_vm13, %v103_v15, %v167_v27  ;;  %v70_v34 = vmul.f32 %v283_v3, %v32_v23  ;;  %v71_v35 = vmul.f32 %v285_v4, %v33_v24 }
  0x1a   :  { %v224_v38 = vpack.c.bf16 %v199_v33, %v198_v32  ;;  %vm136_vm14 = vcmp.ge.f32.partialorder %v104_v28, 0.0  ;;  %vm137_vm15 = vcmp.ge.f32.partialorder %v105_v29, 0.0  ;;  %v168_v39 = vmul.f32 0.2, %v104_v28 }
  0x1b   :  { %v169_v40 = vmul.f32 0.2, %v105_v29  ;;  %v106_v41 = vadd.f32 %v296_v8, %v68_v30  ;;  %v107_v42 = vadd.f32 %v298_v9, %v69_v31  ;;  %v108_v43 = vadd.f32 %v296_v8, %v70_v34  ;;  %v44_v34 = vld [vmem:[%s497_s0 + $0xf0] sm:$0xff] }
  0x1c   :  { %240 = vst [vmem:[%s500_s3 + $0x30] sm:$0xff] %v224_v38  ;;  %v200_v44 = vsel %vm136_vm14, %v104_v28, %v168_v39  ;;  %v109_v45 = vadd.f32 %v298_v9, %v71_v35  ;;  %v72_v46 = vmul.f32 %v283_v3, %v34_v36  ;;  %v73_v47 = vmul.f32 %v285_v4, %v35_v37  ;;  %v45_v35 = vld [vmem:[%s497_s0 + $0xf8] sm:$0xff] }
  0x1d   :  { %v201_v48 = vsel %vm137_vm15, %v105_v29, %v169_v40  ;;  %vm138_vm0 = vcmp.ge.f32.partialorder %v106_v41, 0.0  ;;  %vm139_vm1 = vcmp.ge.f32.partialorder %v107_v42, 0.0  ;;  %v170_v49 = vmul.f32 0.2, %v106_v41 }
  0x1e   :  { %v225_v52 = vpack.c.bf16 %v201_v48, %v200_v44  ;;  %v171_v53 = vmul.f32 0.2, %v107_v42  ;;  %vm140_vm2 = vcmp.ge.f32.partialorder %v108_v43, 0.0  ;;  %vm141_vm3 = vcmp.ge.f32.partialorder %v109_v45, 0.0 }
  0x1f   :  { %v202_v54 = vsel %vm138_vm0, %v106_v41, %v170_v49  ;;  %v172_v55 = vmul.f32 0.2, %v108_v43  ;;  %v173_v56 = vmul.f32 0.2, %v109_v45  ;;  %v110_v57 = vadd.f32 %v296_v8, %v72_v46 }
  0x20   :  { %241 = vst [vmem:[%s500_s3 + $0x38] sm:$0xff] %v225_v52  ;;  %v203_v58 = vsel %vm139_vm1, %v107_v42, %v171_v53  ;;  %v111_v59 = vadd.f32 %v298_v9, %v73_v47  ;;  %v74_v60 = vmul.f32 %v283_v3, %v36_v50  ;;  %v75_v61 = vmul.f32 %v285_v4, %v37_v51 }
  0x21   :  { %v226_v0 = vpack.c.bf16 %v203_v58, %v202_v54  ;;  %v204_v1 = vsel %vm140_vm2, %v108_v43, %v172_v55  ;;  %v205_v2 = vsel %vm141_vm3, %v109_v45, %v173_v56  ;;  %vm142_vm4 = vcmp.ge.f32.partialorder %v110_v57, 0.0 }
  0x22   :  { %v227_v7 = vpack.c.bf16 %v205_v2, %v204_v1  ;;  %vm143_vm5 = vcmp.ge.f32.partialorder %v111_v59, 0.0  ;;  %v174_v10 = vmul.f32 0.2, %v110_v57  ;;  %v175_v11 = vmul.f32 0.2, %v111_v59 }
  0x23   :  { %242 = vst [vmem:[%s500_s3 + $0x40] sm:$0xff] %v226_v0  ;;  %v112_v12 = vadd.f32 %v296_v8, %v74_v60  ;;  %v113_v13 = vadd.f32 %v298_v9, %v75_v61  ;;  %v76_v14 = vmul.f32 %v283_v3, %v38_v62  ;;  %v77_v15 = vmul.f32 %v285_v4, %v39_v63 }
  0x24   :  { %243 = vst [vmem:[%s500_s3 + $0x48] sm:$0xff] %v227_v7  ;;  %v206_v16 = vsel %vm142_vm4, %v110_v57, %v174_v10  ;;  %v207_v17 = vsel %vm143_vm5, %v111_v59, %v175_v11  ;;  %v78_v18 = vmul.f32 %v283_v3, %v40_v5  ;;  %v79_v19 = vmul.f32 %v285_v4, %v41_v6 }
  0x25   :  { %v228_v22 = vpack.c.bf16 %v207_v17, %v206_v16  ;;  %vm144_vm6 = vcmp.ge.f32.partialorder %v112_v12, 0.0  ;;  %vm145_vm7 = vcmp.ge.f32.partialorder %v113_v13, 0.0  ;;  %v176_v23 = vmul.f32 0.2, %v112_v12 }
  0x26   :  { %v177_v24 = vmul.f32 0.2, %v113_v13  ;;  %v114_v25 = vadd.f32 %v296_v8, %v76_v14  ;;  %v115_v26 = vadd.f32 %v298_v9, %v77_v15  ;;  %v116_v27 = vadd.f32 %v296_v8, %v78_v18 }
  0x27   :  { %244 = vst [vmem:[%s500_s3 + $0x50] sm:$0xff] %v228_v22  ;;  %v208_v28 = vsel %vm144_vm6, %v112_v12, %v176_v23  ;;  %v117_v29 = vadd.f32 %v298_v9, %v79_v19  ;;  %v80_v30 = vmul.f32 %v283_v3, %v42_v20  ;;  %v81_v31 = vmul.f32 %v285_v4, %v43_v21 }
  0x28   :  { %v209_v32 = vsel %vm145_vm7, %v113_v13, %v177_v24  ;;  %vm146_vm8 = vcmp.ge.f32.partialorder %v114_v25, 0.0  ;;  %vm147_vm9 = vcmp.ge.f32.partialorder %v115_v26, 0.0  ;;  %v178_v33 = vmul.f32 0.2, %v114_v25 }
  0x29   :  { %v229_v36 = vpack.c.bf16 %v209_v32, %v208_v28  ;;  %v179_v37 = vmul.f32 0.2, %v115_v26  ;;  %vm148_vm10 = vcmp.ge.f32.partialorder %v116_v27, 0.0  ;;  %vm149_vm11 = vcmp.ge.f32.partialorder %v117_v29, 0.0 }
  0x2a   :  { %v210_v38 = vsel %vm146_vm8, %v114_v25, %v178_v33  ;;  %v180_v39 = vmul.f32 0.2, %v116_v27  ;;  %v181_v40 = vmul.f32 0.2, %v117_v29  ;;  %v118_v41 = vadd.f32 %v296_v8, %v80_v30 }
  0x2b   :  { %245 = vst [vmem:[%s500_s3 + $0x58] sm:$0xff] %v229_v36  ;;  %v211_v42 = vsel %vm147_vm9, %v115_v26, %v179_v37  ;;  %v119_v43 = vadd.f32 %v298_v9, %v81_v31  ;;  %v82_v44 = vmul.f32 %v283_v3, %v44_v34  ;;  %v83_v45 = vmul.f32 %v285_v4, %v45_v35 }
  0x2c   :  { %v230_v46 = vpack.c.bf16 %v211_v42, %v210_v38  ;;  %v212_v47 = vsel %vm148_vm10, %v116_v27, %v180_v39  ;;  %v213_v48 = vsel %vm149_vm11, %v117_v29, %v181_v40  ;;  %vm150_vm12 = vcmp.ge.f32.partialorder %v118_v41, 0.0 }
  0x2d   :  { %v231_v49 = vpack.c.bf16 %v213_v48, %v212_v47  ;;  %vm151_vm13 = vcmp.ge.f32.partialorder %v119_v43, 0.0  ;;  %v182_v50 = vmul.f32 0.2, %v118_v41  ;;  %v183_v51 = vmul.f32 0.2, %v119_v43 }
  0x2e   :  { %246 = vst [vmem:[%s500_s3 + $0x60] sm:$0xff] %v230_v46  ;;  %v120_v52 = vadd.f32 %v296_v8, %v82_v44  ;;  %v121_v53 = vadd.f32 %v298_v9, %v83_v45 }
  0x2f   :  { %247 = vst [vmem:[%s500_s3 + $0x68] sm:$0xff] %v231_v49  ;;  %v214_v3 = vsel %vm150_vm12, %v118_v41, %v182_v50  ;;  %v215_v4 = vsel %vm151_vm13, %v119_v43, %v183_v51 }
  0x30   :  { %v232_v54 = vpack.c.bf16 %v215_v4, %v214_v3  ;;  %vm152_vm14 = vcmp.ge.f32.partialorder %v120_v52, 0.0  ;;  %vm153_vm15 = vcmp.ge.f32.partialorder %v121_v53, 0.0  ;;  %v184_v55 = vmul.f32 0.2, %v120_v52 }
  0x31   :  { %v185_v56 = vmul.f32 0.2, %v121_v53 }
  0x32   :  { %248 = vst [vmem:[%s500_s3 + $0x70] sm:$0xff] %v232_v54  ;;  %v216_v57 = vsel %vm152_vm14, %v120_v52, %v184_v55 }
  0x33   :  { %v217_v58 = vsel %vm153_vm15, %v121_v53, %v185_v56 }
  0x34   :  { %v233_v8 = vpack.c.bf16 %v217_v58, %v216_v57 }
  0x36   :  { %249 = vst [vmem:[%s500_s3 + $0x78] sm:$0xff] %v233_v8 }

// kernel: d_forward.13
= control target key start
LH: loop header
LB: loop body
LE: loop exit
PB: predicated region body
PF: predicated region fallthrough
CT: control target
= control target key end

     0   :  { %s2643_s0 = inlined_call_operand.vmem [shape: bf16[32,4096], index: 0, kind: input, shape index: {}]   ;;  %s2644_s1 = inlined_call_operand.vmem [shape: bf16[4096,512], index: 1, kind: input, shape index: {}]   ;;  %s2645_s2 = inlined_call_operand.vmem [shape: f32[32,512], index: 2, kind: output, shape index: {0}]   ;;  %s2646_s3 = inlined_call_operand.vmem [shape: f32[1,1,512], index: 3, kind: output, shape index: {1}]   ;;  %s2647_s4 = inlined_call_operand.vmem [shape: f32[1,1,512], index: 4, kind: output, shape index: {2}]  }
   0x1   :  { %2650 = sst [smem:[#allocation8_spill]] %s2643_s0 }
   0x2   :  { %2651 = sst [smem:[#allocation9_spill]] %s2644_s1 }
   0x3   :  { %s2136_s15 = smov 0   ;;  %s2138_s16 = smov 0  }
   0x4   :  { %s2140_s17 = smov 0   ;;  %s2142_s18 = smov 0  }
   0x5   :  { %s2144_s19 = smov 0   ;;  %s2146_s20 = smov 0  }
   0x6   :  { %s2148_s21 = smov 0   ;;  %s2150_s22 = smov 0  }
   0x7   :  { %s2152_s23 = smov 0   ;;  %s2154_s24 = smov 0  }
   0x8   :  { %s2156_s25 = smov 0  }
   0x9 LB: > { %s1545_s26 = sadd.s32 4294967295, %s2108_s25   ;;  %s27_s27 = sadd.s32 1, %s2100_s23  ;;  %s2108_s25 = sphi %s2156_s25, %s15_s25   ;;  %s2104_s24 = sphi %s2154_s24, %s2670_s24   ;;  %s2100_s23 = sphi %s2152_s23, %s2669_s23   ;;  %s2096_s22 = sphi %s2150_s22, %s2668_s22   ;;  %s2092_s21 = sphi %s2148_s21, %s2667_s21   ;;  %s2088_s20 = sphi %s2146_s20, %s2666_s20   ;;  %s2084_s19 = sphi %s2144_s19, %s2665_s19   ;;  %s2080_s18 = sphi %s2142_s18, %s2664_s18   ;;  %s2076_s17 = sphi %s2140_s17, %s2663_s17   ;;  %s2072_s16 = sphi %s2138_s16, %s2662_s16   ;;  %s2068_s15 = sphi %s2136_s15, %s2661_s15  }
   0xa   : > { %p28_p0 = scmp.ge.s32.totalorder %s27_s27, 8  ;;  %s30_s28 = sadd.s32 1, %s2104_s24 }
   0xb   : > { %s43_s29 = sadd.s32 1, %s2088_s20  ;;  %p50_p1 = scmp.ne.s32.totalorder %s2088_s20, %s2084_s19 }
   0xc   : > { %s2672_s27 = smov (%p28_p0, %s27_s27), 0  ;;  %s2674_s28 = smov (!%p28_p0, %s30_s28), %s2104_s24 }
   0xd   : > { %2652 = sst [smem:[#allocation6_spill]] %s2672_s27  ;;  %s39_s30 = ssub.s32 %s2100_s23, %s2672_s27 }
   0xe   : > { %p51_p2 = scmp.eq.s32.totalorder %s2108_s25, 0  ;;  %p32_p3 = scmp.ge.s32.totalorder %s2674_s28, 2 }
   0xf   : > { %p41_p4 = scmp.eq.s32.totalorder %s39_s30, 0  ;;  %s71_s6 = sadd.s32 1, %s2080_s18 }
  0x10   : > { %p2203_p5 = por %p51_p2, %p50_p1  ;;  %s2676_s28 = smov (%p32_p3, %s2674_s28), 0 }
  0x11   : > { %2654 = sst [smem:[#allocation7_spill]] %s2676_s28  ;;  %s67_s8 = ssub.s32 %s2104_s24, %s2676_s28 }
  0x12   : > { %s2211_s7 = scalar_select %p41_p4, %s2088_s20, %s43_s29  }
  0x13   : > { %p78_p6 = scmp.ne.s32.totalorder %s2080_s18, %s2076_s17  ;;  %s68_s9 = sor.u32 %s67_s8, %s39_s30 }
  0x14   : > { %p97_p7 = scmp.eq.s32.totalorder %s67_s8, 0  ;;  %p69_p8 = scmp.eq.s32.totalorder %s68_s9, 0 }
  0x15   : > { %p2217_p9 = por %p78_p6, %p51_p2  ;;  %s99_s11 = sadd.s32 1, %s2072_s16 }
  0x16   : > { %p109_p10 = scmp.ne.s32.totalorder %s2072_s16, %s2068_s15  ;;  %p110_p11 = scmp.eq.s32.totalorder %s1545_s26, 15 }
  0x17   : > { %s2225_s12 = scalar_select %p69_p8, %s2080_s18, %s71_s6  }
  0x18   : > { %s2228_s13 = scalar_select %p97_p7, %s2072_s16, %s99_s11  }
  0x19   : > { %p2230_p12 = por %p110_p11, %p109_p10  ;;  %p1548_p13 = scmp.ge.s32.totalorder %s2108_s25, 16 }
  0x1b   : > { %188 = sbr.rel (%p1548_p13) target bundleno = 124 (0x7c), region = 16 }
  0x20   : > { %191 = sbr.rel (!%p2203_p5) target bundleno = 50 (0x32), region = 20  ;;  %s193_s29 = sand.u32 (%p2203_p5), 1, %s2088_s20  }
  0x21   : > { %s1858_s30 = sshll.u32 (%p2203_p5), %s2100_s23, 4  ;;  %s1549_s8 = sshll.u32 (%p2203_p5), %s193_s29, 6 }
  0x22   : > { %s2657_s0 = sld [smem:[#allocation8_spill]] (%p2203_p5)  ;;  %s195_s26 = scalar_lea.vmem (%p2203_p5), [#allocation3], %s1549_s8 }
  0x28   : > { %s201_s11 = scalar_lea.vmem %s2657_s0, %s1858_s30 }
  0x29   : > { %v214_v0 = vld [vmem:[%s201_s11] sm:$0xff]  ;;  %v216_v1 = vld [vmem:[%s201_s11 + $0x8] sm:$0xff] }
  0x2a   : > { %v218_v2 = vld [vmem:[%s201_s11 + $0x80] sm:$0xff]  ;;  %215 = vst [vmem:[%s195_s26] sm:$0xff] %v214_v0  ;;  %v220_v3 = vld [vmem:[%s201_s11 + $0x88] sm:$0xff] }
  0x2b   : > { %217 = vst [vmem:[%s195_s26 + $0x8] sm:$0xff] %v216_v1  ;;  %v222_v4 = vld [vmem:[%s201_s11 + $0x100] sm:$0xff]  ;;  %v224_v5 = vld [vmem:[%s201_s11 + $0x108] sm:$0xff] }
  0x2c   : > { %219 = vst [vmem:[%s195_s26 + $0x10] sm:$0xff] %v218_v2  ;;  %v226_v6 = vld [vmem:[%s201_s11 + $0x180] sm:$0xff]  ;;  %v228_v7 = vld [vmem:[%s201_s11 + $0x188] sm:$0xff] }
  0x2d   : > { %221 = vst [vmem:[%s195_s26 + $0x18] sm:$0xff] %v220_v3 }
  0x2e   : > { %223 = vst [vmem:[%s195_s26 + $0x20] sm:$0xff] %v222_v4 }
  0x2f   : > { %225 = vst [vmem:[%s195_s26 + $0x28] sm:$0xff] %v224_v5 }
  0x30   : > { %227 = vst [vmem:[%s195_s26 + $0x30] sm:$0xff] %v226_v6 }
  0x31   : > { %229 = vst [vmem:[%s195_s26 + $0x38] sm:$0xff] %v228_v7 }
  0x32 PF: > { %235 = sbr.rel (!%p2217_p9) target bundleno = 124 (0x7c), region = 43  ;;  %s237_s5 = sand.u32 (%p2217_p9), 1, %s2080_s18  }
  0x33   : > { %s1554_s29 = sshll.u32 (%p2217_p9), %s2104_s24, 1  ;;  %s1552_s30 = sshll.u32 (%p2217_p9), %s237_s5, 9 }
  0x34   : > { %s1859_s8 = sshll.u32 (%p2217_p9), %s2100_s23, 8  ;;  %s2658_s1 = sld [smem:[#allocation9_spill]] (%p2217_p9) }
  0x35   : > { %s243_s6 = sadd.s32 (%p2217_p9), %s1859_s8, %s1554_s29  ;;  %s2255_s10 = scalar_lea.vmem (%p2217_p9), [#allocation4], %s1552_s30 }
  0x36   : > { %s1556_s9 = sshll.u32 (%p2217_p9), %s243_s6, 2 }
  0x3a   : > { %s2250_s11 = scalar_lea.vmem %s2658_s1, %s1556_s9 }
  0x3b   : > { %v400_v8 = vld [vmem:[%s2250_s11] sm:$0xff]  ;;  %v402_v9 = vld [vmem:[%s2250_s11 + $0x10] sm:$0xff] }
  0x3c   : > { %v404_v10 = vld [vmem:[%s2250_s11 + $0x20] sm:$0xff]  ;;  %401 = vst [vmem:[%s2255_s10] sm:$0xff] %v400_v8  ;;  %v406_v11 = vld [vmem:[%s2250_s11 + $0x30] sm:$0xff] }
  0x3d   : > { %403 = vst [vmem:[%s2255_s10 + $0x8] sm:$0xff] %v402_v9  ;;  %v408_v12 = vld [vmem:[%s2250_s11 + $0x40] sm:$0xff]  ;;  %v410_v13 = vld [vmem:[%s2250_s11 + $0x50] sm:$0xff] }
  0x3e   : > { %405 = vst [vmem:[%s2255_s10 + $0x10] sm:$0xff] %v404_v10  ;;  %v412_v14 = vld [vmem:[%s2250_s11 + $0x60] sm:$0xff]  ;;  %v414_v15 = vld [vmem:[%s2250_s11 + $0x70] sm:$0xff] }
  0x3f   : > { %407 = vst [vmem:[%s2255_s10 + $0x18] sm:$0xff] %v406_v11  ;;  %v416_v16 = vld [vmem:[%s2250_s11 + $0x80] sm:$0xff]  ;;  %v418_v17 = vld [vmem:[%s2250_s11 + $0x90] sm:$0xff] }
  0x40   : > { %409 = vst [vmem:[%s2255_s10 + $0x20] sm:$0xff] %v408_v12  ;;  %v420_v18 = vld [vmem:[%s2250_s11 + $0xa0] sm:$0xff]  ;;  %v422_v19 = vld [vmem:[%s2250_s11 + $0xb0] sm:$0xff] }
  0x41   : > { %411 = vst [vmem:[%s2255_s10 + $0x28] sm:$0xff] %v410_v13  ;;  %v424_v20 = vld [vmem:[%s2250_s11 + $0xc0] sm:$0xff]  ;;  %v426_v21 = vld [vmem:[%s2250_s11 + $0xd0] sm:$0xff] }
  0x42   : > { %413 = vst [vmem:[%s2255_s10 + $0x30] sm:$0xff] %v412_v14  ;;  %v428_v22 = vld [vmem:[%s2250_s11 + $0xe0] sm:$0xff]  ;;  %v430_v23 = vld [vmem:[%s2250_s11 + $0xf0] sm:$0xff] }
  0x43   : > { %415 = vst [vmem:[%s2255_s10 + $0x38] sm:$0xff] %v414_v15  ;;  %v432_v24 = vld [vmem:[%s2250_s11 + $0x100] sm:$0xff]  ;;  %v434_v25 = vld [vmem:[%s2250_s11 + $0x110] sm:$0xff] }
  0x44   : > { %417 = vst [vmem:[%s2255_s10 + $0x40] sm:$0xff] %v416_v16  ;;  %v436_v26 = vld [vmem:[%s2250_s11 + $0x120] sm:$0xff]  ;;  %v438_v27 = vld [vmem:[%s2250_s11 + $0x130] sm:$0xff] }
  0x45   : > { %419 = vst [vmem:[%s2255_s10 + $0x48] sm:$0xff] %v418_v17  ;;  %v440_v28 = vld [vmem:[%s2250_s11 + $0x140] sm:$0xff]  ;;  %v442_v29 = vld [vmem:[%s2250_s11 + $0x150] sm:$0xff] }
  0x46   : > { %421 = vst [vmem:[%s2255_s10 + $0x50] sm:$0xff] %v420_v18  ;;  %v444_v30 = vld [vmem:[%s2250_s11 + $0x160] sm:$0xff]  ;;  %v446_v31 = vld [vmem:[%s2250_s11 + $0x170] sm:$0xff] }
  0x47   : > { %423 = vst [vmem:[%s2255_s10 + $0x58] sm:$0xff] %v422_v19  ;;  %v448_v32 = vld [vmem:[%s2250_s11 + $0x180] sm:$0xff]  ;;  %v450_v33 = vld [vmem:[%s2250_s11 + $0x190] sm:$0xff] }
  0x48   : > { %425 = vst [vmem:[%s2255_s10 + $0x60] sm:$0xff] %v424_v20  ;;  %v452_v34 = vld [vmem:[%s2250_s11 + $0x1a0] sm:$0xff]  ;;  %v454_v35 = vld [vmem:[%s2250_s11 + $0x1b0] sm:$0xff] }
  0x49   : > { %427 = vst [vmem:[%s2255_s10 + $0x68] sm:$0xff] %v426_v21  ;;  %v456_v36 = vld [vmem:[%s2250_s11 + $0x1c0] sm:$0xff]  ;;  %v458_v37 = vld [vmem:[%s2250_s11 + $0x1d0] sm:$0xff] }
  0x4a   : > { %429 = vst [vmem:[%s2255_s10 + $0x70] sm:$0xff] %v428_v22  ;;  %v460_v38 = vld [vmem:[%s2250_s11 + $0x1e0] sm:$0xff]  ;;  %v462_v39 = vld [vmem:[%s2250_s11 + $0x1f0] sm:$0xff] }
  0x4b   : > { %431 = vst [vmem:[%s2255_s10 + $0x78] sm:$0xff] %v430_v23  ;;  %v464_v40 = vld [vmem:[%s2250_s11 + $0x200] sm:$0xff]  ;;  %v466_v41 = vld [vmem:[%s2250_s11 + $0x210] sm:$0xff] }
  0x4c   : > { %433 = vst [vmem:[%s2255_s10 + $0x80] sm:$0xff] %v432_v24  ;;  %v468_v42 = vld [vmem:[%s2250_s11 + $0x220] sm:$0xff]  ;;  %v470_v43 = vld [vmem:[%s2250_s11 + $0x230] sm:$0xff] }
  0x4d   : > { %435 = vst [vmem:[%s2255_s10 + $0x88] sm:$0xff] %v434_v25  ;;  %v472_v44 = vld [vmem:[%s2250_s11 + $0x240] sm:$0xff]  ;;  %v474_v45 = vld [vmem:[%s2250_s11 + $0x250] sm:$0xff] }
  0x4e   : > { %437 = vst [vmem:[%s2255_s10 + $0x90] sm:$0xff] %v436_v26  ;;  %v476_v46 = vld [vmem:[%s2250_s11 + $0x260] sm:$0xff]  ;;  %v478_v47 = vld [vmem:[%s2250_s11 + $0x270] sm:$0xff] }
  0x4f   : > { %439 = vst [vmem:[%s2255_s10 + $0x98] sm:$0xff] %v438_v27  ;;  %v480_v48 = vld [vmem:[%s2250_s11 + $0x280] sm:$0xff]  ;;  %v482_v49 = vld [vmem:[%s2250_s11 + $0x290] sm:$0xff] }
  0x50   : > { %441 = vst [vmem:[%s2255_s10 + $0xa0] sm:$0xff] %v440_v28  ;;  %v484_v50 = vld [vmem:[%s2250_s11 + $0x2a0] sm:$0xff]  ;;  %v486_v51 = vld [vmem:[%s2250_s11 + $0x2b0] sm:$0xff] }
  0x51   : > { %443 = vst [vmem:[%s2255_s10 + $0xa8] sm:$0xff] %v442_v29  ;;  %v488_v52 = vld [vmem:[%s2250_s11 + $0x2c0] sm:$0xff]  ;;  %v490_v53 = vld [vmem:[%s2250_s11 + $0x2d0] sm:$0xff] }
  0x52   : > { %445 = vst [vmem:[%s2255_s10 + $0xb0] sm:$0xff] %v444_v30  ;;  %v492_v54 = vld [vmem:[%s2250_s11 + $0x2e0] sm:$0xff]  ;;  %v494_v55 = vld [vmem:[%s2250_s11 + $0x2f0] sm:$0xff] }
  0x53   : > { %447 = vst [vmem:[%s2255_s10 + $0xb8] sm:$0xff] %v446_v31  ;;  %v496_v56 = vld [vmem:[%s2250_s11 + $0x300] sm:$0xff]  ;;  %v498_v57 = vld [vmem:[%s2250_s11 + $0x310] sm:$0xff] }
  0x54   : > { %449 = vst [vmem:[%s2255_s10 + $0xc0] sm:$0xff] %v448_v32  ;;  %v500_v58 = vld [vmem:[%s2250_s11 + $0x320] sm:$0xff]  ;;  %v502_v59 = vld [vmem:[%s2250_s11 + $0x330] sm:$0xff] }
  0x55   : > { %451 = vst [vmem:[%s2255_s10 + $0xc8] sm:$0xff] %v450_v33  ;;  %v504_v60 = vld [vmem:[%s2250_s11 + $0x340] sm:$0xff]  ;;  %v506_v61 = vld [vmem:[%s2250_s11 + $0x350] sm:$0xff] }
  0x56   : > { %453 = vst [vmem:[%s2255_s10 + $0xd0] sm:$0xff] %v452_v34  ;;  %v508_v62 = vld [vmem:[%s2250_s11 + $0x360] sm:$0xff]  ;;  %v510_v63 = vld [vmem:[%s2250_s11 + $0x370] sm:$0xff] }
  0x57   : > { %455 = vst [vmem:[%s2255_s10 + $0xd8] sm:$0xff] %v454_v35  ;;  %v512_v0 = vld [vmem:[%s2250_s11 + $0x380] sm:$0xff]  ;;  %v514_v1 = vld [vmem:[%s2250_s11 + $0x390] sm:$0xff] }
  0x58   : > { %457 = vst [vmem:[%s2255_s10 + $0xe0] sm:$0xff] %v456_v36  ;;  %v516_v2 = vld [vmem:[%s2250_s11 + $0x3a0] sm:$0xff]  ;;  %v518_v3 = vld [vmem:[%s2250_s11 + $0x3b0] sm:$0xff] }
  0x59   : > { %459 = vst [vmem:[%s2255_s10 + $0xe8] sm:$0xff] %v458_v37  ;;  %v520_v4 = vld [vmem:[%s2250_s11 + $0x3c0] sm:$0xff]  ;;  %v522_v5 = vld [vmem:[%s2250_s11 + $0x3d0] sm:$0xff] }
  0x5a   : > { %461 = vst [vmem:[%s2255_s10 + $0xf0] sm:$0xff] %v460_v38  ;;  %v524_v6 = vld [vmem:[%s2250_s11 + $0x3e0] sm:$0xff]  ;;  %v526_v7 = vld [vmem:[%s2250_s11 + $0x3f0] sm:$0xff] }
  0x5b   : > { %463 = vst [vmem:[%s2255_s10 + $0xf8] sm:$0xff] %v462_v39 }
  0x5c   : > { %465 = vst [vmem:[%s2255_s10 + $0x100] sm:$0xff] %v464_v40 }
  0x5d   : > { %467 = vst [vmem:[%s2255_s10 + $0x108] sm:$0xff] %v466_v41 }
  0x5e   : > { %469 = vst [vmem:[%s2255_s10 + $0x110] sm:$0xff] %v468_v42 }
  0x5f   : > { %471 = vst [vmem:[%s2255_s10 + $0x118] sm:$0xff] %v470_v43 }
  0x60   : > { %473 = vst [vmem:[%s2255_s10 + $0x120] sm:$0xff] %v472_v44 }
  0x61   : > { %475 = vst [vmem:[%s2255_s10 + $0x128] sm:$0xff] %v474_v45 }
  0x62   : > { %477 = vst [vmem:[%s2255_s10 + $0x130] sm:$0xff] %v476_v46 }
  0x63   : > { %479 = vst [vmem:[%s2255_s10 + $0x138] sm:$0xff] %v478_v47 }
  0x64   : > { %481 = vst [vmem:[%s2255_s10 + $0x140] sm:$0xff] %v480_v48 }
  0x65   : > { %483 = vst [vmem:[%s2255_s10 + $0x148] sm:$0xff] %v482_v49 }
  0x66   : > { %485 = vst [vmem:[%s2255_s10 + $0x150] sm:$0xff] %v484_v50 }
  0x67   : > { %487 = vst [vmem:[%s2255_s10 + $0x158] sm:$0xff] %v486_v51 }
  0x68   : > { %489 = vst [vmem:[%s2255_s10 + $0x160] sm:$0xff] %v488_v52 }
  0x69   : > { %491 = vst [vmem:[%s2255_s10 + $0x168] sm:$0xff] %v490_v53 }
  0x6a   : > { %493 = vst [vmem:[%s2255_s10 + $0x170] sm:$0xff] %v492_v54 }
  0x6b   : > { %495 = vst [vmem:[%s2255_s10 + $0x178] sm:$0xff] %v494_v55 }
  0x6c   : > { %497 = vst [vmem:[%s2255_s10 + $0x180] sm:$0xff] %v496_v56 }
  0x6d   : > { %499 = vst [vmem:[%s2255_s10 + $0x188] sm:$0xff] %v498_v57 }
  0x6e   : > { %501 = vst [vmem:[%s2255_s10 + $0x190] sm:$0xff] %v500_v58 }
  0x6f   : > { %503 = vst [vmem:[%s2255_s10 + $0x198] sm:$0xff] %v502_v59 }
  0x70   : > { %505 = vst [vmem:[%s2255_s10 + $0x1a0] sm:$0xff] %v504_v60 }
  0x71   : > { %507 = vst [vmem:[%s2255_s10 + $0x1a8] sm:$0xff] %v506_v61 }
  0x72   : > { %509 = vst [vmem:[%s2255_s10 + $0x1b0] sm:$0xff] %v508_v62 }
  0x73   : > { %511 = vst [vmem:[%s2255_s10 + $0x1b8] sm:$0xff] %v510_v63 }
  0x74   : > { %513 = vst [vmem:[%s2255_s10 + $0x1c0] sm:$0xff] %v512_v0 }
  0x75   : > { %515 = vst [vmem:[%s2255_s10 + $0x1c8] sm:$0xff] %v514_v1 }
  0x76   : > { %517 = vst [vmem:[%s2255_s10 + $0x1d0] sm:$0xff] %v516_v2 }
  0x77   : > { %519 = vst [vmem:[%s2255_s10 + $0x1d8] sm:$0xff] %v518_v3 }
  0x78   : > { %521 = vst [vmem:[%s2255_s10 + $0x1e0] sm:$0xff] %v520_v4 }
  0x79   : > { %523 = vst [vmem:[%s2255_s10 + $0x1e8] sm:$0xff] %v522_v5 }
  0x7a   : > { %525 = vst [vmem:[%s2255_s10 + $0x1f0] sm:$0xff] %v524_v6 }
  0x7b   : > { %527 = vst [vmem:[%s2255_s10 + $0x1f8] sm:$0xff] %v526_v7 }
  0x7c PF: > { %p1557_p0 = scmp.ge.s32.totalorder %s2108_s25, 1  ;;  %p532_p1 = scmp.lt.s32.totalorder %s2108_s25, 17 }
  0x7e   : > { %p533_p2 = pnand %p1557_p0, %p532_p1 }
  0x7f   : > { %s539_s0 = sand.u32 (!%p533_p2), 1, %s2084_s19   ;;  %s546_s28 = sand.u32 (!%p533_p2), 1, %s2076_s17  }
  0x80   : > { %536 = sbr.rel (%p533_p2) target bundleno = 417 (0x1a1), region = 81  ;;  %s1558_s26 = sshll.u32 (!%p533_p2), %s539_s0, 6 }
  0x81   : > { %s1559_s5 = sshll.u32 (!%p533_p2), %s546_s28, 9  ;;  %s567_s29 = sand.u32 (!%p533_p2), 1, %s2068_s15  }
  0x82   : > { %s1561_s30 = sshll.u32 (!%p533_p2), %s2096_s22, 1  ;;  %s1560_s8 = sshll.u32 (!%p533_p2), %s567_s29, 6 }
  0x83   : > { %p599_p3 = scmp.lt.s32.totalorder (!%p533_p2), %s1561_s30, 3  ;;  %s2398_s19 = scalar_lea.vmem (!%p533_p2), [#allocation3], %s1558_s26 }
  0x84   : > { %s2400_s17 = scalar_lea.vmem (!%p533_p2), [#allocation4], %s1559_s5  ;;  %s2402_s15 = scalar_lea.vmem (!%p533_p2), [#allocation5], %s1560_s8 }
  0x85   : > { %s2678_s30 = smov (!%p599_p3, %s1561_s30), 3  ;;  %p1563_p4 = scmp.ne.s32.totalorder %s2092_s21, 0 }
  0x86   : > { %s603_s11 = scalar_lea.vmem %s2646_s3, %s2678_s30  ;;  %s612_s27 = scalar_lea.vmem %s2647_s4, %s2678_s30 }
  0x87   : > { %617 = sbr.rel (%p1563_p4) target bundleno = 149 (0x95), region = 93 }
  0x8c   : > { %v2110_v8 = vmov 0.0  }
  0x8d   : > { %618 = vst [vmem:[#allocation2 + $0x30] sm:$0xff] %v2110_v8 }
  0x8e   : > { %619 = vst [vmem:[#allocation2] sm:$0xff] %v2110_v8 }
  0x8f   : > { %620 = vst [vmem:[#allocation2 + $0x18] sm:$0xff] %v2110_v8 }
  0x90   : > { %621 = vst [vmem:[#allocation2 + $0x10] sm:$0xff] %v2110_v8 }
  0x91   : > { %622 = vst [vmem:[#allocation2 + $0x8] sm:$0xff] %v2110_v8 }
  0x92   : > { %623 = vst [vmem:[#allocation2 + $0x20] sm:$0xff] %v2110_v8 }
  0x93   : > { %624 = vst [vmem:[#allocation2 + $0x28] sm:$0xff] %v2110_v8 }
  0x94   : > { %625 = vst [vmem:[#allocation2 + $0x38] sm:$0xff] %v2110_v8 }
  0x95 PF: > { %v1654_v9 = vld [vmem:[%s2400_s17 + $0x70] sm:$0xf]  ;;  %v1883_v10 = vld [vmem:[%s2400_s17 + $0x74] sm:$0xf0]  ;;  %v1646_v20 = vld [vmem:[%s2400_s17 + $0x60] sm:$0xf] }
  0x96   : > { %v1718_v11 = vld [vmem:[%s2400_s17 + $0xf0] sm:$0xf]  ;;  %v1655_v12 = vor.u32 %v1883_v10, %v1654_v9  ;;  %v1899_v13 = vld [vmem:[%s2400_s17 + $0xf4] sm:$0xf0]  ;;  %v1881_v22 = vld [vmem:[%s2400_s17 + $0x64] sm:$0xf0] }
  0x97   : > { %v1782_v14 = vld [vmem:[%s2400_s17 + $0x170] sm:$0xf]  ;;  %v1915_v15 = vld [vmem:[%s2400_s17 + $0x174] sm:$0xf0]  ;;  %v1719_v16 = vor.u32 %v1899_v13, %v1718_v11  ;;  %v1710_v23 = vld [vmem:[%s2400_s17 + $0xe0] sm:$0xf]  ;;  %v1647_v25 = vor.u32 %v1881_v22, %v1646_v20 }
  0x98   : > { %v1783_v17 = vor.u32 %v1915_v15, %v1782_v14  ;;  %v1846_v18 = vld [vmem:[%s2400_s17 + $0x1f0] sm:$0xf]  ;;  %v1931_v19 = vld [vmem:[%s2400_s17 + $0x1f4] sm:$0xf0]  ;;  %1066 = vmatpush.bf16.msra.mxu0 %v1655_v12  ;;  %v1897_v24 = vld [vmem:[%s2400_s17 + $0xe4] sm:$0xf0] }
  0x99   : > { %v1847_v21 = vor.u32 %v1931_v19, %v1846_v18  ;;  %1085 = vmatpush.bf16.msra.mxu1 %v1719_v16  ;;  %v1711_v26 = vor.u32 %v1897_v24, %v1710_v23  ;;  %v1774_v27 = vld [vmem:[%s2400_s17 + $0x160] sm:$0xf]  ;;  %v1913_v28 = vld [vmem:[%s2400_s17 + $0x164] sm:$0xf0]  ;;  %v1638_v32 = vld [vmem:[%s2400_s17 + $0x50] sm:$0xf] }
  0x9a   : > { %1104 = vmatpush.bf16.msra.mxu2 %v1783_v17  ;;  %v1838_v29 = vld [vmem:[%s2400_s17 + $0x1e0] sm:$0xf]  ;;  %v1775_v30 = vor.u32 %v1913_v28, %v1774_v27  ;;  %v1929_v31 = vld [vmem:[%s2400_s17 + $0x1e4] sm:$0xf0]  ;;  %v1879_v33 = vld [vmem:[%s2400_s17 + $0x54] sm:$0xf0] }
  0x9b   : > { %1123 = vmatpush.bf16.msra.mxu3 %v1847_v21  ;;  %v1839_v34 = vor.u32 %v1929_v31, %v1838_v29  ;;  %v1702_v35 = vld [vmem:[%s2400_s17 + $0xd0] sm:$0xf]  ;;  %v1895_v36 = vld [vmem:[%s2400_s17 + $0xd4] sm:$0xf0]  ;;  %v1639_v38 = vor.u32 %v1879_v33, %v1638_v32  ;;  %v1630_v44 = vld [vmem:[%s2400_s17 + $0x40] sm:$0xf] }
  0x9c   : > { %v1766_v37 = vld [vmem:[%s2400_s17 + $0x150] sm:$0xf]  ;;  %1067 = vmatpush.bf16.msra.mxu0 %v1647_v25  ;;  %v1911_v39 = vld [vmem:[%s2400_s17 + $0x154] sm:$0xf0]  ;;  %v1703_v42 = vor.u32 %v1895_v36, %v1702_v35  ;;  %v1877_v45 = vld [vmem:[%s2400_s17 + $0x44] sm:$0xf0] }
  0x9d   : > { %v1830_v40 = vld [vmem:[%s2400_s17 + $0x1d0] sm:$0xf]  ;;  %v1927_v41 = vld [vmem:[%s2400_s17 + $0x1d4] sm:$0xf0]  ;;  %1086 = vmatpush.bf16.msra.mxu1 %v1711_v26  ;;  %v1767_v43 = vor.u32 %v1911_v39, %v1766_v37  ;;  %v1694_v46 = vld [vmem:[%s2400_s17 + $0xc0] sm:$0xf]  ;;  %v1631_v53 = vor.u32 %v1877_v45, %v1630_v44 }
  0x9e   : > { %1105 = vmatpush.bf16.msra.mxu2 %v1775_v30  ;;  %v1831_v47 = vor.u32 %v1927_v41, %v1830_v40  ;;  %v1893_v48 = vld [vmem:[%s2400_s17 + $0xc4] sm:$0xf0]  ;;  %v1758_v49 = vld [vmem:[%s2400_s17 + $0x140] sm:$0xf]  ;;  %v1622_v56 = vld [vmem:[%s2400_s17 + $0x30] sm:$0xf] }
  0x9f   : > { %1124 = vmatpush.bf16.msra.mxu3 %v1839_v34  ;;  %v1909_v50 = vld [vmem:[%s2400_s17 + $0x144] sm:$0xf0]  ;;  %v1822_v51 = vld [vmem:[%s2400_s17 + $0x1c0] sm:$0xf]  ;;  %v1695_v54 = vor.u32 %v1893_v48, %v1694_v46  ;;  %v1875_v57 = vld [vmem:[%s2400_s17 + $0x34] sm:$0xf0] }
  0xa0   : > { %v1925_v52 = vld [vmem:[%s2400_s17 + $0x1c4] sm:$0xf0]  ;;  %1068 = vmatpush.bf16.msra.mxu0 %v1639_v38  ;;  %v1759_v55 = vor.u32 %v1909_v50, %v1758_v49  ;;  %v1686_v58 = vld [vmem:[%s2400_s17 + $0xb0] sm:$0xf]  ;;  %v1891_v60 = vld [vmem:[%s2400_s17 + $0xb4] sm:$0xf0]  ;;  %v1623_v1 = vor.u32 %v1875_v57, %v1622_v56 }
  0xa1   : > { %1087 = vmatpush.bf16.msra.mxu1 %v1703_v42  ;;  %v1823_v59 = vor.u32 %v1925_v52, %v1822_v51  ;;  %v1750_v61 = vld [vmem:[%s2400_s17 + $0x130] sm:$0xf]  ;;  %v1907_v62 = vld [vmem:[%s2400_s17 + $0x134] sm:$0xf0]  ;;  %v1687_v2 = vor.u32 %v1891_v60, %v1686_v58  ;;  %v1614_v4 = vld [vmem:[%s2400_s17 + $0x20] sm:$0xf] }
  0xa2   : > { %1106 = vmatpush.bf16.msra.mxu2 %v1767_v43  ;;  %v1814_v63 = vld [vmem:[%s2400_s17 + $0x1b0] sm:$0xf]  ;;  %v1923_v0 = vld [vmem:[%s2400_s17 + $0x1b4] sm:$0xf0]  ;;  %v1751_v3 = vor.u32 %v1907_v62, %v1750_v61  ;;  %v1873_v5 = vld [vmem:[%s2400_s17 + $0x24] sm:$0xf0] }
  0xa3   : > { %1125 = vmatpush.bf16.msra.mxu3 %v1831_v47  ;;  %v1678_v6 = vld [vmem:[%s2400_s17 + $0xa0] sm:$0xf]  ;;  %v1815_v7 = vor.u32 %v1923_v0, %v1814_v63  ;;  %v1889_v8 = vld [vmem:[%s2400_s17 + $0xa4] sm:$0xf0]  ;;  %v1615_v13 = vor.u32 %v1873_v5, %v1614_v4  ;;  %v1606_v16 = vld [vmem:[%s2400_s17 + $0x10] sm:$0xf] }
  0xa4   : > { %1069 = vmatpush.bf16.msra.mxu0 %v1631_v53  ;;  %v1742_v9 = vld [vmem:[%s2400_s17 + $0x120] sm:$0xf]  ;;  %v1905_v10 = vld [vmem:[%s2400_s17 + $0x124] sm:$0xf0]  ;;  %v1679_v14 = vor.u32 %v1889_v8, %v1678_v6  ;;  %v1871_v17 = vld [vmem:[%s2400_s17 + $0x14] sm:$0xf0] }
  0xa5   : > { %1088 = vmatpush.bf16.msra.mxu1 %v1695_v54  ;;  %v1806_v11 = vld [vmem:[%s2400_s17 + $0x1a0] sm:$0xf]  ;;  %v1921_v12 = vld [vmem:[%s2400_s17 + $0x1a4] sm:$0xf0]  ;;  %v1743_v15 = vor.u32 %v1905_v10, %v1742_v9  ;;  %v1670_v18 = vld [vmem:[%s2400_s17 + $0x90] sm:$0xf]  ;;  %v1607_v26 = vor.u32 %v1871_v17, %v1606_v16 }
  0xa6   : > { %1107 = vmatpush.bf16.msra.mxu2 %v1759_v55  ;;  %v1807_v19 = vor.u32 %v1921_v12, %v1806_v11  ;;  %v1887_v20 = vld [vmem:[%s2400_s17 + $0x94] sm:$0xf0]  ;;  %v1734_v21 = vld [vmem:[%s2400_s17 + $0x110] sm:$0xf]  ;;  %v1598_v25 = vld [vmem:[%s2400_s17] sm:$0xf] }
  0xa7   : > { %1126 = vmatpush.bf16.msra.mxu3 %v1823_v59  ;;  %v1903_v22 = vld [vmem:[%s2400_s17 + $0x114] sm:$0xf0]  ;;  %v1798_v23 = vld [vmem:[%s2400_s17 + $0x190] sm:$0xf]  ;;  %v1869_v27 = vld [vmem:[%s2400_s17 + $0x4] sm:$0xf0]  ;;  %v1671_v30 = vor.u32 %v1887_v20, %v1670_v18 }
  0xa8   : > { %1070 = vmatpush.bf16.msra.mxu0 %v1623_v1  ;;  %v1919_v24 = vld [vmem:[%s2400_s17 + $0x194] sm:$0xf0]  ;;  %v1662_v28 = vld [vmem:[%s2400_s17 + $0x80] sm:$0xf]  ;;  %v1885_v29 = vld [vmem:[%s2400_s17 + $0x84] sm:$0xf0]  ;;  %v1735_v31 = vor.u32 %v1903_v22, %v1734_v21  ;;  %v1599_v43 = vor.u32 %v1869_v27, %v1598_v25 }
  0xa9   : > { %1089 = vmatpush.bf16.msra.mxu1 %v1687_v2  ;;  %v1726_v32 = vld [vmem:[%s2400_s17 + $0x100] sm:$0xf]  ;;  %v1901_v33 = vld [vmem:[%s2400_s17 + $0x104] sm:$0xf0]  ;;  %v1799_v35 = vor.u32 %v1919_v24, %v1798_v23  ;;  %v1862_v38 = vld [vmem:[%s2398_s19 + $0xc] sm:$0xf0]  ;;  %v1663_v47 = vor.u32 %v1885_v29, %v1662_v28 }
  0xaa   : > { %1108 = vmatpush.bf16.msra.mxu2 %v1751_v3  ;;  %v1790_v34 = vld [vmem:[%s2400_s17 + $0x180] sm:$0xf]  ;;  %v1917_v36 = vld [vmem:[%s2400_s17 + $0x184] sm:$0xf0]  ;;  %v1860_v39 = vld [vmem:[%s2398_s19 + $0x4] sm:$0xf]  ;;  %v1727_v48 = vor.u32 %v1901_v33, %v1726_v32 }
  0xab   : > { %1127 = vmatpush.bf16.msra.mxu3 %v1815_v7  ;;  %v1566_v37 = vld [vmem:[%s2398_s19] sm:$0xf]  ;;  %v1568_v40 = vld [vmem:[%s2398_s19 + $0x10] sm:$0xf0]  ;;  %v1784_v42 = vld [vmem:[%s2400_s17 + $0x178] sm:$0xf0]  ;;  %v1791_v52 = vor.u32 %v1917_v36, %v1790_v34 }
  0xac   : > { %1071 = vmatpush.bf16.msra.mxu0 %v1615_v13  ;;  %v1914_v41 = vld [vmem:[%s2400_s17 + $0x174] sm:$0xf]  ;;  %v1574_v44 = vld [vmem:[%s2398_s19 + $0x8] sm:$0xf]  ;;  %v1720_v46 = vld [vmem:[%s2400_s17 + $0xf8] sm:$0xf0]  ;;  %v2484_v57 = vor.u32 %v1862_v38, %v1566_v37  ;;  %v2489_v62 = vor.u32 %v1860_v39, %v1568_v40 }
  0xad   : > { %1090 = vmatpush.bf16.msra.mxu1 %v1679_v14  ;;  %v1898_v45 = vld [vmem:[%s2400_s17 + $0xf4] sm:$0xf]  ;;  %v1863_v49 = vld [vmem:[%s2398_s19 + $0x14] sm:$0xf0]  ;;  %v1861_v50 = vld [vmem:[%s2398_s19 + $0xc] sm:$0xf]  ;;  %v1787_v53 = vor.u32 %v1914_v41, %v1784_v42 }
  0xae   : > { %1109 = vmatpush.bf16.msra.mxu2 %v1743_v15  ;;  %v1576_v51 = vld [vmem:[%s2398_s19 + $0x18] sm:$0xf0]  ;;  %v1882_v54 = vld [vmem:[%s2400_s17 + $0x74] sm:$0xf]  ;;  %v1723_v58 = vor.u32 %v1898_v45, %v1720_v46  ;;  %v1912_v60 = vld [vmem:[%s2400_s17 + $0x164] sm:$0xf]  ;;  %v2491_v63 = vor.u32 %v1863_v49, %v1574_v44 }
  0xaf   : > { %1128 = vmatpush.bf16.msra.mxu3 %v1807_v19  ;;  %v1656_v55 = vld [vmem:[%s2400_s17 + $0x78] sm:$0xf0]  ;;  %v1930_v56 = vld [vmem:[%s2400_s17 + $0x1f4] sm:$0xf]  ;;  %v1776_v61 = vld [vmem:[%s2400_s17 + $0x168] sm:$0xf0]  ;;  %v2495_v2 = vor.u32 %v1861_v50, %v1576_v51 }
  0xb0   : > { %1072 = vmatpush.bf16.msra.mxu0 %v1607_v26  ;;  %v1848_v59 = vld [vmem:[%s2400_s17 + $0x1f8] sm:$0xf0]  ;;  %v1896_v0 = vld [vmem:[%s2400_s17 + $0xe4] sm:$0xf]  ;;  %v1712_v1 = vld [vmem:[%s2400_s17 + $0xe8] sm:$0xf0]  ;;  %v1659_v3 = vor.u32 %v1882_v54, %v1656_v55  ;;  %v1779_v5 = vor.u32 %v1912_v60, %v1776_v61 }
  0xb1   : > { %1091 = vmatpush.bf16.msra.mxu1 %v1671_v30  ;;  %v1851_v4 = vor.u32 %v1930_v56, %v1848_v59  ;;  %v1880_v6 = vld [vmem:[%s2400_s17 + $0x64] sm:$0xf]  ;;  %v1648_v7 = vld [vmem:[%s2400_s17 + $0x68] sm:$0xf0]  ;;  %v1715_v9 = vor.u32 %v1896_v0, %v1712_v1  ;;  %v1910_v11 = vld [vmem:[%s2400_s17 + $0x154] sm:$0xf] }
  0xb2   : > { %1110 = vmatpush.bf16.msra.mxu2 %v1735_v31  ;;  %v1928_v8 = vld [vmem:[%s2400_s17 + $0x1e4] sm:$0xf]  ;;  %v1840_v10 = vld [vmem:[%s2400_s17 + $0x1e8] sm:$0xf0]  ;;  %v1768_v12 = vld [vmem:[%s2400_s17 + $0x158] sm:$0xf0]  ;;  %v1651_v15 = vor.u32 %v1880_v6, %v1648_v7 }
  0xb3   : > { %1129 = vmatpush.bf16.msra.mxu3 %v1799_v35  ;;  %v1894_v13 = vld [vmem:[%s2400_s17 + $0xd4] sm:$0xf]  ;;  %v1704_v14 = vld [vmem:[%s2400_s17 + $0xd8] sm:$0xf0]  ;;  %v1843_v16 = vor.u32 %v1928_v8, %v1840_v10  ;;  %v1771_v17 = vor.u32 %v1910_v11, %v1768_v12  ;;  %v1908_v23 = vld [vmem:[%s2400_s17 + $0x144] sm:$0xf] }
  0xb4   : > { %1073 = vmatpush.bf16.msra.mxu0 %v1599_v43  ;;  %v1878_v18 = vld [vmem:[%s2400_s17 + $0x54] sm:$0xf]  ;;  %v1640_v19 = vld [vmem:[%s2400_s17 + $0x58] sm:$0xf0]  ;;  %v1707_v21 = vor.u32 %v1894_v13, %v1704_v14  ;;  %v1760_v24 = vld [vmem:[%s2400_s17 + $0x148] sm:$0xf0] }
  0xb5   : > { %1092 = vmatpush.bf16.msra.mxu1 %v1663_v47  ;;  %v1926_v20 = vld [vmem:[%s2400_s17 + $0x1d4] sm:$0xf]  ;;  %v1832_v22 = vld [vmem:[%s2400_s17 + $0x1d8] sm:$0xf0]  ;;  %v1892_v25 = vld [vmem:[%s2400_s17 + $0xc4] sm:$0xf]  ;;  %v1643_v27 = vor.u32 %v1878_v18, %v1640_v19  ;;  %v1763_v32 = vor.u32 %v1908_v23, %v1760_v24 }
  0xb6   : > { %1111 = vmatpush.bf16.msra.mxu2 %v1727_v48  ;;  %v1696_v26 = vld [vmem:[%s2400_s17 + $0xc8] sm:$0xf0]  ;;  %v1876_v28 = vld [vmem:[%s2400_s17 + $0x44] sm:$0xf]  ;;  %v1835_v31 = vor.u32 %v1926_v20, %v1832_v22  ;;  %v1582_v34 = vld [vmem:[%s2398_s19 + $0x20] sm:$0xf] }
  0xb7   : > { %1130 = vmatpush.bf16.msra.mxu3 %v1791_v52  ;;  %1074 = vmatmul.bf16.vlgmr.msra.gmra.mxu0 %v2484_v57  ;;  %v1632_v29 = vld [vmem:[%s2400_s17 + $0x48] sm:$0xf0]  ;;  %v1924_v30 = vld [vmem:[%s2400_s17 + $0x1c4] sm:$0xf]  ;;  %v1866_v35 = vld [vmem:[%s2398_s19 + $0x2c] sm:$0xf0]  ;;  %v1699_v36 = vor.u32 %v1892_v25, %v1696_v26 }
  0xb8   : > { %1093 = vmatmul.bf16.vlgmr.msra.gmra.mxu1 %v2489_v62  ;;  %1142 = vmatpush.bf16.msrb.mxu0 %v1659_v3  ;;  %v1824_v33 = vld [vmem:[%s2400_s17 + $0x1c8] sm:$0xf0]  ;;  %v1864_v37 = vld [vmem:[%s2398_s19 + $0x24] sm:$0xf]  ;;  %v1584_v38 = vld [vmem:[%s2398_s19 + $0x30] sm:$0xf0]  ;;  %v1635_v44 = vor.u32 %v1876_v28, %v1632_v29 }
  0xb9   : > { %1161 = vmatpush.bf16.msrb.mxu1 %v1723_v58  ;;  %1112 = vmatmul.bf16.vlgmr.msra.gmra.mxu2 %v2491_v63  ;;  %v1906_v39 = vld [vmem:[%s2400_s17 + $0x134] sm:$0xf]  ;;  %v1752_v40 = vld [vmem:[%s2400_s17 + $0x138] sm:$0xf0]  ;;  %v1590_v41 = vld [vmem:[%s2398_s19 + $0x28] sm:$0xf]  ;;  %v1827_v48 = vor.u32 %v1924_v30, %v1824_v33  ;;  %v2541_v59 = vor.u32 %v1864_v37, %v1584_v38 }
  0xba   : > { %1180 = vmatpush.bf16.msrb.mxu2 %v1787_v53  ;;  %1131 = vmatmul.bf16.vlgmr.msra.gmra.mxu3 %v2495_v2  ;;  %v1890_v42 = vld [vmem:[%s2400_s17 + $0xb4] sm:$0xf]  ;;  %v1688_v43 = vld [vmem:[%s2400_s17 + $0xb8] sm:$0xf0]  ;;  %v1867_v45 = vld [vmem:[%s2398_s19 + $0x34] sm:$0xf0]  ;;  %v1755_v49 = vor.u32 %v1906_v39, %v1752_v40  ;;  %v2536_v53 = vor.u32 %v1866_v35, %v1582_v34 }
  0xbb   : > { %1199 = vmatpush.bf16.msrb.mxu3 %v1851_v4  ;;  %v1865_v46 = vld [vmem:[%s2398_s19 + $0x2c] sm:$0xf]  ;;  %v1592_v47 = vld [vmem:[%s2398_s19 + $0x38] sm:$0xf0]  ;;  %v1874_v50 = vld [vmem:[%s2400_s17 + $0x34] sm:$0xf]  ;;  %v1691_v54 = vor.u32 %v1890_v42, %v1688_v43  ;;  %v2543_v60 = vor.u32 %v1867_v45, %v1590_v41 }
  0xbc   : > { %1143 = vmatpush.bf16.msrb.mxu0 %v1651_v15  ;;  %v1624_v51 = vld [vmem:[%s2400_s17 + $0x38] sm:$0xf0]  ;;  %v1922_v52 = vld [vmem:[%s2400_s17 + $0x1b4] sm:$0xf]  ;;  %v1904_v56 = vld [vmem:[%s2400_s17 + $0x124] sm:$0xf]  ;;  %v1595_v1 = vor.u32 %v1865_v46, %v1592_v47 }
  0xbd   : > { %1162 = vmatpush.bf16.msrb.mxu1 %v1715_v9  ;;  %v1816_v55 = vld [vmem:[%s2400_s17 + $0x1b8] sm:$0xf0]  ;;  %v1744_v58 = vld [vmem:[%s2400_s17 + $0x128] sm:$0xf0]  ;;  %v1888_v61 = vld [vmem:[%s2400_s17 + $0xa4] sm:$0xf]  ;;  %v1627_v3 = vor.u32 %v1874_v50, %v1624_v51 }
  0xbe   : > { %1181 = vmatpush.bf16.msrb.mxu2 %v1779_v5  ;;  %v1680_v0 = vld [vmem:[%s2400_s17 + $0xa8] sm:$0xf0]  ;;  %v1819_v4 = vor.u32 %v1922_v52, %v1816_v55  ;;  %v1747_v5 = vor.u32 %v1904_v56, %v1744_v58  ;;  %v1872_v6 = vld [vmem:[%s2400_s17 + $0x24] sm:$0xf]  ;;  %v1902_v11 = vld [vmem:[%s2400_s17 + $0x114] sm:$0xf] }
  0xbf   : > { %1200 = vmatpush.bf16.msrb.mxu3 %v1843_v16  ;;  %v1616_v7 = vld [vmem:[%s2400_s17 + $0x28] sm:$0xf0]  ;;  %v1920_v8 = vld [vmem:[%s2400_s17 + $0x1a4] sm:$0xf]  ;;  %v1683_v9 = vor.u32 %v1888_v61, %v1680_v0  ;;  %v1736_v12 = vld [vmem:[%s2400_s17 + $0x118] sm:$0xf0] }
  0xc0   : > { %1144 = vmatpush.bf16.msrb.mxu0 %v1643_v27  ;;  %v1808_v10 = vld [vmem:[%s2400_s17 + $0x1a8] sm:$0xf0]  ;;  %v1886_v13 = vld [vmem:[%s2400_s17 + $0x94] sm:$0xf]  ;;  %v1672_v14 = vld [vmem:[%s2400_s17 + $0x98] sm:$0xf0]  ;;  %v1619_v15 = vor.u32 %v1872_v6, %v1616_v7 }
  0xc1   : > { %1163 = vmatpush.bf16.msrb.mxu1 %v1707_v21  ;;  %v1811_v16 = vor.u32 %v1920_v8, %v1808_v10  ;;  %v1870_v18 = vld [vmem:[%s2400_s17 + $0x14] sm:$0xf]  ;;  %v1608_v19 = vld [vmem:[%s2400_s17 + $0x18] sm:$0xf0]  ;;  %v1675_v21 = vor.u32 %v1886_v13, %v1672_v14  ;;  %v1900_v23 = vld [vmem:[%s2400_s17 + $0x104] sm:$0xf] }
  0xc2   : > { %1182 = vmatpush.bf16.msrb.mxu2 %v1771_v17  ;;  %v1739_v17 = vor.u32 %v1902_v11, %v1736_v12  ;;  %v1918_v20 = vld [vmem:[%s2400_s17 + $0x194] sm:$0xf]  ;;  %v1800_v22 = vld [vmem:[%s2400_s17 + $0x198] sm:$0xf0]  ;;  %v1728_v24 = vld [vmem:[%s2400_s17 + $0x108] sm:$0xf0]  ;;  %v1611_v27 = vor.u32 %v1870_v18, %v1608_v19 }
  0xc3   : > { %1201 = vmatpush.bf16.msrb.mxu3 %v1835_v31  ;;  %v1884_v25 = vld [vmem:[%s2400_s17 + $0x84] sm:$0xf]  ;;  %v1664_v26 = vld [vmem:[%s2400_s17 + $0x88] sm:$0xf0]  ;;  %v1803_v28 = vor.u32 %v1918_v20, %v1800_v22  ;;  %v1731_v29 = vor.u32 %v1900_v23, %v1728_v24  ;;  %v626_v43 = vld [vmem:[#allocation2 + $0x30] sm:$0xff]  ;;  %p1852_p5 = scmp.ne.s32.totalorder %s2092_s21, 7 }
  0xc4   : > { %1145 = vmatpush.bf16.msrb.mxu0 %v1635_v44  ;;  %v1868_v30 = vld [vmem:[%s2400_s17 + $0x4] sm:$0xf]  ;;  %v1600_v31 = vld [vmem:[%s2400_s17 + $0x8] sm:$0xf0]  ;;  %v629_v24 = vld [vmem:[#allocation2 + $0x10] sm:$0xff] }
  0xc5   : > { %1164 = vmatpush.bf16.msrb.mxu1 %v1699_v36  ;;  %v1916_v33 = vld [vmem:[%s2400_s17 + $0x184] sm:$0xf]  ;;  %v1792_v34 = vld [vmem:[%s2400_s17 + $0x188] sm:$0xf0]  ;;  %v1603_v35 = vor.u32 %v1868_v30, %v1600_v31 }
  0xc6   : > { %1183 = vmatpush.bf16.msrb.mxu2 %v1763_v32  ;;  %v1667_v32 = vor.u32 %v1884_v25, %v1664_v26  ;;  %v1795_v36 = vor.u32 %v1916_v33, %v1792_v34  ;;  %v632_v6 = vld [vmem:[#allocation2 + $0x28] sm:$0xff]  ;;  %v631_v33 = vld [vmem:[#allocation2 + $0x20] sm:$0xff] }
  0xc7   : > { %1202 = vmatpush.bf16.msrb.mxu3 %v1827_v48  ;;  %1079 = vmatmul.bf16.gmra.mxu0 %v2536_v53 }
  0xc8   : > { %1098 = vmatmul.bf16.gmra.mxu1 %v2541_v59  ;;  %1146 = vmatpush.bf16.msrb.mxu0 %v1627_v3 }
  0xc9   : > { %1165 = vmatpush.bf16.msrb.mxu1 %v1691_v54  ;;  %1117 = vmatmul.bf16.gmra.mxu2 %v2543_v60 }
  0xca   : > { %1184 = vmatpush.bf16.msrb.mxu2 %v1755_v49  ;;  %1136 = vmatmul.bf16.gmra.mxu3 %v1595_v1  ;;  %v628_v49 = vld [vmem:[#allocation2 + $0x18] sm:$0xff] }
  0xcb   : > { %1203 = vmatpush.bf16.msrb.mxu3 %v1819_v4 }
  0xcc   : > { %1147 = vmatpush.bf16.msrb.mxu0 %v1619_v15 }
  0xcd   : > { %1166 = vmatpush.bf16.msrb.mxu1 %v1683_v9 }
  0xce   : > { %1185 = vmatpush.bf16.msrb.mxu2 %v1747_v5 }
  0xcf   : > { %1204 = vmatpush.bf16.msrb.mxu3 %v1811_v16 }
  0xd0   : > { %1148 = vmatpush.bf16.msrb.mxu0 %v1611_v27 }
  0xd1   : > { %1167 = vmatpush.bf16.msrb.mxu1 %v1675_v21 }
  0xd2   : > { %1186 = vmatpush.bf16.msrb.mxu2 %v1739_v17  ;;  %v627_v17 = vld [vmem:[#allocation2] sm:$0xff] }
  0xd3   : > { %1205 = vmatpush.bf16.msrb.mxu3 %v1803_v28 }
  0xd4   : > { %1149 = vmatpush.bf16.msrb.mxu0 %v1603_v35 }
  0xd5   : > { %1168 = vmatpush.bf16.msrb.mxu1 %v1667_v32 }
  0xd6   : > { %1187 = vmatpush.bf16.msrb.mxu2 %v1731_v29 }
  0xd7   : > { %1206 = vmatpush.bf16.msrb.mxu3 %v1795_v36  ;;  %1150 = vmatmul.bf16.vlgmr.msrb.gmra.mxu0 %v2484_v57 }
  0xd8   : > { %1169 = vmatmul.bf16.vlgmr.msrb.gmra.mxu1 %v2489_v62 }
  0xd9   : > { %1188 = vmatmul.bf16.vlgmr.msrb.gmra.mxu2 %v2491_v63 }
  0xda   : > { %1207 = vmatmul.bf16.vlgmr.msrb.gmra.mxu3 %v2495_v2 }
  0xe7   : > { %1155 = vmatmul.bf16.gmra.mxu0 %v2536_v53 }
  0xe8   : > { %1174 = vmatmul.bf16.gmra.mxu1 %v2541_v59  ;;  %v630_v59 = vld [vmem:[#allocation2 + $0x8] sm:$0xff] }
  0xe9   : > { %1193 = vmatmul.bf16.gmra.mxu2 %v2543_v60 }
  0xea   : > { %1212 = vmatmul.bf16.gmra.mxu3 %v1595_v1 }
 0x134   : > { %v1075_v37 = vpop.f32.mrf.mxu0 }
 0x135   : > { %v1094_v38 = vpop.f32.mrf.mxu1 }
 0x136   : > { %v1095_v39 = vadd.f32 %v1094_v38, %v1075_v37 }
 0x13c   : > { %v1113_v40 = vpop.f32.mrf.mxu2  ;;  %v1077_v57 = vpop.f32.mrf.mxu0 }
 0x13d   : > { %v1114_v41 = vadd.f32 %v1113_v40, %v1095_v39  ;;  %v1132_v42 = vpop.f32.mrf.mxu3  ;;  %v1096_v62 = vpop.f32.mrf.mxu1 }
 0x13e   : > { %v1097_v2 = vadd.f32 %v1096_v62, %v1077_v57 }
 0x13f   : > { %v1133_v44 = vadd.f32 %v1132_v42, %v1114_v41  ;;  %v633_v41 = vld [vmem:[#allocation2 + $0x38] sm:$0xff] }
 0x141   : > { %v1218_v63 = vadd.f32 %v1133_v44, %v626_v43 }
 0x143   : > { %1226 = vst [vmem:[#allocation2 + $0x30] sm:$0xff] %v1218_v63 }
 0x144   : > { %v1115_v45 = vpop.f32.mrf.mxu2  ;;  %v1080_v48 = vpop.f32.mrf.mxu0 }
 0x145   : > { %v1116_v46 = vadd.f32 %v1115_v45, %v1097_v2  ;;  %v1134_v47 = vpop.f32.mrf.mxu3  ;;  %v1099_v50 = vpop.f32.mrf.mxu1 }
 0x146   : > { %v1100_v53 = vadd.f32 %v1099_v50, %v1080_v48 }
 0x147   : > { %v1135_v51 = vadd.f32 %v1134_v47, %v1116_v46 }
 0x149   : > { %v1220_v52 = vadd.f32 %v1135_v51, %v628_v49 }
 0x14b   : > { %1228 = vst [vmem:[#allocation2 + $0x18] sm:$0xff] %v1220_v52 }
 0x14c   : > { %v1118_v54 = vpop.f32.mrf.mxu2  ;;  %v1082_v58 = vpop.f32.mrf.mxu0 }
 0x14d   : > { %v1119_v55 = vadd.f32 %v1118_v54, %v1100_v53  ;;  %v1137_v56 = vpop.f32.mrf.mxu3  ;;  %v1101_v60 = vpop.f32.mrf.mxu1 }
 0x14e   : > { %v1102_v1 = vadd.f32 %v1101_v60, %v1082_v58 }
 0x14f   : > { %v1138_v61 = vadd.f32 %v1137_v56, %v1119_v55 }
 0x151   : > { %v1222_v0 = vadd.f32 %v1138_v61, %v630_v59 }
 0x153   : > { %1230 = vst [vmem:[#allocation2 + $0x8] sm:$0xff] %v1222_v0 }
 0x154   : > { %v1120_v3 = vpop.f32.mrf.mxu2  ;;  %v1151_v7 = vpop.f32.mrf.mxu0 }
 0x155   : > { %v1121_v4 = vadd.f32 %v1120_v3, %v1102_v1  ;;  %v1139_v5 = vpop.f32.mrf.mxu3  ;;  %v1170_v8 = vpop.f32.mrf.mxu1 }
 0x156   : > { %v1171_v11 = vadd.f32 %v1170_v8, %v1151_v7 }
 0x157   : > { %v1140_v9 = vadd.f32 %v1139_v5, %v1121_v4 }
 0x159   : > { %v1224_v10 = vadd.f32 %v1140_v9, %v632_v6 }
 0x15b   : > { %1232 = vst [vmem:[#allocation2 + $0x28] sm:$0xff] %v1224_v10 }
 0x15c   : > { %v1189_v12 = vpop.f32.mrf.mxu2  ;;  %v1153_v15 = vpop.f32.mrf.mxu0 }
 0x15d   : > { %v1208_v13 = vpop.f32.mrf.mxu3  ;;  %v1190_v14 = vadd.f32 %v1189_v12, %v1171_v11  ;;  %v1172_v16 = vpop.f32.mrf.mxu1 }
 0x15e   : > { %v1173_v20 = vadd.f32 %v1172_v16, %v1153_v15 }
 0x15f   : > { %v1209_v18 = vadd.f32 %v1208_v13, %v1190_v14 }
 0x161   : > { %v1219_v19 = vadd.f32 %v1209_v18, %v627_v17 }
 0x163   : > { %1227 = vst [vmem:[#allocation2] sm:$0xff] %v1219_v19 }
 0x164   : > { %v1191_v21 = vpop.f32.mrf.mxu2  ;;  %v1156_v25 = vpop.f32.mrf.mxu0 }
 0x165   : > { %v1210_v22 = vpop.f32.mrf.mxu3  ;;  %v1192_v23 = vadd.f32 %v1191_v21, %v1173_v20  ;;  %v1175_v26 = vpop.f32.mrf.mxu1 }
 0x166   : > { %v1176_v29 = vadd.f32 %v1175_v26, %v1156_v25 }
 0x167   : > { %v1211_v27 = vadd.f32 %v1210_v22, %v1192_v23 }
 0x169   : > { %v1221_v28 = vadd.f32 %v1211_v27, %v629_v24 }
 0x16b   : > { %1229 = vst [vmem:[#allocation2 + $0x10] sm:$0xff] %v1221_v28 }
 0x16c   : > { %v1194_v30 = vpop.f32.mrf.mxu2  ;;  %v1158_v35 = vpop.f32.mrf.mxu0 }
 0x16d   : > { %v1213_v31 = vpop.f32.mrf.mxu3  ;;  %v1195_v32 = vadd.f32 %v1194_v30, %v1176_v29  ;;  %v1177_v36 = vpop.f32.mrf.mxu1 }
 0x16e   : > { %v1178_v38 = vadd.f32 %v1177_v36, %v1158_v35 }
 0x16f   : > { %v1214_v34 = vadd.f32 %v1213_v31, %v1195_v32 }
 0x171   : > { %v1223_v37 = vadd.f32 %v1214_v34, %v631_v33 }
 0x173   : > { %1231 = vst [vmem:[#allocation2 + $0x20] sm:$0xff] %v1223_v37 }
 0x174   : > { %v1196_v39 = vpop.f32.mrf.mxu2 }
 0x175   : > { %v1197_v40 = vadd.f32 %v1196_v39, %v1178_v38  ;;  %v1215_v42 = vpop.f32.mrf.mxu3 }
 0x177   : > { %v1216_v57 = vadd.f32 %v1215_v42, %v1197_v40  ;;  %1237 = sbr.rel (%p1852_p5) target bundleno = 407 (0x197), region = 97 }
 0x179   : > { %v1225_v43 = vadd.f32 %v1216_v57, %v633_v41 }
 0x17b   : > { %1233 = vst [vmem:[#allocation2 + $0x38] sm:$0xff] %v1225_v43 }
 0x17c   : > { %v1238_v62 = vld [vmem:[#allocation2 + $0x30] sm:$0xff]  ;;  %v1239_v44 = vld [vmem:[#allocation2] sm:$0xff]  ;;  %v1240_v63 = vld [vmem:[#allocation2 + $0x18] sm:$0xff]  ;;  %v1278_v26 = vlaneseq  ;;  %vm1275_vm0 = vcmask 1040384  }
 0x17d   : > { %1246 = vst [vmem:[%s2402_s15] sm:$0xff] %v1238_v62  ;;  %v1283_v2 = vmul.f32 %v1238_v62, %v1238_v62  ;;  %v1284_v45 = vmul.f32 %v1239_v44, %v1239_v44  ;;  %v1254_v46 = vadd.f32 %v1240_v63, %v1238_v62  ;;  %v1285_v47 = vmul.f32 %v1240_v63, %v1240_v63  ;;  %v1241_v48 = vld [vmem:[#allocation2 + $0x10] sm:$0xff]  ;;  %v1242_v49 = vld [vmem:[#allocation2 + $0x8] sm:$0xff]  ;;  %v1243_v50 = vld [vmem:[#allocation2 + $0x20] sm:$0xff] }
 0x17e   : > { %1247 = vst [vmem:[%s2402_s15 + $0x8] sm:$0xff] %v1239_v44  ;;  %v1263_v51 = vadd.f32 %v1241_v48, %v1239_v44  ;;  %v1286_v52 = vmul.f32 %v1241_v48, %v1241_v48  ;;  %v1287_v53 = vmul.f32 %v1242_v49, %v1242_v49  ;;  %v1288_v54 = vmul.f32 %v1243_v50, %v1243_v50  ;;  %v1244_v55 = vld [vmem:[#allocation2 + $0x28] sm:$0xff] }
 0x17f   : > { %1248 = vst [vmem:[%s2402_s15 + $0x10] sm:$0xff] %v1240_v63  ;;  %v1291_v58 = vadd.f32 %v1285_v47, %v1283_v2  ;;  %v1255_v59 = vadd.f32 %v1254_v46, %v1242_v49  ;;  %v1289_v60 = vmul.f32 %v1244_v55, %v1244_v55  ;;  %vm1280_vm1 = vcmp.lt.s32.totalorder %v1278_v26, 256 }
 0x180   : > { %1249 = vst [vmem:[%s2402_s15 + $0x18] sm:$0xff] %v1241_v48  ;;  %v1300_v61 = vadd.f32 %v1286_v52, %v1284_v45  ;;  %v1264_v0 = vadd.f32 %v1263_v51, %v1243_v50 }
 0x181   : > { %1250 = vst [vmem:[%s2402_s15 + $0x20] sm:$0xff] %v1242_v49  ;;  %v1292_v3 = vadd.f32 %v1291_v58, %v1287_v53  ;;  %v1256_v4 = vadd.f32 %v1255_v59, %v1244_v55 }
 0x182   : > { %v1245_v56 = vld [vmem:[#allocation2 + $0x38] sm:$0xff]  ;;  %1251 = vst [vmem:[%s2402_s15 + $0x28] sm:$0xff] %v1243_v50  ;;  %v1301_v5 = vadd.f32 %v1300_v61, %v1288_v54 }
 0x183   : > { %v1290_v1 = vmul.f32 %v1245_v56, %v1245_v56  ;;  %v1265_v6 = vadd.f32 %v1264_v0, %v1245_v56  ;;  %1252 = vst [vmem:[%s2402_s15 + $0x30] sm:$0xff] %v1244_v55  ;;  %v1257_v7 = vrot.slane %v1256_v4, 4  ;;  %v1293_v8 = vadd.f32 %v1292_v3, %v1289_v60 }
 0x184   : > { %1253 = vst [vmem:[%s2402_s15 + $0x38] sm:$0xff] %v1245_v56 }
 0x185   : > { %v1266_v9 = vrot.slane %v1265_v6, 4  ;;  %v1302_v10 = vadd.f32 %v1301_v5, %v1290_v1  ;;  %v1258_v11 = vadd.f32 %v1257_v7, %v1256_v4  ;;  %v1294_v12 = vrot.slane %v1293_v8, 4 }
 0x187   : > { %v1267_v13 = vadd.f32 %v1266_v9, %v1265_v6  ;;  %v1303_v14 = vrot.slane %v1302_v10, 4  ;;  %v1259_v15 = vrot.slane %v1258_v11, 2  ;;  %v1295_v16 = vadd.f32 %v1294_v12, %v1293_v8 }
 0x189   : > { %v1268_v17 = vrot.slane %v1267_v13, 2  ;;  %v1304_v18 = vadd.f32 %v1303_v14, %v1302_v10  ;;  %v1260_v19 = vadd.f32 %v1259_v15, %v1258_v11  ;;  %v1296_v20 = vrot.slane %v1295_v16, 2 }
 0x18b   : > { %v1269_v21 = vadd.f32 %v1268_v17, %v1267_v13  ;;  %v1305_v22 = vrot.slane %v1304_v18, 2  ;;  %v1261_v23 = vrot.slane %v1260_v19, 1  ;;  %v1297_v24 = vadd.f32 %v1296_v20, %v1295_v16 }
 0x18d   : > { %v1270_v25 = vrot.slane %v1269_v21, 1  ;;  %v1306_v27 = vadd.f32 %v1305_v22, %v1304_v18  ;;  %v1298_v28 = vrot.slane %v1297_v24, 1  ;;  %v1262_v29 = vadd.f32 %v1261_v23, %v1260_v19 }
 0x18f   : > { %v1271_v30 = vadd.f32 %v1270_v25, %v1269_v21  ;;  %v1307_v31 = vrot.slane %v1306_v27, 1  ;;  %v1299_v33 = vadd.f32 %v1298_v28, %v1297_v24 }
 0x191   : > { %v1274_v32 = vrot.slane %v1271_v30, 7  ;;  %v1308_v34 = vadd.f32 %v1307_v31, %v1306_v27 }
 0x193   : > { %v1276_v35 = vsel %vm1275_vm0, %v1262_v29, %v1274_v32  ;;  %v1311_v36 = vrot.slane %v1308_v34, 7 }
 0x194   : > { %1282 = vst.msk [vmem:[%s603_s11] sm:$0x3] %vm1280_vm1, %v1276_v35 }
 0x195   : > { %v1312_v37 = vsel %vm1275_vm0, %v1299_v33, %v1311_v36 }
 0x196   : > { %1314 = vst.msk [vmem:[%s612_s27] sm:$0x3] %vm1280_vm1, %v1312_v37 }
 0x197 PF: > { %1337 = sbr.rel (!%p2230_p12) target bundleno = 417 (0x1a1), region = 101  ;;  %s1932_s26 = sshll.u32 (%p2230_p12), %s2096_s22, 4  ;;  %v1356_v38 = vld [vmem:[%s2402_s15] sm:$0xff] (%p2230_p12)  ;;  %v1358_v39 = vld [vmem:[%s2402_s15 + $0x8] sm:$0xff] (%p2230_p12)  ;;  %v1360_v40 = vld [vmem:[%s2402_s15 + $0x10] sm:$0xff] (%p2230_p12) }
 0x198   : > { %s1343_s27 = scalar_lea.vmem (%p2230_p12), %s2645_s2, %s1932_s26  ;;  %v1362_v41 = vld [vmem:[%s2402_s15 + $0x18] sm:$0xff] (%p2230_p12)  ;;  %v1364_v42 = vld [vmem:[%s2402_s15 + $0x20] sm:$0xff] (%p2230_p12)  ;;  %v1366_v57 = vld [vmem:[%s2402_s15 + $0x28] sm:$0xff] (%p2230_p12) }
 0x199   : > { %1357 = vst [vmem:[%s1343_s27] sm:$0xff] (%p2230_p12), %v1356_v38  ;;  %v1368_v43 = vld [vmem:[%s2402_s15 + $0x30] sm:$0xff] (%p2230_p12)  ;;  %v1370_v62 = vld [vmem:[%s2402_s15 + $0x38] sm:$0xff] (%p2230_p12) }
 0x19a   : > { %1359 = vst [vmem:[%s1343_s27 + $0x8] sm:$0xff] (%p2230_p12), %v1358_v39 }
 0x19b   : > { %1361 = vst [vmem:[%s1343_s27 + $0x20] sm:$0xff] (%p2230_p12), %v1360_v40 }
 0x19c   : > { %1363 = vst [vmem:[%s1343_s27 + $0x28] sm:$0xff] %v1362_v41 }
 0x19d   : > { %1365 = vst [vmem:[%s1343_s27 + $0x40] sm:$0xff] %v1364_v42 }
 0x19e   : > { %1367 = vst [vmem:[%s1343_s27 + $0x48] sm:$0xff] %v1366_v57 }
 0x19f   : > { %1369 = vst [vmem:[%s1343_s27 + $0x60] sm:$0xff] %v1368_v43 }
 0x1a0   : > { %1371 = vst [vmem:[%s1343_s27 + $0x68] sm:$0xff] %v1370_v62 }
 0x1a1 PF: > { %s15_s25 = sadd.s32 1, %s2108_s25   ;;  %s2659_s14 = sld [smem:[#allocation6_spill]] }
 0x1a2   : > { %p12_p6 = scmp.ge.s32.totalorder %s15_s25, 18   ;;  %s2660_s30 = sld [smem:[#allocation7_spill]] }
 0x1a3   : > { %s2661_s15 = smov %s2072_s16  ;;  %s2662_s16 = smov %s2228_s13 }
 0x1a4   : > { %s2663_s17 = smov %s2080_s18  ;;  %s2664_s18 = smov %s2225_s12 }
 0x1a5   : > { %s2665_s19 = smov %s2088_s20  ;;  %s2666_s20 = smov %s2211_s7 }
 0x1a6   : > { %s2667_s21 = smov %s2100_s23  ;;  %s2668_s22 = smov %s2104_s24 }
 0x1a7   : > { %s2669_s23 = smov %s2659_s14  ;;  %14 = sbr.rel (!%p12_p6) target bundleno = 9 (0x9), region = 187 }
 0x1a8   : > { %s2670_s24 = smov %s2660_s30 }

// kernel: d_forward.14
= control target key start
LH: loop header
LB: loop body
LE: loop exit
PB: predicated region body
PF: predicated region fallthrough
CT: control target
= control target key end

     0   :  { %s297_s0 = inlined_call_operand.vmem [shape: f32[32,512], index: 0, kind: input, shape index: {}]   ;;  %s298_s1 = inlined_call_operand.vmem [shape: f32[1,512], index: 1, kind: input, shape index: {}]   ;;  %s299_s2 = inlined_call_operand.vmem [shape: f32[1,512], index: 2, kind: input, shape index: {}]   ;;  %s300_s3 = inlined_call_operand.vmem [shape: bf16[32,512], index: 3, kind: output, shape index: {}]  }
   0x1   :  { %v14_v0 = vld [vmem:[%s297_s0] sm:$0xff]  ;;  %v15_v1 = vld [vmem:[%s297_s0 + $0x8] sm:$0xff]  ;;  %v16_v6 = vld [vmem:[%s297_s0 + $0x10] sm:$0xff] }
   0x2   :  { %v30_v2 = vld [vmem:[%s298_s1] sm:$0xf]  ;;  %v17_v7 = vld [vmem:[%s297_s0 + $0x18] sm:$0xff]  ;;  %v19_v13 = vld [vmem:[%s297_s0 + $0x28] sm:$0xff] }
   0x3   :  { %v179_v3 = vperm.slane %v30_v2, 0  ;;  %v181_v4 = vperm.slane %v30_v2, 1  ;;  %v56_v5 = vld [vmem:[%s299_s2] sm:$0xf]  ;;  %v196_v10 = vperm.slane %v30_v2, 2  ;;  %v198_v11 = vperm.slane %v30_v2, 3 }
   0x4   :  { %v192_v8 = vperm.slane %v56_v5, 0  ;;  %v194_v9 = vperm.slane %v56_v5, 1  ;;  %v18_v12 = vld [vmem:[%s297_s0 + $0x20] sm:$0xff]  ;;  %v208_v16 = vperm.slane %v56_v5, 2  ;;  %v210_v17 = vperm.slane %v56_v5, 3  ;;  %v20_v18 = vld [vmem:[%s297_s0 + $0x30] sm:$0xff] }
   0x5   :  { %v40_v14 = vmul.f32 %v179_v3, %v14_v0  ;;  %v41_v15 = vmul.f32 %v181_v4, %v15_v1  ;;  %v21_v19 = vld [vmem:[%s297_s0 + $0x38] sm:$0xff]  ;;  %v42_v20 = vmul.f32 %v196_v10, %v16_v6  ;;  %v43_v21 = vmul.f32 %v198_v11, %v17_v7  ;;  %v22_v38 = vld [vmem:[%s297_s0 + $0x40] sm:$0xff]  ;;  %v23_v39 = vld [vmem:[%s297_s0 + $0x48] sm:$0xff] }
   0x6   :  { %v44_v22 = vmul.f32 %v179_v3, %v18_v12  ;;  %v45_v23 = vmul.f32 %v181_v4, %v19_v13  ;;  %v46_v26 = vmul.f32 %v196_v10, %v20_v18  ;;  %v47_v27 = vmul.f32 %v198_v11, %v21_v19  ;;  %v24_v40 = vld [vmem:[%s297_s0 + $0x50] sm:$0xff]  ;;  %v25_v52 = vld [vmem:[%s297_s0 + $0x58] sm:$0xff]  ;;  %v26_v54 = vld [vmem:[%s297_s0 + $0x60] sm:$0xff] }
   0x7   :  { %v66_v24 = vadd.f32 %v192_v8, %v40_v14  ;;  %v67_v25 = vadd.f32 %v194_v9, %v41_v15  ;;  %v68_v28 = vadd.f32 %v208_v16, %v42_v20  ;;  %v69_v29 = vadd.f32 %v210_v17, %v43_v21  ;;  %v27_v0 = vld [vmem:[%s297_s0 + $0x68] sm:$0xff]  ;;  %v28_v6 = vld [vmem:[%s297_s0 + $0x70] sm:$0xff]  ;;  %v29_v19 = vld [vmem:[%s297_s0 + $0x78] sm:$0xff] }
   0x8   :  { %v70_v30 = vadd.f32 %v192_v8, %v44_v22  ;;  %v71_v31 = vadd.f32 %v194_v9, %v45_v23  ;;  %v72_v47 = vadd.f32 %v208_v16, %v46_v26  ;;  %v73_v48 = vadd.f32 %v210_v17, %v47_v27 }
   0x9   :  { %vm82_vm0 = vcmp.ge.f32.partialorder %v66_v24, 0.0  ;;  %vm83_vm1 = vcmp.ge.f32.partialorder %v67_v25, 0.0  ;;  %v98_v32 = vmul.f32 0.2, %v66_v24  ;;  %v99_v33 = vmul.f32 0.2, %v67_v25 }
   0xa   :  { %vm84_vm2 = vcmp.ge.f32.partialorder %v68_v28, 0.0  ;;  %vm85_vm3 = vcmp.ge.f32.partialorder %v69_v29, 0.0  ;;  %v100_v34 = vmul.f32 0.2, %v68_v28  ;;  %v101_v35 = vmul.f32 0.2, %v69_v29 }
   0xb   :  { %v114_v36 = vsel %vm82_vm0, %v66_v24, %v98_v32  ;;  %v115_v37 = vsel %vm83_vm1, %v67_v25, %v99_v33  ;;  %vm86_vm4 = vcmp.ge.f32.partialorder %v70_v30, 0.0  ;;  %vm87_vm5 = vcmp.ge.f32.partialorder %v71_v31, 0.0 }
   0xc   :  { %v130_v41 = vpack.c.bf16 %v115_v37, %v114_v36  ;;  %v116_v42 = vsel %vm84_vm2, %v68_v28, %v100_v34  ;;  %v117_v43 = vsel %vm85_vm3, %v69_v29, %v101_v35  ;;  %v102_v44 = vmul.f32 0.2, %v70_v30 }
   0xd   :  { %v131_v45 = vpack.c.bf16 %v117_v43, %v116_v42  ;;  %v103_v46 = vmul.f32 0.2, %v71_v31  ;;  %v48_v50 = vmul.f32 %v179_v3, %v22_v38  ;;  %v49_v51 = vmul.f32 %v181_v4, %v23_v39 }
   0xe   :  { %138 = vst [vmem:[%s300_s3] sm:$0xff] %v130_v41  ;;  %v118_v49 = vsel %vm86_vm4, %v70_v30, %v102_v44  ;;  %v50_v53 = vmul.f32 %v196_v10, %v24_v40  ;;  %vm88_vm6 = vcmp.ge.f32.partialorder %v72_v47, 0.0  ;;  %vm89_vm7 = vcmp.ge.f32.partialorder %v73_v48, 0.0 }
   0xf   :  { %139 = vst [vmem:[%s300_s3 + $0x8] sm:$0xff] %v131_v45  ;;  %v119_v55 = vsel %vm87_vm5, %v71_v31, %v103_v46  ;;  %v104_v56 = vmul.f32 0.2, %v72_v47  ;;  %v105_v58 = vmul.f32 0.2, %v73_v48  ;;  %v74_v59 = vadd.f32 %v192_v8, %v48_v50 }
  0x10   :  { %v132_v57 = vpack.c.bf16 %v119_v55, %v118_v49  ;;  %v75_v60 = vadd.f32 %v194_v9, %v49_v51  ;;  %v51_v62 = vmul.f32 %v198_v11, %v25_v52  ;;  %v76_v63 = vadd.f32 %v208_v16, %v50_v53 }
  0x11   :  { %v120_v61 = vsel %vm88_vm6, %v72_v47, %v104_v56  ;;  %v52_v1 = vmul.f32 %v179_v3, %v26_v54  ;;  %v121_v2 = vsel %vm89_vm7, %v73_v48, %v105_v58  ;;  %vm90_vm8 = vcmp.ge.f32.partialorder %v74_v59, 0.0 }
  0x12   :  { %140 = vst [vmem:[%s300_s3 + $0x10] sm:$0xff] %v132_v57  ;;  %vm91_vm9 = vcmp.ge.f32.partialorder %v75_v60, 0.0  ;;  %v106_v5 = vmul.f32 0.2, %v74_v59  ;;  %v133_v7 = vpack.c.bf16 %v121_v2, %v120_v61  ;;  %v107_v12 = vmul.f32 0.2, %v75_v60 }
  0x13   :  { %v77_v13 = vadd.f32 %v210_v17, %v51_v62  ;;  %vm92_vm10 = vcmp.ge.f32.partialorder %v76_v63, 0.0  ;;  %v108_v15 = vmul.f32 0.2, %v76_v63  ;;  %v53_v3 = vmul.f32 %v181_v4, %v27_v0 }
  0x14   :  { %v122_v14 = vsel %vm90_vm8, %v74_v59, %v106_v5  ;;  %v78_v18 = vadd.f32 %v192_v8, %v52_v1  ;;  %141 = vst [vmem:[%s300_s3 + $0x18] sm:$0xff] %v133_v7  ;;  %v123_v20 = vsel %vm91_vm9, %v75_v60, %v107_v12  ;;  %v54_v22 = vmul.f32 %v196_v10, %v28_v6 }
  0x15   :  { %vm93_vm11 = vcmp.ge.f32.partialorder %v77_v13, 0.0  ;;  %v109_v21 = vmul.f32 0.2, %v77_v13  ;;  %v134_v23 = vpack.c.bf16 %v123_v20, %v122_v14  ;;  %v124_v24 = vsel %vm92_vm10, %v76_v63, %v108_v15 }
  0x16   :  { %v79_v25 = vadd.f32 %v194_v9, %v53_v3  ;;  %vm94_vm12 = vcmp.ge.f32.partialorder %v78_v18, 0.0  ;;  %v110_v8 = vmul.f32 0.2, %v78_v18  ;;  %v55_v26 = vmul.f32 %v198_v11, %v29_v19 }
  0x17   :  { %v125_v4 = vsel %vm93_vm11, %v77_v13, %v109_v21  ;;  %v80_v27 = vadd.f32 %v208_v16, %v54_v22  ;;  %142 = vst [vmem:[%s300_s3 + $0x20] sm:$0xff] %v134_v23 }
  0x18   :  { %v135_v28 = vpack.c.bf16 %v125_v4, %v124_v24  ;;  %vm95_vm13 = vcmp.ge.f32.partialorder %v79_v25, 0.0  ;;  %v111_v29 = vmul.f32 0.2, %v79_v25  ;;  %v126_v30 = vsel %vm94_vm12, %v78_v18, %v110_v8 }
  0x19   :  { %v81_v10 = vadd.f32 %v210_v17, %v55_v26  ;;  %vm96_vm14 = vcmp.ge.f32.partialorder %v80_v27, 0.0  ;;  %v112_v31 = vmul.f32 0.2, %v80_v27 }
  0x1a   :  { %143 = vst [vmem:[%s300_s3 + $0x28] sm:$0xff] %v135_v28  ;;  %v127_v9 = vsel %vm95_vm13, %v79_v25, %v111_v29 }
  0x1b   :  { %v136_v11 = vpack.c.bf16 %v127_v9, %v126_v30  ;;  %vm97_vm15 = vcmp.ge.f32.partialorder %v81_v10, 0.0  ;;  %v113_v16 = vmul.f32 0.2, %v81_v10  ;;  %v128_v32 = vsel %vm96_vm14, %v80_v27, %v112_v31 }
  0x1d   :  { %144 = vst [vmem:[%s300_s3 + $0x30] sm:$0xff] %v136_v11  ;;  %v129_v33 = vsel %vm97_vm15, %v81_v10, %v113_v16 }
  0x1e   :  { %v137_v34 = vpack.c.bf16 %v129_v33, %v128_v32 }
  0x20   :  { %145 = vst [vmem:[%s300_s3 + $0x38] sm:$0xff] %v137_v34 }

// kernel: d_forward.15
= control target key start
LH: loop header
LB: loop body
LE: loop exit
PB: predicated region body
PF: predicated region fallthrough
CT: control target
= control target key end

     0   :  { %s910_s9 = smov 0   ;;  %s912_s10 = smov 0   ;;  %s990_s0 = inlined_call_operand.vmem [shape: bf16[8,8192], index: 0, kind: input, shape index: {}]   ;;  %s991_s1 = inlined_call_operand.vmem [shape: bf16[8192,128], index: 1, kind: input, shape index: {}]   ;;  %s992_s2 = inlined_call_operand.vmem [shape: f32[8,128], index: 2, kind: output, shape index: {}]  }
   0x1   :  { %s914_s11 = smov 0  }
   0x2 LB: > { %s24_s12 = sadd.s32 1, %s888_s10  ;;  %p671_p0 = scmp.ge.s32.totalorder %s892_s11, 1  ;;  %s892_s11 = sphi %s914_s11, %s12_s11   ;;  %s888_s10 = sphi %s912_s10, %s994_s10   ;;  %s884_s9 = sphi %s910_s9, %s993_s9  }
   0x3   : > { %p25_p1 = scmp.ge.s32.totalorder %s24_s12, 16  ;;  %p156_p2 = scmp.lt.s32.totalorder %s892_s11, 17 }
   0x5   : > { %s996_s12 = smov (%p25_p1, %s24_s12), 0  ;;  %p157_p3 = pnand %p671_p0, %p156_p2 }
   0x6   : > { %s672_s13 = sshll.u32 (!%p157_p3), %s884_s9, 2  ;;  %s674_s14 = sshll.u32 (!%p157_p3), %s884_s9, 6 }
   0x7   : > { %160 = sbr.rel (%p157_p3) target bundleno = 233 (0xe9), region = 28  ;;  %p195_p4 = scmp.lt.s32.totalorder (!%p157_p3), %s672_s13, 63 }
   0x8   : > { %p203_p5 = scmp.lt.s32.totalorder (!%p157_p3), %s674_s14, 1023  ;;  %p676_p6 = scmp.ne.s32.totalorder (!%p157_p3), %s884_s9, 0 }
   0xc   : > { %s998_s13 = smov (!%p195_p4, %s672_s13), 63  ;;  %s1000_s14 = smov (!%p203_p5, %s674_s14), 1023 }
   0xd   : > { %s673_s15 = sshll.u32 %s998_s13, 2  ;;  %s675_s19 = sshll.u32 %s1000_s14, 2 }
   0xe   : > { %s935_s18 = scalar_lea.vmem %s990_s0, %s673_s15  ;;  %s940_s22 = scalar_lea.vmem %s991_s1, %s675_s19 }
   0xf   : > { %221 = sbr.rel (%p676_p6) target bundleno = 22 (0x16), region = 32 }
  0x14   : > { %v894_v0 = vmov 0.0  }
  0x15   : > { %222 = vst [vmem:[#allocation2] sm:$0xff] %v894_v0 }
  0x16 PF: > { %v816_v1 = vld [vmem:[%s940_s22 + $0x38] sm:$0xff]  ;;  %v815_v5 = vld [vmem:[%s940_s22 + $0x30] sm:$0xff]  ;;  %v814_v9 = vld [vmem:[%s940_s22 + $0x28] sm:$0xff]  ;;  %p805_p7 = scmp.ne.s32.totalorder %s884_s9, 15 }
  0x17   : > { %v824_v2 = vld [vmem:[%s940_s22 + $0x78] sm:$0xff]  ;;  %496 = vmatpush.bf16.msra.mxu0 %v816_v1  ;;  %v823_v6 = vld [vmem:[%s940_s22 + $0x70] sm:$0xff]  ;;  %v822_v10 = vld [vmem:[%s940_s22 + $0x68] sm:$0xff] }
  0x18   : > { %v832_v3 = vld [vmem:[%s940_s22 + $0xb8] sm:$0xff]  ;;  %509 = vmatpush.bf16.msra.mxu1 %v824_v2  ;;  %v831_v7 = vld [vmem:[%s940_s22 + $0xb0] sm:$0xff]  ;;  %v830_v11 = vld [vmem:[%s940_s22 + $0xa8] sm:$0xff] }
  0x19   : > { %v840_v4 = vld [vmem:[%s940_s22 + $0xf8] sm:$0xff]  ;;  %522 = vmatpush.bf16.msra.mxu2 %v832_v3  ;;  %v839_v8 = vld [vmem:[%s940_s22 + $0xf0] sm:$0xff]  ;;  %v838_v12 = vld [vmem:[%s940_s22 + $0xe8] sm:$0xff] }
  0x1a   : > { %535 = vmatpush.bf16.msra.mxu3 %v840_v4  ;;  %v813_v13 = vld [vmem:[%s940_s22 + $0x20] sm:$0xff]  ;;  %v812_v17 = vld [vmem:[%s940_s22 + $0x18] sm:$0xff]  ;;  %v811_v21 = vld [vmem:[%s940_s22 + $0x10] sm:$0xff] }
  0x1b   : > { %497 = vmatpush.bf16.msra.mxu0 %v815_v5  ;;  %v821_v14 = vld [vmem:[%s940_s22 + $0x60] sm:$0xff]  ;;  %v820_v18 = vld [vmem:[%s940_s22 + $0x58] sm:$0xff]  ;;  %v819_v22 = vld [vmem:[%s940_s22 + $0x50] sm:$0xff] }
  0x1c   : > { %510 = vmatpush.bf16.msra.mxu1 %v823_v6  ;;  %v829_v15 = vld [vmem:[%s940_s22 + $0xa0] sm:$0xff]  ;;  %v828_v19 = vld [vmem:[%s940_s22 + $0x98] sm:$0xff]  ;;  %v827_v23 = vld [vmem:[%s940_s22 + $0x90] sm:$0xff] }
  0x1d   : > { %523 = vmatpush.bf16.msra.mxu2 %v831_v7  ;;  %v837_v16 = vld [vmem:[%s940_s22 + $0xe0] sm:$0xff]  ;;  %v836_v20 = vld [vmem:[%s940_s22 + $0xd8] sm:$0xff]  ;;  %v835_v24 = vld [vmem:[%s940_s22 + $0xd0] sm:$0xff] }
  0x1e   : > { %536 = vmatpush.bf16.msra.mxu3 %v839_v8  ;;  %v810_v25 = vld [vmem:[%s940_s22 + $0x8] sm:$0xff]  ;;  %v224_v27 = vld [vmem:[%s935_s18] sm:$0xff] }
  0x1f   : > { %498 = vmatpush.bf16.msra.mxu0 %v814_v9  ;;  %v818_v26 = vld [vmem:[%s940_s22 + $0x48] sm:$0xff]  ;;  %v292_v31 = vunpack.c.l.b16 %v224_v27  ;;  %v293_v32 = vunpack.c.h.b16 %v224_v27  ;;  %v809_v33 = vld [vmem:[%s940_s22] sm:$0xff] }
  0x20   : > { %511 = vmatpush.bf16.msra.mxu1 %v822_v10  ;;  %v826_v28 = vld [vmem:[%s940_s22 + $0x88] sm:$0xff]  ;;  %v817_v34 = vld [vmem:[%s940_s22 + $0x40] sm:$0xff] }
  0x21   : > { %524 = vmatpush.bf16.msra.mxu2 %v830_v11  ;;  %v834_v29 = vld [vmem:[%s940_s22 + $0xc8] sm:$0xff]  ;;  %v825_v37 = vld [vmem:[%s940_s22 + $0x80] sm:$0xff]  ;;  %v296_v39 = vpack.c.b16 %v292_v31, %v292_v31  ;;  %v297_v40 = vpack.c.b16 %v293_v32, %v293_v32 }
  0x22   : > { %537 = vmatpush.bf16.msra.mxu3 %v838_v12  ;;  %v225_v30 = vld [vmem:[%s935_s18 + $0x8] sm:$0xff]  ;;  %v833_v38 = vld [vmem:[%s940_s22 + $0xc0] sm:$0xff] }
  0x23   : > { %499 = vmatpush.bf16.msra.mxu0 %v813_v13  ;;  %v294_v35 = vunpack.c.l.b16 %v225_v30  ;;  %v295_v36 = vunpack.c.h.b16 %v225_v30  ;;  %v223_v51 = vld [vmem:[#allocation2] sm:$0xff] }
  0x24   : > { %512 = vmatpush.bf16.msra.mxu1 %v821_v14 }
  0x25   : > { %525 = vmatpush.bf16.msra.mxu2 %v829_v15  ;;  %v298_v41 = vpack.c.b16 %v294_v35, %v294_v35  ;;  %v299_v42 = vpack.c.b16 %v295_v36, %v295_v36 }
  0x26   : > { %538 = vmatpush.bf16.msra.mxu3 %v837_v16 }
  0x27   : > { %500 = vmatpush.bf16.msra.mxu0 %v812_v17 }
  0x28   : > { %513 = vmatpush.bf16.msra.mxu1 %v820_v18 }
  0x29   : > { %526 = vmatpush.bf16.msra.mxu2 %v828_v19 }
  0x2a   : > { %539 = vmatpush.bf16.msra.mxu3 %v836_v20 }
  0x2b   : > { %501 = vmatpush.bf16.msra.mxu0 %v811_v21 }
  0x2c   : > { %514 = vmatpush.bf16.msra.mxu1 %v819_v22 }
  0x2d   : > { %527 = vmatpush.bf16.msra.mxu2 %v827_v23 }
  0x2e   : > { %540 = vmatpush.bf16.msra.mxu3 %v835_v24 }
  0x2f   : > { %502 = vmatpush.bf16.msra.mxu0 %v810_v25 }
  0x30   : > { %515 = vmatpush.bf16.msra.mxu1 %v818_v26 }
  0x31   : > { %528 = vmatpush.bf16.msra.mxu2 %v826_v28 }
  0x32   : > { %541 = vmatpush.bf16.msra.mxu3 %v834_v29 }
  0x33   : > { %503 = vmatpush.bf16.msra.mxu0 %v809_v33 }
  0x34   : > { %516 = vmatpush.bf16.msra.mxu1 %v817_v34 }
  0x35   : > { %529 = vmatpush.bf16.msra.mxu2 %v825_v37 }
  0x36   : > { %542 = vmatpush.bf16.msra.mxu3 %v833_v38  ;;  %504 = vmatmul.bf16.vlgmr.msra.gmra.mxu0 %v296_v39 }
  0x37   : > { %517 = vmatmul.bf16.vlgmr.msra.gmra.mxu1 %v297_v40 }
  0x38   : > { %530 = vmatmul.bf16.vlgmr.msra.gmra.mxu2 %v298_v41 }
  0x39   : > { %543 = vmatmul.bf16.vlgmr.msra.gmra.mxu3 %v299_v42 }
  0xb3   : > { %v505_v43 = vpop.f32.mrf.mxu0 }
  0xb4   : > { %v518_v44 = vpop.f32.mrf.mxu1 }
  0xb5   : > { %v519_v45 = vadd.f32 %v518_v44, %v505_v43 }
  0xbb   : > { %v531_v46 = vpop.f32.mrf.mxu2  ;;  %v507_v49 = vpop.f32.mrf.mxu0 }
  0xbc   : > { %v544_v47 = vpop.f32.mrf.mxu3  ;;  %v532_v48 = vadd.f32 %v531_v46, %v519_v45  ;;  %v520_v50 = vpop.f32.mrf.mxu1 }
  0xbe   : > { %v545_v52 = vadd.f32 %v544_v47, %v532_v48 }
  0xc0   : > { %v548_v53 = vadd.f32 %v545_v52, %v223_v51  ;;  %553 = sbr.rel (%p805_p7) target bundleno = 233 (0xe9), region = 36 }
  0xc2   : > { %549 = vst [vmem:[#allocation2] sm:$0xff] %v548_v53 }
  0xc3   : > { %v533_v54 = vpop.f32.mrf.mxu2 }
  0xc4   : > { %v546_v55 = vpop.f32.mrf.mxu3 }
  0xc9   : > { %v554_v56 = vld [vmem:[#allocation2] sm:$0xff] }
  0xca   : > { %v555_v57 = vsub.f32 0.0, %v554_v56 }
  0xcc   : > { %v556_v58 = vmul.f32 1.442695, %v555_v57 }
  0xce   : > { %866 = vpow2.f32 %v556_v58 }
  0xd4   : > { %v867_v59 = vpop.eup %866 }
  0xd5   : > { %v558_v60 = vadd.f32 1.0, %v867_v59 }
  0xd7   : > { %868 = vrcp.f32 %v558_v60  ;;  %v570_v63 = vand.u32 2147483648, %v558_v60  ;;  %vm564_vm0 = vweird.f32 %v558_v60  ;;  %v568_v1 = vand.u32 2147483647, %v558_v60 }
  0xd9   : > { %v571_v3 = vor.u32 1.1754944e-38, %v570_v63  ;;  %vm569_vm3 = vcmp.eq.f32.partialorder %v568_v1, 8.507059e+37 }
  0xdd   : > { %v869_v61 = vpop.eup %868 }
  0xde   : > { %v560_v62 = vmul.f32 %v869_v61, %v558_v60  ;;  %vm565_vm1 = vweird.f32 %v869_v61 }
  0xdf   : > { %vm566_vm2 = vmor %vm564_vm0, %vm565_vm1 }
  0xe0   : > { %v561_v0 = vsub.f32 1.0, %v560_v62 }
  0xe2   : > { %v562_v2 = vmul.f32 %v869_v61, %v561_v0 }
  0xe4   : > { %v563_v4 = vadd.f32 %v869_v61, %v562_v2 }
  0xe6   : > { %v567_v5 = vsel %vm566_vm2, %v869_v61, %v563_v4 }
  0xe7   : > { %v572_v6 = vsel %vm569_vm3, %v571_v3, %v567_v5 }
  0xe8   : > { %574 = vst [vmem:[%s992_s2] sm:$0xff] %v572_v6 }
  0xe9 PF: > { %s12_s11 = sadd.s32 1, %s892_s11   ;;  %s993_s9 = smov %s888_s10 }
  0xea   : > { %p9_p8 = scmp.ge.s32.totalorder %s12_s11, 18   ;;  %s994_s10 = smov %s996_s12 }
  0xec   :  { %11 = sbr.rel (!%p9_p8) target bundleno = 2 (0x2), region = 69 }

</bundles_post_ra>
